<compile_context>
chip_gen: v7x
topology: tpu7x:2x2x1
jax: 0.10.0
libtpu: 0.0.40
codegen_flags: <defaults>
</compile_context>

<pallas_src>
import math
from functools import partial

import numpy as np
import jax
import jax.numpy as jnp
from jax.experimental import pallas as pl
from jax.experimental.pallas import tpu as pltpu


# --------------------------------------------------------------------------
# In-kernel helpers (traced inside the single fused Pallas kernel)
# --------------------------------------------------------------------------

def _relu(v):
    return jnp.maximum(v, 0.0)


def _mm(a, b):
    # MXU matmul: bf16 operands, f32 accumulation.
    return jnp.dot(a.astype(jnp.bfloat16), b, preferred_element_type=jnp.float32)


def _dw3x3(h, T, wdw, bdw, mo):
    """Depthwise 3x3 conv (stride folded into T): h (Mi, C) -> (mo, C).

    T is a constant 0/1 selection matrix (9*mo, Mi): one MXU matmul yields all nine
    spatially shifted taps; rows falling in the conv's zero padding are all-zero rows,
    so padding semantics are exact.  Per-channel 3x3 weights are applied as a 9-term
    VPU multiply-accumulate, plus folded bias/BN shift.
    """
    taps = jnp.dot(T, h.astype(jnp.bfloat16), preferred_element_type=jnp.float32)
    acc = taps[0:mo] * wdw[0]
    for t in range(1, 9):
        acc = acc + taps[t * mo:(t + 1) * mo] * wdw[t]
    return acc + bdw


def _network_kernel(*refs, plan, n_in):
    ins = refs[:n_in]
    outs = refs[n_in:]

    def rd(i):
        return ins[i][...]

    # ---- stem: im2col'd 7x7/s2 conv (+ folded BN) + ReLU -------------------
    xcol = ins[plan["xcol"]][0]                                      # (Ms, 147) bf16
    y = _relu(jnp.dot(xcol, rd(plan["stem_w"]),
                      preferred_element_type=jnp.float32) + rd(plan["stem_b"]))
    outs[0][0] = y

    # ---- 3x3/s2 max-pool via 0/1 row-selection taps -------------------------
    # y is post-ReLU (>= 0), so the all-zero rows standing in for the spatial padding
    # can never exceed the true window max -> exact max-pool semantics here.
    mo = plan["pool_mo"]
    taps = jnp.dot(rd(plan["t_pool"]), y.astype(jnp.bfloat16),
                   preferred_element_type=jnp.float32)
    x = taps[0:mo]
    for t in range(1, 9):
        x = jnp.maximum(x, taps[t * mo:(t + 1) * mo])

    # ---- ShuffleBlocks (weights pre-folded / pre-permuted) -------------------
    out_i = 1
    for blk in plan["blocks"]:
        mo = blk["mo"]
        if blk["stride"] == 1:
            wdw, bdw = rd(blk["wdw"]), rd(blk["bdw"])
            h = _relu(_mm(x, rd(blk["w1"])) + rd(blk["b1"]))          # pw1 + ReLU (x2 half)
            if blk["t_dw"] is None:                                   # 1x1 spatial: centre tap
                d = h * wdw[4] + bdw
            else:
                d = _dw3x3(h, rd(blk["t_dw"]), wdw, bdw, mo)
            # pw2 + ReLU, columns pre-scattered to the odd (shuffled) channels;
            # even channels give relu(0 + 0) = 0.
            y2 = _relu(_mm(d, rd(blk["w2"])) + rd(blk["b2"]))
            # passthrough half (x1) spread to the even channels via a 0/1 placement matrix
            x = _mm(x, rd(blk["p1"])) + y2
        else:
            T = rd(blk["t_dw"])
            # branch1: dw3x3/s2 -> pw (+ReLU), columns scattered to even channels
            d1 = _dw3x3(x, T, rd(blk["wdw1"]), rd(blk["bdw1"]), mo)
            y1 = _relu(_mm(d1, rd(blk["w1pw"])) + rd(blk["b1pw"]))
            # branch2: pw1 (+ReLU) ONCE at input resolution, dw3x3/s2, pw2 (+ReLU, odd cols)
            h = _relu(_mm(x, rd(blk["w2pw1"])) + rd(blk["b2pw1"]))
            d2 = _dw3x3(h, T, rd(blk["wdw2"]), rd(blk["bdw2"]), mo)
            y2 = _relu(_mm(d2, rd(blk["w2pw2"])) + rd(blk["b2pw2"]))
            x = y1 + y2                                               # already interleaved
        if blk["emit"]:
            outs[out_i][0] = x
            out_i += 1


# --------------------------------------------------------------------------
# Wrapper-side glue: specs, selection matrices, stem im2col
# --------------------------------------------------------------------------

def _const_spec(shape):
    nd = len(shape)
    return pl.BlockSpec(tuple(int(s) for s in shape), lambda b, _n=nd: (0,) * _n)


def _batch_spec(shape):
    nd = len(shape)
    blk = (1,) + tuple(int(s) for s in shape[1:])
    return pl.BlockSpec(blk, lambda b, _n=nd: (b,) + (0,) * (_n - 1))


def _conv3x3_selection(h, w, stride):
    """Constant 0/1 selection matrix for a 3x3 / pad-1 conv window (single image)."""
    ho = (h + 2 - 3) // stride + 1
    wo = (w + 2 - 3) // stride + 1
    mi, mo = h * w, ho * wo
    T = np.zeros((9 * mo, mi), np.float32)
    for dy in range(3):
        for dx in range(3):
            t = 3 * dy + dx
            for oy in range(ho):
                iy = stride * oy + dy - 1
                if iy < 0 or iy >= h:
                    continue
                for ox in range(wo):
                    ix = stride * ox + dx - 1
                    if 0 <= ix < w:
                        T[t * mo + oy * wo + ox, iy * w + ix] = 1.0
    return T, ho, wo


def _stem_im2col(x):
    """NHWC -> (N, Ho*Wo, 7*7*C) bf16 im2col for the 7x7/s2/p3 stem ((kh,kw,cin) order)."""
    n, h, w, c = x.shape
    ho = (h + 6 - 7) // 2 + 1
    wo = (w + 6 - 7) // 2 + 1
    xp = jnp.pad(x, ((0, 0), (3, 3), (3, 3), (0, 0)))
    cols = []
    for dy in range(7):
        for dx in range(7):
            cols.append(jax.lax.slice(
                xp, (0, dy, dx, 0),
                (n, dy + 2 * (ho - 1) + 1, dx + 2 * (wo - 1) + 1, c),
                (1, 2, 2, 1)))
    xcol = jnp.concatenate(cols, axis=-1)
    return xcol.reshape(n, ho * wo, 7 * 7 * c).astype(jnp.bfloat16), ho, wo


# --------------------------------------------------------------------------
# Forward pass: assemble the plan + flat input list, one pallas_call
# --------------------------------------------------------------------------

def shuffle_resnet18_forward(x_nchw, params, be_backbone=True):
    assert be_backbone, "only be_backbone=True is reproducible (see TODO at top)"
    x = jnp.transpose(x_nchw, (0, 2, 3, 1)).astype(jnp.float32)      # NCHW -> NHWC
    n = x.shape[0]

    xcol, hs, ws = _stem_im2col(x)
    c_stem = int(params["conv1_w"].shape[1])

    inputs = []

    def add(a):
        inputs.append(a)
        return len(inputs) - 1

    plan = {"xcol": add(xcol),
            "stem_w": add(params["conv1_w"]),
            "stem_b": add(params["conv1_b"])}

    t_pool, hp, wp = _conv3x3_selection(hs, ws, 2)
    plan["t_pool"] = add(jnp.asarray(t_pool, jnp.bfloat16))
    plan["pool_mo"] = hp * wp

    t_cache, p_cache = {}, {}

    def get_t(hh, ww, stride):
        key = (hh, ww, stride)
        if key not in t_cache:
            T, ho, wo = _conv3x3_selection(hh, ww, stride)
            t_cache[key] = (add(jnp.asarray(T, jnp.bfloat16)), ho, wo)
        return t_cache[key]

    def get_p1(c):
        if c not in p_cache:
            P = np.zeros((c, c), np.float32)
            idx = np.arange(c // 2)
            P[idx, 2 * idx] = 1.0                  # passthrough channel i -> output 2i
            p_cache[c] = add(jnp.asarray(P, jnp.bfloat16))
        return p_cache[c]

    blocks = []
    out_shapes = [((n, hs * ws, c_stem), jnp.float32)]
    out_meta = [(hs, ws, c_stem)]
    ch, cw = hp, wp
    for layer in params["layers"]:
        for bp in layer:
            if bp["stride"] == 1:
                t_idx = None if (ch == 1 and cw == 1) else get_t(ch, cw, 1)[0]
                blocks.append(dict(
                    stride=1, t_dw=t_idx, mo=ch * cw, emit=False,
                    w1=add(bp["w1"]), b1=add(bp["b1"]),
                    wdw=add(bp["wdw"]), bdw=add(bp["bdw"]),
                    w2=add(bp["w2"]), b2=add(bp["b2"]),
                    p1=get_p1(bp["out_ch"])))
            else:
                t_idx, ho, wo = get_t(ch, cw, 2)
                blocks.append(dict(
                    stride=2, t_dw=t_idx, mo=ho * wo, emit=False,
                    wdw1=add(bp["wdw1"]), bdw1=add(bp["bdw1"]),
                    w1pw=add(bp["w1pw"]), b1pw=add(bp["b1pw"]),
                    w2pw1=add(bp["w2pw1"]), b2pw1=add(bp["b2pw1"]),
                    wdw2=add(bp["wdw2"]), bdw2=add(bp["bdw2"]),
                    w2pw2=add(bp["w2pw2"]), b2pw2=add(bp["b2pw2"])))
                ch, cw = ho, wo
        blocks[-1]["emit"] = True
        cout = layer[-1]["out_ch"]
        out_shapes.append(((n, ch * cw, cout), jnp.float32))
        out_meta.append((ch, cw, cout))
    plan["blocks"] = blocks

    n_in = len(inputs)
    in_specs = [_batch_spec(a.shape) if i == plan["xcol"] else _const_spec(a.shape)
                for i, a in enumerate(inputs)]
    out_specs = [_batch_spec(s) for s, _ in out_shapes]

    outs = pl.pallas_call(
        partial(_network_kernel, plan=plan, n_in=n_in),
        out_shape=[jax.ShapeDtypeStruct(s, d) for s, d in out_shapes],
        grid_spec=pltpu.PrefetchScalarGridSpec(
            num_scalar_prefetch=0,
            grid=(n,),                             # batch-parallel: feeds both v7x TCs
            in_specs=in_specs,
            out_specs=out_specs,
        ),
        compiler_params=pltpu.CompilerParams(
            dimension_semantics=("parallel",),
            vmem_limit_bytes=32 * 1024 * 1024,
        ),
    )(*inputs)

    feats = []
    for o, (hh, ww, cc) in zip(outs, out_meta):
        feats.append(jnp.transpose(o.reshape(n, hh, ww, cc), (0, 3, 1, 2)))  # -> NCHW
    return feats


# --------------------------------------------------------------------------
# Parameters (PyTorch 'xavier' init), BN folded, shuffle folded into weights
# --------------------------------------------------------------------------

class KeyGen:
    def __init__(self, seed):
        self.key = jax.random.PRNGKey(seed)

    def __call__(self):
        self.key, k = jax.random.split(self.key)
        return k


def _bn_affine(c, eps=1e-5):
    # inference-mode BN with the module's 'xavier' init (gamma=1, beta=0, mean=0, var=1)
    gamma = jnp.ones((c,), jnp.float32)
    beta = jnp.zeros((c,), jnp.float32)
    mean = jnp.zeros((c,), jnp.float32)
    var = jnp.ones((c,), jnp.float32)
    scale = gamma / jnp.sqrt(var + eps)
    shift = beta - mean * scale
    return scale, shift


def _fold_pw(w, bn):
    # 1x1 (or im2col'd) conv without bias + BN -> f32 folded weight, f32 bias.
    scale, shift = bn
    return w * scale[None, :], shift


def _fold_dw(w9, bias, bn):
    # depthwise 3x3 conv (bias=True) + BN -> f32 per-tap weights (9,1,C) + f32 bias row.
    scale, shift = bn
    return w9 * scale[None, None, :], (bias * scale + shift).reshape(1, -1)


def _expand_cols(w, b, cout, parity):
    # scatter pw columns (and bias) straight to their final shuffled channel positions.
    we = jnp.zeros((w.shape[0], cout), jnp.float32).at[:, parity::2].set(w)
    be = jnp.zeros((cout,), jnp.float32).at[parity::2].set(b)
    return we.astype(jnp.bfloat16), be.reshape(1, -1)


def _conv1x1_w(kg, cin, cout):
    std = math.sqrt(2.0 / (1 * 1 * cout))          # 'xavier' init of the reference module
    return std * jax.random.normal(kg(), (cin, cout), jnp.float32)


def _conv7x7_w(kg, cin, cout):
    std = math.sqrt(2.0 / (7 * 7 * cout))
    w = std * jax.random.normal(kg(), (7, 7, cin, cout), jnp.float32)
    return w.reshape(7 * 7 * cin, cout)            # rows ordered (kh, kw, cin)


def _dw3x3_w(kg, c):
    std = math.sqrt(2.0 / (3 * 3 * c))
    w = std * jax.random.normal(kg(), (3, 3, c), jnp.float32)
    return w.reshape(9, 1, c)                      # rows ordered (kh, kw)


def _dw_bias(kg, c):
    bound = 1.0 / math.sqrt(9.0)                   # fan_in = (cin/groups) * k * k = 9
    return jax.random.uniform(kg(), (c,), jnp.float32, -bound, bound)


def make_shuffle_block_params(kg, in_ch, out_ch, stride):
    bf = out_ch // 2
    p = {"stride": stride, "out_ch": out_ch}
    if stride > 1:
        p["wdw1"], p["bdw1"] = _fold_dw(_dw3x3_w(kg, in_ch), _dw_bias(kg, in_ch),
                                        _bn_affine(in_ch))
        w, b = _fold_pw(_conv1x1_w(kg, in_ch, bf), _bn_affine(bf))
        p["w1pw"], p["b1pw"] = _expand_cols(w, b, out_ch, parity=0)    # branch1 -> even ch
        w, b = _fold_pw(_conv1x1_w(kg, in_ch, bf), _bn_affine(bf))
        p["w2pw1"], p["b2pw1"] = w.astype(jnp.bfloat16), b.reshape(1, -1)
        p["wdw2"], p["bdw2"] = _fold_dw(_dw3x3_w(kg, bf), _dw_bias(kg, bf), _bn_affine(bf))
        w, b = _fold_pw(_conv1x1_w(kg, bf, bf), _bn_affine(bf))
        p["w2pw2"], p["b2pw2"] = _expand_cols(w, b, out_ch, parity=1)  # branch2 -> odd ch
    else:
        assert in_ch == out_ch, "stride-1 ShuffleBlocks keep channel count in this net"
        w, b = _fold_pw(_conv1x1_w(kg, bf, bf), _bn_affine(bf))
        # pw1 consumes only the x2 half (channels bf..C-1): zero rows for the x1 half.
        w1 = jnp.zeros((in_ch, bf), jnp.float32).at[bf:, :].set(w)
        p["w1"], p["b1"] = w1.astype(jnp.bfloat16), b.reshape(1, -1)
        p["wdw"], p["bdw"] = _fold_dw(_dw3x3_w(kg, bf), _dw_bias(kg, bf), _bn_affine(bf))
        w, b = _fold_pw(_conv1x1_w(kg, bf, bf), _bn_affine(bf))
        p["w2"], p["b2"] = _expand_cols(w, b, out_ch, parity=1)        # branch2 -> odd ch
    return p


def make_model_params(seed=0):
    kg = KeyGen(seed)
    w7, b7 = _fold_pw(_conv7x7_w(kg, 3, 64), _bn_affine(64))
    p = {"conv1_w": w7.astype(jnp.bfloat16), "conv1_b": b7.reshape(1, -1)}
    layer_cfg = [(64, 64, [1, 1]), (64, 128, [2, 1]), (128, 256, [2, 1]), (256, 512, [2, 1])]
    layers = []
    for in_ch, out_ch, strides in layer_cfg:
        blocks, c = [], in_ch
        for s in strides:
            blocks.append(make_shuffle_block_params(kg, c, out_ch, s))
            c = out_ch
        layers.append(blocks)
    p["layers"] = layers
    return p


if __name__ == "__main__":
    x = jax.random.normal(jax.random.PRNGKey(0), (2, 3, 32, 32), jnp.float32)
    params = make_model_params(seed=0)
    fwd = jax.jit(lambda xin: shuffle_resnet18_forward(xin, params))
    outs = jax.block_until_ready(fwd(x))
    expected = [(2, 64, 16, 16), (2, 64, 8, 8), (2, 128, 4, 4), (2, 256, 2, 2), (2, 512, 1, 1)]
    got = [tuple(int(d) for d in o.shape) for o in outs]
    assert got == expected, f"shape mismatch: {got} vs {expected}"
    assert all(bool(jnp.all(jnp.isfinite(o))) for o in outs)
    print("KERNEL_OK")
</pallas_src>

<mosaic_0001>
module attributes {stable_mosaic.version = 11 : i64} {
  func.func @_network_kernel(%arg0: i32, %arg1: memref<1x256x147xbf16, #tpu.memory_space<vmem>>, %arg2: memref<147x64xbf16, #tpu.memory_space<vmem>>, %arg3: memref<1x64xf32, #tpu.memory_space<vmem>>, %arg4: memref<576x256xbf16, #tpu.memory_space<vmem>>, %arg5: memref<576x64xbf16, #tpu.memory_space<vmem>>, %arg6: memref<64x32xbf16, #tpu.memory_space<vmem>>, %arg7: memref<1x32xf32, #tpu.memory_space<vmem>>, %arg8: memref<9x1x32xf32, #tpu.memory_space<vmem>>, %arg9: memref<1x32xf32, #tpu.memory_space<vmem>>, %arg10: memref<32x64xbf16, #tpu.memory_space<vmem>>, %arg11: memref<1x64xf32, #tpu.memory_space<vmem>>, %arg12: memref<64x64xbf16, #tpu.memory_space<vmem>>, %arg13: memref<64x32xbf16, #tpu.memory_space<vmem>>, %arg14: memref<1x32xf32, #tpu.memory_space<vmem>>, %arg15: memref<9x1x32xf32, #tpu.memory_space<vmem>>, %arg16: memref<1x32xf32, #tpu.memory_space<vmem>>, %arg17: memref<32x64xbf16, #tpu.memory_space<vmem>>, %arg18: memref<1x64xf32, #tpu.memory_space<vmem>>, %arg19: memref<144x64xbf16, #tpu.memory_space<vmem>>, %arg20: memref<9x1x64xf32, #tpu.memory_space<vmem>>, %arg21: memref<1x64xf32, #tpu.memory_space<vmem>>, %arg22: memref<64x128xbf16, #tpu.memory_space<vmem>>, %arg23: memref<1x128xf32, #tpu.memory_space<vmem>>, %arg24: memref<64x64xbf16, #tpu.memory_space<vmem>>, %arg25: memref<1x64xf32, #tpu.memory_space<vmem>>, %arg26: memref<9x1x64xf32, #tpu.memory_space<vmem>>, %arg27: memref<1x64xf32, #tpu.memory_space<vmem>>, %arg28: memref<64x128xbf16, #tpu.memory_space<vmem>>, %arg29: memref<1x128xf32, #tpu.memory_space<vmem>>, %arg30: memref<144x16xbf16, #tpu.memory_space<vmem>>, %arg31: memref<128x64xbf16, #tpu.memory_space<vmem>>, %arg32: memref<1x64xf32, #tpu.memory_space<vmem>>, %arg33: memref<9x1x64xf32, #tpu.memory_space<vmem>>, %arg34: memref<1x64xf32, #tpu.memory_space<vmem>>, %arg35: memref<64x128xbf16, #tpu.memory_space<vmem>>, %arg36: memref<1x128xf32, #tpu.memory_space<vmem>>, %arg37: memref<128x128xbf16, #tpu.memory_space<vmem>>, %arg38: memref<36x16xbf16, #tpu.memory_space<vmem>>, %arg39: memref<9x1x128xf32, #tpu.memory_space<vmem>>, %arg40: memref<1x128xf32, #tpu.memory_space<vmem>>, %arg41: memref<128x256xbf16, #tpu.memory_space<vmem>>, %arg42: memref<1x256xf32, #tpu.memory_space<vmem>>, %arg43: memref<128x128xbf16, #tpu.memory_space<vmem>>, %arg44: memref<1x128xf32, #tpu.memory_space<vmem>>, %arg45: memref<9x1x128xf32, #tpu.memory_space<vmem>>, %arg46: memref<1x128xf32, #tpu.memory_space<vmem>>, %arg47: memref<128x256xbf16, #tpu.memory_space<vmem>>, %arg48: memref<1x256xf32, #tpu.memory_space<vmem>>, %arg49: memref<36x4xbf16, #tpu.memory_space<vmem>>, %arg50: memref<256x128xbf16, #tpu.memory_space<vmem>>, %arg51: memref<1x128xf32, #tpu.memory_space<vmem>>, %arg52: memref<9x1x128xf32, #tpu.memory_space<vmem>>, %arg53: memref<1x128xf32, #tpu.memory_space<vmem>>, %arg54: memref<128x256xbf16, #tpu.memory_space<vmem>>, %arg55: memref<1x256xf32, #tpu.memory_space<vmem>>, %arg56: memref<256x256xbf16, #tpu.memory_space<vmem>>, %arg57: memref<9x4xbf16, #tpu.memory_space<vmem>>, %arg58: memref<9x1x256xf32, #tpu.memory_space<vmem>>, %arg59: memref<1x256xf32, #tpu.memory_space<vmem>>, %arg60: memref<256x512xbf16, #tpu.memory_space<vmem>>, %arg61: memref<1x512xf32, #tpu.memory_space<vmem>>, %arg62: memref<256x256xbf16, #tpu.memory_space<vmem>>, %arg63: memref<1x256xf32, #tpu.memory_space<vmem>>, %arg64: memref<9x1x256xf32, #tpu.memory_space<vmem>>, %arg65: memref<1x256xf32, #tpu.memory_space<vmem>>, %arg66: memref<256x512xbf16, #tpu.memory_space<vmem>>, %arg67: memref<1x512xf32, #tpu.memory_space<vmem>>, %arg68: memref<512x256xbf16, #tpu.memory_space<vmem>>, %arg69: memref<1x256xf32, #tpu.memory_space<vmem>>, %arg70: memref<9x1x256xf32, #tpu.memory_space<vmem>>, %arg71: memref<1x256xf32, #tpu.memory_space<vmem>>, %arg72: memref<256x512xbf16, #tpu.memory_space<vmem>>, %arg73: memref<1x512xf32, #tpu.memory_space<vmem>>, %arg74: memref<512x512xbf16, #tpu.memory_space<vmem>>, %arg75: memref<1x256x64xf32, #tpu.memory_space<vmem>>, %arg76: memref<1x64x64xf32, #tpu.memory_space<vmem>>, %arg77: memref<1x16x128xf32, #tpu.memory_space<vmem>>, %arg78: memref<1x4x256xf32, #tpu.memory_space<vmem>>, %arg79: memref<1x1x512xf32, #tpu.memory_space<vmem>>) attributes {dimension_semantics = [#tpu.dimension_semantics<parallel>], iteration_bounds = array<i64: 2>, scalar_prefetch = 0 : i64, scratch_operands = 0 : i64, tpu.core_type = #tpu.core_type<tc>, window_params = [{transform_indices = @transform_0, window_bounds = array<i64: 1, 256, 147>}, {pipeline_mode = #tpu.pipeline_mode<synchronous>, transform_indices = @transform_1, window_bounds = array<i64: 147, 64>}, {pipeline_mode = #tpu.pipeline_mode<synchronous>, transform_indices = @transform_2, window_bounds = array<i64: 1, 64>}, {pipeline_mode = #tpu.pipeline_mode<synchronous>, transform_indices = @transform_3, window_bounds = array<i64: 576, 256>}, {pipeline_mode = #tpu.pipeline_mode<synchronous>, transform_indices = @transform_4, window_bounds = array<i64: 576, 64>}, {pipeline_mode = #tpu.pipeline_mode<synchronous>, transform_indices = @transform_5, window_bounds = array<i64: 64, 32>}, {pipeline_mode = #tpu.pipeline_mode<synchronous>, transform_indices = @transform_6, window_bounds = array<i64: 1, 32>}, {pipeline_mode = #tpu.pipeline_mode<synchronous>, transform_indices = @transform_7, window_bounds = array<i64: 9, 1, 32>}, {pipeline_mode = #tpu.pipeline_mode<synchronous>, transform_indices = @transform_8, window_bounds = array<i64: 1, 32>}, {pipeline_mode = #tpu.pipeline_mode<synchronous>, transform_indices = @transform_9, window_bounds = array<i64: 32, 64>}, {pipeline_mode = #tpu.pipeline_mode<synchronous>, transform_indices = @transform_10, window_bounds = array<i64: 1, 64>}, {pipeline_mode = #tpu.pipeline_mode<synchronous>, transform_indices = @transform_11, window_bounds = array<i64: 64, 64>}, {pipeline_mode = #tpu.pipeline_mode<synchronous>, transform_indices = @transform_12, window_bounds = array<i64: 64, 32>}, {pipeline_mode = #tpu.pipeline_mode<synchronous>, transform_indices = @transform_13, window_bounds = array<i64: 1, 32>}, {pipeline_mode = #tpu.pipeline_mode<synchronous>, transform_indices = @transform_14, window_bounds = array<i64: 9, 1, 32>}, {pipeline_mode = #tpu.pipeline_mode<synchronous>, transform_indices = @transform_15, window_bounds = array<i64: 1, 32>}, {pipeline_mode = #tpu.pipeline_mode<synchronous>, transform_indices = @transform_16, window_bounds = array<i64: 32, 64>}, {pipeline_mode = #tpu.pipeline_mode<synchronous>, transform_indices = @transform_17, window_bounds = array<i64: 1, 64>}, {pipeline_mode = #tpu.pipeline_mode<synchronous>, transform_indices = @transform_18, window_bounds = array<i64: 144, 64>}, {pipeline_mode = #tpu.pipeline_mode<synchronous>, transform_indices = @transform_19, window_bounds = array<i64: 9, 1, 64>}, {pipeline_mode = #tpu.pipeline_mode<synchronous>, transform_indices = @transform_20, window_bounds = array<i64: 1, 64>}, {pipeline_mode = #tpu.pipeline_mode<synchronous>, transform_indices = @transform_21, window_bounds = array<i64: 64, 128>}, {pipeline_mode = #tpu.pipeline_mode<synchronous>, transform_indices = @transform_22, window_bounds = array<i64: 1, 128>}, {pipeline_mode = #tpu.pipeline_mode<synchronous>, transform_indices = @transform_23, window_bounds = array<i64: 64, 64>}, {pipeline_mode = #tpu.pipeline_mode<synchronous>, transform_indices = @transform_24, window_bounds = array<i64: 1, 64>}, {pipeline_mode = #tpu.pipeline_mode<synchronous>, transform_indices = @transform_25, window_bounds = array<i64: 9, 1, 64>}, {pipeline_mode = #tpu.pipeline_mode<synchronous>, transform_indices = @transform_26, window_bounds = array<i64: 1, 64>}, {pipeline_mode = #tpu.pipeline_mode<synchronous>, transform_indices = @transform_27, window_bounds = array<i64: 64, 128>}, {pipeline_mode = #tpu.pipeline_mode<synchronous>, transform_indices = @transform_28, window_bounds = array<i64: 1, 128>}, {pipeline_mode = #tpu.pipeline_mode<synchronous>, transform_indices = @transform_29, window_bounds = array<i64: 144, 16>}, {pipeline_mode = #tpu.pipeline_mode<synchronous>, transform_indices = @transform_30, window_bounds = array<i64: 128, 64>}, {pipeline_mode = #tpu.pipeline_mode<synchronous>, transform_indices = @transform_31, window_bounds = array<i64: 1, 64>}, {pipeline_mode = #tpu.pipeline_mode<synchronous>, transform_indices = @transform_32, window_bounds = array<i64: 9, 1, 64>}, {pipeline_mode = #tpu.pipeline_mode<synchronous>, transform_indices = @transform_33, window_bounds = array<i64: 1, 64>}, {pipeline_mode = #tpu.pipeline_mode<synchronous>, transform_indices = @transform_34, window_bounds = array<i64: 64, 128>}, {pipeline_mode = #tpu.pipeline_mode<synchronous>, transform_indices = @transform_35, window_bounds = array<i64: 1, 128>}, {pipeline_mode = #tpu.pipeline_mode<synchronous>, transform_indices = @transform_36, window_bounds = array<i64: 128, 128>}, {pipeline_mode = #tpu.pipeline_mode<synchronous>, transform_indices = @transform_37, window_bounds = array<i64: 36, 16>}, {pipeline_mode = #tpu.pipeline_mode<synchronous>, transform_indices = @transform_38, window_bounds = array<i64: 9, 1, 128>}, {pipeline_mode = #tpu.pipeline_mode<synchronous>, transform_indices = @transform_39, window_bounds = array<i64: 1, 128>}, {pipeline_mode = #tpu.pipeline_mode<synchronous>, transform_indices = @transform_40, window_bounds = array<i64: 128, 256>}, {pipeline_mode = #tpu.pipeline_mode<synchronous>, transform_indices = @transform_41, window_bounds = array<i64: 1, 256>}, {pipeline_mode = #tpu.pipeline_mode<synchronous>, transform_indices = @transform_42, window_bounds = array<i64: 128, 128>}, {pipeline_mode = #tpu.pipeline_mode<synchronous>, transform_indices = @transform_43, window_bounds = array<i64: 1, 128>}, {pipeline_mode = #tpu.pipeline_mode<synchronous>, transform_indices = @transform_44, window_bounds = array<i64: 9, 1, 128>}, {pipeline_mode = #tpu.pipeline_mode<synchronous>, transform_indices = @transform_45, window_bounds = array<i64: 1, 128>}, {pipeline_mode = #tpu.pipeline_mode<synchronous>, transform_indices = @transform_46, window_bounds = array<i64: 128, 256>}, {pipeline_mode = #tpu.pipeline_mode<synchronous>, transform_indices = @transform_47, window_bounds = array<i64: 1, 256>}, {pipeline_mode = #tpu.pipeline_mode<synchronous>, transform_indices = @transform_48, window_bounds = array<i64: 36, 4>}, {pipeline_mode = #tpu.pipeline_mode<synchronous>, transform_indices = @transform_49, window_bounds = array<i64: 256, 128>}, {pipeline_mode = #tpu.pipeline_mode<synchronous>, transform_indices = @transform_50, window_bounds = array<i64: 1, 128>}, {pipeline_mode = #tpu.pipeline_mode<synchronous>, transform_indices = @transform_51, window_bounds = array<i64: 9, 1, 128>}, {pipeline_mode = #tpu.pipeline_mode<synchronous>, transform_indices = @transform_52, window_bounds = array<i64: 1, 128>}, {pipeline_mode = #tpu.pipeline_mode<synchronous>, transform_indices = @transform_53, window_bounds = array<i64: 128, 256>}, {pipeline_mode = #tpu.pipeline_mode<synchronous>, transform_indices = @transform_54, window_bounds = array<i64: 1, 256>}, {pipeline_mode = #tpu.pipeline_mode<synchronous>, transform_indices = @transform_55, window_bounds = array<i64: 256, 256>}, {pipeline_mode = #tpu.pipeline_mode<synchronous>, transform_indices = @transform_56, window_bounds = array<i64: 9, 4>}, {pipeline_mode = #tpu.pipeline_mode<synchronous>, transform_indices = @transform_57, window_bounds = array<i64: 9, 1, 256>}, {pipeline_mode = #tpu.pipeline_mode<synchronous>, transform_indices = @transform_58, window_bounds = array<i64: 1, 256>}, {pipeline_mode = #tpu.pipeline_mode<synchronous>, transform_indices = @transform_59, window_bounds = array<i64: 256, 512>}, {pipeline_mode = #tpu.pipeline_mode<synchronous>, transform_indices = @transform_60, window_bounds = array<i64: 1, 512>}, {pipeline_mode = #tpu.pipeline_mode<synchronous>, transform_indices = @transform_61, window_bounds = array<i64: 256, 256>}, {pipeline_mode = #tpu.pipeline_mode<synchronous>, transform_indices = @transform_62, window_bounds = array<i64: 1, 256>}, {pipeline_mode = #tpu.pipeline_mode<synchronous>, transform_indices = @transform_63, window_bounds = array<i64: 9, 1, 256>}, {pipeline_mode = #tpu.pipeline_mode<synchronous>, transform_indices = @transform_64, window_bounds = array<i64: 1, 256>}, {pipeline_mode = #tpu.pipeline_mode<synchronous>, transform_indices = @transform_65, window_bounds = array<i64: 256, 512>}, {pipeline_mode = #tpu.pipeline_mode<synchronous>, transform_indices = @transform_66, window_bounds = array<i64: 1, 512>}, {pipeline_mode = #tpu.pipeline_mode<synchronous>, transform_indices = @transform_67, window_bounds = array<i64: 512, 256>}, {pipeline_mode = #tpu.pipeline_mode<synchronous>, transform_indices = @transform_68, window_bounds = array<i64: 1, 256>}, {pipeline_mode = #tpu.pipeline_mode<synchronous>, transform_indices = @transform_69, window_bounds = array<i64: 9, 1, 256>}, {pipeline_mode = #tpu.pipeline_mode<synchronous>, transform_indices = @transform_70, window_bounds = array<i64: 1, 256>}, {pipeline_mode = #tpu.pipeline_mode<synchronous>, transform_indices = @transform_71, window_bounds = array<i64: 256, 512>}, {pipeline_mode = #tpu.pipeline_mode<synchronous>, transform_indices = @transform_72, window_bounds = array<i64: 1, 512>}, {pipeline_mode = #tpu.pipeline_mode<synchronous>, transform_indices = @transform_73, window_bounds = array<i64: 512, 512>}, {transform_indices = @transform_74, window_bounds = array<i64: 1, 256, 64>}, {transform_indices = @transform_75, window_bounds = array<i64: 1, 64, 64>}, {transform_indices = @transform_76, window_bounds = array<i64: 1, 16, 128>}, {transform_indices = @transform_77, window_bounds = array<i64: 1, 4, 256>}, {transform_indices = @transform_78, window_bounds = array<i64: 1, 1, 512>}]} {
    %c0 = arith.constant 0 : index
    %c0_0 = arith.constant 0 : index
    %c0_1 = arith.constant 0 : index
    %0 = vector.load %arg1[%c0, %c0_0, %c0_1] : memref<1x256x147xbf16, #tpu.memory_space<vmem>>, vector<1x256x147xbf16>
    %1 = vector.shape_cast %0 : vector<1x256x147xbf16> to vector<256x147xbf16>
    %c0_2 = arith.constant 0 : index
    %c0_3 = arith.constant 0 : index
    %2 = vector.load %arg2[%c0_2, %c0_3] : memref<147x64xbf16, #tpu.memory_space<vmem>>, vector<147x64xbf16>
    %cst = arith.constant dense<0.000000e+00> : vector<256x64xf32>
    %3 = tpu.matmul %1, %2, %cst {dimension_numbers = #tpu.dot_dimension_numbers<[1], [0], [0], [1], [0, 0, 1, 1], [], []>} : vector<256x147xbf16>, vector<147x64xbf16>, vector<256x64xf32> -> vector<256x64xf32>
    %c0_4 = arith.constant 0 : index
    %c0_5 = arith.constant 0 : index
    %4 = vector.load %arg3[%c0_4, %c0_5] : memref<1x64xf32, #tpu.memory_space<vmem>>, vector<1x64xf32>
    %5 = vector.broadcast %4 : vector<1x64xf32> to vector<256x64xf32>
    %6 = arith.addf %3, %5 : vector<256x64xf32>
    %cst_6 = arith.constant 0.000000e+00 : f32
    %7 = vector.broadcast %cst_6 : f32 to vector<256x64xf32>
    %8 = arith.maximumf %6, %7 : vector<256x64xf32>
    %c0_7 = arith.constant 0 : index
    %c0_8 = arith.constant 0 : index
    %c0_9 = arith.constant 0 : index
    %9 = vector.load %arg75[%c0_7, %c0_8, %c0_9] : memref<1x256x64xf32, #tpu.memory_space<vmem>>, vector<1x256x64xf32>
    %10 = vector.shape_cast %9 : vector<1x256x64xf32> to vector<256x64xf32>
    %11 = vector.shape_cast %8 : vector<256x64xf32> to vector<1x256x64xf32>
    tpu.vector_store %arg75[%c0_7, %c0_8, %c0_9], %11 {strides = array<i32>} : memref<1x256x64xf32, #tpu.memory_space<vmem>>, vector<1x256x64xf32>,
    %c0_10 = arith.constant 0 : index
    %c0_11 = arith.constant 0 : index
    %12 = vector.load %arg4[%c0_10, %c0_11] : memref<576x256xbf16, #tpu.memory_space<vmem>>, vector<576x256xbf16>
    %13 = arith.truncf %8 : vector<256x64xf32> to vector<256x64xbf16>
    %cst_12 = arith.constant dense<0.000000e+00> : vector<576x64xf32>
    %14 = tpu.matmul %12, %13, %cst_12 {dimension_numbers = #tpu.dot_dimension_numbers<[1], [0], [0], [1], [0, 0, 1, 1], [], []>} : vector<576x256xbf16>, vector<256x64xbf16>, vector<576x64xf32> -> vector<576x64xf32>
    %15 = vector.extract_strided_slice %14 {offsets = [0, 0], sizes = [64, 64], strides = [1, 1]} : vector<576x64xf32> to vector<64x64xf32>
    %16 = vector.extract_strided_slice %14 {offsets = [64, 0], sizes = [64, 64], strides = [1, 1]} : vector<576x64xf32> to vector<64x64xf32>
    %17 = arith.maximumf %15, %16 : vector<64x64xf32>
    %18 = vector.extract_strided_slice %14 {offsets = [128, 0], sizes = [64, 64], strides = [1, 1]} : vector<576x64xf32> to vector<64x64xf32>
    %19 = arith.maximumf %17, %18 : vector<64x64xf32>
    %20 = vector.extract_strided_slice %14 {offsets = [192, 0], sizes = [64, 64], strides = [1, 1]} : vector<576x64xf32> to vector<64x64xf32>
    %21 = arith.maximumf %19, %20 : vector<64x64xf32>
    %22 = vector.extract_strided_slice %14 {offsets = [256, 0], sizes = [64, 64], strides = [1, 1]} : vector<576x64xf32> to vector<64x64xf32>
    %23 = arith.maximumf %21, %22 : vector<64x64xf32>
    %24 = vector.extract_strided_slice %14 {offsets = [320, 0], sizes = [64, 64], strides = [1, 1]} : vector<576x64xf32> to vector<64x64xf32>
    %25 = arith.maximumf %23, %24 : vector<64x64xf32>
    %26 = vector.extract_strided_slice %14 {offsets = [384, 0], sizes = [64, 64], strides = [1, 1]} : vector<576x64xf32> to vector<64x64xf32>
    %27 = arith.maximumf %25, %26 : vector<64x64xf32>
    %28 = vector.extract_strided_slice %14 {offsets = [448, 0], sizes = [64, 64], strides = [1, 1]} : vector<576x64xf32> to vector<64x64xf32>
    %29 = arith.maximumf %27, %28 : vector<64x64xf32>
    %30 = vector.extract_strided_slice %14 {offsets = [512, 0], sizes = [64, 64], strides = [1, 1]} : vector<576x64xf32> to vector<64x64xf32>
    %31 = arith.maximumf %29, %30 : vector<64x64xf32>
    %c0_13 = arith.constant 0 : index
    %c0_14 = arith.constant 0 : index
    %c0_15 = arith.constant 0 : index
    %32 = vector.load %arg8[%c0_13, %c0_14, %c0_15] : memref<9x1x32xf32, #tpu.memory_space<vmem>>, vector<9x1x32xf32>
    %c0_16 = arith.constant 0 : index
    %c0_17 = arith.constant 0 : index
    %33 = vector.load %arg9[%c0_16, %c0_17] : memref<1x32xf32, #tpu.memory_space<vmem>>, vector<1x32xf32>
    %c0_18 = arith.constant 0 : index
    %c0_19 = arith.constant 0 : index
    %34 = vector.load %arg6[%c0_18, %c0_19] : memref<64x32xbf16, #tpu.memory_space<vmem>>, vector<64x32xbf16>
    %35 = arith.truncf %31 : vector<64x64xf32> to vector<64x64xbf16>
    %cst_20 = arith.constant dense<0.000000e+00> : vector<64x32xf32>
    %36 = tpu.matmul %35, %34, %cst_20 {dimension_numbers = #tpu.dot_dimension_numbers<[1], [0], [0], [1], [0, 0, 1, 1], [], []>} : vector<64x64xbf16>, vector<64x32xbf16>, vector<64x32xf32> -> vector<64x32xf32>
    %c0_21 = arith.constant 0 : index
    %c0_22 = arith.constant 0 : index
    %37 = vector.load %arg7[%c0_21, %c0_22] : memref<1x32xf32, #tpu.memory_space<vmem>>, vector<1x32xf32>
    %38 = vector.broadcast %37 : vector<1x32xf32> to vector<64x32xf32>
    %39 = arith.addf %36, %38 : vector<64x32xf32>
    %cst_23 = arith.constant 0.000000e+00 : f32
    %40 = vector.broadcast %cst_23 : f32 to vector<64x32xf32>
    %41 = arith.maximumf %39, %40 : vector<64x32xf32>
    %c0_24 = arith.constant 0 : index
    %c0_25 = arith.constant 0 : index
    %42 = vector.load %arg5[%c0_24, %c0_25] : memref<576x64xbf16, #tpu.memory_space<vmem>>, vector<576x64xbf16>
    %43 = arith.truncf %41 : vector<64x32xf32> to vector<64x32xbf16>
    %cst_26 = arith.constant dense<0.000000e+00> : vector<576x32xf32>
    %44 = tpu.matmul %42, %43, %cst_26 {dimension_numbers = #tpu.dot_dimension_numbers<[1], [0], [0], [1], [0, 0, 1, 1], [], []>} : vector<576x64xbf16>, vector<64x32xbf16>, vector<576x32xf32> -> vector<576x32xf32>
    %45 = vector.extract_strided_slice %44 {offsets = [0, 0], sizes = [64, 32], strides = [1, 1]} : vector<576x32xf32> to vector<64x32xf32>
    %46 = vector.extract_strided_slice %32 {offsets = [0, 0, 0], sizes = [1, 1, 32], strides = [1, 1, 1]} : vector<9x1x32xf32> to vector<1x1x32xf32>
    %47 = vector.shape_cast %46 : vector<1x1x32xf32> to vector<1x32xf32>
    %48 = vector.broadcast %47 : vector<1x32xf32> to vector<64x32xf32>
    %49 = arith.mulf %45, %48 : vector<64x32xf32>
    %50 = vector.extract_strided_slice %44 {offsets = [64, 0], sizes = [64, 32], strides = [1, 1]} : vector<576x32xf32> to vector<64x32xf32>
    %51 = vector.extract_strided_slice %32 {offsets = [1, 0, 0], sizes = [1, 1, 32], strides = [1, 1, 1]} : vector<9x1x32xf32> to vector<1x1x32xf32>
    %52 = vector.shape_cast %51 : vector<1x1x32xf32> to vector<1x32xf32>
    %53 = vector.broadcast %52 : vector<1x32xf32> to vector<64x32xf32>
    %54 = arith.mulf %50, %53 : vector<64x32xf32>
    %55 = arith.addf %49, %54 : vector<64x32xf32>
    %56 = vector.extract_strided_slice %44 {offsets = [128, 0], sizes = [64, 32], strides = [1, 1]} : vector<576x32xf32> to vector<64x32xf32>
    %57 = vector.extract_strided_slice %32 {offsets = [2, 0, 0], sizes = [1, 1, 32], strides = [1, 1, 1]} : vector<9x1x32xf32> to vector<1x1x32xf32>
    %58 = vector.shape_cast %57 : vector<1x1x32xf32> to vector<1x32xf32>
    %59 = vector.broadcast %58 : vector<1x32xf32> to vector<64x32xf32>
    %60 = arith.mulf %56, %59 : vector<64x32xf32>
    %61 = arith.addf %55, %60 : vector<64x32xf32>
    %62 = vector.extract_strided_slice %44 {offsets = [192, 0], sizes = [64, 32], strides = [1, 1]} : vector<576x32xf32> to vector<64x32xf32>
    %63 = vector.extract_strided_slice %32 {offsets = [3, 0, 0], sizes = [1, 1, 32], strides = [1, 1, 1]} : vector<9x1x32xf32> to vector<1x1x32xf32>
    %64 = vector.shape_cast %63 : vector<1x1x32xf32> to vector<1x32xf32>
    %65 = vector.broadcast %64 : vector<1x32xf32> to vector<64x32xf32>
    %66 = arith.mulf %62, %65 : vector<64x32xf32>
    %67 = arith.addf %61, %66 : vector<64x32xf32>
    %68 = vector.extract_strided_slice %44 {offsets = [256, 0], sizes = [64, 32], strides = [1, 1]} : vector<576x32xf32> to vector<64x32xf32>
    %69 = vector.extract_strided_slice %32 {offsets = [4, 0, 0], sizes = [1, 1, 32], strides = [1, 1, 1]} : vector<9x1x32xf32> to vector<1x1x32xf32>
    %70 = vector.shape_cast %69 : vector<1x1x32xf32> to vector<1x32xf32>
    %71 = vector.broadcast %70 : vector<1x32xf32> to vector<64x32xf32>
    %72 = arith.mulf %68, %71 : vector<64x32xf32>
    %73 = arith.addf %67, %72 : vector<64x32xf32>
    %74 = vector.extract_strided_slice %44 {offsets = [320, 0], sizes = [64, 32], strides = [1, 1]} : vector<576x32xf32> to vector<64x32xf32>
    %75 = vector.extract_strided_slice %32 {offsets = [5, 0, 0], sizes = [1, 1, 32], strides = [1, 1, 1]} : vector<9x1x32xf32> to vector<1x1x32xf32>
    %76 = vector.shape_cast %75 : vector<1x1x32xf32> to vector<1x32xf32>
    %77 = vector.broadcast %76 : vector<1x32xf32> to vector<64x32xf32>
    %78 = arith.mulf %74, %77 : vector<64x32xf32>
    %79 = arith.addf %73, %78 : vector<64x32xf32>
    %80 = vector.extract_strided_slice %44 {offsets = [384, 0], sizes = [64, 32], strides = [1, 1]} : vector<576x32xf32> to vector<64x32xf32>
    %81 = vector.extract_strided_slice %32 {offsets = [6, 0, 0], sizes = [1, 1, 32], strides = [1, 1, 1]} : vector<9x1x32xf32> to vector<1x1x32xf32>
    %82 = vector.shape_cast %81 : vector<1x1x32xf32> to vector<1x32xf32>
    %83 = vector.broadcast %82 : vector<1x32xf32> to vector<64x32xf32>
    %84 = arith.mulf %80, %83 : vector<64x32xf32>
    %85 = arith.addf %79, %84 : vector<64x32xf32>
    %86 = vector.extract_strided_slice %44 {offsets = [448, 0], sizes = [64, 32], strides = [1, 1]} : vector<576x32xf32> to vector<64x32xf32>
    %87 = vector.extract_strided_slice %32 {offsets = [7, 0, 0], sizes = [1, 1, 32], strides = [1, 1, 1]} : vector<9x1x32xf32> to vector<1x1x32xf32>
    %88 = vector.shape_cast %87 : vector<1x1x32xf32> to vector<1x32xf32>
    %89 = vector.broadcast %88 : vector<1x32xf32> to vector<64x32xf32>
    %90 = arith.mulf %86, %89 : vector<64x32xf32>
    %91 = arith.addf %85, %90 : vector<64x32xf32>
    %92 = vector.extract_strided_slice %44 {offsets = [512, 0], sizes = [64, 32], strides = [1, 1]} : vector<576x32xf32> to vector<64x32xf32>
    %93 = vector.extract_strided_slice %32 {offsets = [8, 0, 0], sizes = [1, 1, 32], strides = [1, 1, 1]} : vector<9x1x32xf32> to vector<1x1x32xf32>
    %94 = vector.shape_cast %93 : vector<1x1x32xf32> to vector<1x32xf32>
    %95 = vector.broadcast %94 : vector<1x32xf32> to vector<64x32xf32>
    %96 = arith.mulf %92, %95 : vector<64x32xf32>
    %97 = arith.addf %91, %96 : vector<64x32xf32>
    %98 = vector.broadcast %33 : vector<1x32xf32> to vector<64x32xf32>
    %99 = arith.addf %97, %98 : vector<64x32xf32>
    %c0_27 = arith.constant 0 : index
    %c0_28 = arith.constant 0 : index
    %100 = vector.load %arg10[%c0_27, %c0_28] : memref<32x64xbf16, #tpu.memory_space<vmem>>, vector<32x64xbf16>
    %101 = arith.truncf %99 : vector<64x32xf32> to vector<64x32xbf16>
    %cst_29 = arith.constant dense<0.000000e+00> : vector<64x64xf32>
    %102 = tpu.matmul %101, %100, %cst_29 {dimension_numbers = #tpu.dot_dimension_numbers<[1], [0], [0], [1], [0, 0, 1, 1], [], []>} : vector<64x32xbf16>, vector<32x64xbf16>, vector<64x64xf32> -> vector<64x64xf32>
    %c0_30 = arith.constant 0 : index
    %c0_31 = arith.constant 0 : index
    %103 = vector.load %arg11[%c0_30, %c0_31] : memref<1x64xf32, #tpu.memory_space<vmem>>, vector<1x64xf32>
    %104 = vector.broadcast %103 : vector<1x64xf32> to vector<64x64xf32>
    %105 = arith.addf %102, %104 : vector<64x64xf32>
    %cst_32 = arith.constant 0.000000e+00 : f32
    %106 = vector.broadcast %cst_32 : f32 to vector<64x64xf32>
    %107 = arith.maximumf %105, %106 : vector<64x64xf32>
    %c0_33 = arith.constant 0 : index
    %c0_34 = arith.constant 0 : index
    %108 = vector.load %arg12[%c0_33, %c0_34] : memref<64x64xbf16, #tpu.memory_space<vmem>>, vector<64x64xbf16>
    %109 = arith.truncf %31 : vector<64x64xf32> to vector<64x64xbf16>
    %cst_35 = arith.constant dense<0.000000e+00> : vector<64x64xf32>
    %110 = tpu.matmul %109, %108, %cst_35 {dimension_numbers = #tpu.dot_dimension_numbers<[1], [0], [0], [1], [0, 0, 1, 1], [], []>} : vector<64x64xbf16>, vector<64x64xbf16>, vector<64x64xf32> -> vector<64x64xf32>
    %111 = arith.addf %110, %107 : vector<64x64xf32>
    %c0_36 = arith.constant 0 : index
    %c0_37 = arith.constant 0 : index
    %c0_38 = arith.constant 0 : index
    %112 = vector.load %arg15[%c0_36, %c0_37, %c0_38] : memref<9x1x32xf32, #tpu.memory_space<vmem>>, vector<9x1x32xf32>
    %c0_39 = arith.constant 0 : index
    %c0_40 = arith.constant 0 : index
    %113 = vector.load %arg16[%c0_39, %c0_40] : memref<1x32xf32, #tpu.memory_space<vmem>>, vector<1x32xf32>
    %c0_41 = arith.constant 0 : index
    %c0_42 = arith.constant 0 : index
    %114 = vector.load %arg13[%c0_41, %c0_42] : memref<64x32xbf16, #tpu.memory_space<vmem>>, vector<64x32xbf16>
    %115 = arith.truncf %111 : vector<64x64xf32> to vector<64x64xbf16>
    %cst_43 = arith.constant dense<0.000000e+00> : vector<64x32xf32>
    %116 = tpu.matmul %115, %114, %cst_43 {dimension_numbers = #tpu.dot_dimension_numbers<[1], [0], [0], [1], [0, 0, 1, 1], [], []>} : vector<64x64xbf16>, vector<64x32xbf16>, vector<64x32xf32> -> vector<64x32xf32>
    %c0_44 = arith.constant 0 : index
    %c0_45 = arith.constant 0 : index
    %117 = vector.load %arg14[%c0_44, %c0_45] : memref<1x32xf32, #tpu.memory_space<vmem>>, vector<1x32xf32>
    %118 = vector.broadcast %117 : vector<1x32xf32> to vector<64x32xf32>
    %119 = arith.addf %116, %118 : vector<64x32xf32>
    %cst_46 = arith.constant 0.000000e+00 : f32
    %120 = vector.broadcast %cst_46 : f32 to vector<64x32xf32>
    %121 = arith.maximumf %119, %120 : vector<64x32xf32>
    %c0_47 = arith.constant 0 : index
    %c0_48 = arith.constant 0 : index
    %122 = vector.load %arg5[%c0_47, %c0_48] : memref<576x64xbf16, #tpu.memory_space<vmem>>, vector<576x64xbf16>
    %123 = arith.truncf %121 : vector<64x32xf32> to vector<64x32xbf16>
    %cst_49 = arith.constant dense<0.000000e+00> : vector<576x32xf32>
    %124 = tpu.matmul %122, %123, %cst_49 {dimension_numbers = #tpu.dot_dimension_numbers<[1], [0], [0], [1], [0, 0, 1, 1], [], []>} : vector<576x64xbf16>, vector<64x32xbf16>, vector<576x32xf32> -> vector<576x32xf32>
    %125 = vector.extract_strided_slice %124 {offsets = [0, 0], sizes = [64, 32], strides = [1, 1]} : vector<576x32xf32> to vector<64x32xf32>
    %126 = vector.extract_strided_slice %112 {offsets = [0, 0, 0], sizes = [1, 1, 32], strides = [1, 1, 1]} : vector<9x1x32xf32> to vector<1x1x32xf32>
    %127 = vector.shape_cast %126 : vector<1x1x32xf32> to vector<1x32xf32>
    %128 = vector.broadcast %127 : vector<1x32xf32> to vector<64x32xf32>
    %129 = arith.mulf %125, %128 : vector<64x32xf32>
    %130 = vector.extract_strided_slice %124 {offsets = [64, 0], sizes = [64, 32], strides = [1, 1]} : vector<576x32xf32> to vector<64x32xf32>
    %131 = vector.extract_strided_slice %112 {offsets = [1, 0, 0], sizes = [1, 1, 32], strides = [1, 1, 1]} : vector<9x1x32xf32> to vector<1x1x32xf32>
    %132 = vector.shape_cast %131 : vector<1x1x32xf32> to vector<1x32xf32>
    %133 = vector.broadcast %132 : vector<1x32xf32> to vector<64x32xf32>
    %134 = arith.mulf %130, %133 : vector<64x32xf32>
    %135 = arith.addf %129, %134 : vector<64x32xf32>
    %136 = vector.extract_strided_slice %124 {offsets = [128, 0], sizes = [64, 32], strides = [1, 1]} : vector<576x32xf32> to vector<64x32xf32>
    %137 = vector.extract_strided_slice %112 {offsets = [2, 0, 0], sizes = [1, 1, 32], strides = [1, 1, 1]} : vector<9x1x32xf32> to vector<1x1x32xf32>
    %138 = vector.shape_cast %137 : vector<1x1x32xf32> to vector<1x32xf32>
    %139 = vector.broadcast %138 : vector<1x32xf32> to vector<64x32xf32>
    %140 = arith.mulf %136, %139 : vector<64x32xf32>
    %141 = arith.addf %135, %140 : vector<64x32xf32>
    %142 = vector.extract_strided_slice %124 {offsets = [192, 0], sizes = [64, 32], strides = [1, 1]} : vector<576x32xf32> to vector<64x32xf32>
    %143 = vector.extract_strided_slice %112 {offsets = [3, 0, 0], sizes = [1, 1, 32], strides = [1, 1, 1]} : vector<9x1x32xf32> to vector<1x1x32xf32>
    %144 = vector.shape_cast %143 : vector<1x1x32xf32> to vector<1x32xf32>
    %145 = vector.broadcast %144 : vector<1x32xf32> to vector<64x32xf32>
    %146 = arith.mulf %142, %145 : vector<64x32xf32>
    %147 = arith.addf %141, %146 : vector<64x32xf32>
    %148 = vector.extract_strided_slice %124 {offsets = [256, 0], sizes = [64, 32], strides = [1, 1]} : vector<576x32xf32> to vector<64x32xf32>
    %149 = vector.extract_strided_slice %112 {offsets = [4, 0, 0], sizes = [1, 1, 32], strides = [1, 1, 1]} : vector<9x1x32xf32> to vector<1x1x32xf32>
    %150 = vector.shape_cast %149 : vector<1x1x32xf32> to vector<1x32xf32>
    %151 = vector.broadcast %150 : vector<1x32xf32> to vector<64x32xf32>
    %152 = arith.mulf %148, %151 : vector<64x32xf32>
    %153 = arith.addf %147, %152 : vector<64x32xf32>
    %154 = vector.extract_strided_slice %124 {offsets = [320, 0], sizes = [64, 32], strides = [1, 1]} : vector<576x32xf32> to vector<64x32xf32>
    %155 = vector.extract_strided_slice %112 {offsets = [5, 0, 0], sizes = [1, 1, 32], strides = [1, 1, 1]} : vector<9x1x32xf32> to vector<1x1x32xf32>
    %156 = vector.shape_cast %155 : vector<1x1x32xf32> to vector<1x32xf32>
    %157 = vector.broadcast %156 : vector<1x32xf32> to vector<64x32xf32>
    %158 = arith.mulf %154, %157 : vector<64x32xf32>
    %159 = arith.addf %153, %158 : vector<64x32xf32>
    %160 = vector.extract_strided_slice %124 {offsets = [384, 0], sizes = [64, 32], strides = [1, 1]} : vector<576x32xf32> to vector<64x32xf32>
    %161 = vector.extract_strided_slice %112 {offsets = [6, 0, 0], sizes = [1, 1, 32], strides = [1, 1, 1]} : vector<9x1x32xf32> to vector<1x1x32xf32>
    %162 = vector.shape_cast %161 : vector<1x1x32xf32> to vector<1x32xf32>
    %163 = vector.broadcast %162 : vector<1x32xf32> to vector<64x32xf32>
    %164 = arith.mulf %160, %163 : vector<64x32xf32>
    %165 = arith.addf %159, %164 : vector<64x32xf32>
    %166 = vector.extract_strided_slice %124 {offsets = [448, 0], sizes = [64, 32], strides = [1, 1]} : vector<576x32xf32> to vector<64x32xf32>
    %167 = vector.extract_strided_slice %112 {offsets = [7, 0, 0], sizes = [1, 1, 32], strides = [1, 1, 1]} : vector<9x1x32xf32> to vector<1x1x32xf32>
    %168 = vector.shape_cast %167 : vector<1x1x32xf32> to vector<1x32xf32>
    %169 = vector.broadcast %168 : vector<1x32xf32> to vector<64x32xf32>
    %170 = arith.mulf %166, %169 : vector<64x32xf32>
    %171 = arith.addf %165, %170 : vector<64x32xf32>
    %172 = vector.extract_strided_slice %124 {offsets = [512, 0], sizes = [64, 32], strides = [1, 1]} : vector<576x32xf32> to vector<64x32xf32>
    %173 = vector.extract_strided_slice %112 {offsets = [8, 0, 0], sizes = [1, 1, 32], strides = [1, 1, 1]} : vector<9x1x32xf32> to vector<1x1x32xf32>
    %174 = vector.shape_cast %173 : vector<1x1x32xf32> to vector<1x32xf32>
    %175 = vector.broadcast %174 : vector<1x32xf32> to vector<64x32xf32>
    %176 = arith.mulf %172, %175 : vector<64x32xf32>
    %177 = arith.addf %171, %176 : vector<64x32xf32>
    %178 = vector.broadcast %113 : vector<1x32xf32> to vector<64x32xf32>
    %179 = arith.addf %177, %178 : vector<64x32xf32>
    %c0_50 = arith.constant 0 : index
    %c0_51 = arith.constant 0 : index
    %180 = vector.load %arg17[%c0_50, %c0_51] : memref<32x64xbf16, #tpu.memory_space<vmem>>, vector<32x64xbf16>
    %181 = arith.truncf %179 : vector<64x32xf32> to vector<64x32xbf16>
    %cst_52 = arith.constant dense<0.000000e+00> : vector<64x64xf32>
    %182 = tpu.matmul %181, %180, %cst_52 {dimension_numbers = #tpu.dot_dimension_numbers<[1], [0], [0], [1], [0, 0, 1, 1], [], []>} : vector<64x32xbf16>, vector<32x64xbf16>, vector<64x64xf32> -> vector<64x64xf32>
    %c0_53 = arith.constant 0 : index
    %c0_54 = arith.constant 0 : index
    %183 = vector.load %arg18[%c0_53, %c0_54] : memref<1x64xf32, #tpu.memory_space<vmem>>, vector<1x64xf32>
    %184 = vector.broadcast %183 : vector<1x64xf32> to vector<64x64xf32>
    %185 = arith.addf %182, %184 : vector<64x64xf32>
    %cst_55 = arith.constant 0.000000e+00 : f32
    %186 = vector.broadcast %cst_55 : f32 to vector<64x64xf32>
    %187 = arith.maximumf %185, %186 : vector<64x64xf32>
    %c0_56 = arith.constant 0 : index
    %c0_57 = arith.constant 0 : index
    %188 = vector.load %arg12[%c0_56, %c0_57] : memref<64x64xbf16, #tpu.memory_space<vmem>>, vector<64x64xbf16>
    %189 = arith.truncf %111 : vector<64x64xf32> to vector<64x64xbf16>
    %cst_58 = arith.constant dense<0.000000e+00> : vector<64x64xf32>
    %190 = tpu.matmul %189, %188, %cst_58 {dimension_numbers = #tpu.dot_dimension_numbers<[1], [0], [0], [1], [0, 0, 1, 1], [], []>} : vector<64x64xbf16>, vector<64x64xbf16>, vector<64x64xf32> -> vector<64x64xf32>
    %191 = arith.addf %190, %187 : vector<64x64xf32>
    %c0_59 = arith.constant 0 : index
    %c0_60 = arith.constant 0 : index
    %c0_61 = arith.constant 0 : index
    %192 = vector.load %arg76[%c0_59, %c0_60, %c0_61] : memref<1x64x64xf32, #tpu.memory_space<vmem>>, vector<1x64x64xf32>
    %193 = vector.shape_cast %192 : vector<1x64x64xf32> to vector<64x64xf32>
    %194 = vector.shape_cast %191 : vector<64x64xf32> to vector<1x64x64xf32>
    tpu.vector_store %arg76[%c0_59, %c0_60, %c0_61], %194 {strides = array<i32>} : memref<1x64x64xf32, #tpu.memory_space<vmem>>, vector<1x64x64xf32>,
    %c0_62 = arith.constant 0 : index
    %c0_63 = arith.constant 0 : index
    %195 = vector.load %arg19[%c0_62, %c0_63] : memref<144x64xbf16, #tpu.memory_space<vmem>>, vector<144x64xbf16>
    %c0_64 = arith.constant 0 : index
    %c0_65 = arith.constant 0 : index
    %c0_66 = arith.constant 0 : index
    %196 = vector.load %arg20[%c0_64, %c0_65, %c0_66] : memref<9x1x64xf32, #tpu.memory_space<vmem>>, vector<9x1x64xf32>
    %c0_67 = arith.constant 0 : index
    %c0_68 = arith.constant 0 : index
    %197 = vector.load %arg21[%c0_67, %c0_68] : memref<1x64xf32, #tpu.memory_space<vmem>>, vector<1x64xf32>
    %198 = arith.truncf %191 : vector<64x64xf32> to vector<64x64xbf16>
    %cst_69 = arith.constant dense<0.000000e+00> : vector<144x64xf32>
    %199 = tpu.matmul %195, %198, %cst_69 {dimension_numbers = #tpu.dot_dimension_numbers<[1], [0], [0], [1], [0, 0, 1, 1], [], []>} : vector<144x64xbf16>, vector<64x64xbf16>, vector<144x64xf32> -> vector<144x64xf32>
    %200 = vector.extract_strided_slice %199 {offsets = [0, 0], sizes = [16, 64], strides = [1, 1]} : vector<144x64xf32> to vector<16x64xf32>
    %201 = vector.extract_strided_slice %196 {offsets = [0, 0, 0], sizes = [1, 1, 64], strides = [1, 1, 1]} : vector<9x1x64xf32> to vector<1x1x64xf32>
    %202 = vector.shape_cast %201 : vector<1x1x64xf32> to vector<1x64xf32>
    %203 = vector.broadcast %202 : vector<1x64xf32> to vector<16x64xf32>
    %204 = arith.mulf %200, %203 : vector<16x64xf32>
    %205 = vector.extract_strided_slice %199 {offsets = [16, 0], sizes = [16, 64], strides = [1, 1]} : vector<144x64xf32> to vector<16x64xf32>
    %206 = vector.extract_strided_slice %196 {offsets = [1, 0, 0], sizes = [1, 1, 64], strides = [1, 1, 1]} : vector<9x1x64xf32> to vector<1x1x64xf32>
    %207 = vector.shape_cast %206 : vector<1x1x64xf32> to vector<1x64xf32>
    %208 = vector.broadcast %207 : vector<1x64xf32> to vector<16x64xf32>
    %209 = arith.mulf %205, %208 : vector<16x64xf32>
    %210 = arith.addf %204, %209 : vector<16x64xf32>
    %211 = vector.extract_strided_slice %199 {offsets = [32, 0], sizes = [16, 64], strides = [1, 1]} : vector<144x64xf32> to vector<16x64xf32>
    %212 = vector.extract_strided_slice %196 {offsets = [2, 0, 0], sizes = [1, 1, 64], strides = [1, 1, 1]} : vector<9x1x64xf32> to vector<1x1x64xf32>
    %213 = vector.shape_cast %212 : vector<1x1x64xf32> to vector<1x64xf32>
    %214 = vector.broadcast %213 : vector<1x64xf32> to vector<16x64xf32>
    %215 = arith.mulf %211, %214 : vector<16x64xf32>
    %216 = arith.addf %210, %215 : vector<16x64xf32>
    %217 = vector.extract_strided_slice %199 {offsets = [48, 0], sizes = [16, 64], strides = [1, 1]} : vector<144x64xf32> to vector<16x64xf32>
    %218 = vector.extract_strided_slice %196 {offsets = [3, 0, 0], sizes = [1, 1, 64], strides = [1, 1, 1]} : vector<9x1x64xf32> to vector<1x1x64xf32>
    %219 = vector.shape_cast %218 : vector<1x1x64xf32> to vector<1x64xf32>
    %220 = vector.broadcast %219 : vector<1x64xf32> to vector<16x64xf32>
    %221 = arith.mulf %217, %220 : vector<16x64xf32>
    %222 = arith.addf %216, %221 : vector<16x64xf32>
    %223 = vector.extract_strided_slice %199 {offsets = [64, 0], sizes = [16, 64], strides = [1, 1]} : vector<144x64xf32> to vector<16x64xf32>
    %224 = vector.extract_strided_slice %196 {offsets = [4, 0, 0], sizes = [1, 1, 64], strides = [1, 1, 1]} : vector<9x1x64xf32> to vector<1x1x64xf32>
    %225 = vector.shape_cast %224 : vector<1x1x64xf32> to vector<1x64xf32>
    %226 = vector.broadcast %225 : vector<1x64xf32> to vector<16x64xf32>
    %227 = arith.mulf %223, %226 : vector<16x64xf32>
    %228 = arith.addf %222, %227 : vector<16x64xf32>
    %229 = vector.extract_strided_slice %199 {offsets = [80, 0], sizes = [16, 64], strides = [1, 1]} : vector<144x64xf32> to vector<16x64xf32>
    %230 = vector.extract_strided_slice %196 {offsets = [5, 0, 0], sizes = [1, 1, 64], strides = [1, 1, 1]} : vector<9x1x64xf32> to vector<1x1x64xf32>
    %231 = vector.shape_cast %230 : vector<1x1x64xf32> to vector<1x64xf32>
    %232 = vector.broadcast %231 : vector<1x64xf32> to vector<16x64xf32>
    %233 = arith.mulf %229, %232 : vector<16x64xf32>
    %234 = arith.addf %228, %233 : vector<16x64xf32>
    %235 = vector.extract_strided_slice %199 {offsets = [96, 0], sizes = [16, 64], strides = [1, 1]} : vector<144x64xf32> to vector<16x64xf32>
    %236 = vector.extract_strided_slice %196 {offsets = [6, 0, 0], sizes = [1, 1, 64], strides = [1, 1, 1]} : vector<9x1x64xf32> to vector<1x1x64xf32>
    %237 = vector.shape_cast %236 : vector<1x1x64xf32> to vector<1x64xf32>
    %238 = vector.broadcast %237 : vector<1x64xf32> to vector<16x64xf32>
    %239 = arith.mulf %235, %238 : vector<16x64xf32>
    %240 = arith.addf %234, %239 : vector<16x64xf32>
    %241 = vector.extract_strided_slice %199 {offsets = [112, 0], sizes = [16, 64], strides = [1, 1]} : vector<144x64xf32> to vector<16x64xf32>
    %242 = vector.extract_strided_slice %196 {offsets = [7, 0, 0], sizes = [1, 1, 64], strides = [1, 1, 1]} : vector<9x1x64xf32> to vector<1x1x64xf32>
    %243 = vector.shape_cast %242 : vector<1x1x64xf32> to vector<1x64xf32>
    %244 = vector.broadcast %243 : vector<1x64xf32> to vector<16x64xf32>
    %245 = arith.mulf %241, %244 : vector<16x64xf32>
    %246 = arith.addf %240, %245 : vector<16x64xf32>
    %247 = vector.extract_strided_slice %199 {offsets = [128, 0], sizes = [16, 64], strides = [1, 1]} : vector<144x64xf32> to vector<16x64xf32>
    %248 = vector.extract_strided_slice %196 {offsets = [8, 0, 0], sizes = [1, 1, 64], strides = [1, 1, 1]} : vector<9x1x64xf32> to vector<1x1x64xf32>
    %249 = vector.shape_cast %248 : vector<1x1x64xf32> to vector<1x64xf32>
    %250 = vector.broadcast %249 : vector<1x64xf32> to vector<16x64xf32>
    %251 = arith.mulf %247, %250 : vector<16x64xf32>
    %252 = arith.addf %246, %251 : vector<16x64xf32>
    %253 = vector.broadcast %197 : vector<1x64xf32> to vector<16x64xf32>
    %254 = arith.addf %252, %253 : vector<16x64xf32>
    %c0_70 = arith.constant 0 : index
    %c0_71 = arith.constant 0 : index
    %255 = vector.load %arg22[%c0_70, %c0_71] : memref<64x128xbf16, #tpu.memory_space<vmem>>, vector<64x128xbf16>
    %256 = arith.truncf %254 : vector<16x64xf32> to vector<16x64xbf16>
    %cst_72 = arith.constant dense<0.000000e+00> : vector<16x128xf32>
    %257 = tpu.matmul %256, %255, %cst_72 {dimension_numbers = #tpu.dot_dimension_numbers<[1], [0], [0], [1], [0, 0, 1, 1], [], []>} : vector<16x64xbf16>, vector<64x128xbf16>, vector<16x128xf32> -> vector<16x128xf32>
    %c0_73 = arith.constant 0 : index
    %c0_74 = arith.constant 0 : index
    %258 = vector.load %arg23[%c0_73, %c0_74] : memref<1x128xf32, #tpu.memory_space<vmem>>, vector<1x128xf32>
    %259 = vector.broadcast %258 : vector<1x128xf32> to vector<16x128xf32>
    %260 = arith.addf %257, %259 : vector<16x128xf32>
    %cst_75 = arith.constant 0.000000e+00 : f32
    %261 = vector.broadcast %cst_75 : f32 to vector<16x128xf32>
    %262 = arith.maximumf %260, %261 : vector<16x128xf32>
    %c0_76 = arith.constant 0 : index
    %c0_77 = arith.constant 0 : index
    %263 = vector.load %arg24[%c0_76, %c0_77] : memref<64x64xbf16, #tpu.memory_space<vmem>>, vector<64x64xbf16>
    %264 = arith.truncf %191 : vector<64x64xf32> to vector<64x64xbf16>
    %cst_78 = arith.constant dense<0.000000e+00> : vector<64x64xf32>
    %265 = tpu.matmul %264, %263, %cst_78 {dimension_numbers = #tpu.dot_dimension_numbers<[1], [0], [0], [1], [0, 0, 1, 1], [], []>} : vector<64x64xbf16>, vector<64x64xbf16>, vector<64x64xf32> -> vector<64x64xf32>
    %c0_79 = arith.constant 0 : index
    %c0_80 = arith.constant 0 : index
    %266 = vector.load %arg25[%c0_79, %c0_80] : memref<1x64xf32, #tpu.memory_space<vmem>>, vector<1x64xf32>
    %267 = vector.broadcast %266 : vector<1x64xf32> to vector<64x64xf32>
    %268 = arith.addf %265, %267 : vector<64x64xf32>
    %cst_81 = arith.constant 0.000000e+00 : f32
    %269 = vector.broadcast %cst_81 : f32 to vector<64x64xf32>
    %270 = arith.maximumf %268, %269 : vector<64x64xf32>
    %c0_82 = arith.constant 0 : index
    %c0_83 = arith.constant 0 : index
    %c0_84 = arith.constant 0 : index
    %271 = vector.load %arg26[%c0_82, %c0_83, %c0_84] : memref<9x1x64xf32, #tpu.memory_space<vmem>>, vector<9x1x64xf32>
    %c0_85 = arith.constant 0 : index
    %c0_86 = arith.constant 0 : index
    %272 = vector.load %arg27[%c0_85, %c0_86] : memref<1x64xf32, #tpu.memory_space<vmem>>, vector<1x64xf32>
    %273 = arith.truncf %270 : vector<64x64xf32> to vector<64x64xbf16>
    %cst_87 = arith.constant dense<0.000000e+00> : vector<144x64xf32>
    %274 = tpu.matmul %195, %273, %cst_87 {dimension_numbers = #tpu.dot_dimension_numbers<[1], [0], [0], [1], [0, 0, 1, 1], [], []>} : vector<144x64xbf16>, vector<64x64xbf16>, vector<144x64xf32> -> vector<144x64xf32>
    %275 = vector.extract_strided_slice %274 {offsets = [0, 0], sizes = [16, 64], strides = [1, 1]} : vector<144x64xf32> to vector<16x64xf32>
    %276 = vector.extract_strided_slice %271 {offsets = [0, 0, 0], sizes = [1, 1, 64], strides = [1, 1, 1]} : vector<9x1x64xf32> to vector<1x1x64xf32>
    %277 = vector.shape_cast %276 : vector<1x1x64xf32> to vector<1x64xf32>
    %278 = vector.broadcast %277 : vector<1x64xf32> to vector<16x64xf32>
    %279 = arith.mulf %275, %278 : vector<16x64xf32>
    %280 = vector.extract_strided_slice %274 {offsets = [16, 0], sizes = [16, 64], strides = [1, 1]} : vector<144x64xf32> to vector<16x64xf32>
    %281 = vector.extract_strided_slice %271 {offsets = [1, 0, 0], sizes = [1, 1, 64], strides = [1, 1, 1]} : vector<9x1x64xf32> to vector<1x1x64xf32>
    %282 = vector.shape_cast %281 : vector<1x1x64xf32> to vector<1x64xf32>
    %283 = vector.broadcast %282 : vector<1x64xf32> to vector<16x64xf32>
    %284 = arith.mulf %280, %283 : vector<16x64xf32>
    %285 = arith.addf %279, %284 : vector<16x64xf32>
    %286 = vector.extract_strided_slice %274 {offsets = [32, 0], sizes = [16, 64], strides = [1, 1]} : vector<144x64xf32> to vector<16x64xf32>
    %287 = vector.extract_strided_slice %271 {offsets = [2, 0, 0], sizes = [1, 1, 64], strides = [1, 1, 1]} : vector<9x1x64xf32> to vector<1x1x64xf32>
    %288 = vector.shape_cast %287 : vector<1x1x64xf32> to vector<1x64xf32>
    %289 = vector.broadcast %288 : vector<1x64xf32> to vector<16x64xf32>
    %290 = arith.mulf %286, %289 : vector<16x64xf32>
    %291 = arith.addf %285, %290 : vector<16x64xf32>
    %292 = vector.extract_strided_slice %274 {offsets = [48, 0], sizes = [16, 64], strides = [1, 1]} : vector<144x64xf32> to vector<16x64xf32>
    %293 = vector.extract_strided_slice %271 {offsets = [3, 0, 0], sizes = [1, 1, 64], strides = [1, 1, 1]} : vector<9x1x64xf32> to vector<1x1x64xf32>
    %294 = vector.shape_cast %293 : vector<1x1x64xf32> to vector<1x64xf32>
    %295 = vector.broadcast %294 : vector<1x64xf32> to vector<16x64xf32>
    %296 = arith.mulf %292, %295 : vector<16x64xf32>
    %297 = arith.addf %291, %296 : vector<16x64xf32>
    %298 = vector.extract_strided_slice %274 {offsets = [64, 0], sizes = [16, 64], strides = [1, 1]} : vector<144x64xf32> to vector<16x64xf32>
    %299 = vector.extract_strided_slice %271 {offsets = [4, 0, 0], sizes = [1, 1, 64], strides = [1, 1, 1]} : vector<9x1x64xf32> to vector<1x1x64xf32>
    %300 = vector.shape_cast %299 : vector<1x1x64xf32> to vector<1x64xf32>
    %301 = vector.broadcast %300 : vector<1x64xf32> to vector<16x64xf32>
    %302 = arith.mulf %298, %301 : vector<16x64xf32>
    %303 = arith.addf %297, %302 : vector<16x64xf32>
    %304 = vector.extract_strided_slice %274 {offsets = [80, 0], sizes = [16, 64], strides = [1, 1]} : vector<144x64xf32> to vector<16x64xf32>
    %305 = vector.extract_strided_slice %271 {offsets = [5, 0, 0], sizes = [1, 1, 64], strides = [1, 1, 1]} : vector<9x1x64xf32> to vector<1x1x64xf32>
    %306 = vector.shape_cast %305 : vector<1x1x64xf32> to vector<1x64xf32>
    %307 = vector.broadcast %306 : vector<1x64xf32> to vector<16x64xf32>
    %308 = arith.mulf %304, %307 : vector<16x64xf32>
    %309 = arith.addf %303, %308 : vector<16x64xf32>
    %310 = vector.extract_strided_slice %274 {offsets = [96, 0], sizes = [16, 64], strides = [1, 1]} : vector<144x64xf32> to vector<16x64xf32>
    %311 = vector.extract_strided_slice %271 {offsets = [6, 0, 0], sizes = [1, 1, 64], strides = [1, 1, 1]} : vector<9x1x64xf32> to vector<1x1x64xf32>
    %312 = vector.shape_cast %311 : vector<1x1x64xf32> to vector<1x64xf32>
    %313 = vector.broadcast %312 : vector<1x64xf32> to vector<16x64xf32>
    %314 = arith.mulf %310, %313 : vector<16x64xf32>
    %315 = arith.addf %309, %314 : vector<16x64xf32>
    %316 = vector.extract_strided_slice %274 {offsets = [112, 0], sizes = [16, 64], strides = [1, 1]} : vector<144x64xf32> to vector<16x64xf32>
    %317 = vector.extract_strided_slice %271 {offsets = [7, 0, 0], sizes = [1, 1, 64], strides = [1, 1, 1]} : vector<9x1x64xf32> to vector<1x1x64xf32>
    %318 = vector.shape_cast %317 : vector<1x1x64xf32> to vector<1x64xf32>
    %319 = vector.broadcast %318 : vector<1x64xf32> to vector<16x64xf32>
    %320 = arith.mulf %316, %319 : vector<16x64xf32>
    %321 = arith.addf %315, %320 : vector<16x64xf32>
    %322 = vector.extract_strided_slice %274 {offsets = [128, 0], sizes = [16, 64], strides = [1, 1]} : vector<144x64xf32> to vector<16x64xf32>
    %323 = vector.extract_strided_slice %271 {offsets = [8, 0, 0], sizes = [1, 1, 64], strides = [1, 1, 1]} : vector<9x1x64xf32> to vector<1x1x64xf32>
    %324 = vector.shape_cast %323 : vector<1x1x64xf32> to vector<1x64xf32>
    %325 = vector.broadcast %324 : vector<1x64xf32> to vector<16x64xf32>
    %326 = arith.mulf %322, %325 : vector<16x64xf32>
    %327 = arith.addf %321, %326 : vector<16x64xf32>
    %328 = vector.broadcast %272 : vector<1x64xf32> to vector<16x64xf32>
    %329 = arith.addf %327, %328 : vector<16x64xf32>
    %c0_88 = arith.constant 0 : index
    %c0_89 = arith.constant 0 : index
    %330 = vector.load %arg28[%c0_88, %c0_89] : memref<64x128xbf16, #tpu.memory_space<vmem>>, vector<64x128xbf16>
    %331 = arith.truncf %329 : vector<16x64xf32> to vector<16x64xbf16>
    %cst_90 = arith.constant dense<0.000000e+00> : vector<16x128xf32>
    %332 = tpu.matmul %331, %330, %cst_90 {dimension_numbers = #tpu.dot_dimension_numbers<[1], [0], [0], [1], [0, 0, 1, 1], [], []>} : vector<16x64xbf16>, vector<64x128xbf16>, vector<16x128xf32> -> vector<16x128xf32>
    %c0_91 = arith.constant 0 : index
    %c0_92 = arith.constant 0 : index
    %333 = vector.load %arg29[%c0_91, %c0_92] : memref<1x128xf32, #tpu.memory_space<vmem>>, vector<1x128xf32>
    %334 = vector.broadcast %333 : vector<1x128xf32> to vector<16x128xf32>
    %335 = arith.addf %332, %334 : vector<16x128xf32>
    %cst_93 = arith.constant 0.000000e+00 : f32
    %336 = vector.broadcast %cst_93 : f32 to vector<16x128xf32>
    %337 = arith.maximumf %335, %336 : vector<16x128xf32>
    %338 = arith.addf %262, %337 : vector<16x128xf32>
    %c0_94 = arith.constant 0 : index
    %c0_95 = arith.constant 0 : index
    %c0_96 = arith.constant 0 : index
    %339 = vector.load %arg33[%c0_94, %c0_95, %c0_96] : memref<9x1x64xf32, #tpu.memory_space<vmem>>, vector<9x1x64xf32>
    %c0_97 = arith.constant 0 : index
    %c0_98 = arith.constant 0 : index
    %340 = vector.load %arg34[%c0_97, %c0_98] : memref<1x64xf32, #tpu.memory_space<vmem>>, vector<1x64xf32>
    %c0_99 = arith.constant 0 : index
    %c0_100 = arith.constant 0 : index
    %341 = vector.load %arg31[%c0_99, %c0_100] : memref<128x64xbf16, #tpu.memory_space<vmem>>, vector<128x64xbf16>
    %342 = arith.truncf %338 : vector<16x128xf32> to vector<16x128xbf16>
    %cst_101 = arith.constant dense<0.000000e+00> : vector<16x64xf32>
    %343 = tpu.matmul %342, %341, %cst_101 {dimension_numbers = #tpu.dot_dimension_numbers<[1], [0], [0], [1], [0, 0, 1, 1], [], []>} : vector<16x128xbf16>, vector<128x64xbf16>, vector<16x64xf32> -> vector<16x64xf32>
    %c0_102 = arith.constant 0 : index
    %c0_103 = arith.constant 0 : index
    %344 = vector.load %arg32[%c0_102, %c0_103] : memref<1x64xf32, #tpu.memory_space<vmem>>, vector<1x64xf32>
    %345 = vector.broadcast %344 : vector<1x64xf32> to vector<16x64xf32>
    %346 = arith.addf %343, %345 : vector<16x64xf32>
    %cst_104 = arith.constant 0.000000e+00 : f32
    %347 = vector.broadcast %cst_104 : f32 to vector<16x64xf32>
    %348 = arith.maximumf %346, %347 : vector<16x64xf32>
    %c0_105 = arith.constant 0 : index
    %c0_106 = arith.constant 0 : index
    %349 = vector.load %arg30[%c0_105, %c0_106] : memref<144x16xbf16, #tpu.memory_space<vmem>>, vector<144x16xbf16>
    %350 = arith.truncf %348 : vector<16x64xf32> to vector<16x64xbf16>
    %cst_107 = arith.constant dense<0.000000e+00> : vector<144x64xf32>
    %351 = tpu.matmul %349, %350, %cst_107 {dimension_numbers = #tpu.dot_dimension_numbers<[1], [0], [0], [1], [0, 0, 1, 1], [], []>} : vector<144x16xbf16>, vector<16x64xbf16>, vector<144x64xf32> -> vector<144x64xf32>
    %352 = vector.extract_strided_slice %351 {offsets = [0, 0], sizes = [16, 64], strides = [1, 1]} : vector<144x64xf32> to vector<16x64xf32>
    %353 = vector.extract_strided_slice %339 {offsets = [0, 0, 0], sizes = [1, 1, 64], strides = [1, 1, 1]} : vector<9x1x64xf32> to vector<1x1x64xf32>
    %354 = vector.shape_cast %353 : vector<1x1x64xf32> to vector<1x64xf32>
    %355 = vector.broadcast %354 : vector<1x64xf32> to vector<16x64xf32>
    %356 = arith.mulf %352, %355 : vector<16x64xf32>
    %357 = vector.extract_strided_slice %351 {offsets = [16, 0], sizes = [16, 64], strides = [1, 1]} : vector<144x64xf32> to vector<16x64xf32>
    %358 = vector.extract_strided_slice %339 {offsets = [1, 0, 0], sizes = [1, 1, 64], strides = [1, 1, 1]} : vector<9x1x64xf32> to vector<1x1x64xf32>
    %359 = vector.shape_cast %358 : vector<1x1x64xf32> to vector<1x64xf32>
    %360 = vector.broadcast %359 : vector<1x64xf32> to vector<16x64xf32>
    %361 = arith.mulf %357, %360 : vector<16x64xf32>
    %362 = arith.addf %356, %361 : vector<16x64xf32>
    %363 = vector.extract_strided_slice %351 {offsets = [32, 0], sizes = [16, 64], strides = [1, 1]} : vector<144x64xf32> to vector<16x64xf32>
    %364 = vector.extract_strided_slice %339 {offsets = [2, 0, 0], sizes = [1, 1, 64], strides = [1, 1, 1]} : vector<9x1x64xf32> to vector<1x1x64xf32>
    %365 = vector.shape_cast %364 : vector<1x1x64xf32> to vector<1x64xf32>
    %366 = vector.broadcast %365 : vector<1x64xf32> to vector<16x64xf32>
    %367 = arith.mulf %363, %366 : vector<16x64xf32>
    %368 = arith.addf %362, %367 : vector<16x64xf32>
    %369 = vector.extract_strided_slice %351 {offsets = [48, 0], sizes = [16, 64], strides = [1, 1]} : vector<144x64xf32> to vector<16x64xf32>
    %370 = vector.extract_strided_slice %339 {offsets = [3, 0, 0], sizes = [1, 1, 64], strides = [1, 1, 1]} : vector<9x1x64xf32> to vector<1x1x64xf32>
    %371 = vector.shape_cast %370 : vector<1x1x64xf32> to vector<1x64xf32>
    %372 = vector.broadcast %371 : vector<1x64xf32> to vector<16x64xf32>
    %373 = arith.mulf %369, %372 : vector<16x64xf32>
    %374 = arith.addf %368, %373 : vector<16x64xf32>
    %375 = vector.extract_strided_slice %351 {offsets = [64, 0], sizes = [16, 64], strides = [1, 1]} : vector<144x64xf32> to vector<16x64xf32>
    %376 = vector.extract_strided_slice %339 {offsets = [4, 0, 0], sizes = [1, 1, 64], strides = [1, 1, 1]} : vector<9x1x64xf32> to vector<1x1x64xf32>
    %377 = vector.shape_cast %376 : vector<1x1x64xf32> to vector<1x64xf32>
    %378 = vector.broadcast %377 : vector<1x64xf32> to vector<16x64xf32>
    %379 = arith.mulf %375, %378 : vector<16x64xf32>
    %380 = arith.addf %374, %379 : vector<16x64xf32>
    %381 = vector.extract_strided_slice %351 {offsets = [80, 0], sizes = [16, 64], strides = [1, 1]} : vector<144x64xf32> to vector<16x64xf32>
    %382 = vector.extract_strided_slice %339 {offsets = [5, 0, 0], sizes = [1, 1, 64], strides = [1, 1, 1]} : vector<9x1x64xf32> to vector<1x1x64xf32>
    %383 = vector.shape_cast %382 : vector<1x1x64xf32> to vector<1x64xf32>
    %384 = vector.broadcast %383 : vector<1x64xf32> to vector<16x64xf32>
    %385 = arith.mulf %381, %384 : vector<16x64xf32>
    %386 = arith.addf %380, %385 : vector<16x64xf32>
    %387 = vector.extract_strided_slice %351 {offsets = [96, 0], sizes = [16, 64], strides = [1, 1]} : vector<144x64xf32> to vector<16x64xf32>
    %388 = vector.extract_strided_slice %339 {offsets = [6, 0, 0], sizes = [1, 1, 64], strides = [1, 1, 1]} : vector<9x1x64xf32> to vector<1x1x64xf32>
    %389 = vector.shape_cast %388 : vector<1x1x64xf32> to vector<1x64xf32>
    %390 = vector.broadcast %389 : vector<1x64xf32> to vector<16x64xf32>
    %391 = arith.mulf %387, %390 : vector<16x64xf32>
    %392 = arith.addf %386, %391 : vector<16x64xf32>
    %393 = vector.extract_strided_slice %351 {offsets = [112, 0], sizes = [16, 64], strides = [1, 1]} : vector<144x64xf32> to vector<16x64xf32>
    %394 = vector.extract_strided_slice %339 {offsets = [7, 0, 0], sizes = [1, 1, 64], strides = [1, 1, 1]} : vector<9x1x64xf32> to vector<1x1x64xf32>
    %395 = vector.shape_cast %394 : vector<1x1x64xf32> to vector<1x64xf32>
    %396 = vector.broadcast %395 : vector<1x64xf32> to vector<16x64xf32>
    %397 = arith.mulf %393, %396 : vector<16x64xf32>
    %398 = arith.addf %392, %397 : vector<16x64xf32>
    %399 = vector.extract_strided_slice %351 {offsets = [128, 0], sizes = [16, 64], strides = [1, 1]} : vector<144x64xf32> to vector<16x64xf32>
    %400 = vector.extract_strided_slice %339 {offsets = [8, 0, 0], sizes = [1, 1, 64], strides = [1, 1, 1]} : vector<9x1x64xf32> to vector<1x1x64xf32>
    %401 = vector.shape_cast %400 : vector<1x1x64xf32> to vector<1x64xf32>
    %402 = vector.broadcast %401 : vector<1x64xf32> to vector<16x64xf32>
    %403 = arith.mulf %399, %402 : vector<16x64xf32>
    %404 = arith.addf %398, %403 : vector<16x64xf32>
    %405 = vector.broadcast %340 : vector<1x64xf32> to vector<16x64xf32>
    %406 = arith.addf %404, %405 : vector<16x64xf32>
    %c0_108 = arith.constant 0 : index
    %c0_109 = arith.constant 0 : index
    %407 = vector.load %arg35[%c0_108, %c0_109] : memref<64x128xbf16, #tpu.memory_space<vmem>>, vector<64x128xbf16>
    %408 = arith.truncf %406 : vector<16x64xf32> to vector<16x64xbf16>
    %cst_110 = arith.constant dense<0.000000e+00> : vector<16x128xf32>
    %409 = tpu.matmul %408, %407, %cst_110 {dimension_numbers = #tpu.dot_dimension_numbers<[1], [0], [0], [1], [0, 0, 1, 1], [], []>} : vector<16x64xbf16>, vector<64x128xbf16>, vector<16x128xf32> -> vector<16x128xf32>
    %c0_111 = arith.constant 0 : index
    %c0_112 = arith.constant 0 : index
    %410 = vector.load %arg36[%c0_111, %c0_112] : memref<1x128xf32, #tpu.memory_space<vmem>>, vector<1x128xf32>
    %411 = vector.broadcast %410 : vector<1x128xf32> to vector<16x128xf32>
    %412 = arith.addf %409, %411 : vector<16x128xf32>
    %cst_113 = arith.constant 0.000000e+00 : f32
    %413 = vector.broadcast %cst_113 : f32 to vector<16x128xf32>
    %414 = arith.maximumf %412, %413 : vector<16x128xf32>
    %c0_114 = arith.constant 0 : index
    %c0_115 = arith.constant 0 : index
    %415 = vector.load %arg37[%c0_114, %c0_115] : memref<128x128xbf16, #tpu.memory_space<vmem>>, vector<128x128xbf16>
    %416 = arith.truncf %338 : vector<16x128xf32> to vector<16x128xbf16>
    %cst_116 = arith.constant dense<0.000000e+00> : vector<16x128xf32>
    %417 = tpu.matmul %416, %415, %cst_116 {dimension_numbers = #tpu.dot_dimension_numbers<[1], [0], [0], [1], [0, 0, 1, 1], [], []>} : vector<16x128xbf16>, vector<128x128xbf16>, vector<16x128xf32> -> vector<16x128xf32>
    %418 = arith.addf %417, %414 : vector<16x128xf32>
    %c0_117 = arith.constant 0 : index
    %c0_118 = arith.constant 0 : index
    %c0_119 = arith.constant 0 : index
    %419 = vector.load %arg77[%c0_117, %c0_118, %c0_119] : memref<1x16x128xf32, #tpu.memory_space<vmem>>, vector<1x16x128xf32>
    %420 = vector.shape_cast %419 : vector<1x16x128xf32> to vector<16x128xf32>
    %421 = vector.shape_cast %418 : vector<16x128xf32> to vector<1x16x128xf32>
    tpu.vector_store %arg77[%c0_117, %c0_118, %c0_119], %421 {strides = array<i32>} : memref<1x16x128xf32, #tpu.memory_space<vmem>>, vector<1x16x128xf32>,
    %c0_120 = arith.constant 0 : index
    %c0_121 = arith.constant 0 : index
    %422 = vector.load %arg38[%c0_120, %c0_121] : memref<36x16xbf16, #tpu.memory_space<vmem>>, vector<36x16xbf16>
    %c0_122 = arith.constant 0 : index
    %c0_123 = arith.constant 0 : index
    %c0_124 = arith.constant 0 : index
    %423 = vector.load %arg39[%c0_122, %c0_123, %c0_124] : memref<9x1x128xf32, #tpu.memory_space<vmem>>, vector<9x1x128xf32>
    %c0_125 = arith.constant 0 : index
    %c0_126 = arith.constant 0 : index
    %424 = vector.load %arg40[%c0_125, %c0_126] : memref<1x128xf32, #tpu.memory_space<vmem>>, vector<1x128xf32>
    %425 = arith.truncf %418 : vector<16x128xf32> to vector<16x128xbf16>
    %cst_127 = arith.constant dense<0.000000e+00> : vector<36x128xf32>
    %426 = tpu.matmul %422, %425, %cst_127 {dimension_numbers = #tpu.dot_dimension_numbers<[1], [0], [0], [1], [0, 0, 1, 1], [], []>} : vector<36x16xbf16>, vector<16x128xbf16>, vector<36x128xf32> -> vector<36x128xf32>
    %427 = vector.extract_strided_slice %426 {offsets = [0, 0], sizes = [4, 128], strides = [1, 1]} : vector<36x128xf32> to vector<4x128xf32>
    %428 = vector.extract_strided_slice %423 {offsets = [0, 0, 0], sizes = [1, 1, 128], strides = [1, 1, 1]} : vector<9x1x128xf32> to vector<1x1x128xf32>
    %429 = vector.shape_cast %428 : vector<1x1x128xf32> to vector<1x128xf32>
    %430 = vector.broadcast %429 : vector<1x128xf32> to vector<4x128xf32>
    %431 = arith.mulf %427, %430 : vector<4x128xf32>
    %432 = vector.extract_strided_slice %426 {offsets = [4, 0], sizes = [4, 128], strides = [1, 1]} : vector<36x128xf32> to vector<4x128xf32>
    %433 = vector.extract_strided_slice %423 {offsets = [1, 0, 0], sizes = [1, 1, 128], strides = [1, 1, 1]} : vector<9x1x128xf32> to vector<1x1x128xf32>
    %434 = vector.shape_cast %433 : vector<1x1x128xf32> to vector<1x128xf32>
    %435 = vector.broadcast %434 : vector<1x128xf32> to vector<4x128xf32>
    %436 = arith.mulf %432, %435 : vector<4x128xf32>
    %437 = arith.addf %431, %436 : vector<4x128xf32>
    %438 = vector.extract_strided_slice %426 {offsets = [8, 0], sizes = [4, 128], strides = [1, 1]} : vector<36x128xf32> to vector<4x128xf32>
    %439 = vector.extract_strided_slice %423 {offsets = [2, 0, 0], sizes = [1, 1, 128], strides = [1, 1, 1]} : vector<9x1x128xf32> to vector<1x1x128xf32>
    %440 = vector.shape_cast %439 : vector<1x1x128xf32> to vector<1x128xf32>
    %441 = vector.broadcast %440 : vector<1x128xf32> to vector<4x128xf32>
    %442 = arith.mulf %438, %441 : vector<4x128xf32>
    %443 = arith.addf %437, %442 : vector<4x128xf32>
    %444 = vector.extract_strided_slice %426 {offsets = [12, 0], sizes = [4, 128], strides = [1, 1]} : vector<36x128xf32> to vector<4x128xf32>
    %445 = vector.extract_strided_slice %423 {offsets = [3, 0, 0], sizes = [1, 1, 128], strides = [1, 1, 1]} : vector<9x1x128xf32> to vector<1x1x128xf32>
    %446 = vector.shape_cast %445 : vector<1x1x128xf32> to vector<1x128xf32>
    %447 = vector.broadcast %446 : vector<1x128xf32> to vector<4x128xf32>
    %448 = arith.mulf %444, %447 : vector<4x128xf32>
    %449 = arith.addf %443, %448 : vector<4x128xf32>
    %450 = vector.extract_strided_slice %426 {offsets = [16, 0], sizes = [4, 128], strides = [1, 1]} : vector<36x128xf32> to vector<4x128xf32>
    %451 = vector.extract_strided_slice %423 {offsets = [4, 0, 0], sizes = [1, 1, 128], strides = [1, 1, 1]} : vector<9x1x128xf32> to vector<1x1x128xf32>
    %452 = vector.shape_cast %451 : vector<1x1x128xf32> to vector<1x128xf32>
    %453 = vector.broadcast %452 : vector<1x128xf32> to vector<4x128xf32>
    %454 = arith.mulf %450, %453 : vector<4x128xf32>
    %455 = arith.addf %449, %454 : vector<4x128xf32>
    %456 = vector.extract_strided_slice %426 {offsets = [20, 0], sizes = [4, 128], strides = [1, 1]} : vector<36x128xf32> to vector<4x128xf32>
    %457 = vector.extract_strided_slice %423 {offsets = [5, 0, 0], sizes = [1, 1, 128], strides = [1, 1, 1]} : vector<9x1x128xf32> to vector<1x1x128xf32>
    %458 = vector.shape_cast %457 : vector<1x1x128xf32> to vector<1x128xf32>
    %459 = vector.broadcast %458 : vector<1x128xf32> to vector<4x128xf32>
    %460 = arith.mulf %456, %459 : vector<4x128xf32>
    %461 = arith.addf %455, %460 : vector<4x128xf32>
    %462 = vector.extract_strided_slice %426 {offsets = [24, 0], sizes = [4, 128], strides = [1, 1]} : vector<36x128xf32> to vector<4x128xf32>
    %463 = vector.extract_strided_slice %423 {offsets = [6, 0, 0], sizes = [1, 1, 128], strides = [1, 1, 1]} : vector<9x1x128xf32> to vector<1x1x128xf32>
    %464 = vector.shape_cast %463 : vector<1x1x128xf32> to vector<1x128xf32>
    %465 = vector.broadcast %464 : vector<1x128xf32> to vector<4x128xf32>
    %466 = arith.mulf %462, %465 : vector<4x128xf32>
    %467 = arith.addf %461, %466 : vector<4x128xf32>
    %468 = vector.extract_strided_slice %426 {offsets = [28, 0], sizes = [4, 128], strides = [1, 1]} : vector<36x128xf32> to vector<4x128xf32>
    %469 = vector.extract_strided_slice %423 {offsets = [7, 0, 0], sizes = [1, 1, 128], strides = [1, 1, 1]} : vector<9x1x128xf32> to vector<1x1x128xf32>
    %470 = vector.shape_cast %469 : vector<1x1x128xf32> to vector<1x128xf32>
    %471 = vector.broadcast %470 : vector<1x128xf32> to vector<4x128xf32>
    %472 = arith.mulf %468, %471 : vector<4x128xf32>
    %473 = arith.addf %467, %472 : vector<4x128xf32>
    %474 = vector.extract_strided_slice %426 {offsets = [32, 0], sizes = [4, 128], strides = [1, 1]} : vector<36x128xf32> to vector<4x128xf32>
    %475 = vector.extract_strided_slice %423 {offsets = [8, 0, 0], sizes = [1, 1, 128], strides = [1, 1, 1]} : vector<9x1x128xf32> to vector<1x1x128xf32>
    %476 = vector.shape_cast %475 : vector<1x1x128xf32> to vector<1x128xf32>
    %477 = vector.broadcast %476 : vector<1x128xf32> to vector<4x128xf32>
    %478 = arith.mulf %474, %477 : vector<4x128xf32>
    %479 = arith.addf %473, %478 : vector<4x128xf32>
    %480 = vector.broadcast %424 : vector<1x128xf32> to vector<4x128xf32>
    %481 = arith.addf %479, %480 : vector<4x128xf32>
    %c0_128 = arith.constant 0 : index
    %c0_129 = arith.constant 0 : index
    %482 = vector.load %arg41[%c0_128, %c0_129] : memref<128x256xbf16, #tpu.memory_space<vmem>>, vector<128x256xbf16>
    %483 = arith.truncf %481 : vector<4x128xf32> to vector<4x128xbf16>
    %cst_130 = arith.constant dense<0.000000e+00> : vector<4x256xf32>
    %484 = tpu.matmul %483, %482, %cst_130 {dimension_numbers = #tpu.dot_dimension_numbers<[1], [0], [0], [1], [0, 0, 1, 1], [], []>} : vector<4x128xbf16>, vector<128x256xbf16>, vector<4x256xf32> -> vector<4x256xf32>
    %c0_131 = arith.constant 0 : index
    %c0_132 = arith.constant 0 : index
    %485 = vector.load %arg42[%c0_131, %c0_132] : memref<1x256xf32, #tpu.memory_space<vmem>>, vector<1x256xf32>
    %486 = vector.broadcast %485 : vector<1x256xf32> to vector<4x256xf32>
    %487 = arith.addf %484, %486 : vector<4x256xf32>
    %cst_133 = arith.constant 0.000000e+00 : f32
    %488 = vector.broadcast %cst_133 : f32 to vector<4x256xf32>
    %489 = arith.maximumf %487, %488 : vector<4x256xf32>
    %c0_134 = arith.constant 0 : index
    %c0_135 = arith.constant 0 : index
    %490 = vector.load %arg43[%c0_134, %c0_135] : memref<128x128xbf16, #tpu.memory_space<vmem>>, vector<128x128xbf16>
    %491 = arith.truncf %418 : vector<16x128xf32> to vector<16x128xbf16>
    %cst_136 = arith.constant dense<0.000000e+00> : vector<16x128xf32>
    %492 = tpu.matmul %491, %490, %cst_136 {dimension_numbers = #tpu.dot_dimension_numbers<[1], [0], [0], [1], [0, 0, 1, 1], [], []>} : vector<16x128xbf16>, vector<128x128xbf16>, vector<16x128xf32> -> vector<16x128xf32>
    %c0_137 = arith.constant 0 : index
    %c0_138 = arith.constant 0 : index
    %493 = vector.load %arg44[%c0_137, %c0_138] : memref<1x128xf32, #tpu.memory_space<vmem>>, vector<1x128xf32>
    %494 = vector.broadcast %493 : vector<1x128xf32> to vector<16x128xf32>
    %495 = arith.addf %492, %494 : vector<16x128xf32>
    %cst_139 = arith.constant 0.000000e+00 : f32
    %496 = vector.broadcast %cst_139 : f32 to vector<16x128xf32>
    %497 = arith.maximumf %495, %496 : vector<16x128xf32>
    %c0_140 = arith.constant 0 : index
    %c0_141 = arith.constant 0 : index
    %c0_142 = arith.constant 0 : index
    %498 = vector.load %arg45[%c0_140, %c0_141, %c0_142] : memref<9x1x128xf32, #tpu.memory_space<vmem>>, vector<9x1x128xf32>
    %c0_143 = arith.constant 0 : index
    %c0_144 = arith.constant 0 : index
    %499 = vector.load %arg46[%c0_143, %c0_144] : memref<1x128xf32, #tpu.memory_space<vmem>>, vector<1x128xf32>
    %500 = arith.truncf %497 : vector<16x128xf32> to vector<16x128xbf16>
    %cst_145 = arith.constant dense<0.000000e+00> : vector<36x128xf32>
    %501 = tpu.matmul %422, %500, %cst_145 {dimension_numbers = #tpu.dot_dimension_numbers<[1], [0], [0], [1], [0, 0, 1, 1], [], []>} : vector<36x16xbf16>, vector<16x128xbf16>, vector<36x128xf32> -> vector<36x128xf32>
    %502 = vector.extract_strided_slice %501 {offsets = [0, 0], sizes = [4, 128], strides = [1, 1]} : vector<36x128xf32> to vector<4x128xf32>
    %503 = vector.extract_strided_slice %498 {offsets = [0, 0, 0], sizes = [1, 1, 128], strides = [1, 1, 1]} : vector<9x1x128xf32> to vector<1x1x128xf32>
    %504 = vector.shape_cast %503 : vector<1x1x128xf32> to vector<1x128xf32>
    %505 = vector.broadcast %504 : vector<1x128xf32> to vector<4x128xf32>
    %506 = arith.mulf %502, %505 : vector<4x128xf32>
    %507 = vector.extract_strided_slice %501 {offsets = [4, 0], sizes = [4, 128], strides = [1, 1]} : vector<36x128xf32> to vector<4x128xf32>
    %508 = vector.extract_strided_slice %498 {offsets = [1, 0, 0], sizes = [1, 1, 128], strides = [1, 1, 1]} : vector<9x1x128xf32> to vector<1x1x128xf32>
    %509 = vector.shape_cast %508 : vector<1x1x128xf32> to vector<1x128xf32>
    %510 = vector.broadcast %509 : vector<1x128xf32> to vector<4x128xf32>
    %511 = arith.mulf %507, %510 : vector<4x128xf32>
    %512 = arith.addf %506, %511 : vector<4x128xf32>
    %513 = vector.extract_strided_slice %501 {offsets = [8, 0], sizes = [4, 128], strides = [1, 1]} : vector<36x128xf32> to vector<4x128xf32>
    %514 = vector.extract_strided_slice %498 {offsets = [2, 0, 0], sizes = [1, 1, 128], strides = [1, 1, 1]} : vector<9x1x128xf32> to vector<1x1x128xf32>
    %515 = vector.shape_cast %514 : vector<1x1x128xf32> to vector<1x128xf32>
    %516 = vector.broadcast %515 : vector<1x128xf32> to vector<4x128xf32>
    %517 = arith.mulf %513, %516 : vector<4x128xf32>
    %518 = arith.addf %512, %517 : vector<4x128xf32>
    %519 = vector.extract_strided_slice %501 {offsets = [12, 0], sizes = [4, 128], strides = [1, 1]} : vector<36x128xf32> to vector<4x128xf32>
    %520 = vector.extract_strided_slice %498 {offsets = [3, 0, 0], sizes = [1, 1, 128], strides = [1, 1, 1]} : vector<9x1x128xf32> to vector<1x1x128xf32>
    %521 = vector.shape_cast %520 : vector<1x1x128xf32> to vector<1x128xf32>
    %522 = vector.broadcast %521 : vector<1x128xf32> to vector<4x128xf32>
    %523 = arith.mulf %519, %522 : vector<4x128xf32>
    %524 = arith.addf %518, %523 : vector<4x128xf32>
    %525 = vector.extract_strided_slice %501 {offsets = [16, 0], sizes = [4, 128], strides = [1, 1]} : vector<36x128xf32> to vector<4x128xf32>
    %526 = vector.extract_strided_slice %498 {offsets = [4, 0, 0], sizes = [1, 1, 128], strides = [1, 1, 1]} : vector<9x1x128xf32> to vector<1x1x128xf32>
    %527 = vector.shape_cast %526 : vector<1x1x128xf32> to vector<1x128xf32>
    %528 = vector.broadcast %527 : vector<1x128xf32> to vector<4x128xf32>
    %529 = arith.mulf %525, %528 : vector<4x128xf32>
    %530 = arith.addf %524, %529 : vector<4x128xf32>
    %531 = vector.extract_strided_slice %501 {offsets = [20, 0], sizes = [4, 128], strides = [1, 1]} : vector<36x128xf32> to vector<4x128xf32>
    %532 = vector.extract_strided_slice %498 {offsets = [5, 0, 0], sizes = [1, 1, 128], strides = [1, 1, 1]} : vector<9x1x128xf32> to vector<1x1x128xf32>
    %533 = vector.shape_cast %532 : vector<1x1x128xf32> to vector<1x128xf32>
    %534 = vector.broadcast %533 : vector<1x128xf32> to vector<4x128xf32>
    %535 = arith.mulf %531, %534 : vector<4x128xf32>
    %536 = arith.addf %530, %535 : vector<4x128xf32>
    %537 = vector.extract_strided_slice %501 {offsets = [24, 0], sizes = [4, 128], strides = [1, 1]} : vector<36x128xf32> to vector<4x128xf32>
    %538 = vector.extract_strided_slice %498 {offsets = [6, 0, 0], sizes = [1, 1, 128], strides = [1, 1, 1]} : vector<9x1x128xf32> to vector<1x1x128xf32>
    %539 = vector.shape_cast %538 : vector<1x1x128xf32> to vector<1x128xf32>
    %540 = vector.broadcast %539 : vector<1x128xf32> to vector<4x128xf32>
    %541 = arith.mulf %537, %540 : vector<4x128xf32>
    %542 = arith.addf %536, %541 : vector<4x128xf32>
    %543 = vector.extract_strided_slice %501 {offsets = [28, 0], sizes = [4, 128], strides = [1, 1]} : vector<36x128xf32> to vector<4x128xf32>
    %544 = vector.extract_strided_slice %498 {offsets = [7, 0, 0], sizes = [1, 1, 128], strides = [1, 1, 1]} : vector<9x1x128xf32> to vector<1x1x128xf32>
    %545 = vector.shape_cast %544 : vector<1x1x128xf32> to vector<1x128xf32>
    %546 = vector.broadcast %545 : vector<1x128xf32> to vector<4x128xf32>
    %547 = arith.mulf %543, %546 : vector<4x128xf32>
    %548 = arith.addf %542, %547 : vector<4x128xf32>
    %549 = vector.extract_strided_slice %501 {offsets = [32, 0], sizes = [4, 128], strides = [1, 1]} : vector<36x128xf32> to vector<4x128xf32>
    %550 = vector.extract_strided_slice %498 {offsets = [8, 0, 0], sizes = [1, 1, 128], strides = [1, 1, 1]} : vector<9x1x128xf32> to vector<1x1x128xf32>
    %551 = vector.shape_cast %550 : vector<1x1x128xf32> to vector<1x128xf32>
    %552 = vector.broadcast %551 : vector<1x128xf32> to vector<4x128xf32>
    %553 = arith.mulf %549, %552 : vector<4x128xf32>
    %554 = arith.addf %548, %553 : vector<4x128xf32>
    %555 = vector.broadcast %499 : vector<1x128xf32> to vector<4x128xf32>
    %556 = arith.addf %554, %555 : vector<4x128xf32>
    %c0_146 = arith.constant 0 : index
    %c0_147 = arith.constant 0 : index
    %557 = vector.load %arg47[%c0_146, %c0_147] : memref<128x256xbf16, #tpu.memory_space<vmem>>, vector<128x256xbf16>
    %558 = arith.truncf %556 : vector<4x128xf32> to vector<4x128xbf16>
    %cst_148 = arith.constant dense<0.000000e+00> : vector<4x256xf32>
    %559 = tpu.matmul %558, %557, %cst_148 {dimension_numbers = #tpu.dot_dimension_numbers<[1], [0], [0], [1], [0, 0, 1, 1], [], []>} : vector<4x128xbf16>, vector<128x256xbf16>, vector<4x256xf32> -> vector<4x256xf32>
    %c0_149 = arith.constant 0 : index
    %c0_150 = arith.constant 0 : index
    %560 = vector.load %arg48[%c0_149, %c0_150] : memref<1x256xf32, #tpu.memory_space<vmem>>, vector<1x256xf32>
    %561 = vector.broadcast %560 : vector<1x256xf32> to vector<4x256xf32>
    %562 = arith.addf %559, %561 : vector<4x256xf32>
    %cst_151 = arith.constant 0.000000e+00 : f32
    %563 = vector.broadcast %cst_151 : f32 to vector<4x256xf32>
    %564 = arith.maximumf %562, %563 : vector<4x256xf32>
    %565 = arith.addf %489, %564 : vector<4x256xf32>
    %c0_152 = arith.constant 0 : index
    %c0_153 = arith.constant 0 : index
    %c0_154 = arith.constant 0 : index
    %566 = vector.load %arg52[%c0_152, %c0_153, %c0_154] : memref<9x1x128xf32, #tpu.memory_space<vmem>>, vector<9x1x128xf32>
    %c0_155 = arith.constant 0 : index
    %c0_156 = arith.constant 0 : index
    %567 = vector.load %arg53[%c0_155, %c0_156] : memref<1x128xf32, #tpu.memory_space<vmem>>, vector<1x128xf32>
    %c0_157 = arith.constant 0 : index
    %c0_158 = arith.constant 0 : index
    %568 = vector.load %arg50[%c0_157, %c0_158] : memref<256x128xbf16, #tpu.memory_space<vmem>>, vector<256x128xbf16>
    %569 = arith.truncf %565 : vector<4x256xf32> to vector<4x256xbf16>
    %cst_159 = arith.constant dense<0.000000e+00> : vector<4x128xf32>
    %570 = tpu.matmul %569, %568, %cst_159 {dimension_numbers = #tpu.dot_dimension_numbers<[1], [0], [0], [1], [0, 0, 1, 1], [], []>} : vector<4x256xbf16>, vector<256x128xbf16>, vector<4x128xf32> -> vector<4x128xf32>
    %c0_160 = arith.constant 0 : index
    %c0_161 = arith.constant 0 : index
    %571 = vector.load %arg51[%c0_160, %c0_161] : memref<1x128xf32, #tpu.memory_space<vmem>>, vector<1x128xf32>
    %572 = vector.broadcast %571 : vector<1x128xf32> to vector<4x128xf32>
    %573 = arith.addf %570, %572 : vector<4x128xf32>
    %cst_162 = arith.constant 0.000000e+00 : f32
    %574 = vector.broadcast %cst_162 : f32 to vector<4x128xf32>
    %575 = arith.maximumf %573, %574 : vector<4x128xf32>
    %c0_163 = arith.constant 0 : index
    %c0_164 = arith.constant 0 : index
    %576 = vector.load %arg49[%c0_163, %c0_164] : memref<36x4xbf16, #tpu.memory_space<vmem>>, vector<36x4xbf16>
    %577 = arith.truncf %575 : vector<4x128xf32> to vector<4x128xbf16>
    %cst_165 = arith.constant dense<0.000000e+00> : vector<36x128xf32>
    %578 = tpu.matmul %576, %577, %cst_165 {dimension_numbers = #tpu.dot_dimension_numbers<[1], [0], [0], [1], [0, 0, 1, 1], [], []>} : vector<36x4xbf16>, vector<4x128xbf16>, vector<36x128xf32> -> vector<36x128xf32>
    %579 = vector.extract_strided_slice %578 {offsets = [0, 0], sizes = [4, 128], strides = [1, 1]} : vector<36x128xf32> to vector<4x128xf32>
    %580 = vector.extract_strided_slice %566 {offsets = [0, 0, 0], sizes = [1, 1, 128], strides = [1, 1, 1]} : vector<9x1x128xf32> to vector<1x1x128xf32>
    %581 = vector.shape_cast %580 : vector<1x1x128xf32> to vector<1x128xf32>
    %582 = vector.broadcast %581 : vector<1x128xf32> to vector<4x128xf32>
    %583 = arith.mulf %579, %582 : vector<4x128xf32>
    %584 = vector.extract_strided_slice %578 {offsets = [4, 0], sizes = [4, 128], strides = [1, 1]} : vector<36x128xf32> to vector<4x128xf32>
    %585 = vector.extract_strided_slice %566 {offsets = [1, 0, 0], sizes = [1, 1, 128], strides = [1, 1, 1]} : vector<9x1x128xf32> to vector<1x1x128xf32>
    %586 = vector.shape_cast %585 : vector<1x1x128xf32> to vector<1x128xf32>
    %587 = vector.broadcast %586 : vector<1x128xf32> to vector<4x128xf32>
    %588 = arith.mulf %584, %587 : vector<4x128xf32>
    %589 = arith.addf %583, %588 : vector<4x128xf32>
    %590 = vector.extract_strided_slice %578 {offsets = [8, 0], sizes = [4, 128], strides = [1, 1]} : vector<36x128xf32> to vector<4x128xf32>
    %591 = vector.extract_strided_slice %566 {offsets = [2, 0, 0], sizes = [1, 1, 128], strides = [1, 1, 1]} : vector<9x1x128xf32> to vector<1x1x128xf32>
    %592 = vector.shape_cast %591 : vector<1x1x128xf32> to vector<1x128xf32>
    %593 = vector.broadcast %592 : vector<1x128xf32> to vector<4x128xf32>
    %594 = arith.mulf %590, %593 : vector<4x128xf32>
    %595 = arith.addf %589, %594 : vector<4x128xf32>
    %596 = vector.extract_strided_slice %578 {offsets = [12, 0], sizes = [4, 128], strides = [1, 1]} : vector<36x128xf32> to vector<4x128xf32>
    %597 = vector.extract_strided_slice %566 {offsets = [3, 0, 0], sizes = [1, 1, 128], strides = [1, 1, 1]} : vector<9x1x128xf32> to vector<1x1x128xf32>
    %598 = vector.shape_cast %597 : vector<1x1x128xf32> to vector<1x128xf32>
    %599 = vector.broadcast %598 : vector<1x128xf32> to vector<4x128xf32>
    %600 = arith.mulf %596, %599 : vector<4x128xf32>
    %601 = arith.addf %595, %600 : vector<4x128xf32>
    %602 = vector.extract_strided_slice %578 {offsets = [16, 0], sizes = [4, 128], strides = [1, 1]} : vector<36x128xf32> to vector<4x128xf32>
    %603 = vector.extract_strided_slice %566 {offsets = [4, 0, 0], sizes = [1, 1, 128], strides = [1, 1, 1]} : vector<9x1x128xf32> to vector<1x1x128xf32>
    %604 = vector.shape_cast %603 : vector<1x1x128xf32> to vector<1x128xf32>
    %605 = vector.broadcast %604 : vector<1x128xf32> to vector<4x128xf32>
    %606 = arith.mulf %602, %605 : vector<4x128xf32>
    %607 = arith.addf %601, %606 : vector<4x128xf32>
    %608 = vector.extract_strided_slice %578 {offsets = [20, 0], sizes = [4, 128], strides = [1, 1]} : vector<36x128xf32> to vector<4x128xf32>
    %609 = vector.extract_strided_slice %566 {offsets = [5, 0, 0], sizes = [1, 1, 128], strides = [1, 1, 1]} : vector<9x1x128xf32> to vector<1x1x128xf32>
    %610 = vector.shape_cast %609 : vector<1x1x128xf32> to vector<1x128xf32>
    %611 = vector.broadcast %610 : vector<1x128xf32> to vector<4x128xf32>
    %612 = arith.mulf %608, %611 : vector<4x128xf32>
    %613 = arith.addf %607, %612 : vector<4x128xf32>
    %614 = vector.extract_strided_slice %578 {offsets = [24, 0], sizes = [4, 128], strides = [1, 1]} : vector<36x128xf32> to vector<4x128xf32>
    %615 = vector.extract_strided_slice %566 {offsets = [6, 0, 0], sizes = [1, 1, 128], strides = [1, 1, 1]} : vector<9x1x128xf32> to vector<1x1x128xf32>
    %616 = vector.shape_cast %615 : vector<1x1x128xf32> to vector<1x128xf32>
    %617 = vector.broadcast %616 : vector<1x128xf32> to vector<4x128xf32>
    %618 = arith.mulf %614, %617 : vector<4x128xf32>
    %619 = arith.addf %613, %618 : vector<4x128xf32>
    %620 = vector.extract_strided_slice %578 {offsets = [28, 0], sizes = [4, 128], strides = [1, 1]} : vector<36x128xf32> to vector<4x128xf32>
    %621 = vector.extract_strided_slice %566 {offsets = [7, 0, 0], sizes = [1, 1, 128], strides = [1, 1, 1]} : vector<9x1x128xf32> to vector<1x1x128xf32>
    %622 = vector.shape_cast %621 : vector<1x1x128xf32> to vector<1x128xf32>
    %623 = vector.broadcast %622 : vector<1x128xf32> to vector<4x128xf32>
    %624 = arith.mulf %620, %623 : vector<4x128xf32>
    %625 = arith.addf %619, %624 : vector<4x128xf32>
    %626 = vector.extract_strided_slice %578 {offsets = [32, 0], sizes = [4, 128], strides = [1, 1]} : vector<36x128xf32> to vector<4x128xf32>
    %627 = vector.extract_strided_slice %566 {offsets = [8, 0, 0], sizes = [1, 1, 128], strides = [1, 1, 1]} : vector<9x1x128xf32> to vector<1x1x128xf32>
    %628 = vector.shape_cast %627 : vector<1x1x128xf32> to vector<1x128xf32>
    %629 = vector.broadcast %628 : vector<1x128xf32> to vector<4x128xf32>
    %630 = arith.mulf %626, %629 : vector<4x128xf32>
    %631 = arith.addf %625, %630 : vector<4x128xf32>
    %632 = vector.broadcast %567 : vector<1x128xf32> to vector<4x128xf32>
    %633 = arith.addf %631, %632 : vector<4x128xf32>
    %c0_166 = arith.constant 0 : index
    %c0_167 = arith.constant 0 : index
    %634 = vector.load %arg54[%c0_166, %c0_167] : memref<128x256xbf16, #tpu.memory_space<vmem>>, vector<128x256xbf16>
    %635 = arith.truncf %633 : vector<4x128xf32> to vector<4x128xbf16>
    %cst_168 = arith.constant dense<0.000000e+00> : vector<4x256xf32>
    %636 = tpu.matmul %635, %634, %cst_168 {dimension_numbers = #tpu.dot_dimension_numbers<[1], [0], [0], [1], [0, 0, 1, 1], [], []>} : vector<4x128xbf16>, vector<128x256xbf16>, vector<4x256xf32> -> vector<4x256xf32>
    %c0_169 = arith.constant 0 : index
    %c0_170 = arith.constant 0 : index
    %637 = vector.load %arg55[%c0_169, %c0_170] : memref<1x256xf32, #tpu.memory_space<vmem>>, vector<1x256xf32>
    %638 = vector.broadcast %637 : vector<1x256xf32> to vector<4x256xf32>
    %639 = arith.addf %636, %638 : vector<4x256xf32>
    %cst_171 = arith.constant 0.000000e+00 : f32
    %640 = vector.broadcast %cst_171 : f32 to vector<4x256xf32>
    %641 = arith.maximumf %639, %640 : vector<4x256xf32>
    %c0_172 = arith.constant 0 : index
    %c0_173 = arith.constant 0 : index
    %642 = vector.load %arg56[%c0_172, %c0_173] : memref<256x256xbf16, #tpu.memory_space<vmem>>, vector<256x256xbf16>
    %643 = arith.truncf %565 : vector<4x256xf32> to vector<4x256xbf16>
    %cst_174 = arith.constant dense<0.000000e+00> : vector<4x256xf32>
    %644 = tpu.matmul %643, %642, %cst_174 {dimension_numbers = #tpu.dot_dimension_numbers<[1], [0], [0], [1], [0, 0, 1, 1], [], []>} : vector<4x256xbf16>, vector<256x256xbf16>, vector<4x256xf32> -> vector<4x256xf32>
    %645 = arith.addf %644, %641 : vector<4x256xf32>
    %c0_175 = arith.constant 0 : index
    %c0_176 = arith.constant 0 : index
    %c0_177 = arith.constant 0 : index
    %646 = vector.load %arg78[%c0_175, %c0_176, %c0_177] : memref<1x4x256xf32, #tpu.memory_space<vmem>>, vector<1x4x256xf32>
    %647 = vector.shape_cast %646 : vector<1x4x256xf32> to vector<4x256xf32>
    %648 = vector.shape_cast %645 : vector<4x256xf32> to vector<1x4x256xf32>
    tpu.vector_store %arg78[%c0_175, %c0_176, %c0_177], %648 {strides = array<i32>} : memref<1x4x256xf32, #tpu.memory_space<vmem>>, vector<1x4x256xf32>,
    %c0_178 = arith.constant 0 : index
    %c0_179 = arith.constant 0 : index
    %649 = vector.load %arg57[%c0_178, %c0_179] : memref<9x4xbf16, #tpu.memory_space<vmem>>, vector<9x4xbf16>
    %c0_180 = arith.constant 0 : index
    %c0_181 = arith.constant 0 : index
    %c0_182 = arith.constant 0 : index
    %650 = vector.load %arg58[%c0_180, %c0_181, %c0_182] : memref<9x1x256xf32, #tpu.memory_space<vmem>>, vector<9x1x256xf32>
    %c0_183 = arith.constant 0 : index
    %c0_184 = arith.constant 0 : index
    %651 = vector.load %arg59[%c0_183, %c0_184] : memref<1x256xf32, #tpu.memory_space<vmem>>, vector<1x256xf32>
    %652 = arith.truncf %645 : vector<4x256xf32> to vector<4x256xbf16>
    %cst_185 = arith.constant dense<0.000000e+00> : vector<9x256xf32>
    %653 = tpu.matmul %649, %652, %cst_185 {dimension_numbers = #tpu.dot_dimension_numbers<[1], [0], [0], [1], [0, 0, 1, 1], [], []>} : vector<9x4xbf16>, vector<4x256xbf16>, vector<9x256xf32> -> vector<9x256xf32>
    %654 = vector.extract_strided_slice %653 {offsets = [0, 0], sizes = [1, 256], strides = [1, 1]} : vector<9x256xf32> to vector<1x256xf32>
    %655 = vector.extract_strided_slice %650 {offsets = [0, 0, 0], sizes = [1, 1, 256], strides = [1, 1, 1]} : vector<9x1x256xf32> to vector<1x1x256xf32>
    %656 = vector.shape_cast %655 : vector<1x1x256xf32> to vector<1x256xf32>
    %657 = arith.mulf %654, %656 : vector<1x256xf32>
    %658 = vector.extract_strided_slice %653 {offsets = [1, 0], sizes = [1, 256], strides = [1, 1]} : vector<9x256xf32> to vector<1x256xf32>
    %659 = vector.extract_strided_slice %650 {offsets = [1, 0, 0], sizes = [1, 1, 256], strides = [1, 1, 1]} : vector<9x1x256xf32> to vector<1x1x256xf32>
    %660 = vector.shape_cast %659 : vector<1x1x256xf32> to vector<1x256xf32>
    %661 = arith.mulf %658, %660 : vector<1x256xf32>
    %662 = arith.addf %657, %661 : vector<1x256xf32>
    %663 = vector.extract_strided_slice %653 {offsets = [2, 0], sizes = [1, 256], strides = [1, 1]} : vector<9x256xf32> to vector<1x256xf32>
    %664 = vector.extract_strided_slice %650 {offsets = [2, 0, 0], sizes = [1, 1, 256], strides = [1, 1, 1]} : vector<9x1x256xf32> to vector<1x1x256xf32>
    %665 = vector.shape_cast %664 : vector<1x1x256xf32> to vector<1x256xf32>
    %666 = arith.mulf %663, %665 : vector<1x256xf32>
    %667 = arith.addf %662, %666 : vector<1x256xf32>
    %668 = vector.extract_strided_slice %653 {offsets = [3, 0], sizes = [1, 256], strides = [1, 1]} : vector<9x256xf32> to vector<1x256xf32>
    %669 = vector.extract_strided_slice %650 {offsets = [3, 0, 0], sizes = [1, 1, 256], strides = [1, 1, 1]} : vector<9x1x256xf32> to vector<1x1x256xf32>
    %670 = vector.shape_cast %669 : vector<1x1x256xf32> to vector<1x256xf32>
    %671 = arith.mulf %668, %670 : vector<1x256xf32>
    %672 = arith.addf %667, %671 : vector<1x256xf32>
    %673 = vector.extract_strided_slice %653 {offsets = [4, 0], sizes = [1, 256], strides = [1, 1]} : vector<9x256xf32> to vector<1x256xf32>
    %674 = vector.extract_strided_slice %650 {offsets = [4, 0, 0], sizes = [1, 1, 256], strides = [1, 1, 1]} : vector<9x1x256xf32> to vector<1x1x256xf32>
    %675 = vector.shape_cast %674 : vector<1x1x256xf32> to vector<1x256xf32>
    %676 = arith.mulf %673, %675 : vector<1x256xf32>
    %677 = arith.addf %672, %676 : vector<1x256xf32>
    %678 = vector.extract_strided_slice %653 {offsets = [5, 0], sizes = [1, 256], strides = [1, 1]} : vector<9x256xf32> to vector<1x256xf32>
    %679 = vector.extract_strided_slice %650 {offsets = [5, 0, 0], sizes = [1, 1, 256], strides = [1, 1, 1]} : vector<9x1x256xf32> to vector<1x1x256xf32>
    %680 = vector.shape_cast %679 : vector<1x1x256xf32> to vector<1x256xf32>
    %681 = arith.mulf %678, %680 : vector<1x256xf32>
    %682 = arith.addf %677, %681 : vector<1x256xf32>
    %683 = vector.extract_strided_slice %653 {offsets = [6, 0], sizes = [1, 256], strides = [1, 1]} : vector<9x256xf32> to vector<1x256xf32>
    %684 = vector.extract_strided_slice %650 {offsets = [6, 0, 0], sizes = [1, 1, 256], strides = [1, 1, 1]} : vector<9x1x256xf32> to vector<1x1x256xf32>
    %685 = vector.shape_cast %684 : vector<1x1x256xf32> to vector<1x256xf32>
    %686 = arith.mulf %683, %685 : vector<1x256xf32>
    %687 = arith.addf %682, %686 : vector<1x256xf32>
    %688 = vector.extract_strided_slice %653 {offsets = [7, 0], sizes = [1, 256], strides = [1, 1]} : vector<9x256xf32> to vector<1x256xf32>
    %689 = vector.extract_strided_slice %650 {offsets = [7, 0, 0], sizes = [1, 1, 256], strides = [1, 1, 1]} : vector<9x1x256xf32> to vector<1x1x256xf32>
    %690 = vector.shape_cast %689 : vector<1x1x256xf32> to vector<1x256xf32>
    %691 = arith.mulf %688, %690 : vector<1x256xf32>
    %692 = arith.addf %687, %691 : vector<1x256xf32>
    %693 = vector.extract_strided_slice %653 {offsets = [8, 0], sizes = [1, 256], strides = [1, 1]} : vector<9x256xf32> to vector<1x256xf32>
    %694 = vector.extract_strided_slice %650 {offsets = [8, 0, 0], sizes = [1, 1, 256], strides = [1, 1, 1]} : vector<9x1x256xf32> to vector<1x1x256xf32>
    %695 = vector.shape_cast %694 : vector<1x1x256xf32> to vector<1x256xf32>
    %696 = arith.mulf %693, %695 : vector<1x256xf32>
    %697 = arith.addf %692, %696 : vector<1x256xf32>
    %698 = arith.addf %697, %651 : vector<1x256xf32>
    %c0_186 = arith.constant 0 : index
    %c0_187 = arith.constant 0 : index
    %699 = vector.load %arg60[%c0_186, %c0_187] : memref<256x512xbf16, #tpu.memory_space<vmem>>, vector<256x512xbf16>
    %700 = arith.truncf %698 : vector<1x256xf32> to vector<1x256xbf16>
    %cst_188 = arith.constant dense<0.000000e+00> : vector<1x512xf32>
    %701 = tpu.matmul %700, %699, %cst_188 {dimension_numbers = #tpu.dot_dimension_numbers<[1], [0], [0], [1], [0, 0, 1, 1], [], []>} : vector<1x256xbf16>, vector<256x512xbf16>, vector<1x512xf32> -> vector<1x512xf32>
    %c0_189 = arith.constant 0 : index
    %c0_190 = arith.constant 0 : index
    %702 = vector.load %arg61[%c0_189, %c0_190] : memref<1x512xf32, #tpu.memory_space<vmem>>, vector<1x512xf32>
    %703 = arith.addf %701, %702 : vector<1x512xf32>
    %cst_191 = arith.constant 0.000000e+00 : f32
    %704 = vector.broadcast %cst_191 : f32 to vector<1x512xf32>
    %705 = arith.maximumf %703, %704 : vector<1x512xf32>
    %c0_192 = arith.constant 0 : index
    %c0_193 = arith.constant 0 : index
    %706 = vector.load %arg62[%c0_192, %c0_193] : memref<256x256xbf16, #tpu.memory_space<vmem>>, vector<256x256xbf16>
    %707 = arith.truncf %645 : vector<4x256xf32> to vector<4x256xbf16>
    %cst_194 = arith.constant dense<0.000000e+00> : vector<4x256xf32>
    %708 = tpu.matmul %707, %706, %cst_194 {dimension_numbers = #tpu.dot_dimension_numbers<[1], [0], [0], [1], [0, 0, 1, 1], [], []>} : vector<4x256xbf16>, vector<256x256xbf16>, vector<4x256xf32> -> vector<4x256xf32>
    %c0_195 = arith.constant 0 : index
    %c0_196 = arith.constant 0 : index
    %709 = vector.load %arg63[%c0_195, %c0_196] : memref<1x256xf32, #tpu.memory_space<vmem>>, vector<1x256xf32>
    %710 = vector.broadcast %709 : vector<1x256xf32> to vector<4x256xf32>
    %711 = arith.addf %708, %710 : vector<4x256xf32>
    %cst_197 = arith.constant 0.000000e+00 : f32
    %712 = vector.broadcast %cst_197 : f32 to vector<4x256xf32>
    %713 = arith.maximumf %711, %712 : vector<4x256xf32>
    %c0_198 = arith.constant 0 : index
    %c0_199 = arith.constant 0 : index
    %c0_200 = arith.constant 0 : index
    %714 = vector.load %arg64[%c0_198, %c0_199, %c0_200] : memref<9x1x256xf32, #tpu.memory_space<vmem>>, vector<9x1x256xf32>
    %c0_201 = arith.constant 0 : index
    %c0_202 = arith.constant 0 : index
    %715 = vector.load %arg65[%c0_201, %c0_202] : memref<1x256xf32, #tpu.memory_space<vmem>>, vector<1x256xf32>
    %716 = arith.truncf %713 : vector<4x256xf32> to vector<4x256xbf16>
    %cst_203 = arith.constant dense<0.000000e+00> : vector<9x256xf32>
    %717 = tpu.matmul %649, %716, %cst_203 {dimension_numbers = #tpu.dot_dimension_numbers<[1], [0], [0], [1], [0, 0, 1, 1], [], []>} : vector<9x4xbf16>, vector<4x256xbf16>, vector<9x256xf32> -> vector<9x256xf32>
    %718 = vector.extract_strided_slice %717 {offsets = [0, 0], sizes = [1, 256], strides = [1, 1]} : vector<9x256xf32> to vector<1x256xf32>
    %719 = vector.extract_strided_slice %714 {offsets = [0, 0, 0], sizes = [1, 1, 256], strides = [1, 1, 1]} : vector<9x1x256xf32> to vector<1x1x256xf32>
    %720 = vector.shape_cast %719 : vector<1x1x256xf32> to vector<1x256xf32>
    %721 = arith.mulf %718, %720 : vector<1x256xf32>
    %722 = vector.extract_strided_slice %717 {offsets = [1, 0], sizes = [1, 256], strides = [1, 1]} : vector<9x256xf32> to vector<1x256xf32>
    %723 = vector.extract_strided_slice %714 {offsets = [1, 0, 0], sizes = [1, 1, 256], strides = [1, 1, 1]} : vector<9x1x256xf32> to vector<1x1x256xf32>
    %724 = vector.shape_cast %723 : vector<1x1x256xf32> to vector<1x256xf32>
    %725 = arith.mulf %722, %724 : vector<1x256xf32>
    %726 = arith.addf %721, %725 : vector<1x256xf32>
    %727 = vector.extract_strided_slice %717 {offsets = [2, 0], sizes = [1, 256], strides = [1, 1]} : vector<9x256xf32> to vector<1x256xf32>
    %728 = vector.extract_strided_slice %714 {offsets = [2, 0, 0], sizes = [1, 1, 256], strides = [1, 1, 1]} : vector<9x1x256xf32> to vector<1x1x256xf32>
    %729 = vector.shape_cast %728 : vector<1x1x256xf32> to vector<1x256xf32>
    %730 = arith.mulf %727, %729 : vector<1x256xf32>
    %731 = arith.addf %726, %730 : vector<1x256xf32>
    %732 = vector.extract_strided_slice %717 {offsets = [3, 0], sizes = [1, 256], strides = [1, 1]} : vector<9x256xf32> to vector<1x256xf32>
    %733 = vector.extract_strided_slice %714 {offsets = [3, 0, 0], sizes = [1, 1, 256], strides = [1, 1, 1]} : vector<9x1x256xf32> to vector<1x1x256xf32>
    %734 = vector.shape_cast %733 : vector<1x1x256xf32> to vector<1x256xf32>
    %735 = arith.mulf %732, %734 : vector<1x256xf32>
    %736 = arith.addf %731, %735 : vector<1x256xf32>
    %737 = vector.extract_strided_slice %717 {offsets = [4, 0], sizes = [1, 256], strides = [1, 1]} : vector<9x256xf32> to vector<1x256xf32>
    %738 = vector.extract_strided_slice %714 {offsets = [4, 0, 0], sizes = [1, 1, 256], strides = [1, 1, 1]} : vector<9x1x256xf32> to vector<1x1x256xf32>
    %739 = vector.shape_cast %738 : vector<1x1x256xf32> to vector<1x256xf32>
    %740 = arith.mulf %737, %739 : vector<1x256xf32>
    %741 = arith.addf %736, %740 : vector<1x256xf32>
    %742 = vector.extract_strided_slice %717 {offsets = [5, 0], sizes = [1, 256], strides = [1, 1]} : vector<9x256xf32> to vector<1x256xf32>
    %743 = vector.extract_strided_slice %714 {offsets = [5, 0, 0], sizes = [1, 1, 256], strides = [1, 1, 1]} : vector<9x1x256xf32> to vector<1x1x256xf32>
    %744 = vector.shape_cast %743 : vector<1x1x256xf32> to vector<1x256xf32>
    %745 = arith.mulf %742, %744 : vector<1x256xf32>
    %746 = arith.addf %741, %745 : vector<1x256xf32>
    %747 = vector.extract_strided_slice %717 {offsets = [6, 0], sizes = [1, 256], strides = [1, 1]} : vector<9x256xf32> to vector<1x256xf32>
    %748 = vector.extract_strided_slice %714 {offsets = [6, 0, 0], sizes = [1, 1, 256], strides = [1, 1, 1]} : vector<9x1x256xf32> to vector<1x1x256xf32>
    %749 = vector.shape_cast %748 : vector<1x1x256xf32> to vector<1x256xf32>
    %750 = arith.mulf %747, %749 : vector<1x256xf32>
    %751 = arith.addf %746, %750 : vector<1x256xf32>
    %752 = vector.extract_strided_slice %717 {offsets = [7, 0], sizes = [1, 256], strides = [1, 1]} : vector<9x256xf32> to vector<1x256xf32>
    %753 = vector.extract_strided_slice %714 {offsets = [7, 0, 0], sizes = [1, 1, 256], strides = [1, 1, 1]} : vector<9x1x256xf32> to vector<1x1x256xf32>
    %754 = vector.shape_cast %753 : vector<1x1x256xf32> to vector<1x256xf32>
    %755 = arith.mulf %752, %754 : vector<1x256xf32>
    %756 = arith.addf %751, %755 : vector<1x256xf32>
    %757 = vector.extract_strided_slice %717 {offsets = [8, 0], sizes = [1, 256], strides = [1, 1]} : vector<9x256xf32> to vector<1x256xf32>
    %758 = vector.extract_strided_slice %714 {offsets = [8, 0, 0], sizes = [1, 1, 256], strides = [1, 1, 1]} : vector<9x1x256xf32> to vector<1x1x256xf32>
    %759 = vector.shape_cast %758 : vector<1x1x256xf32> to vector<1x256xf32>
    %760 = arith.mulf %757, %759 : vector<1x256xf32>
    %761 = arith.addf %756, %760 : vector<1x256xf32>
    %762 = arith.addf %761, %715 : vector<1x256xf32>
    %c0_204 = arith.constant 0 : index
    %c0_205 = arith.constant 0 : index
    %763 = vector.load %arg66[%c0_204, %c0_205] : memref<256x512xbf16, #tpu.memory_space<vmem>>, vector<256x512xbf16>
    %764 = arith.truncf %762 : vector<1x256xf32> to vector<1x256xbf16>
    %cst_206 = arith.constant dense<0.000000e+00> : vector<1x512xf32>
    %765 = tpu.matmul %764, %763, %cst_206 {dimension_numbers = #tpu.dot_dimension_numbers<[1], [0], [0], [1], [0, 0, 1, 1], [], []>} : vector<1x256xbf16>, vector<256x512xbf16>, vector<1x512xf32> -> vector<1x512xf32>
    %c0_207 = arith.constant 0 : index
    %c0_208 = arith.constant 0 : index
    %766 = vector.load %arg67[%c0_207, %c0_208] : memref<1x512xf32, #tpu.memory_space<vmem>>, vector<1x512xf32>
    %767 = arith.addf %765, %766 : vector<1x512xf32>
    %cst_209 = arith.constant 0.000000e+00 : f32
    %768 = vector.broadcast %cst_209 : f32 to vector<1x512xf32>
    %769 = arith.maximumf %767, %768 : vector<1x512xf32>
    %770 = arith.addf %705, %769 : vector<1x512xf32>
    %c0_210 = arith.constant 0 : index
    %c0_211 = arith.constant 0 : index
    %c0_212 = arith.constant 0 : index
    %771 = vector.load %arg70[%c0_210, %c0_211, %c0_212] : memref<9x1x256xf32, #tpu.memory_space<vmem>>, vector<9x1x256xf32>
    %c0_213 = arith.constant 0 : index
    %c0_214 = arith.constant 0 : index
    %772 = vector.load %arg71[%c0_213, %c0_214] : memref<1x256xf32, #tpu.memory_space<vmem>>, vector<1x256xf32>
    %c0_215 = arith.constant 0 : index
    %c0_216 = arith.constant 0 : index
    %773 = vector.load %arg68[%c0_215, %c0_216] : memref<512x256xbf16, #tpu.memory_space<vmem>>, vector<512x256xbf16>
    %774 = arith.truncf %770 : vector<1x512xf32> to vector<1x512xbf16>
    %cst_217 = arith.constant dense<0.000000e+00> : vector<1x256xf32>
    %775 = tpu.matmul %774, %773, %cst_217 {dimension_numbers = #tpu.dot_dimension_numbers<[1], [0], [0], [1], [0, 0, 1, 1], [], []>} : vector<1x512xbf16>, vector<512x256xbf16>, vector<1x256xf32> -> vector<1x256xf32>
    %c0_218 = arith.constant 0 : index
    %c0_219 = arith.constant 0 : index
    %776 = vector.load %arg69[%c0_218, %c0_219] : memref<1x256xf32, #tpu.memory_space<vmem>>, vector<1x256xf32>
    %777 = arith.addf %775, %776 : vector<1x256xf32>
    %cst_220 = arith.constant 0.000000e+00 : f32
    %778 = vector.broadcast %cst_220 : f32 to vector<1x256xf32>
    %779 = arith.maximumf %777, %778 : vector<1x256xf32>
    %780 = vector.extract_strided_slice %771 {offsets = [4, 0, 0], sizes = [1, 1, 256], strides = [1, 1, 1]} : vector<9x1x256xf32> to vector<1x1x256xf32>
    %781 = vector.shape_cast %780 : vector<1x1x256xf32> to vector<1x256xf32>
    %782 = arith.mulf %779, %781 : vector<1x256xf32>
    %783 = arith.addf %782, %772 : vector<1x256xf32>
    %c0_221 = arith.constant 0 : index
    %c0_222 = arith.constant 0 : index
    %784 = vector.load %arg72[%c0_221, %c0_222] : memref<256x512xbf16, #tpu.memory_space<vmem>>, vector<256x512xbf16>
    %785 = arith.truncf %783 : vector<1x256xf32> to vector<1x256xbf16>
    %cst_223 = arith.constant dense<0.000000e+00> : vector<1x512xf32>
    %786 = tpu.matmul %785, %784, %cst_223 {dimension_numbers = #tpu.dot_dimension_numbers<[1], [0], [0], [1], [0, 0, 1, 1], [], []>} : vector<1x256xbf16>, vector<256x512xbf16>, vector<1x512xf32> -> vector<1x512xf32>
    %c0_224 = arith.constant 0 : index
    %c0_225 = arith.constant 0 : index
    %787 = vector.load %arg73[%c0_224, %c0_225] : memref<1x512xf32, #tpu.memory_space<vmem>>, vector<1x512xf32>
    %788 = arith.addf %786, %787 : vector<1x512xf32>
    %cst_226 = arith.constant 0.000000e+00 : f32
    %789 = vector.broadcast %cst_226 : f32 to vector<1x512xf32>
    %790 = arith.maximumf %788, %789 : vector<1x512xf32>
    %c0_227 = arith.constant 0 : index
    %c0_228 = arith.constant 0 : index
    %791 = vector.load %arg74[%c0_227, %c0_228] : memref<512x512xbf16, #tpu.memory_space<vmem>>, vector<512x512xbf16>
    %792 = arith.truncf %770 : vector<1x512xf32> to vector<1x512xbf16>
    %cst_229 = arith.constant dense<0.000000e+00> : vector<1x512xf32>
    %793 = tpu.matmul %792, %791, %cst_229 {dimension_numbers = #tpu.dot_dimension_numbers<[1], [0], [0], [1], [0, 0, 1, 1], [], []>} : vector<1x512xbf16>, vector<512x512xbf16>, vector<1x512xf32> -> vector<1x512xf32>
    %794 = arith.addf %793, %790 : vector<1x512xf32>
    %c0_230 = arith.constant 0 : index
    %c0_231 = arith.constant 0 : index
    %c0_232 = arith.constant 0 : index
    %795 = vector.load %arg79[%c0_230, %c0_231, %c0_232] : memref<1x1x512xf32, #tpu.memory_space<vmem>>, vector<1x1x512xf32>
    %796 = vector.shape_cast %795 : vector<1x1x512xf32> to vector<1x512xf32>
    %797 = vector.shape_cast %794 : vector<1x512xf32> to vector<1x1x512xf32>
    tpu.vector_store %arg79[%c0_230, %c0_231, %c0_232], %797 {strides = array<i32>} : memref<1x1x512xf32, #tpu.memory_space<vmem>>, vector<1x1x512xf32>,
    return
  }
  func.func @transform_0(%arg0: i32) -> (i32, i32, i32) {
    %c0_i32 = arith.constant 0 : i32
    %c0_i32_0 = arith.constant 0 : i32
    %c0_i32_1 = arith.constant 0 : i32
    return %arg0, %c0_i32, %c0_i32_0 : i32, i32, i32
  }
  func.func @transform_1(%arg0: i32) -> (i32, i32) {
    %c0_i32 = arith.constant 0 : i32
    %c0_i32_0 = arith.constant 0 : i32
    %c0_i32_1 = arith.constant 0 : i32
    return %c0_i32, %c0_i32_0 : i32, i32
  }
  func.func @transform_2(%arg0: i32) -> (i32, i32) {
    %c0_i32 = arith.constant 0 : i32
    %c0_i32_0 = arith.constant 0 : i32
    %c0_i32_1 = arith.constant 0 : i32
    return %c0_i32, %c0_i32_0 : i32, i32
  }
  func.func @transform_3(%arg0: i32) -> (i32, i32) {
    %c0_i32 = arith.constant 0 : i32
    %c0_i32_0 = arith.constant 0 : i32
    %c0_i32_1 = arith.constant 0 : i32
    return %c0_i32, %c0_i32_0 : i32, i32
  }
  func.func @transform_4(%arg0: i32) -> (i32, i32) {
    %c0_i32 = arith.constant 0 : i32
    %c0_i32_0 = arith.constant 0 : i32
    %c0_i32_1 = arith.constant 0 : i32
    return %c0_i32, %c0_i32_0 : i32, i32
  }
  func.func @transform_5(%arg0: i32) -> (i32, i32) {
    %c0_i32 = arith.constant 0 : i32
    %c0_i32_0 = arith.constant 0 : i32
    %c0_i32_1 = arith.constant 0 : i32
    return %c0_i32, %c0_i32_0 : i32, i32
  }
  func.func @transform_6(%arg0: i32) -> (i32, i32) {
    %c0_i32 = arith.constant 0 : i32
    %c0_i32_0 = arith.constant 0 : i32
    %c0_i32_1 = arith.constant 0 : i32
    return %c0_i32, %c0_i32_0 : i32, i32
  }
  func.func @transform_7(%arg0: i32) -> (i32, i32, i32) {
    %c0_i32 = arith.constant 0 : i32
    %c0_i32_0 = arith.constant 0 : i32
    %c0_i32_1 = arith.constant 0 : i32
    %c0_i32_2 = arith.constant 0 : i32
    return %c0_i32, %c0_i32_0, %c0_i32_1 : i32, i32, i32
  }
  func.func @transform_8(%arg0: i32) -> (i32, i32) {
    %c0_i32 = arith.constant 0 : i32
    %c0_i32_0 = arith.constant 0 : i32
    %c0_i32_1 = arith.constant 0 : i32
    return %c0_i32, %c0_i32_0 : i32, i32
  }
  func.func @transform_9(%arg0: i32) -> (i32, i32) {
    %c0_i32 = arith.constant 0 : i32
    %c0_i32_0 = arith.constant 0 : i32
    %c0_i32_1 = arith.constant 0 : i32
    return %c0_i32, %c0_i32_0 : i32, i32
  }
  func.func @transform_10(%arg0: i32) -> (i32, i32) {
    %c0_i32 = arith.constant 0 : i32
    %c0_i32_0 = arith.constant 0 : i32
    %c0_i32_1 = arith.constant 0 : i32
    return %c0_i32, %c0_i32_0 : i32, i32
  }
  func.func @transform_11(%arg0: i32) -> (i32, i32) {
    %c0_i32 = arith.constant 0 : i32
    %c0_i32_0 = arith.constant 0 : i32
    %c0_i32_1 = arith.constant 0 : i32
    return %c0_i32, %c0_i32_0 : i32, i32
  }
  func.func @transform_12(%arg0: i32) -> (i32, i32) {
    %c0_i32 = arith.constant 0 : i32
    %c0_i32_0 = arith.constant 0 : i32
    %c0_i32_1 = arith.constant 0 : i32
    return %c0_i32, %c0_i32_0 : i32, i32
  }
  func.func @transform_13(%arg0: i32) -> (i32, i32) {
    %c0_i32 = arith.constant 0 : i32
    %c0_i32_0 = arith.constant 0 : i32
    %c0_i32_1 = arith.constant 0 : i32
    return %c0_i32, %c0_i32_0 : i32, i32
  }
  func.func @transform_14(%arg0: i32) -> (i32, i32, i32) {
    %c0_i32 = arith.constant 0 : i32
    %c0_i32_0 = arith.constant 0 : i32
    %c0_i32_1 = arith.constant 0 : i32
    %c0_i32_2 = arith.constant 0 : i32
    return %c0_i32, %c0_i32_0, %c0_i32_1 : i32, i32, i32
  }
  func.func @transform_15(%arg0: i32) -> (i32, i32) {
    %c0_i32 = arith.constant 0 : i32
    %c0_i32_0 = arith.constant 0 : i32
    %c0_i32_1 = arith.constant 0 : i32
    return %c0_i32, %c0_i32_0 : i32, i32
  }
  func.func @transform_16(%arg0: i32) -> (i32, i32) {
    %c0_i32 = arith.constant 0 : i32
    %c0_i32_0 = arith.constant 0 : i32
    %c0_i32_1 = arith.constant 0 : i32
    return %c0_i32, %c0_i32_0 : i32, i32
  }
  func.func @transform_17(%arg0: i32) -> (i32, i32) {
    %c0_i32 = arith.constant 0 : i32
    %c0_i32_0 = arith.constant 0 : i32
    %c0_i32_1 = arith.constant 0 : i32
    return %c0_i32, %c0_i32_0 : i32, i32
  }
  func.func @transform_18(%arg0: i32) -> (i32, i32) {
    %c0_i32 = arith.constant 0 : i32
    %c0_i32_0 = arith.constant 0 : i32
    %c0_i32_1 = arith.constant 0 : i32
    return %c0_i32, %c0_i32_0 : i32, i32
  }
  func.func @transform_19(%arg0: i32) -> (i32, i32, i32) {
    %c0_i32 = arith.constant 0 : i32
    %c0_i32_0 = arith.constant 0 : i32
    %c0_i32_1 = arith.constant 0 : i32
    %c0_i32_2 = arith.constant 0 : i32
    return %c0_i32, %c0_i32_0, %c0_i32_1 : i32, i32, i32
  }
  func.func @transform_20(%arg0: i32) -> (i32, i32) {
    %c0_i32 = arith.constant 0 : i32
    %c0_i32_0 = arith.constant 0 : i32
    %c0_i32_1 = arith.constant 0 : i32
    return %c0_i32, %c0_i32_0 : i32, i32
  }
  func.func @transform_21(%arg0: i32) -> (i32, i32) {
    %c0_i32 = arith.constant 0 : i32
    %c0_i32_0 = arith.constant 0 : i32
    %c0_i32_1 = arith.constant 0 : i32
    return %c0_i32, %c0_i32_0 : i32, i32
  }
  func.func @transform_22(%arg0: i32) -> (i32, i32) {
    %c0_i32 = arith.constant 0 : i32
    %c0_i32_0 = arith.constant 0 : i32
    %c0_i32_1 = arith.constant 0 : i32
    return %c0_i32, %c0_i32_0 : i32, i32
  }
  func.func @transform_23(%arg0: i32) -> (i32, i32) {
    %c0_i32 = arith.constant 0 : i32
    %c0_i32_0 = arith.constant 0 : i32
    %c0_i32_1 = arith.constant 0 : i32
    return %c0_i32, %c0_i32_0 : i32, i32
  }
  func.func @transform_24(%arg0: i32) -> (i32, i32) {
    %c0_i32 = arith.constant 0 : i32
    %c0_i32_0 = arith.constant 0 : i32
    %c0_i32_1 = arith.constant 0 : i32
    return %c0_i32, %c0_i32_0 : i32, i32
  }
  func.func @transform_25(%arg0: i32) -> (i32, i32, i32) {
    %c0_i32 = arith.constant 0 : i32
    %c0_i32_0 = arith.constant 0 : i32
    %c0_i32_1 = arith.constant 0 : i32
    %c0_i32_2 = arith.constant 0 : i32
    return %c0_i32, %c0_i32_0, %c0_i32_1 : i32, i32, i32
  }
  func.func @transform_26(%arg0: i32) -> (i32, i32) {
    %c0_i32 = arith.constant 0 : i32
    %c0_i32_0 = arith.constant 0 : i32
    %c0_i32_1 = arith.constant 0 : i32
    return %c0_i32, %c0_i32_0 : i32, i32
  }
  func.func @transform_27(%arg0: i32) -> (i32, i32) {
    %c0_i32 = arith.constant 0 : i32
    %c0_i32_0 = arith.constant 0 : i32
    %c0_i32_1 = arith.constant 0 : i32
    return %c0_i32, %c0_i32_0 : i32, i32
  }
  func.func @transform_28(%arg0: i32) -> (i32, i32) {
    %c0_i32 = arith.constant 0 : i32
    %c0_i32_0 = arith.constant 0 : i32
    %c0_i32_1 = arith.constant 0 : i32
    return %c0_i32, %c0_i32_0 : i32, i32
  }
  func.func @transform_29(%arg0: i32) -> (i32, i32) {
    %c0_i32 = arith.constant 0 : i32
    %c0_i32_0 = arith.constant 0 : i32
    %c0_i32_1 = arith.constant 0 : i32
    return %c0_i32, %c0_i32_0 : i32, i32
  }
  func.func @transform_30(%arg0: i32) -> (i32, i32) {
    %c0_i32 = arith.constant 0 : i32
    %c0_i32_0 = arith.constant 0 : i32
    %c0_i32_1 = arith.constant 0 : i32
    return %c0_i32, %c0_i32_0 : i32, i32
  }
  func.func @transform_31(%arg0: i32) -> (i32, i32) {
    %c0_i32 = arith.constant 0 : i32
    %c0_i32_0 = arith.constant 0 : i32
    %c0_i32_1 = arith.constant 0 : i32
    return %c0_i32, %c0_i32_0 : i32, i32
  }
  func.func @transform_32(%arg0: i32) -> (i32, i32, i32) {
    %c0_i32 = arith.constant 0 : i32
    %c0_i32_0 = arith.constant 0 : i32
    %c0_i32_1 = arith.constant 0 : i32
    %c0_i32_2 = arith.constant 0 : i32
    return %c0_i32, %c0_i32_0, %c0_i32_1 : i32, i32, i32
  }
  func.func @transform_33(%arg0: i32) -> (i32, i32) {
    %c0_i32 = arith.constant 0 : i32
    %c0_i32_0 = arith.constant 0 : i32
    %c0_i32_1 = arith.constant 0 : i32
    return %c0_i32, %c0_i32_0 : i32, i32
  }
  func.func @transform_34(%arg0: i32) -> (i32, i32) {
    %c0_i32 = arith.constant 0 : i32
    %c0_i32_0 = arith.constant 0 : i32
    %c0_i32_1 = arith.constant 0 : i32
    return %c0_i32, %c0_i32_0 : i32, i32
  }
  func.func @transform_35(%arg0: i32) -> (i32, i32) {
    %c0_i32 = arith.constant 0 : i32
    %c0_i32_0 = arith.constant 0 : i32
    %c0_i32_1 = arith.constant 0 : i32
    return %c0_i32, %c0_i32_0 : i32, i32
  }
  func.func @transform_36(%arg0: i32) -> (i32, i32) {
    %c0_i32 = arith.constant 0 : i32
    %c0_i32_0 = arith.constant 0 : i32
    %c0_i32_1 = arith.constant 0 : i32
    return %c0_i32, %c0_i32_0 : i32, i32
  }
  func.func @transform_37(%arg0: i32) -> (i32, i32) {
    %c0_i32 = arith.constant 0 : i32
    %c0_i32_0 = arith.constant 0 : i32
    %c0_i32_1 = arith.constant 0 : i32
    return %c0_i32, %c0_i32_0 : i32, i32
  }
  func.func @transform_38(%arg0: i32) -> (i32, i32, i32) {
    %c0_i32 = arith.constant 0 : i32
    %c0_i32_0 = arith.constant 0 : i32
    %c0_i32_1 = arith.constant 0 : i32
    %c0_i32_2 = arith.constant 0 : i32
    return %c0_i32, %c0_i32_0, %c0_i32_1 : i32, i32, i32
  }
  func.func @transform_39(%arg0: i32) -> (i32, i32) {
    %c0_i32 = arith.constant 0 : i32
    %c0_i32_0 = arith.constant 0 : i32
    %c0_i32_1 = arith.constant 0 : i32
    return %c0_i32, %c0_i32_0 : i32, i32
  }
  func.func @transform_40(%arg0: i32) -> (i32, i32) {
    %c0_i32 = arith.constant 0 : i32
    %c0_i32_0 = arith.constant 0 : i32
    %c0_i32_1 = arith.constant 0 : i32
    return %c0_i32, %c0_i32_0 : i32, i32
  }
  func.func @transform_41(%arg0: i32) -> (i32, i32) {
    %c0_i32 = arith.constant 0 : i32
    %c0_i32_0 = arith.constant 0 : i32
    %c0_i32_1 = arith.constant 0 : i32
    return %c0_i32, %c0_i32_0 : i32, i32
  }
  func.func @transform_42(%arg0: i32) -> (i32, i32) {
    %c0_i32 = arith.constant 0 : i32
    %c0_i32_0 = arith.constant 0 : i32
    %c0_i32_1 = arith.constant 0 : i32
    return %c0_i32, %c0_i32_0 : i32, i32
  }
  func.func @transform_43(%arg0: i32) -> (i32, i32) {
    %c0_i32 = arith.constant 0 : i32
    %c0_i32_0 = arith.constant 0 : i32
    %c0_i32_1 = arith.constant 0 : i32
    return %c0_i32, %c0_i32_0 : i32, i32
  }
  func.func @transform_44(%arg0: i32) -> (i32, i32, i32) {
    %c0_i32 = arith.constant 0 : i32
    %c0_i32_0 = arith.constant 0 : i32
    %c0_i32_1 = arith.constant 0 : i32
    %c0_i32_2 = arith.constant 0 : i32
    return %c0_i32, %c0_i32_0, %c0_i32_1 : i32, i32, i32
  }
  func.func @transform_45(%arg0: i32) -> (i32, i32) {
    %c0_i32 = arith.constant 0 : i32
    %c0_i32_0 = arith.constant 0 : i32
    %c0_i32_1 = arith.constant 0 : i32
    return %c0_i32, %c0_i32_0 : i32, i32
  }
  func.func @transform_46(%arg0: i32) -> (i32, i32) {
    %c0_i32 = arith.constant 0 : i32
    %c0_i32_0 = arith.constant 0 : i32
    %c0_i32_1 = arith.constant 0 : i32
    return %c0_i32, %c0_i32_0 : i32, i32
  }
  func.func @transform_47(%arg0: i32) -> (i32, i32) {
    %c0_i32 = arith.constant 0 : i32
    %c0_i32_0 = arith.constant 0 : i32
    %c0_i32_1 = arith.constant 0 : i32
    return %c0_i32, %c0_i32_0 : i32, i32
  }
  func.func @transform_48(%arg0: i32) -> (i32, i32) {
    %c0_i32 = arith.constant 0 : i32
    %c0_i32_0 = arith.constant 0 : i32
    %c0_i32_1 = arith.constant 0 : i32
    return %c0_i32, %c0_i32_0 : i32, i32
  }
  func.func @transform_49(%arg0: i32) -> (i32, i32) {
    %c0_i32 = arith.constant 0 : i32
    %c0_i32_0 = arith.constant 0 : i32
    %c0_i32_1 = arith.constant 0 : i32
    return %c0_i32, %c0_i32_0 : i32, i32
  }
  func.func @transform_50(%arg0: i32) -> (i32, i32) {
    %c0_i32 = arith.constant 0 : i32
    %c0_i32_0 = arith.constant 0 : i32
    %c0_i32_1 = arith.constant 0 : i32
    return %c0_i32, %c0_i32_0 : i32, i32
  }
  func.func @transform_51(%arg0: i32) -> (i32, i32, i32) {
    %c0_i32 = arith.constant 0 : i32
    %c0_i32_0 = arith.constant 0 : i32
    %c0_i32_1 = arith.constant 0 : i32
    %c0_i32_2 = arith.constant 0 : i32
    return %c0_i32, %c0_i32_0, %c0_i32_1 : i32, i32, i32
  }
  func.func @transform_52(%arg0: i32) -> (i32, i32) {
    %c0_i32 = arith.constant 0 : i32
    %c0_i32_0 = arith.constant 0 : i32
    %c0_i32_1 = arith.constant 0 : i32
    return %c0_i32, %c0_i32_0 : i32, i32
  }
  func.func @transform_53(%arg0: i32) -> (i32, i32) {
    %c0_i32 = arith.constant 0 : i32
    %c0_i32_0 = arith.constant 0 : i32
    %c0_i32_1 = arith.constant 0 : i32
    return %c0_i32, %c0_i32_0 : i32, i32
  }
  func.func @transform_54(%arg0: i32) -> (i32, i32) {
    %c0_i32 = arith.constant 0 : i32
    %c0_i32_0 = arith.constant 0 : i32
    %c0_i32_1 = arith.constant 0 : i32
    return %c0_i32, %c0_i32_0 : i32, i32
  }
  func.func @transform_55(%arg0: i32) -> (i32, i32) {
    %c0_i32 = arith.constant 0 : i32
    %c0_i32_0 = arith.constant 0 : i32
    %c0_i32_1 = arith.constant 0 : i32
    return %c0_i32, %c0_i32_0 : i32, i32
  }
  func.func @transform_56(%arg0: i32) -> (i32, i32) {
    %c0_i32 = arith.constant 0 : i32
    %c0_i32_0 = arith.constant 0 : i32
    %c0_i32_1 = arith.constant 0 : i32
    return %c0_i32, %c0_i32_0 : i32, i32
  }
  func.func @transform_57(%arg0: i32) -> (i32, i32, i32) {
    %c0_i32 = arith.constant 0 : i32
    %c0_i32_0 = arith.constant 0 : i32
    %c0_i32_1 = arith.constant 0 : i32
    %c0_i32_2 = arith.constant 0 : i32
    return %c0_i32, %c0_i32_0, %c0_i32_1 : i32, i32, i32
  }
  func.func @transform_58(%arg0: i32) -> (i32, i32) {
    %c0_i32 = arith.constant 0 : i32
    %c0_i32_0 = arith.constant 0 : i32
    %c0_i32_1 = arith.constant 0 : i32
    return %c0_i32, %c0_i32_0 : i32, i32
  }
  func.func @transform_59(%arg0: i32) -> (i32, i32) {
    %c0_i32 = arith.constant 0 : i32
    %c0_i32_0 = arith.constant 0 : i32
    %c0_i32_1 = arith.constant 0 : i32
    return %c0_i32, %c0_i32_0 : i32, i32
  }
  func.func @transform_60(%arg0: i32) -> (i32, i32) {
    %c0_i32 = arith.constant 0 : i32
    %c0_i32_0 = arith.constant 0 : i32
    %c0_i32_1 = arith.constant 0 : i32
    return %c0_i32, %c0_i32_0 : i32, i32
  }
  func.func @transform_61(%arg0: i32) -> (i32, i32) {
    %c0_i32 = arith.constant 0 : i32
    %c0_i32_0 = arith.constant 0 : i32
    %c0_i32_1 = arith.constant 0 : i32
    return %c0_i32, %c0_i32_0 : i32, i32
  }
  func.func @transform_62(%arg0: i32) -> (i32, i32) {
    %c0_i32 = arith.constant 0 : i32
    %c0_i32_0 = arith.constant 0 : i32
    %c0_i32_1 = arith.constant 0 : i32
    return %c0_i32, %c0_i32_0 : i32, i32
  }
  func.func @transform_63(%arg0: i32) -> (i32, i32, i32) {
    %c0_i32 = arith.constant 0 : i32
    %c0_i32_0 = arith.constant 0 : i32
    %c0_i32_1 = arith.constant 0 : i32
    %c0_i32_2 = arith.constant 0 : i32
    return %c0_i32, %c0_i32_0, %c0_i32_1 : i32, i32, i32
  }
  func.func @transform_64(%arg0: i32) -> (i32, i32) {
    %c0_i32 = arith.constant 0 : i32
    %c0_i32_0 = arith.constant 0 : i32
    %c0_i32_1 = arith.constant 0 : i32
    return %c0_i32, %c0_i32_0 : i32, i32
  }
  func.func @transform_65(%arg0: i32) -> (i32, i32) {
    %c0_i32 = arith.constant 0 : i32
    %c0_i32_0 = arith.constant 0 : i32
    %c0_i32_1 = arith.constant 0 : i32
    return %c0_i32, %c0_i32_0 : i32, i32
  }
  func.func @transform_66(%arg0: i32) -> (i32, i32) {
    %c0_i32 = arith.constant 0 : i32
    %c0_i32_0 = arith.constant 0 : i32
    %c0_i32_1 = arith.constant 0 : i32
    return %c0_i32, %c0_i32_0 : i32, i32
  }
  func.func @transform_67(%arg0: i32) -> (i32, i32) {
    %c0_i32 = arith.constant 0 : i32
    %c0_i32_0 = arith.constant 0 : i32
    %c0_i32_1 = arith.constant 0 : i32
    return %c0_i32, %c0_i32_0 : i32, i32
  }
  func.func @transform_68(%arg0: i32) -> (i32, i32) {
    %c0_i32 = arith.constant 0 : i32
    %c0_i32_0 = arith.constant 0 : i32
    %c0_i32_1 = arith.constant 0 : i32
    return %c0_i32, %c0_i32_0 : i32, i32
  }
  func.func @transform_69(%arg0: i32) -> (i32, i32, i32) {
    %c0_i32 = arith.constant 0 : i32
    %c0_i32_0 = arith.constant 0 : i32
    %c0_i32_1 = arith.constant 0 : i32
    %c0_i32_2 = arith.constant 0 : i32
    return %c0_i32, %c0_i32_0, %c0_i32_1 : i32, i32, i32
  }
  func.func @transform_70(%arg0: i32) -> (i32, i32) {
    %c0_i32 = arith.constant 0 : i32
    %c0_i32_0 = arith.constant 0 : i32
    %c0_i32_1 = arith.constant 0 : i32
    return %c0_i32, %c0_i32_0 : i32, i32
  }
  func.func @transform_71(%arg0: i32) -> (i32, i32) {
    %c0_i32 = arith.constant 0 : i32
    %c0_i32_0 = arith.constant 0 : i32
    %c0_i32_1 = arith.constant 0 : i32
    return %c0_i32, %c0_i32_0 : i32, i32
  }
  func.func @transform_72(%arg0: i32) -> (i32, i32) {
    %c0_i32 = arith.constant 0 : i32
    %c0_i32_0 = arith.constant 0 : i32
    %c0_i32_1 = arith.constant 0 : i32
    return %c0_i32, %c0_i32_0 : i32, i32
  }
  func.func @transform_73(%arg0: i32) -> (i32, i32) {
    %c0_i32 = arith.constant 0 : i32
    %c0_i32_0 = arith.constant 0 : i32
    %c0_i32_1 = arith.constant 0 : i32
    return %c0_i32, %c0_i32_0 : i32, i32
  }
  func.func @transform_74(%arg0: i32) -> (i32, i32, i32) {
    %c0_i32 = arith.constant 0 : i32
    %c0_i32_0 = arith.constant 0 : i32
    %c0_i32_1 = arith.constant 0 : i32
    return %arg0, %c0_i32, %c0_i32_0 : i32, i32, i32
  }
  func.func @transform_75(%arg0: i32) -> (i32, i32, i32) {
    %c0_i32 = arith.constant 0 : i32
    %c0_i32_0 = arith.constant 0 : i32
    %c0_i32_1 = arith.constant 0 : i32
    return %arg0, %c0_i32, %c0_i32_0 : i32, i32, i32
  }
  func.func @transform_76(%arg0: i32) -> (i32, i32, i32) {
    %c0_i32 = arith.constant 0 : i32
    %c0_i32_0 = arith.constant 0 : i32
    %c0_i32_1 = arith.constant 0 : i32
    return %arg0, %c0_i32, %c0_i32_0 : i32, i32, i32
  }
  func.func @transform_77(%arg0: i32) -> (i32, i32, i32) {
    %c0_i32 = arith.constant 0 : i32
    %c0_i32_0 = arith.constant 0 : i32
    %c0_i32_1 = arith.constant 0 : i32
    return %arg0, %c0_i32, %c0_i32_0 : i32, i32, i32
  }
  func.func @transform_78(%arg0: i32) -> (i32, i32, i32) {
    %c0_i32 = arith.constant 0 : i32
    %c0_i32_0 = arith.constant 0 : i32
    %c0_i32_1 = arith.constant 0 : i32
    return %arg0, %c0_i32, %c0_i32_0 : i32, i32, i32
  }
}

</mosaic_0001>

<bundles_post_ra>
// kernel: _lambda_.1
= control target key start
LH: loop header
LB: loop body
LE: loop exit
PB: predicated region body
PF: predicated region fallthrough
CT: control target
= control target key end

     0   :  { %s16459_s6 = smov 1   ;;  %s16460_s10 = smov 2   ;;  %s19077_s0 = inlined_call_operand.smem [shape: u32[79], index: -1, kind: input, shape index: {}] }
   0x1   :  { %s16564_s5 = sld [smem:[%s19077_s0]]   ;;  %s16461_s14 = smov 3  }
   0x2   :  { %s16569_s9 = sld [smem:[%s19077_s0 + %s16459_s6]]   ;;  %s16462_s18 = smov 4  }
   0x3   :  { %s16574_s13 = sld [smem:[%s19077_s0 + %s16460_s10]]   ;;  %s16463_s22 = smov 5  }
   0x4   :  { %s16579_s17 = sld [smem:[%s19077_s0 + %s16461_s14]]   ;;  %s16464_s26 = smov 6  }
   0x5   :  { %s16584_s21 = sld [smem:[%s19077_s0 + %s16462_s18]]   ;;  %s16465_s30 = smov 7  }
   0x6   :  { %s16589_s25 = sld [smem:[%s19077_s0 + %s16463_s22]]   ;;  %s16466_s4 = smov 8  }
   0x7   :  { %19176 = sst [smem:[#allocation30_spill]] %s16564_s5  ;;  %s16467_s10 = smov 9  }
   0x8   :  { %19177 = sst [smem:[#allocation31_spill]] %s16569_s9  ;;  %s16468_s15 = smov 10  }
   0x9   :  { %19178 = sst [smem:[#allocation32_spill]] %s16574_s13  ;;  %s16469_s20 = smov 11  }
   0xa   :  { %19179 = sst [smem:[#allocation33_spill]] %s16579_s17  ;;  %s16471_s1 = smov 13  }
   0xb   :  { %s16594_s29 = sld [smem:[%s19077_s0 + %s16464_s26]]   ;;  %s16470_s26 = smov 12  }
   0xc   :  { %s16599_s3 = sld [smem:[%s19077_s0 + %s16465_s30]]   ;;  %s16472_s7 = smov 14  }
   0xd   :  { %s16604_s8 = sld [smem:[%s19077_s0 + %s16466_s4]]   ;;  %s16474_s22 = smov 16  }
   0xe   :  { %s16609_s14 = sld [smem:[%s19077_s0 + %s16467_s10]]   ;;  %s16475_s28 = smov 17  }
   0xf   :  { %s16614_s19 = sld [smem:[%s19077_s0 + %s16468_s15]]   ;;  %s16473_s15 = smov 15  }
  0x10   :  { %s16619_s24 = sld [smem:[%s19077_s0 + %s16469_s20]]  }
  0x11   :  { %19180 = sst [smem:[#allocation34_spill]] %s16594_s29 }
  0x12   :  { %19181 = sst [smem:[#allocation35_spill]] %s16599_s3 }
  0x13   :  { %19182 = sst [smem:[#allocation36_spill]] %s16604_s8 }
  0x14   :  { %19183 = sst [smem:[#allocation37_spill]] %s16609_s14 }
  0x15   :  { %19184 = sst [smem:[#allocation38_spill]] %s16614_s19 }
  0x16   :  { %19185 = sst [smem:[#allocation39_spill]] %s16619_s24 }
  0x17   :  { %s16624_s30 = sld [smem:[%s19077_s0 + %s16470_s26]]  }
  0x18   :  { %s16629_s6 = sld [smem:[%s19077_s0 + %s16471_s1]]  }
  0x19   :  { %s16634_s12 = sld [smem:[%s19077_s0 + %s16472_s7]]   ;;  %s16476_s7 = smov 18  }
  0x1a   :  { %s16639_s20 = sld [smem:[%s19077_s0 + %s16473_s15]]   ;;  %s16477_s15 = smov 19  }
  0x1b   :  { %s16644_s27 = sld [smem:[%s19077_s0 + %s16474_s22]]   ;;  %s16478_s22 = smov 20  }
  0x1c   :  { %s16649_s4 = sld [smem:[%s19077_s0 + %s16475_s28]]   ;;  %s16479_s28 = smov 21  }
  0x1d   :  { %19186 = sst [smem:[#allocation40_spill]] %s16624_s30 }
  0x1e   :  { %19187 = sst [smem:[#allocation41_spill]] %s16629_s6 }
  0x1f   :  { %19188 = sst [smem:[#allocation42_spill]] %s16634_s12 }
  0x20   :  { %19189 = sst [smem:[#allocation43_spill]] %s16639_s20 }
  0x21   :  { %19190 = sst [smem:[#allocation44_spill]] %s16644_s27 }
  0x22   :  { %19191 = sst [smem:[#allocation45_spill]] %s16649_s4 }
  0x23   :  { %s16654_s12 = sld [smem:[%s19077_s0 + %s16476_s7]]   ;;  %s16480_s7 = smov 22  }
  0x24   :  { %s16659_s6 = sld [smem:[%s19077_s0 + %s16477_s15]]   ;;  %s16481_s15 = smov 23  }
  0x25   :  { %s16664_s27 = sld [smem:[%s19077_s0 + %s16478_s22]]   ;;  %s16482_s22 = smov 24  }
  0x26   :  { %s16669_s4 = sld [smem:[%s19077_s0 + %s16479_s28]]   ;;  %s16483_s28 = smov 25  }
  0x27   :  { %s16684_s19 = sld [smem:[%s19077_s0 + %s16482_s22]]   ;;  %s16486_s22 = smov 28  }
  0x29   :  { %19192 = sst [smem:[#allocation46_spill]] %s16654_s12 }
  0x2a   :  { %19193 = sst [smem:[#allocation47_spill]] %s16659_s6 }
  0x2b   :  { %s16674_s12 = sld [smem:[%s19077_s0 + %s16480_s7]]   ;;  %s16484_s7 = smov 26  }
  0x2c   :  { %19194 = sst [smem:[#allocation48_spill]] %s16669_s4 }
  0x2d   :  { %s16679_s6 = sld [smem:[%s19077_s0 + %s16481_s15]]   ;;  %s16485_s15 = smov 27  }
  0x2e   :  { %19197 = sst [smem:[#allocation51_spill]] %s16684_s19 }
  0x2f   :  { %s16689_s4 = sld [smem:[%s19077_s0 + %s16483_s28]]   ;;  %s16487_s28 = smov 29  }
  0x30   :  { %s16704_s19 = sld [smem:[%s19077_s0 + %s16486_s22]]   ;;  %s16490_s22 = smov 32  }
  0x31   :  { %19195 = sst [smem:[#allocation49_spill]] %s16674_s12 }
  0x32   :  { %s16694_s12 = sld [smem:[%s19077_s0 + %s16484_s7]]   ;;  %s16488_s7 = smov 30  }
  0x33   :  { %19196 = sst [smem:[#allocation50_spill]] %s16679_s6 }
  0x34   :  { %s16699_s6 = sld [smem:[%s19077_s0 + %s16485_s15]]   ;;  %s16489_s15 = smov 31  }
  0x35   :  { %19198 = sst [smem:[#allocation52_spill]] %s16689_s4 }
  0x36   :  { %19201 = sst [smem:[#allocation55_spill]] %s16704_s19 }
  0x37   :  { %s16709_s4 = sld [smem:[%s19077_s0 + %s16487_s28]]   ;;  %s16491_s28 = smov 33  }
  0x38   :  { %19199 = sst [smem:[#allocation53_spill]] %s16694_s12 }
  0x39   :  { %s16714_s30 = sld [smem:[%s19077_s0 + %s16488_s7]]   ;;  %s16492_s7 = smov 34  }
  0x3a   :  { %19200 = sst [smem:[#allocation54_spill]] %s16699_s6 }
  0x3b   :  { %s16719_s6 = sld [smem:[%s19077_s0 + %s16489_s15]]   ;;  %s16493_s15 = smov 35  }
  0x3c   :  { %s16724_s19 = sld [smem:[%s19077_s0 + %s16490_s22]]   ;;  %s16494_s22 = smov 36  }
  0x3d   :  { %19202 = sst [smem:[#allocation56_spill]] %s16709_s4 }
  0x3e   :  { %s16729_s4 = sld [smem:[%s19077_s0 + %s16491_s28]]   ;;  %s16495_s28 = smov 37  }
  0x3f   :  { %19203 = sst [smem:[#allocation57_spill]] %s16714_s30 }
  0x40   :  { %s16734_s30 = sld [smem:[%s19077_s0 + %s16492_s7]]   ;;  %s16496_s7 = smov 38  }
  0x41   :  { %19204 = sst [smem:[#allocation58_spill]] %s16719_s6 }
  0x42   :  { %19205 = sst [smem:[#allocation59_spill]] %s16724_s19 }
  0x43   :  { %s16739_s6 = sld [smem:[%s19077_s0 + %s16493_s15]]   ;;  %s16497_s15 = smov 39  }
  0x44   :  { %19206 = sst [smem:[#allocation60_spill]] %s16729_s4 }
  0x45   :  { %s16744_s19 = sld [smem:[%s19077_s0 + %s16494_s22]]   ;;  %s16498_s22 = smov 40  }
  0x46   :  { %19207 = sst [smem:[#allocation61_spill]] %s16734_s30 }
  0x47   :  { %s16749_s3 = sld [smem:[%s19077_s0 + %s16495_s28]]   ;;  %s16499_s28 = smov 41  }
  0x48   :  { %s16754_s30 = sld [smem:[%s19077_s0 + %s16496_s7]]   ;;  %s16500_s7 = smov 42  }
  0x49   :  { %19208 = sst [smem:[#allocation62_spill]] %s16739_s6 }
  0x4a   :  { %s16759_s6 = sld [smem:[%s19077_s0 + %s16497_s15]]   ;;  %s16501_s15 = smov 43  }
  0x4b   :  { %19209 = sst [smem:[#allocation63_spill]] %s16744_s19 }
  0x4c   :  { %s16764_s19 = sld [smem:[%s19077_s0 + %s16498_s22]]   ;;  %s16502_s22 = smov 44  }
  0x4d   :  { %19210 = sst [smem:[#allocation64_spill]] %s16749_s3 }
  0x4e   :  { %19211 = sst [smem:[#allocation65_spill]] %s16754_s30 }
  0x4f   :  { %s16769_s3 = sld [smem:[%s19077_s0 + %s16499_s28]]   ;;  %s16503_s28 = smov 45  }
  0x50   :  { %19212 = sst [smem:[#allocation66_spill]] %s16759_s6 }
  0x51   :  { %s16774_s30 = sld [smem:[%s19077_s0 + %s16500_s7]]   ;;  %s16504_s7 = smov 46  }
  0x52   :  { %19213 = sst [smem:[#allocation67_spill]] %s16764_s19 }
  0x53   :  { %s16779_s24 = sld [smem:[%s19077_s0 + %s16501_s15]]   ;;  %s16505_s15 = smov 47  }
  0x54   :  { %s16784_s19 = sld [smem:[%s19077_s0 + %s16502_s22]]   ;;  %s16506_s22 = smov 48  }
  0x55   :  { %19214 = sst [smem:[#allocation68_spill]] %s16769_s3 }
  0x56   :  { %s16789_s3 = sld [smem:[%s19077_s0 + %s16503_s28]]   ;;  %s16507_s28 = smov 49  }
  0x57   :  { %19215 = sst [smem:[#allocation69_spill]] %s16774_s30 }
  0x58   :  { %s16794_s30 = sld [smem:[%s19077_s0 + %s16504_s7]]   ;;  %s16508_s7 = smov 50  }
  0x59   :  { %19216 = sst [smem:[#allocation70_spill]] %s16779_s24 }
  0x5a   :  { %19217 = sst [smem:[#allocation71_spill]] %s16784_s19 }
  0x5b   :  { %s16799_s24 = sld [smem:[%s19077_s0 + %s16505_s15]]   ;;  %s16509_s15 = smov 51  }
  0x5c   :  { %19218 = sst [smem:[#allocation72_spill]] %s16789_s3 }
  0x5d   :  { %s16804_s19 = sld [smem:[%s19077_s0 + %s16506_s22]]   ;;  %s16510_s22 = smov 52  }
  0x5e   :  { %19219 = sst [smem:[#allocation73_spill]] %s16794_s30 }
  0x5f   :  { %s16809_s14 = sld [smem:[%s19077_s0 + %s16507_s28]]   ;;  %s16511_s28 = smov 53  }
  0x60   :  { %s16814_s30 = sld [smem:[%s19077_s0 + %s16508_s7]]   ;;  %s16512_s7 = smov 54  }
  0x61   :  { %19220 = sst [smem:[#allocation74_spill]] %s16799_s24 }
  0x62   :  { %s16819_s24 = sld [smem:[%s19077_s0 + %s16509_s15]]   ;;  %s16513_s15 = smov 55  }
  0x63   :  { %19221 = sst [smem:[#allocation75_spill]] %s16804_s19 }
  0x64   :  { %s16824_s19 = sld [smem:[%s19077_s0 + %s16510_s22]]   ;;  %s16514_s22 = smov 56  }
  0x65   :  { %19222 = sst [smem:[#allocation76_spill]] %s16809_s14 }
  0x66   :  { %19223 = sst [smem:[#allocation77_spill]] %s16814_s30 }
  0x67   :  { %s16829_s14 = sld [smem:[%s19077_s0 + %s16511_s28]]   ;;  %s16515_s28 = smov 57  }
  0x68   :  { %19224 = sst [smem:[#allocation78_spill]] %s16819_s24 }
  0x69   :  { %s16834_s30 = sld [smem:[%s19077_s0 + %s16512_s7]]   ;;  %s16516_s7 = smov 58  }
  0x6a   :  { %19225 = sst [smem:[#allocation79_spill]] %s16824_s19 }
  0x6b   :  { %s16839_s24 = sld [smem:[%s19077_s0 + %s16513_s15]]   ;;  %s16517_s15 = smov 59  }
  0x6c   :  { %s16844_s29 = sld [smem:[%s19077_s0 + %s16514_s22]]   ;;  %s16518_s22 = smov 60  }
  0x6d   :  { %19226 = sst [smem:[#allocation80_spill]] %s16829_s14 }
  0x6e   :  { %s16849_s14 = sld [smem:[%s19077_s0 + %s16515_s28]]   ;;  %s16519_s28 = smov 61  }
  0x6f   :  { %19227 = sst [smem:[#allocation81_spill]] %s16834_s30 }
  0x70   :  { %s16854_s30 = sld [smem:[%s19077_s0 + %s16516_s7]]   ;;  %s16520_s7 = smov 62  }
  0x71   :  { %19228 = sst [smem:[#allocation82_spill]] %s16839_s24 }
  0x72   :  { %19229 = sst [smem:[#allocation83_spill]] %s16844_s29 }
  0x73   :  { %s16859_s24 = sld [smem:[%s19077_s0 + %s16517_s15]]   ;;  %s16521_s15 = smov 63  }
  0x74   :  { %19230 = sst [smem:[#allocation84_spill]] %s16849_s14 }
  0x75   :  { %s16864_s29 = sld [smem:[%s19077_s0 + %s16518_s22]]   ;;  %s16522_s22 = smov 64  }
  0x76   :  { %19231 = sst [smem:[#allocation85_spill]] %s16854_s30 }
  0x77   :  { %s16869_s14 = sld [smem:[%s19077_s0 + %s16519_s28]]   ;;  %s16523_s28 = smov 65  }
  0x78   :  { %s16874_s30 = sld [smem:[%s19077_s0 + %s16520_s7]]   ;;  %s16524_s7 = smov 66  }
  0x79   :  { %19232 = sst [smem:[#allocation86_spill]] %s16859_s24 }
  0x7a   :  { %s16879_s24 = sld [smem:[%s19077_s0 + %s16521_s15]]   ;;  %s16525_s15 = smov 67  }
  0x7b   :  { %19233 = sst [smem:[#allocation87_spill]] %s16864_s29 }
  0x7c   :  { %s16884_s29 = sld [smem:[%s19077_s0 + %s16522_s22]]   ;;  %s16526_s22 = smov 68  }
  0x7d   :  { %19234 = sst [smem:[#allocation88_spill]] %s16869_s14 }
  0x7e   :  { %19235 = sst [smem:[#allocation89_spill]] %s16874_s30 }
  0x7f   :  { %s16889_s14 = sld [smem:[%s19077_s0 + %s16523_s28]]   ;;  %s16527_s28 = smov 69  }
  0x80   :  { %19236 = sst [smem:[#allocation90_spill]] %s16879_s24 }
  0x81   :  { %s16894_s30 = sld [smem:[%s19077_s0 + %s16524_s7]]   ;;  %s16528_s7 = smov 70  }
  0x82   :  { %19237 = sst [smem:[#allocation91_spill]] %s16884_s29 }
  0x83   :  { %s16899_s24 = sld [smem:[%s19077_s0 + %s16525_s15]]   ;;  %s16529_s15 = smov 71  }
  0x84   :  { %s16904_s29 = sld [smem:[%s19077_s0 + %s16526_s22]]   ;;  %s16530_s22 = smov 72  }
  0x85   :  { %19238 = sst [smem:[#allocation92_spill]] %s16889_s14 }
  0x86   :  { %s16909_s14 = sld [smem:[%s19077_s0 + %s16527_s28]]   ;;  %s16531_s28 = smov 73  }
  0x87   :  { %19239 = sst [smem:[#allocation93_spill]] %s16894_s30 }
  0x88   :  { %s16914_s30 = sld [smem:[%s19077_s0 + %s16528_s7]]   ;;  %s16532_s7 = smov 74  }
  0x89   :  { %19240 = sst [smem:[#allocation94_spill]] %s16899_s24 }
  0x8a   :  { %19241 = sst [smem:[#allocation95_spill]] %s16904_s29 }
  0x8b   :  { %s16919_s24 = sld [smem:[%s19077_s0 + %s16529_s15]]   ;;  %s16533_s15 = smov 75  }
  0x8c   :  { %19242 = sst [smem:[#allocation96_spill]] %s16909_s14 }
  0x8d   :  { %s16924_s29 = sld [smem:[%s19077_s0 + %s16530_s22]]   ;;  %s16534_s22 = smov 76  }
  0x8e   :  { %19243 = sst [smem:[#allocation97_spill]] %s16914_s30 }
  0x8f   :  { %s16929_s14 = sld [smem:[%s19077_s0 + %s16531_s28]]   ;;  %s16535_s28 = smov 77  }
  0x90   :  { %s16934_s30 = sld [smem:[%s19077_s0 + %s16532_s7]]   ;;  %s16536_s7 = smov 78  }
  0x91   :  { %19244 = sst [smem:[#allocation98_spill]] %s16919_s24 }
  0x92   :  { %s16939_s24 = sld [smem:[%s19077_s0 + %s16533_s15]]  }
  0x93   :  { %19245 = sst [smem:[#allocation99_spill]] %s16924_s29 }
  0x94   :  { %s16944_s29 = sld [smem:[%s19077_s0 + %s16534_s22]]  }
  0x95   :  { %19246 = sst [smem:[#allocation100_spill]] %s16929_s14 }
  0x96   :  { %19247 = sst [smem:[#allocation101_spill]] %s16934_s30 }
  0x97   :  { %s16949_s14 = sld [smem:[%s19077_s0 + %s16535_s28]]  }
  0x98   :  { %s16954_s30 = sld [smem:[%s19077_s0 + %s16536_s7]]  }
  0x9d   :  { %19248 = sst [smem:[#allocation102_spill]] %s16949_s14 }
  0x9e   :  { %163 = vsyncpa [#allocation3], 0 }
  0x9f   :  { %164 = vsyncpa [#allocation6], 0 }
  0xa0   :  { %165 = vsyncpa [#allocation9], 0 }
  0xa1   :  { %166 = vsyncpa [#allocation12], 0 }
  0xa2   :  { %167 = vsyncpa [#allocation15], 0 }
  0xa3   :  { %168 = vsyncpa [#allocation4], 0 }
  0xa4   :  { %170 = vsyncpa [#allocation4 + $0x1], 0 }
  0xa5   :  { %171 = vsyncpa [#allocation18], 0 }
  0xa6   :  { %173 = vsyncpa [#allocation18 + $0x1], 0 }
  0xa7   :  { %174 = vsyncpa [#allocation21], 0 }
  0xa8   :  { %176 = vsyncpa [#allocation21 + $0x1], 0  ;;  %s16956_s15 = smov 0   ;;  %s16958_s16 = smov 0  }
  0xa9   :  { %s16960_s18 = smov 0   ;;  %s16962_s22 = smov 0  }
  0xaa LB: > { %s19249_s19 = sld [smem:[#allocation79_spill]]  ;;  %s19250_s17 = sld [smem:[#allocation33_spill]]  ;;  %s16445_s15 = sphi %s16956_s15, %s19374_s15   ;;  %s16457_s22 = sphi %s16962_s22, %s19371_s22   ;;  %s16453_s18 = sphi %s16960_s18, %s19373_s18   ;;  %s16449_s16 = sphi %s16958_s16, %s19375_s16  }
  0xab   : > { %s19251_s9 = sld [smem:[#allocation31_spill]]  ;;  %s19252_s8 = sld [smem:[#allocation36_spill]] }
  0xac   : > { %s19253_s6 = sld [smem:[#allocation66_spill]]  ;;  %s19254_s4 = sld [smem:[#allocation60_spill]] }
  0xad   : > { %s19255_s3 = sld [smem:[#allocation72_spill]]  ;;  %s19256_s20 = sld [smem:[#allocation43_spill]] }
  0xae   : > { %s19257_s12 = sld [smem:[#allocation53_spill]]  ;;  %19258 = sst [smem:[#allocation103_spill]] %s16445_s15 }
  0xaf   : > { %19259 = sst [smem:[#allocation104_spill]] %s16453_s18  ;;  %s16977_s0 = sadd.s32 4294967295, %s16457_s22  }
  0xb0   : > { %s19115_s23 = sadd.s32 4294967294, %s16457_s22   ;;  %s16981_s26 = sadd.s32 1, %s16457_s22  }
  0xb1   : > { %19260 = sst [smem:[#allocation105_spill]] %s16981_s26  ;;  %s1748_s28 = sadd.s32 1, %s16453_s18 }
  0xb2   : > { %s1745_s1 = ssub.s32 %s16457_s22, %s16981_s26  ;;  %p1758_p0 = scmp.ne.s32.totalorder %s16453_s18, %s16449_s16 }
  0xb3   : > { %p1746_p1 = scmp.eq.s32.totalorder %s1745_s1, 0  ;;  %p1759_p2 = scmp.eq.s32.totalorder %s16977_s0, 1 }
  0xb4   : > { %p1764_p3 = scmp.ne.s32.totalorder %s16449_s16, %s16445_s15  ;;  %p1765_p4 = scmp.eq.s32.totalorder %s19115_s23, 1 }
  0xb5   : > { %s16994_s2 = scalar_select %p1746_p1, %s16453_s18, %s1748_s28  }
  0xb6   : > { %p16996_p5 = por %p1759_p2, %p1758_p0  ;;  %p17000_p6 = por %p1765_p4, %p1764_p3 }
  0xb7   : > { %19261 = sst [smem:[#allocation106_spill]] %s16994_s2  ;;  %p12964_p7 = scmp.ge.s32.totalorder %s16457_s22, 1 }
  0xb8   : > { %s19262_s7 = scalar_select %p16996_p5, 1, 0 }
  0xb9   : > { %s19263_s10 = scalar_select %p17000_p6, 1, 0 }
  0xba   : > { %p1876_p8 = scmp.lt.s32.totalorder %s16457_s22, 3  ;;  %p19121_p9 = scmp.eq.s32.totalorder %s16977_s0, 0 }
  0xbb   : > { %19264 = sst [smem:[#allocation107_spill]] %s19263_s10  ;;  %s16537_s28 = smov [#allocation5]  }
  0xbc   : > { %p17007_p10 = pnand %p12964_p7, %p1876_p8  ;;  %s1939_s1 = sshll.u32 %s16537_s28, 4  ;;  %s1940_s1 = int_to_ptr.vmem [resolvable:$true] %s1939_s1 }
  0xbd   : > { %s16538_s23 = smov [#allocation8]   ;;  %s16539_s26 = smov [#allocation11]  }
  0xbe   : > { %s19265_s11 = scalar_select %p17007_p10, 1, 0 }
  0xbf   : > { %p14835_p11 = pneg %p17007_p10  ;;  %s1988_s2 = sshll.u32 %s16538_s23, 4  ;;  %s17019_s2 = int_to_ptr.vmem [resolvable:$true] %s1988_s2 }
  0xc0   : > { %s2043_s10 = sshll.u32 %s16539_s26, 4  ;;  %s16059_s15 = scalar_lea.hbm %s19256_s20, 16  ;;  %s17021_s10 = int_to_ptr.vmem [resolvable:$true] %s2043_s10 }
  0xc1   : > { %p17015_p12 = pnand %p19121_p9, %p14835_p11  ;;  %p16060_p13 = scmp.ne.s32.totalorder %s19256_s20, %s16059_s15 }
  0xc2   : > { %p16066_p3 = scmp.lt.u32.totalorder %s16059_s15, %s19256_s20 }
  0xc3   : > { %p17027_p0 = pneg %p17015_p12 }
  0xc5   : > { %p16062_p1 = pnand %p17027_p0, %p16060_p13 }
  0xc7   : > { %p16063_p2 = pneg %p16062_p1 }
  0xc9   : > { %p16068_p4 = pnand %p16066_p3, %p16063_p2 }
  0xcb   : > { %16071 = shalt.err (!%p16068_p4)
}
  0xcc   : > { %s16072_s23 = scalar_lea.vmem %s1940_s1, 16  ;;  %s16079_s26 = scalar_lea.vmem %s1940_s1, 32 }
  0xcd   : > { %p16073_p7 = scmp.ne.s32.totalorder %s1940_s1, %s16072_s23  ;;  %p16080_p9 = scmp.lt.s32.totalorder %s1940_s1, %s1940_s1 }
  0xce   : > { %p16081_p6 = scmp.lt.s32.totalorder %s16079_s26, %s16072_s23 }
  0xcf   : > { %p16075_p8 = pnand %p16073_p7, %p17027_p0 }
  0xd0   : > { %p16082_p5 = por %p16081_p6, %p16080_p9 }
  0xd1   : > { %p16076_p11 = pneg %p16075_p8 }
  0xd3   : > { %p16083_p10 = pnand %p16082_p5, %p16076_p11 }
  0xd5   : > { %16086 = shalt.err (!%p16083_p10)
}
  0xd6   : > { %14841 = dma.hbm_to_vmem [thread:$0]  (!%p17015_p12), %s19256_s20, 16, %s1940_s1, [#allocation6]  }
  0xd7   : > { %s16087_s15 = scalar_lea.hbm %s19257_s12, 16 }
  0xd8   : > { %p16088_p13 = scmp.ne.s32.totalorder %s19257_s12, %s16087_s15  ;;  %p16094_p3 = scmp.lt.u32.totalorder %s16087_s15, %s19257_s12 }
  0xda   : > { %p16090_p1 = pnand %p16088_p13, %p17027_p0 }
  0xdc   : > { %p16091_p2 = pneg %p16090_p1 }
  0xde   : > { %p16096_p4 = pnand %p16094_p3, %p16091_p2 }
  0xe0   : > { %16099 = shalt.err (!%p16096_p4)
}
  0xe1   : > { %s16100_s23 = scalar_lea.vmem %s17019_s2, 16  ;;  %s16107_s26 = scalar_lea.vmem %s17019_s2, 32 }
  0xe2   : > { %p16101_p5 = scmp.ne.s32.totalorder %s17019_s2, %s16100_s23  ;;  %p16108_p10 = scmp.lt.s32.totalorder %s17019_s2, %s17019_s2 }
  0xe3   : > { %p16109_p7 = scmp.lt.s32.totalorder %s16107_s26, %s16100_s23 }
  0xe4   : > { %p16103_p6 = pnand %p16101_p5, %p17027_p0 }
  0xe5   : > { %p16110_p8 = por %p16109_p7, %p16108_p10 }
  0xe6   : > { %p16104_p9 = pneg %p16103_p6 }
  0xe8   : > { %p16111_p11 = pnand %p16110_p8, %p16104_p9 }
  0xea   : > { %16114 = shalt.err (!%p16111_p11)
}
  0xeb   : > { %14847 = dma.hbm_to_vmem [thread:$0]  (!%p17015_p12), %s19257_s12, 16, %s17019_s2, [#allocation9]  }
  0xec   : > { %s16115_s1 = scalar_lea.hbm %s19253_s6, 16 }
  0xed   : > { %p16116_p13 = scmp.ne.s32.totalorder %s19253_s6, %s16115_s1  ;;  %p16122_p3 = scmp.lt.u32.totalorder %s16115_s1, %s19253_s6 }
  0xef   : > { %p16118_p1 = pnand %p16116_p13, %p17027_p0 }
  0xf1   : > { %p16119_p2 = pneg %p16118_p1 }
  0xf3   : > { %p16124_p4 = pnand %p16122_p3, %p16119_p2 }
  0xf5   : > { %16127 = shalt.err (!%p16124_p4)
}
  0xf6   : > { %s16128_s15 = scalar_lea.vmem %s17021_s10, 16  ;;  %s16135_s23 = scalar_lea.vmem %s17021_s10, 32 }
  0xf7   : > { %p16129_p5 = scmp.ne.s32.totalorder %s17021_s10, %s16128_s15  ;;  %p16136_p10 = scmp.lt.s32.totalorder %s17021_s10, %s17021_s10 }
  0xf8   : > { %p16137_p7 = scmp.lt.s32.totalorder %s16135_s23, %s16128_s15 }
  0xf9   : > { %p16131_p6 = pnand %p16129_p5, %p17027_p0 }
  0xfa   : > { %p16138_p8 = por %p16137_p7, %p16136_p10 }
  0xfb   : > { %p16132_p9 = pneg %p16131_p6 }
  0xfd   : > { %p16139_p11 = pnand %p16138_p8, %p16132_p9 }
  0xff   : > { %16142 = shalt.err (!%p16139_p11)
}
 0x100   : > { %14853 = dma.hbm_to_vmem [thread:$0]  (!%p17015_p12), %s19253_s6, 16, %s17021_s10, [#allocation12]  }
 0x101   : > { %s16540_s2 = smov [#allocation2]   ;;  %s16541_s1 = smov [#allocation7]  }
 0x102   : > { %s1910_s26 = sshll.u32 %s16540_s2, 4  ;;  %s1962_s12 = sshll.u32 %s16541_s1, 4  ;;  %s1911_s26 = int_to_ptr.vmem [resolvable:$true] %s1910_s26  ;;  %s1963_s12 = int_to_ptr.vmem [resolvable:$true] %s1962_s12 }
 0x103   : > { %s16143_s20 = scalar_lea.hbm %s19252_s8, 16 }
 0x104   : > { %p16144_p13 = scmp.ne.s32.totalorder %s19252_s8, %s16143_s20  ;;  %p16150_p3 = scmp.lt.u32.totalorder %s16143_s20, %s19252_s8 }
 0x106   : > { %p16146_p1 = pnand %p16144_p13, %p17027_p0 }
 0x108   : > { %p16147_p2 = pneg %p16146_p1 }
 0x10a   : > { %p16152_p4 = pnand %p16150_p3, %p16147_p2 }
 0x10c   : > { %16155 = shalt.err (!%p16152_p4)
}
 0x10d   : > { %s16156_s15 = scalar_lea.vmem %s1911_s26, 16  ;;  %s16163_s10 = scalar_lea.vmem %s1911_s26, 32 }
 0x10e   : > { %p16157_p5 = scmp.ne.s32.totalorder %s1911_s26, %s16156_s15  ;;  %p16164_p10 = scmp.lt.s32.totalorder %s1911_s26, %s1911_s26 }
 0x10f   : > { %p16165_p7 = scmp.lt.s32.totalorder %s16163_s10, %s16156_s15 }
 0x110   : > { %p16159_p6 = pnand %p16157_p5, %p17027_p0 }
 0x111   : > { %p16166_p8 = por %p16165_p7, %p16164_p10 }
 0x112   : > { %p16160_p9 = pneg %p16159_p6 }
 0x114   : > { %p16167_p11 = pnand %p16166_p8, %p16160_p9 }
 0x116   : > { %16170 = shalt.err (!%p16167_p11)
}
 0x117   : > { %14838 = dma.hbm_to_vmem [thread:$0]  (!%p17015_p12), %s19252_s8, 16, %s1911_s26, [#allocation3]  }
 0x118   : > { %s16171_s20 = scalar_lea.hbm %s16664_s27, 16 }
 0x119   : > { %p16172_p13 = scmp.ne.s32.totalorder %s16664_s27, %s16171_s20  ;;  %p16178_p3 = scmp.lt.u32.totalorder %s16171_s20, %s16664_s27 }
 0x11b   : > { %p16174_p1 = pnand %p16172_p13, %p17027_p0 }
 0x11d   : > { %p16175_p2 = pneg %p16174_p1 }
 0x11f   : > { %p16180_p4 = pnand %p16178_p3, %p16175_p2 }
 0x121   : > { %16183 = shalt.err (!%p16180_p4)
}
 0x122   : > { %s16184_s23 = scalar_lea.vmem %s1963_s12, 16  ;;  %s16191_s2 = scalar_lea.vmem %s1963_s12, 32 }
 0x123   : > { %p16185_p5 = scmp.ne.s32.totalorder %s1963_s12, %s16184_s23  ;;  %p16192_p10 = scmp.lt.s32.totalorder %s1963_s12, %s1963_s12 }
 0x124   : > { %p16193_p7 = scmp.lt.s32.totalorder %s16191_s2, %s16184_s23 }
 0x125   : > { %p16187_p6 = pnand %p16185_p5, %p17027_p0 }
 0x126   : > { %p16194_p8 = por %p16193_p7, %p16192_p10 }
 0x127   : > { %p16188_p9 = pneg %p16187_p6 }
 0x129   : > { %p16195_p11 = pnand %p16194_p8, %p16188_p9 }
 0x12b   : > { %16198 = shalt.err (!%p16195_p11)
}
 0x12c   : > { %14844 = dma.hbm_to_vmem [thread:$0]  (!%p17015_p12), %s16664_s27, 16, %s1963_s12, [#allocation6]  }
 0x12d   : > { %s16542_s26 = smov [#allocation10]   ;;  %s16543_s15 = smov [#allocation13]  }
 0x12e   : > { %s2017_s1 = sshll.u32 %s16542_s26, 4  ;;  %s2069_s10 = sshll.u32 %s16543_s15, 4  ;;  %s2018_s1 = int_to_ptr.vmem [resolvable:$true] %s2017_s1  ;;  %s2070_s10 = int_to_ptr.vmem [resolvable:$true] %s2069_s10 }
 0x12f   : > { %s16199_s20 = scalar_lea.hbm %s19254_s4, 16 }
 0x130   : > { %p16200_p13 = scmp.ne.s32.totalorder %s19254_s4, %s16199_s20  ;;  %p16206_p3 = scmp.lt.u32.totalorder %s16199_s20, %s19254_s4 }
 0x132   : > { %p16202_p1 = pnand %p16200_p13, %p17027_p0 }
 0x134   : > { %p16203_p2 = pneg %p16202_p1 }
 0x136   : > { %p16208_p4 = pnand %p16206_p3, %p16203_p2 }
 0x138   : > { %16211 = shalt.err (!%p16208_p4)
}
 0x139   : > { %s16212_s23 = scalar_lea.vmem %s2018_s1, 16  ;;  %s16219_s12 = scalar_lea.vmem %s2018_s1, 32 }
 0x13a   : > { %p16213_p5 = scmp.ne.s32.totalorder %s2018_s1, %s16212_s23  ;;  %p16220_p10 = scmp.lt.s32.totalorder %s2018_s1, %s2018_s1 }
 0x13b   : > { %p16221_p7 = scmp.lt.s32.totalorder %s16219_s12, %s16212_s23 }
 0x13c   : > { %p16215_p6 = pnand %p16213_p5, %p17027_p0 }
 0x13d   : > { %p16222_p8 = por %p16221_p7, %p16220_p10 }
 0x13e   : > { %p16216_p9 = pneg %p16215_p6 }
 0x140   : > { %p16223_p11 = pnand %p16222_p8, %p16216_p9 }
 0x142   : > { %16226 = shalt.err (!%p16223_p11)
}
 0x143   : > { %14850 = dma.hbm_to_vmem [thread:$0]  (!%p17015_p12), %s19254_s4, 16, %s2018_s1, [#allocation9]  }
 0x144   : > { %s16227_s2 = scalar_lea.hbm %s19255_s3, 16 }
 0x145   : > { %p16228_p13 = scmp.ne.s32.totalorder %s19255_s3, %s16227_s2  ;;  %p16234_p3 = scmp.lt.u32.totalorder %s16227_s2, %s19255_s3 }
 0x147   : > { %p16230_p1 = pnand %p16228_p13, %p17027_p0 }
 0x149   : > { %p16231_p2 = pneg %p16230_p1 }
 0x14b   : > { %p16236_p4 = pnand %p16234_p3, %p16231_p2 }
 0x14d   : > { %16239 = shalt.err (!%p16236_p4)
}
 0x14e   : > { %s16240_s26 = scalar_lea.vmem %s2070_s10, 16  ;;  %s16247_s15 = scalar_lea.vmem %s2070_s10, 32 }
 0x14f   : > { %p16241_p5 = scmp.ne.s32.totalorder %s2070_s10, %s16240_s26  ;;  %p16248_p10 = scmp.lt.s32.totalorder %s2070_s10, %s2070_s10 }
 0x150   : > { %p16249_p7 = scmp.lt.s32.totalorder %s16247_s15, %s16240_s26 }
 0x151   : > { %p16243_p6 = pnand %p16241_p5, %p17027_p0 }
 0x152   : > { %p16250_p8 = por %p16249_p7, %p16248_p10 }
 0x153   : > { %p16244_p9 = pneg %p16243_p6 }
 0x155   : > { %p16251_p11 = pnand %p16250_p8, %p16244_p9 }
 0x157   : > { %16254 = shalt.err (!%p16251_p11)
}
 0x158   : > { %14856 = dma.hbm_to_vmem [thread:$0]  (!%p17015_p12), %s19255_s3, 16, %s2070_s10, [#allocation12]  }
 0x159   : > { %s16544_s1 = smov [#allocation14]   ;;  %s16255_s23 = scalar_lea.hbm %s19249_s19, 16 }
 0x15a   : > { %s2098_s20 = sshll.u32 %s16544_s1, 4  ;;  %p16256_p13 = scmp.ne.s32.totalorder %s19249_s19, %s16255_s23  ;;  %s2099_s20 = int_to_ptr.vmem [resolvable:$true] %s2098_s20 }
 0x15b   : > { %p16262_p3 = scmp.lt.u32.totalorder %s16255_s23, %s19249_s19 }
 0x15c   : > { %p16258_p1 = pnand %p16256_p13, %p17027_p0 }
 0x15e   : > { %p16259_p2 = pneg %p16258_p1 }
 0x160   : > { %p16264_p4 = pnand %p16262_p3, %p16259_p2 }
 0x162   : > { %16267 = shalt.err (!%p16264_p4)
}
 0x163   : > { %s16268_s12 = scalar_lea.vmem %s2099_s20, 16  ;;  %s16275_s2 = scalar_lea.vmem %s2099_s20, 32 }
 0x164   : > { %p16269_p5 = scmp.ne.s32.totalorder %s2099_s20, %s16268_s12  ;;  %p16276_p10 = scmp.lt.s32.totalorder %s2099_s20, %s2099_s20 }
 0x165   : > { %p16277_p7 = scmp.lt.s32.totalorder %s16275_s2, %s16268_s12 }
 0x166   : > { %p16271_p6 = pnand %p16269_p5, %p17027_p0 }
 0x167   : > { %p16278_p8 = por %p16277_p7, %p16276_p10 }
 0x168   : > { %p16272_p9 = pneg %p16271_p6 }
 0x16a   : > { %p16279_p11 = pnand %p16278_p8, %p16272_p9 }
 0x16c   : > { %16282 = shalt.err (!%p16279_p11)
}
 0x16d   : > { %14859 = dma.hbm_to_vmem [thread:$0]  (!%p17015_p12), %s19249_s19, 16, %s2099_s20, [#allocation15]  }
 0x16e   : > { %p19268_p13 = scmp.ne.s32.totalorder %s19265_s11, 0 }
 0x170   : > { %2182 = sbr.rel (%p19268_p13) target bundleno = 7837 (0x1e9d), region = 316 }
 0x177   : > { %p19269_p1 = scmp.eq.s32.totalorder %s16977_s0, 0 }
 0x179   : > { %16412 = dma.done.wait (%p19269_p1), [#allocation3], 16   ;;  %p19270_p2 = pmov %p19269_p1 }
 0x17a   : > { %p19271_p0 = pmov %p19269_p1 }
 0x17b   : > { %16414 = vsyncadd (%p19270_p2), [#allocation3], 4294967280 }
 0x17c   : > { %16416 = dma.done.wait (%p19271_p0), [#allocation6], 32   ;;  %p19272_p3 = pmov %p19271_p0 }
 0x17d   : > { %p19273_p4 = pmov %p19271_p0 }
 0x17e   : > { %16418 = vsyncadd (%p19272_p3), [#allocation6], 4294967264 }
 0x17f   : > { %16420 = dma.done.wait (%p19273_p4), [#allocation9], 32   ;;  %p19274_p12 = pmov %p19271_p0 }
 0x180   : > { %p19275_p5 = pmov %p19271_p0 }
 0x181   : > { %16422 = vsyncadd (%p19274_p12), [#allocation9], 4294967264 }
 0x182   : > { %16424 = dma.done.wait (%p19275_p5), [#allocation12], 32   ;;  %p19276_p6 = pmov %p19271_p0 }
 0x183   : > { %p19277_p9 = pmov %p19271_p0 }
 0x184   : > { %16426 = vsyncadd (%p19276_p6), [#allocation12], 4294967264 }
 0x185   : > { %16428 = dma.done.wait (%p19277_p9), [#allocation15], 16   ;;  %p19278_p10 = pmov %p19271_p0 }
 0x186   : > { %s19279_s5 = sld [smem:[#allocation30_spill]]  ;;  %v19126_v0 = vmov 0   ;;  %p2404_p7 = scmp.lt.s32.totalorder %s16977_s0, 1  ;;  %v15015_v1 = vld [vmem:[%s19251_s9] sm:$0xff]   ;;  %v15016_v2 = vld [vmem:[%s19251_s9 + $0x8] sm:$0xff]   ;;  %v15017_v3 = vld [vmem:[%s19251_s9 + $0x10] sm:$0xff]  }
 0x187   : > { %16430 = vsyncadd (%p19278_p10), [#allocation15], 4294967280  ;;  %2730 = vmatprep.subr.bf16.mxu0 %v19126_v0  ;;  %3404 = vmatprep.subr.bf16.mxu1 %v19126_v0  ;;  %vm2674_vm0 = vcmask 154624   ;;  %v15018_v4 = vld [vmem:[%s19251_s9 + $0x18] sm:$0xff]   ;;  %v15019_v6 = vld [vmem:[%s19251_s9 + $0x20] sm:$0xff]   ;;  %vm2723_vm1 = vcmask 1040384  }
 0x188   : > { %s17148_s18 = scalar_select %p2404_p7, %s16977_s0, 1  ;;  %2731 = vmatpush1.bf16.msra.mxu0 %v15015_v1  ;;  %v15020_v7 = vld [vmem:[%s19251_s9 + $0x28] sm:$0xff]   ;;  %v15021_v8 = vld [vmem:[%s19251_s9 + $0x30] sm:$0xff]   ;;  %v15022_v9 = vld [vmem:[%s19251_s9 + $0x38] sm:$0xff]   ;;  %vm2724_vm2 = vcmask 1041408   ;;  %v16546_v10 = vmov 65535  }
 0x189   : > { %2732 = vmatprep.subr.bf16.mxu0 %v19126_v0  ;;  %v2725_v11 = vsel %vm2723_vm1, 4294967295, %v16546_v10  ;;  %v15023_v12 = vld [vmem:[%s19251_s9 + $0x40] sm:$0xff]   ;;  %v15024_v13 = vld [vmem:[%s19251_s9 + $0x48] ss:$0 sps:$4 sm:$0x33]   ;;  %s19280_s13 = sld [smem:[#allocation32_spill]] }
 0x18a   : > { %s13999_s11 = sshll.u32 %s17148_s18, 8  ;;  %v2726_v14 = vsel %vm2724_vm2, %v2725_v11, 0  ;;  %s17225_s10 = sand.u32 1, %s16449_s16   ;;  %v15075_v51 = vld [vmem:[%s19250_s17 + $0x4] ss:$8 sps:$4 sm:$0xff]   ;;  %vm2923_vm3 = vcmask 523264  }
 0x18b   : > { %v2728_v15 = vand.u32 %v15024_v13, %v2726_v14  ;;  %s12983_s26 = sshll.u32 %s17225_s10, 8  ;;  %3436 = vmatprep.mubr.bf16.mxu1 %v15075_v51  ;;  %s19281_s1 = sld [smem:[#allocation34_spill]]  ;;  %vm4843_vm4 = vcmask 261120   ;;  %vm16548_vm5 = vmmov 0   ;;  %vm6885_vm6 = vcmask 130048  }
 0x18c   : > { %2733 = vmatpush1.bf16.msra.mxu0 %v15016_v2  ;;  %s17156_s28 = scalar_lea.vmem %s19279_s5, %s13999_s11  ;;  %s17231_s15 = scalar_lea.vmem [#allocation16], %s12983_s26  ;;  %vm8275_vm7 = vcmask 31744  }
 0x18d   : > { %2734 = vmatprep.subr.bf16.mxu0 %v19126_v0  ;;  %v15027_v5 = vld [vmem:[%s17156_s28 + $0x4] ss:$8 sps:$4 sm:$0xff]   ;;  %v15025_v16 = vld [vmem:[%s17156_s28] ss:$8 sps:$4 sm:$0xff]   ;;  %v15028_v17 = vld [vmem:[%s17156_s28 + $0x14] ss:$8 sps:$4 sm:$0xff]  }
 0x18e   : > { %13034 = vmatprep.mubr.msk.bf16.mxu0 %vm2674_vm0, %v15027_v5  ;;  %v15030_v18 = vld [vmem:[%s17156_s28 + $0x10] ss:$8 sps:$4 sm:$0xff]   ;;  %v15031_v19 = vld [vmem:[%s17156_s28 + $0x24] ss:$8 sps:$4 sm:$0xff]   ;;  %v15033_v20 = vld [vmem:[%s17156_s28 + $0x20] ss:$8 sps:$4 sm:$0xff]  }
 0x18f   : > { %v15034_v21 = vld [vmem:[%s17156_s28 + $0x34] ss:$8 sps:$4 sm:$0xff]   ;;  %v15036_v22 = vld [vmem:[%s17156_s28 + $0x30] ss:$8 sps:$4 sm:$0xff]   ;;  %v15037_v23 = vld [vmem:[%s17156_s28 + $0x44] ss:$8 sps:$4 sm:$0xff]  }
 0x190   : > { %2735 = vmatpush1.bf16.msra.mxu0 %v15017_v3  ;;  %v15039_v24 = vld [vmem:[%s17156_s28 + $0x40] ss:$8 sps:$4 sm:$0xff]   ;;  %v15040_v25 = vld [vmem:[%s17156_s28 + $0x54] ss:$8 sps:$4 sm:$0xff]   ;;  %v15042_v26 = vld [vmem:[%s17156_s28 + $0x50] ss:$8 sps:$4 sm:$0xff]  }
 0x191   : > { %2736 = vmatprep.subr.bf16.mxu0 %v19126_v0  ;;  %v15043_v27 = vld [vmem:[%s17156_s28 + $0x64] ss:$8 sps:$4 sm:$0xff]   ;;  %v15045_v28 = vld [vmem:[%s17156_s28 + $0x60] ss:$8 sps:$4 sm:$0xff]   ;;  %v15046_v29 = vld [vmem:[%s17156_s28 + $0x74] ss:$8 sps:$4 sm:$0xff]  }
 0x192   : > { %v15048_v30 = vld [vmem:[%s17156_s28 + $0x70] ss:$8 sps:$4 sm:$0xff]   ;;  %v15049_v31 = vld [vmem:[%s17156_s28 + $0x84] ss:$8 sps:$4 sm:$0xff]   ;;  %v15051_v32 = vld [vmem:[%s17156_s28 + $0x80] ss:$8 sps:$4 sm:$0xff]  }
 0x193   : > { %v15052_v33 = vld [vmem:[%s17156_s28 + $0x94] ss:$8 sps:$4 sm:$0xff]   ;;  %v15054_v34 = vld [vmem:[%s17156_s28 + $0x90] ss:$8 sps:$4 sm:$0xff]   ;;  %v15055_v35 = vld [vmem:[%s17156_s28 + $0xa4] ss:$8 sps:$4 sm:$0xff]  }
 0x194   : > { %2737 = vmatpush1.bf16.msra.mxu0 %v15018_v4  ;;  %v15057_v36 = vld [vmem:[%s17156_s28 + $0xa0] ss:$8 sps:$4 sm:$0xff]   ;;  %v15058_v37 = vld [vmem:[%s17156_s28 + $0xb4] ss:$8 sps:$4 sm:$0xff]   ;;  %v15060_v38 = vld [vmem:[%s17156_s28 + $0xb0] ss:$8 sps:$4 sm:$0xff]  }
 0x195   : > { %2738 = vmatprep.subr.bf16.mxu0 %v19126_v0  ;;  %v15061_v39 = vld [vmem:[%s17156_s28 + $0xc4] ss:$8 sps:$4 sm:$0xff]   ;;  %v15063_v40 = vld [vmem:[%s17156_s28 + $0xc0] ss:$8 sps:$4 sm:$0xff]   ;;  %v15064_v41 = vld [vmem:[%s17156_s28 + $0xd4] ss:$8 sps:$4 sm:$0xff]  }
 0x196   : > { %v15066_v42 = vld [vmem:[%s17156_s28 + $0xd0] ss:$8 sps:$4 sm:$0xff]   ;;  %v15067_v43 = vld [vmem:[%s17156_s28 + $0xe4] ss:$8 sps:$4 sm:$0xff]   ;;  %v15069_v44 = vld [vmem:[%s17156_s28 + $0xe0] ss:$8 sps:$4 sm:$0xff]  }
 0x197   : > { %v15070_v45 = vld [vmem:[%s17156_s28 + $0xf4] ss:$8 sps:$4 sm:$0xff]   ;;  %v15072_v46 = vld [vmem:[%s17156_s28 + $0xf0] ss:$8 sps:$4 sm:$0xff]   ;;  %v17222_v47 = vld [vmem:[%s19280_s13] ss:$0 sm:$0xff] }
 0x198   : > { %2739 = vmatpush1.bf16.msra.mxu0 %v15019_v6  ;;  %s19284_s20 = sld [smem:[#allocation37_spill]]  ;;  %s19292_s23 = sld [smem:[#allocation39_spill]] }
 0x199   : > { %2740 = vmatprep.subr.bf16.mxu0 %v19126_v0  ;;  %s19293_s12 = sld [smem:[#allocation35_spill]]  ;;  %s19294_s2 = sld [smem:[#allocation40_spill]] }
 0x19a   : > { %s19295_s11 = sld [smem:[#allocation38_spill]]  ;;  %s19296_s28 = sld [smem:[#allocation41_spill]] }
 0x19b   : > { %s19297_s26 = sld [smem:[#allocation44_spill]]  ;;  %s19312_s3 = sld [smem:[#allocation47_spill]] }
 0x19c   : > { %2741 = vmatpush1.bf16.msra.mxu0 %v15020_v7  ;;  %s19319_s4 = sld [smem:[#allocation58_spill]]  ;;  %s19342_s14 = sld [smem:[#allocation102_spill]] }
 0x19d   : > { %2742 = vmatprep.subr.bf16.mxu0 %v19126_v0  ;;  %p19365_p11 = scmp.ne.s32.totalorder %s19262_s7, 0 }
 0x1a0   : > { %2743 = vmatpush1.bf16.msra.mxu0 %v15021_v8 }
 0x1a1   : > { %2744 = vmatprep.subr.bf16.mxu0 %v19126_v0 }
 0x1a4   : > { %2745 = vmatpush1.bf16.msra.mxu0 %v15022_v9 }
 0x1a5   : > { %2746 = vmatprep.subr.bf16.mxu0 %v19126_v0 }
 0x1a8   : > { %2747 = vmatpush1.bf16.msra.mxu0 %v15023_v12 }
 0x1a9   : > { %2748 = vmatprep.subr.bf16.mxu0 %v19126_v0 }
 0x1ac   : > { %2749 = vmatpush1.bf16.msra.mxu0 %v2728_v15 }
 0x1af   : > { %2763 = vmatmul.mubr.bf16.vlgmr.msra.gmra.mrb[0].mxu0 %v15025_v16 }
 0x1b0   : > { %13035 = vmatprep.mubr.msk.bf16.mxu0 %vm2674_vm0, %v15028_v17 }
 0x1b7   : > { %2771 = vmatmul.mubr.bf16.gmra.mrb[4].mxu0 %v15030_v18 }
 0x1b8   : > { %13036 = vmatprep.mubr.msk.bf16.mxu0 %vm2674_vm0, %v15031_v19 }
 0x1bf   : > { %2779 = vmatmul.mubr.bf16.gmra.mrb[8].mxu0 %v15033_v20 }
 0x1c0   : > { %13037 = vmatprep.mubr.msk.bf16.mxu0 %vm2674_vm0, %v15034_v21 }
 0x1c7   : > { %2787 = vmatmul.mubr.bf16.gmra.mrb[12].mxu0 %v15036_v22 }
 0x1c8   : > { %13038 = vmatprep.mubr.msk.bf16.mxu0 %vm2674_vm0, %v15037_v23 }
 0x1cf   : > { %2795 = vmatmul.mubr.bf16.gmra.mrb[16].mxu0 %v15039_v24 }
 0x1d0   : > { %13039 = vmatprep.mubr.msk.bf16.mxu0 %vm2674_vm0, %v15040_v25 }
 0x1d7   : > { %2803 = vmatmul.mubr.bf16.gmra.mrb[20].mxu0 %v15042_v26 }
 0x1d8   : > { %13040 = vmatprep.mubr.msk.bf16.mxu0 %vm2674_vm0, %v15043_v27 }
 0x1df   : > { %2811 = vmatmul.mubr.bf16.gmra.mrb[24].mxu0 %v15045_v28 }
 0x1e0   : > { %13041 = vmatprep.mubr.msk.bf16.mxu0 %vm2674_vm0, %v15046_v29 }
 0x1e7   : > { %2819 = vmatmul.mubr.bf16.gmra.mrb[28].mxu0 %v15048_v30 }
 0x1e8   : > { %13042 = vmatprep.mubr.msk.bf16.mxu0 %vm2674_vm0, %v15049_v31 }
 0x1ef   : > { %2827 = vmatmul.mubr.bf16.gmra.mrb[32].mxu0 %v15051_v32 }
 0x1f0   : > { %13043 = vmatprep.mubr.msk.bf16.mxu0 %vm2674_vm0, %v15052_v33 }
 0x1f7   : > { %2835 = vmatmul.mubr.bf16.gmra.mrb[36].mxu0 %v15054_v34 }
 0x1f8   : > { %13044 = vmatprep.mubr.msk.bf16.mxu0 %vm2674_vm0, %v15055_v35 }
 0x1ff   : > { %2843 = vmatmul.mubr.bf16.gmra.mrb[40].mxu0 %v15057_v36 }
 0x200   : > { %13045 = vmatprep.mubr.msk.bf16.mxu0 %vm2674_vm0, %v15058_v37 }
 0x207   : > { %2851 = vmatmul.mubr.bf16.gmra.mrb[44].mxu0 %v15060_v38 }
 0x208   : > { %13046 = vmatprep.mubr.msk.bf16.mxu0 %vm2674_vm0, %v15061_v39 }
 0x20f   : > { %2859 = vmatmul.mubr.bf16.gmra.mrb[48].mxu0 %v15063_v40 }
 0x210   : > { %13047 = vmatprep.mubr.msk.bf16.mxu0 %vm2674_vm0, %v15064_v41 }
 0x217   : > { %2867 = vmatmul.mubr.bf16.gmra.mrb[52].mxu0 %v15066_v42 }
 0x218   : > { %13048 = vmatprep.mubr.msk.bf16.mxu0 %vm2674_vm0, %v15067_v43 }
 0x21f   : > { %2875 = vmatmul.mubr.bf16.gmra.mrb[56].mxu0 %v15069_v44 }
 0x220   : > { %13049 = vmatprep.mubr.msk.bf16.mxu0 %vm2674_vm0, %v15070_v45 }
 0x227   : > { %2883 = vmatmul.mubr.bf16.gmra.mrb[60].mxu0 %v15072_v46 }
 0x282   : > { %v2764_v48 = vpop.f32.mrb[0].mxu0 }
 0x283   : > { %v2765_v49 = vadd.f32 %v17222_v47, %v2764_v48  ;;  %v2766_v50 = vpop.f32.mrb[1].mxu0 }
 0x284   : > { %v2767_v52 = vpop.f32.mrb[2].mxu0 }
 0x285   : > { %v2768_v53 = vadd.f32 %v17222_v47, %v2767_v52  ;;  %v2769_v54 = vpop.f32.mrb[3].mxu0  ;;  %v2891_v55 = vmax.f32 %v2765_v49, 0.0 }
 0x287   : > { %v2892_v56 = vmax.f32 %v2768_v53, 0.0  ;;  %2924 = vst.msk [vmem:[%s17231_s15] sm:$0xff] %vm2923_vm3, %v2891_v55 }
 0x289   : > { %2925 = vst.msk [vmem:[%s17231_s15 + $0x8] sm:$0xff] %vm2923_vm3, %v2892_v56  ;;  %v3028_v57 = vpack.c.bf16 %v2892_v56, %v2891_v55 }
 0x28a   : > { %v2772_v58 = vpop.f32.mrb[4].mxu0 }
 0x28b   : > { %v2773_v59 = vadd.f32 %v17222_v47, %v2772_v58  ;;  %v2774_v60 = vpop.f32.mrb[5].mxu0  ;;  %3405 = vmatpush1.bf16.msra.mxu1 %v3028_v57 }
 0x28c   : > { %v2775_v61 = vpop.f32.mrb[6].mxu0  ;;  %3406 = vmatprep.subr.bf16.mxu1 %v19126_v0 }
 0x28d   : > { %v2893_v62 = vmax.f32 %v2773_v59, 0.0  ;;  %v2776_v63 = vadd.f32 %v17222_v47, %v2775_v61  ;;  %v2777_v1 = vpop.f32.mrb[7].mxu0 }
 0x28f   : > { %2926 = vst.msk [vmem:[%s17231_s15 + $0x10] sm:$0xff] %vm2923_vm3, %v2893_v62  ;;  %v2894_v2 = vmax.f32 %v2776_v63, 0.0 }
 0x291   : > { %2927 = vst.msk [vmem:[%s17231_s15 + $0x18] sm:$0xff] %vm2923_vm3, %v2894_v2  ;;  %v3029_v3 = vpack.c.bf16 %v2894_v2, %v2893_v62 }
 0x292   : > { %v2780_v4 = vpop.f32.mrb[8].mxu0 }
 0x293   : > { %v2781_v5 = vadd.f32 %v17222_v47, %v2780_v4  ;;  %v2782_v6 = vpop.f32.mrb[9].mxu0  ;;  %3407 = vmatpush1.bf16.msra.mxu1 %v3029_v3 }
 0x294   : > { %v2783_v7 = vpop.f32.mrb[10].mxu0  ;;  %3408 = vmatprep.subr.bf16.mxu1 %v19126_v0 }
 0x295   : > { %v2895_v8 = vmax.f32 %v2781_v5, 0.0  ;;  %v2784_v9 = vadd.f32 %v17222_v47, %v2783_v7  ;;  %v2785_v10 = vpop.f32.mrb[11].mxu0 }
 0x297   : > { %2928 = vst.msk [vmem:[%s17231_s15 + $0x20] sm:$0xff] %vm2923_vm3, %v2895_v8  ;;  %v2896_v11 = vmax.f32 %v2784_v9, 0.0 }
 0x299   : > { %2929 = vst.msk [vmem:[%s17231_s15 + $0x28] sm:$0xff] %vm2923_vm3, %v2896_v11  ;;  %v3030_v12 = vpack.c.bf16 %v2896_v11, %v2895_v8 }
 0x29a   : > { %v2788_v13 = vpop.f32.mrb[12].mxu0 }
 0x29b   : > { %v2789_v14 = vadd.f32 %v17222_v47, %v2788_v13  ;;  %v2790_v15 = vpop.f32.mrb[13].mxu0  ;;  %3409 = vmatpush1.bf16.msra.mxu1 %v3030_v12 }
 0x29c   : > { %v2791_v16 = vpop.f32.mrb[14].mxu0  ;;  %3410 = vmatprep.subr.bf16.mxu1 %v19126_v0 }
 0x29d   : > { %v2897_v17 = vmax.f32 %v2789_v14, 0.0  ;;  %v2792_v18 = vadd.f32 %v17222_v47, %v2791_v16  ;;  %v2793_v19 = vpop.f32.mrb[15].mxu0 }
 0x29f   : > { %2930 = vst.msk [vmem:[%s17231_s15 + $0x30] sm:$0xff] %vm2923_vm3, %v2897_v17  ;;  %v2898_v20 = vmax.f32 %v2792_v18, 0.0 }
 0x2a1   : > { %2931 = vst.msk [vmem:[%s17231_s15 + $0x38] sm:$0xff] %vm2923_vm3, %v2898_v20  ;;  %v3031_v21 = vpack.c.bf16 %v2898_v20, %v2897_v17 }
 0x2a2   : > { %v2796_v22 = vpop.f32.mrb[16].mxu0 }
 0x2a3   : > { %v2797_v23 = vadd.f32 %v17222_v47, %v2796_v22  ;;  %v2798_v24 = vpop.f32.mrb[17].mxu0  ;;  %3411 = vmatpush1.bf16.msra.mxu1 %v3031_v21 }
 0x2a4   : > { %v2799_v25 = vpop.f32.mrb[18].mxu0  ;;  %3412 = vmatprep.subr.bf16.mxu1 %v19126_v0 }
 0x2a5   : > { %v2899_v26 = vmax.f32 %v2797_v23, 0.0  ;;  %v2800_v27 = vadd.f32 %v17222_v47, %v2799_v25  ;;  %v2801_v28 = vpop.f32.mrb[19].mxu0 }
 0x2a7   : > { %2932 = vst.msk [vmem:[%s17231_s15 + $0x40] sm:$0xff] %vm2923_vm3, %v2899_v26  ;;  %v2900_v29 = vmax.f32 %v2800_v27, 0.0 }
 0x2a9   : > { %2933 = vst.msk [vmem:[%s17231_s15 + $0x48] sm:$0xff] %vm2923_vm3, %v2900_v29  ;;  %v3032_v30 = vpack.c.bf16 %v2900_v29, %v2899_v26 }
 0x2aa   : > { %v2804_v31 = vpop.f32.mrb[20].mxu0 }
 0x2ab   : > { %v2805_v32 = vadd.f32 %v17222_v47, %v2804_v31  ;;  %v2806_v33 = vpop.f32.mrb[21].mxu0  ;;  %3413 = vmatpush1.bf16.msra.mxu1 %v3032_v30 }
 0x2ac   : > { %v2807_v34 = vpop.f32.mrb[22].mxu0  ;;  %3414 = vmatprep.subr.bf16.mxu1 %v19126_v0 }
 0x2ad   : > { %v2901_v35 = vmax.f32 %v2805_v32, 0.0  ;;  %v2808_v36 = vadd.f32 %v17222_v47, %v2807_v34  ;;  %v2809_v37 = vpop.f32.mrb[23].mxu0 }
 0x2af   : > { %2934 = vst.msk [vmem:[%s17231_s15 + $0x50] sm:$0xff] %vm2923_vm3, %v2901_v35  ;;  %v2902_v38 = vmax.f32 %v2808_v36, 0.0 }
 0x2b1   : > { %2935 = vst.msk [vmem:[%s17231_s15 + $0x58] sm:$0xff] %vm2923_vm3, %v2902_v38  ;;  %v3033_v39 = vpack.c.bf16 %v2902_v38, %v2901_v35 }
 0x2b2   : > { %v2812_v40 = vpop.f32.mrb[24].mxu0 }
 0x2b3   : > { %v2813_v41 = vadd.f32 %v17222_v47, %v2812_v40  ;;  %v2814_v42 = vpop.f32.mrb[25].mxu0  ;;  %3415 = vmatpush1.bf16.msra.mxu1 %v3033_v39 }
 0x2b4   : > { %v2815_v43 = vpop.f32.mrb[26].mxu0  ;;  %3416 = vmatprep.subr.bf16.mxu1 %v19126_v0 }
 0x2b5   : > { %v2903_v44 = vmax.f32 %v2813_v41, 0.0  ;;  %v2816_v45 = vadd.f32 %v17222_v47, %v2815_v43  ;;  %v2817_v46 = vpop.f32.mrb[27].mxu0 }
 0x2b7   : > { %2936 = vst.msk [vmem:[%s17231_s15 + $0x60] sm:$0xff] %vm2923_vm3, %v2903_v44  ;;  %v2904_v48 = vmax.f32 %v2816_v45, 0.0 }
 0x2b9   : > { %2937 = vst.msk [vmem:[%s17231_s15 + $0x68] sm:$0xff] %vm2923_vm3, %v2904_v48  ;;  %v3034_v49 = vpack.c.bf16 %v2904_v48, %v2903_v44 }
 0x2ba   : > { %v2820_v50 = vpop.f32.mrb[28].mxu0 }
 0x2bb   : > { %v2821_v51 = vadd.f32 %v17222_v47, %v2820_v50  ;;  %v2822_v52 = vpop.f32.mrb[29].mxu0  ;;  %3417 = vmatpush1.bf16.msra.mxu1 %v3034_v49 }
 0x2bc   : > { %v2823_v53 = vpop.f32.mrb[30].mxu0  ;;  %3418 = vmatprep.subr.bf16.mxu1 %v19126_v0 }
 0x2bd   : > { %v2905_v54 = vmax.f32 %v2821_v51, 0.0  ;;  %v2824_v55 = vadd.f32 %v17222_v47, %v2823_v53  ;;  %v2825_v56 = vpop.f32.mrb[31].mxu0 }
 0x2bf   : > { %2938 = vst.msk [vmem:[%s17231_s15 + $0x70] sm:$0xff] %vm2923_vm3, %v2905_v54  ;;  %v2906_v57 = vmax.f32 %v2824_v55, 0.0 }
 0x2c1   : > { %2939 = vst.msk [vmem:[%s17231_s15 + $0x78] sm:$0xff] %vm2923_vm3, %v2906_v57  ;;  %v3035_v58 = vpack.c.bf16 %v2906_v57, %v2905_v54 }
 0x2c2   : > { %v2828_v59 = vpop.f32.mrb[32].mxu0 }
 0x2c3   : > { %v2829_v60 = vadd.f32 %v17222_v47, %v2828_v59  ;;  %v2830_v61 = vpop.f32.mrb[33].mxu0  ;;  %3419 = vmatpush1.bf16.msra.mxu1 %v3035_v58 }
 0x2c4   : > { %v2831_v62 = vpop.f32.mrb[34].mxu0  ;;  %3420 = vmatprep.subr.bf16.mxu1 %v19126_v0 }
 0x2c5   : > { %v2907_v63 = vmax.f32 %v2829_v60, 0.0  ;;  %v2832_v1 = vadd.f32 %v17222_v47, %v2831_v62  ;;  %v2833_v2 = vpop.f32.mrb[35].mxu0 }
 0x2c7   : > { %2940 = vst.msk [vmem:[%s17231_s15 + $0x80] sm:$0xff] %vm2923_vm3, %v2907_v63  ;;  %v2908_v3 = vmax.f32 %v2832_v1, 0.0 }
 0x2c9   : > { %2941 = vst.msk [vmem:[%s17231_s15 + $0x88] sm:$0xff] %vm2923_vm3, %v2908_v3  ;;  %v3036_v4 = vpack.c.bf16 %v2908_v3, %v2907_v63 }
 0x2ca   : > { %v2836_v5 = vpop.f32.mrb[36].mxu0 }
 0x2cb   : > { %v2837_v6 = vadd.f32 %v17222_v47, %v2836_v5  ;;  %v2838_v7 = vpop.f32.mrb[37].mxu0  ;;  %3421 = vmatpush1.bf16.msra.mxu1 %v3036_v4 }
 0x2cc   : > { %v2839_v8 = vpop.f32.mrb[38].mxu0  ;;  %3422 = vmatprep.subr.bf16.mxu1 %v19126_v0  ;;  %v15076_v7 = vld [vmem:[%s19250_s17 + $0x14] ss:$8 sps:$4 sm:$0xff]  }
 0x2cd   : > { %v2909_v9 = vmax.f32 %v2837_v6, 0.0  ;;  %v2840_v10 = vadd.f32 %v17222_v47, %v2839_v8  ;;  %v2841_v11 = vpop.f32.mrb[39].mxu0  ;;  %v15073_v6 = vld [vmem:[%s19250_s17] ss:$8 sps:$4 sm:$0xff]   ;;  %v15078_v8 = vld [vmem:[%s19250_s17 + $0x10] ss:$8 sps:$4 sm:$0xff]  }
 0x2ce   : > { %v15084_v11 = vld [vmem:[%s19250_s17 + $0x30] ss:$8 sps:$4 sm:$0xff]  }
 0x2cf   : > { %2942 = vst.msk [vmem:[%s17231_s15 + $0x90] sm:$0xff] %vm2923_vm3, %v2909_v9  ;;  %v2910_v12 = vmax.f32 %v2840_v10, 0.0  ;;  %v15082_v10 = vld [vmem:[%s19250_s17 + $0x34] ss:$8 sps:$4 sm:$0xff]  }
 0x2d1   : > { %2943 = vst.msk [vmem:[%s17231_s15 + $0x98] sm:$0xff] %vm2923_vm3, %v2910_v12  ;;  %v3037_v13 = vpack.c.bf16 %v2910_v12, %v2909_v9  ;;  %v15081_v9 = vld [vmem:[%s19250_s17 + $0x20] ss:$8 sps:$4 sm:$0xff]   ;;  %v15085_v12 = vld [vmem:[%s19250_s17 + $0x44] ss:$8 sps:$4 sm:$0xff]  }
 0x2d2   : > { %v2844_v14 = vpop.f32.mrb[40].mxu0 }
 0x2d3   : > { %v2845_v15 = vadd.f32 %v17222_v47, %v2844_v14  ;;  %v2846_v16 = vpop.f32.mrb[41].mxu0  ;;  %3423 = vmatpush1.bf16.msra.mxu1 %v3037_v13  ;;  %v15087_v13 = vld [vmem:[%s19250_s17 + $0x40] ss:$8 sps:$4 sm:$0xff]   ;;  %v15088_v14 = vld [vmem:[%s19250_s17 + $0x54] ss:$8 sps:$4 sm:$0xff]  }
 0x2d4   : > { %v2847_v17 = vpop.f32.mrb[42].mxu0  ;;  %3424 = vmatprep.subr.bf16.mxu1 %v19126_v0  ;;  %v15091_v16 = vld [vmem:[%s19250_s17 + $0x64] ss:$8 sps:$4 sm:$0xff]  }
 0x2d5   : > { %v2911_v18 = vmax.f32 %v2845_v15, 0.0  ;;  %v2848_v19 = vadd.f32 %v17222_v47, %v2847_v17  ;;  %v2849_v20 = vpop.f32.mrb[43].mxu0  ;;  %v15090_v15 = vld [vmem:[%s19250_s17 + $0x50] ss:$8 sps:$4 sm:$0xff]   ;;  %v15093_v17 = vld [vmem:[%s19250_s17 + $0x60] ss:$8 sps:$4 sm:$0xff]  }
 0x2d6   : > { %v15097_v20 = vld [vmem:[%s19250_s17 + $0x84] ss:$8 sps:$4 sm:$0xff]  }
 0x2d7   : > { %2944 = vst.msk [vmem:[%s17231_s15 + $0xa0] sm:$0xff] %vm2923_vm3, %v2911_v18  ;;  %v2912_v21 = vmax.f32 %v2848_v19, 0.0  ;;  %v15096_v19 = vld [vmem:[%s19250_s17 + $0x70] ss:$8 sps:$4 sm:$0xff]  }
 0x2d9   : > { %2945 = vst.msk [vmem:[%s17231_s15 + $0xa8] sm:$0xff] %vm2923_vm3, %v2912_v21  ;;  %v3038_v22 = vpack.c.bf16 %v2912_v21, %v2911_v18  ;;  %v15094_v18 = vld [vmem:[%s19250_s17 + $0x74] ss:$8 sps:$4 sm:$0xff]   ;;  %v15099_v21 = vld [vmem:[%s19250_s17 + $0x80] ss:$8 sps:$4 sm:$0xff]  }
 0x2da   : > { %v2852_v23 = vpop.f32.mrb[44].mxu0 }
 0x2db   : > { %v2853_v24 = vadd.f32 %v17222_v47, %v2852_v23  ;;  %v2854_v25 = vpop.f32.mrb[45].mxu0  ;;  %3425 = vmatpush1.bf16.msra.mxu1 %v3038_v22  ;;  %v15100_v22 = vld [vmem:[%s19250_s17 + $0x94] ss:$8 sps:$4 sm:$0xff]   ;;  %v15102_v23 = vld [vmem:[%s19250_s17 + $0x90] ss:$8 sps:$4 sm:$0xff]  }
 0x2dc   : > { %v2855_v26 = vpop.f32.mrb[46].mxu0  ;;  %3426 = vmatprep.subr.bf16.mxu1 %v19126_v0  ;;  %v15105_v25 = vld [vmem:[%s19250_s17 + $0xa0] ss:$8 sps:$4 sm:$0xff]  }
 0x2dd   : > { %v2913_v27 = vmax.f32 %v2853_v24, 0.0  ;;  %v2856_v28 = vadd.f32 %v17222_v47, %v2855_v26  ;;  %v2857_v29 = vpop.f32.mrb[47].mxu0  ;;  %v15103_v24 = vld [vmem:[%s19250_s17 + $0xa4] ss:$8 sps:$4 sm:$0xff]   ;;  %v15106_v26 = vld [vmem:[%s19250_s17 + $0xb4] ss:$8 sps:$4 sm:$0xff]  }
 0x2de   : > { %v15111_v29 = vld [vmem:[%s19250_s17 + $0xc0] ss:$8 sps:$4 sm:$0xff]  }
 0x2df   : > { %2946 = vst.msk [vmem:[%s17231_s15 + $0xb0] sm:$0xff] %vm2923_vm3, %v2913_v27  ;;  %v2914_v30 = vmax.f32 %v2856_v28, 0.0  ;;  %v15109_v28 = vld [vmem:[%s19250_s17 + $0xc4] ss:$8 sps:$4 sm:$0xff]  }
 0x2e1   : > { %2947 = vst.msk [vmem:[%s17231_s15 + $0xb8] sm:$0xff] %vm2923_vm3, %v2914_v30  ;;  %v3039_v31 = vpack.c.bf16 %v2914_v30, %v2913_v27  ;;  %v15108_v27 = vld [vmem:[%s19250_s17 + $0xb0] ss:$8 sps:$4 sm:$0xff]   ;;  %v15112_v30 = vld [vmem:[%s19250_s17 + $0xd4] ss:$8 sps:$4 sm:$0xff]  }
 0x2e2   : > { %v2860_v32 = vpop.f32.mrb[48].mxu0 }
 0x2e3   : > { %v2861_v33 = vadd.f32 %v17222_v47, %v2860_v32  ;;  %v2862_v34 = vpop.f32.mrb[49].mxu0  ;;  %3427 = vmatpush1.bf16.msra.mxu1 %v3039_v31  ;;  %v15114_v31 = vld [vmem:[%s19250_s17 + $0xd0] ss:$8 sps:$4 sm:$0xff]   ;;  %v15115_v32 = vld [vmem:[%s19250_s17 + $0xe4] ss:$8 sps:$4 sm:$0xff]  }
 0x2e4   : > { %v2863_v35 = vpop.f32.mrb[50].mxu0  ;;  %3428 = vmatprep.subr.bf16.mxu1 %v19126_v0  ;;  %v15118_v34 = vld [vmem:[%s19250_s17 + $0xf4] ss:$8 sps:$4 sm:$0xff]  }
 0x2e5   : > { %v2915_v36 = vmax.f32 %v2861_v33, 0.0  ;;  %v2864_v37 = vadd.f32 %v17222_v47, %v2863_v35  ;;  %v2865_v38 = vpop.f32.mrb[51].mxu0  ;;  %v15117_v33 = vld [vmem:[%s19250_s17 + $0xe0] ss:$8 sps:$4 sm:$0xff]   ;;  %v15120_v35 = vld [vmem:[%s19250_s17 + $0xf0] ss:$8 sps:$4 sm:$0xff]  }
 0x2e6   : > { %v15124_v38 = vld [vmem:[%s19250_s17 + $0x114] ss:$8 sps:$4 sm:$0xff]  }
 0x2e7   : > { %2948 = vst.msk [vmem:[%s17231_s15 + $0xc0] sm:$0xff] %vm2923_vm3, %v2915_v36  ;;  %v2916_v39 = vmax.f32 %v2864_v37, 0.0  ;;  %v15123_v37 = vld [vmem:[%s19250_s17 + $0x100] ss:$8 sps:$4 sm:$0xff]  }
 0x2e9   : > { %2949 = vst.msk [vmem:[%s17231_s15 + $0xc8] sm:$0xff] %vm2923_vm3, %v2916_v39  ;;  %v3040_v40 = vpack.c.bf16 %v2916_v39, %v2915_v36  ;;  %v15121_v36 = vld [vmem:[%s19250_s17 + $0x104] ss:$8 sps:$4 sm:$0xff]   ;;  %v15126_v39 = vld [vmem:[%s19250_s17 + $0x110] ss:$8 sps:$4 sm:$0xff]  }
 0x2ea   : > { %v2868_v41 = vpop.f32.mrb[52].mxu0 }
 0x2eb   : > { %v2869_v42 = vadd.f32 %v17222_v47, %v2868_v41  ;;  %v2870_v43 = vpop.f32.mrb[53].mxu0  ;;  %3429 = vmatpush1.bf16.msra.mxu1 %v3040_v40  ;;  %v15127_v40 = vld [vmem:[%s19250_s17 + $0x124] ss:$8 sps:$4 sm:$0xff]   ;;  %v15129_v41 = vld [vmem:[%s19250_s17 + $0x120] ss:$8 sps:$4 sm:$0xff]  }
 0x2ec   : > { %v2871_v44 = vpop.f32.mrb[54].mxu0  ;;  %3430 = vmatprep.subr.bf16.mxu1 %v19126_v0  ;;  %v15132_v43 = vld [vmem:[%s19250_s17 + $0x130] ss:$8 sps:$4 sm:$0xff]  }
 0x2ed   : > { %v2917_v45 = vmax.f32 %v2869_v42, 0.0  ;;  %v2872_v46 = vadd.f32 %v17222_v47, %v2871_v44  ;;  %v2873_v48 = vpop.f32.mrb[55].mxu0  ;;  %v15130_v42 = vld [vmem:[%s19250_s17 + $0x134] ss:$8 sps:$4 sm:$0xff]   ;;  %v15133_v44 = vld [vmem:[%s19250_s17 + $0x144] ss:$8 sps:$4 sm:$0xff]  }
 0x2ee   : > { %v15138_v48 = vld [vmem:[%s19250_s17 + $0x150] ss:$8 sps:$4 sm:$0xff]  }
 0x2ef   : > { %2950 = vst.msk [vmem:[%s17231_s15 + $0xd0] sm:$0xff] %vm2923_vm3, %v2917_v45  ;;  %v2918_v49 = vmax.f32 %v2872_v46, 0.0  ;;  %v15136_v46 = vld [vmem:[%s19250_s17 + $0x154] ss:$8 sps:$4 sm:$0xff]  }
 0x2f1   : > { %2951 = vst.msk [vmem:[%s17231_s15 + $0xd8] sm:$0xff] %vm2923_vm3, %v2918_v49  ;;  %v3041_v50 = vpack.c.bf16 %v2918_v49, %v2917_v45  ;;  %v15135_v45 = vld [vmem:[%s19250_s17 + $0x140] ss:$8 sps:$4 sm:$0xff]   ;;  %v15139_v49 = vld [vmem:[%s19250_s17 + $0x164] ss:$8 sps:$4 sm:$0xff]  }
 0x2f2   : > { %v2876_v51 = vpop.f32.mrb[56].mxu0 }
 0x2f3   : > { %v2877_v52 = vadd.f32 %v17222_v47, %v2876_v51  ;;  %v2878_v53 = vpop.f32.mrb[57].mxu0  ;;  %3431 = vmatpush1.bf16.msra.mxu1 %v3041_v50  ;;  %v15141_v50 = vld [vmem:[%s19250_s17 + $0x160] ss:$8 sps:$4 sm:$0xff]   ;;  %v15142_v51 = vld [vmem:[%s19250_s17 + $0x174] ss:$8 sps:$4 sm:$0xff]  }
 0x2f4   : > { %v2879_v54 = vpop.f32.mrb[58].mxu0  ;;  %3432 = vmatprep.subr.bf16.mxu1 %v19126_v0  ;;  %v15145_v53 = vld [vmem:[%s19250_s17 + $0x184] ss:$8 sps:$4 sm:$0xff]  }
 0x2f5   : > { %v2919_v55 = vmax.f32 %v2877_v52, 0.0  ;;  %v2880_v56 = vadd.f32 %v17222_v47, %v2879_v54  ;;  %v2881_v57 = vpop.f32.mrb[59].mxu0  ;;  %v15144_v52 = vld [vmem:[%s19250_s17 + $0x170] ss:$8 sps:$4 sm:$0xff]   ;;  %v15147_v54 = vld [vmem:[%s19250_s17 + $0x180] ss:$8 sps:$4 sm:$0xff]  }
 0x2f6   : > { %v15151_v57 = vld [vmem:[%s19250_s17 + $0x1a4] ss:$8 sps:$4 sm:$0xff]  }
 0x2f7   : > { %2952 = vst.msk [vmem:[%s17231_s15 + $0xe0] sm:$0xff] %vm2923_vm3, %v2919_v55  ;;  %v2920_v58 = vmax.f32 %v2880_v56, 0.0  ;;  %v15150_v56 = vld [vmem:[%s19250_s17 + $0x190] ss:$8 sps:$4 sm:$0xff]  }
 0x2f9   : > { %2953 = vst.msk [vmem:[%s17231_s15 + $0xe8] sm:$0xff] %vm2923_vm3, %v2920_v58  ;;  %v3042_v59 = vpack.c.bf16 %v2920_v58, %v2919_v55  ;;  %v15148_v55 = vld [vmem:[%s19250_s17 + $0x194] ss:$8 sps:$4 sm:$0xff]   ;;  %v15153_v58 = vld [vmem:[%s19250_s17 + $0x1a0] ss:$8 sps:$4 sm:$0xff]  }
 0x2fa   : > { %v2884_v60 = vpop.f32.mrb[60].mxu0 }
 0x2fb   : > { %v2885_v61 = vadd.f32 %v17222_v47, %v2884_v60  ;;  %v2886_v62 = vpop.f32.mrb[61].mxu0  ;;  %3433 = vmatpush1.bf16.msra.mxu1 %v3042_v59  ;;  %v15154_v59 = vld [vmem:[%s19250_s17 + $0x1b4] ss:$8 sps:$4 sm:$0xff]  }
 0x2fc   : > { %v2887_v63 = vpop.f32.mrb[62].mxu0  ;;  %3434 = vmatprep.subr.bf16.mxu1 %v19126_v0  ;;  %v15156_v62 = vld [vmem:[%s19250_s17 + $0x1b0] ss:$8 sps:$4 sm:$0xff]  }
 0x2fd   : > { %v2921_v1 = vmax.f32 %v2885_v61, 0.0  ;;  %v2888_v2 = vadd.f32 %v17222_v47, %v2887_v63  ;;  %v2889_v3 = vpop.f32.mrb[63].mxu0  ;;  %v15079_v47 = vld [vmem:[%s19250_s17 + $0x24] ss:$8 sps:$4 sm:$0xff]  }
 0x2ff   : > { %2954 = vst.msk [vmem:[%s17231_s15 + $0xf0] sm:$0xff] %vm2923_vm3, %v2921_v1  ;;  %v2922_v4 = vmax.f32 %v2888_v2, 0.0 }
 0x301   : > { %2955 = vst.msk [vmem:[%s17231_s15 + $0xf8] sm:$0xff] %vm2923_vm3, %v2922_v4  ;;  %v3043_v5 = vpack.c.bf16 %v2922_v4, %v2921_v1  ;;  %v15157_v1 = vld [vmem:[%s19250_s17 + $0x1c4] ss:$8 sps:$4 sm:$0xff]  }
 0x303   : > { %3435 = vmatpush1.bf16.msra.mxu1 %v3043_v5  ;;  %v15159_v5 = vld [vmem:[%s19250_s17 + $0x1c0] ss:$8 sps:$4 sm:$0xff]  }
 0x306   : > { %3437 = vmatmul.mubr.bf16.vlgmr.msra.gmra.mrb[0].mxu1 %v15073_v6 }
 0x307   : > { %3444 = vmatprep.mubr.bf16.mxu1 %v15076_v7  ;;  %v15160_v7 = vld [vmem:[%s19250_s17 + $0x1d4] ss:$8 sps:$4 sm:$0xff]  }
 0x30e   : > { %3445 = vmatmul.mubr.bf16.gmra.mrb[4].mxu1 %v15078_v8 }
 0x30f   : > { %3452 = vmatprep.mubr.bf16.mxu1 %v15079_v47 }
 0x316   : > { %3453 = vmatmul.mubr.bf16.gmra.mrb[8].mxu1 %v15081_v9 }
 0x317   : > { %3460 = vmatprep.mubr.bf16.mxu1 %v15082_v10  ;;  %v15162_v10 = vld [vmem:[%s19250_s17 + $0x1d0] ss:$8 sps:$4 sm:$0xff]  }
 0x31e   : > { %3461 = vmatmul.mubr.bf16.gmra.mrb[12].mxu1 %v15084_v11 }
 0x31f   : > { %3468 = vmatprep.mubr.bf16.mxu1 %v15085_v12  ;;  %v15163_v12 = vld [vmem:[%s19250_s17 + $0x1e4] ss:$8 sps:$4 sm:$0xff]  }
 0x326   : > { %3469 = vmatmul.mubr.bf16.gmra.mrb[16].mxu1 %v15087_v13 }
 0x327   : > { %3476 = vmatprep.mubr.bf16.mxu1 %v15088_v14 }
 0x32e   : > { %3477 = vmatmul.mubr.bf16.gmra.mrb[20].mxu1 %v15090_v15 }
 0x32f   : > { %3484 = vmatprep.mubr.bf16.mxu1 %v15091_v16  ;;  %v15165_v16 = vld [vmem:[%s19250_s17 + $0x1e0] ss:$8 sps:$4 sm:$0xff]  }
 0x336   : > { %3485 = vmatmul.mubr.bf16.gmra.mrb[24].mxu1 %v15093_v17 }
 0x337   : > { %3492 = vmatprep.mubr.bf16.mxu1 %v15094_v18  ;;  %v15166_v18 = vld [vmem:[%s19250_s17 + $0x1f4] ss:$8 sps:$4 sm:$0xff]  }
 0x33e   : > { %3493 = vmatmul.mubr.bf16.gmra.mrb[28].mxu1 %v15096_v19 }
 0x33f   : > { %3500 = vmatprep.mubr.bf16.mxu1 %v15097_v20 }
 0x346   : > { %3501 = vmatmul.mubr.bf16.gmra.mrb[32].mxu1 %v15099_v21 }
 0x347   : > { %3508 = vmatprep.mubr.bf16.mxu1 %v15100_v22 }
 0x34e   : > { %3509 = vmatmul.mubr.bf16.gmra.mrb[36].mxu1 %v15102_v23  ;;  %v15168_v23 = vld [vmem:[%s19250_s17 + $0x1f0] ss:$8 sps:$4 sm:$0xff]  }
 0x34f   : > { %3516 = vmatprep.mubr.bf16.mxu1 %v15103_v24 }
 0x356   : > { %3517 = vmatmul.mubr.bf16.gmra.mrb[40].mxu1 %v15105_v25  ;;  %v15169_v25 = vld [vmem:[%s19250_s17 + $0x204] ss:$8 sps:$4 sm:$0xff]  }
 0x357   : > { %3524 = vmatprep.mubr.bf16.mxu1 %v15106_v26 }
 0x35e   : > { %3525 = vmatmul.mubr.bf16.gmra.mrb[44].mxu1 %v15108_v27 }
 0x35f   : > { %3532 = vmatprep.mubr.bf16.mxu1 %v15109_v28 }
 0x366   : > { %3533 = vmatmul.mubr.bf16.gmra.mrb[48].mxu1 %v15111_v29 }
 0x367   : > { %3540 = vmatprep.mubr.bf16.mxu1 %v15112_v30 }
 0x36e   : > { %3541 = vmatmul.mubr.bf16.gmra.mrb[52].mxu1 %v15114_v31  ;;  %v15171_v31 = vld [vmem:[%s19250_s17 + $0x200] ss:$8 sps:$4 sm:$0xff]  }
 0x36f   : > { %3548 = vmatprep.mubr.bf16.mxu1 %v15115_v32 }
 0x376   : > { %3549 = vmatmul.mubr.bf16.gmra.mrb[56].mxu1 %v15117_v33  ;;  %v15172_v33 = vld [vmem:[%s19250_s17 + $0x214] ss:$8 sps:$4 sm:$0xff]  }
 0x377   : > { %3556 = vmatprep.mubr.bf16.mxu1 %v15118_v34 }
 0x37e   : > { %3557 = vmatmul.mubr.bf16.gmra.mrb[60].mxu1 %v15120_v35 }
 0x37f   : > { %3564 = vmatprep.mubr.bf16.mxu1 %v15121_v36 }
 0x386   : > { %3565 = vmatmul.mubr.bf16.gmra.mrb[64].mxu1 %v15123_v37 }
 0x387   : > { %3572 = vmatprep.mubr.bf16.mxu1 %v15124_v38 }
 0x38e   : > { %3573 = vmatmul.mubr.bf16.gmra.mrb[68].mxu1 %v15126_v39  ;;  %v15174_v39 = vld [vmem:[%s19250_s17 + $0x210] ss:$8 sps:$4 sm:$0xff]  }
 0x38f   : > { %3580 = vmatprep.mubr.bf16.mxu1 %v15127_v40 }
 0x396   : > { %3581 = vmatmul.mubr.bf16.gmra.mrb[72].mxu1 %v15129_v41  ;;  %v15175_v41 = vld [vmem:[%s19250_s17 + $0x224] ss:$8 sps:$4 sm:$0xff]  }
 0x397   : > { %3588 = vmatprep.mubr.bf16.mxu1 %v15130_v42 }
 0x39e   : > { %3589 = vmatmul.mubr.bf16.gmra.mrb[76].mxu1 %v15132_v43 }
 0x39f   : > { %3596 = vmatprep.mubr.bf16.mxu1 %v15133_v44 }
 0x3a6   : > { %3597 = vmatmul.mubr.bf16.gmra.mrb[80].mxu1 %v15135_v45 }
 0x3a7   : > { %3604 = vmatprep.mubr.bf16.mxu1 %v15136_v46 }
 0x3ae   : > { %3605 = vmatmul.mubr.bf16.gmra.mrb[84].mxu1 %v15138_v48  ;;  %v15177_v48 = vld [vmem:[%s19250_s17 + $0x220] ss:$8 sps:$4 sm:$0xff]  }
 0x3af   : > { %3612 = vmatprep.mubr.bf16.mxu1 %v15139_v49 }
 0x3b6   : > { %3613 = vmatmul.mubr.bf16.gmra.mrb[88].mxu1 %v15141_v50  ;;  %v15178_v50 = vld [vmem:[%s19250_s17 + $0x234] ss:$8 sps:$4 sm:$0xff]  }
 0x3b7   : > { %3620 = vmatprep.mubr.bf16.mxu1 %v15142_v51 }
 0x3be   : > { %3621 = vmatmul.mubr.bf16.gmra.mrb[92].mxu1 %v15144_v52 }
 0x3bf   : > { %3628 = vmatprep.mubr.bf16.mxu1 %v15145_v53 }
 0x3c6   : > { %3629 = vmatmul.mubr.bf16.gmra.mrb[96].mxu1 %v15147_v54 }
 0x3c7   : > { %3636 = vmatprep.mubr.bf16.mxu1 %v15148_v55 }
 0x3ce   : > { %3637 = vmatmul.mubr.bf16.gmra.mrb[100].mxu1 %v15150_v56  ;;  %v15180_v56 = vld [vmem:[%s19250_s17 + $0x230] ss:$8 sps:$4 sm:$0xff]  }
 0x3cf   : > { %3644 = vmatprep.mubr.bf16.mxu1 %v15151_v57 }
 0x3d6   : > { %3645 = vmatmul.mubr.bf16.gmra.mrb[104].mxu1 %v15153_v58 }
 0x3d7   : > { %3652 = vmatprep.mubr.bf16.mxu1 %v15154_v59 }
 0x3d9   : > { %v17396_v60 = vpop.f32.mrb[0].mxu1 }
 0x3da   : > { %v3440_v61 = vpop.f32.mrb[1].mxu1 }
 0x3db   : > { %v17399_v63 = vpop.f32.mrb[2].mxu1 }
 0x3dc   : > { %v3443_v2 = vpop.f32.mrb[3].mxu1 }
 0x3de   : > { %3653 = vmatmul.mubr.bf16.gmra.mrb[108].mxu1 %v15156_v62 }
 0x3df   : > { %3660 = vmatprep.mubr.bf16.mxu1 %v15157_v1 }
 0x3e1   : > { %v17402_v3 = vpop.f32.mrb[4].mxu1 }
 0x3e2   : > { %v3448_v4 = vpop.f32.mrb[5].mxu1 }
 0x3e3   : > { %v17405_v6 = vpop.f32.mrb[6].mxu1 }
 0x3e4   : > { %v3451_v8 = vpop.f32.mrb[7].mxu1 }
 0x3e6   : > { %3661 = vmatmul.mubr.bf16.gmra.mrb[112].mxu1 %v15159_v5 }
 0x3e7   : > { %3668 = vmatprep.mubr.bf16.mxu1 %v15160_v7 }
 0x3e9   : > { %v17408_v47 = vpop.f32.mrb[8].mxu1 }
 0x3ea   : > { %v3456_v9 = vpop.f32.mrb[9].mxu1 }
 0x3eb   : > { %v17411_v11 = vpop.f32.mrb[10].mxu1 }
 0x3ec   : > { %v3459_v13 = vpop.f32.mrb[11].mxu1 }
 0x3ee   : > { %3669 = vmatmul.mubr.bf16.gmra.mrb[116].mxu1 %v15162_v10 }
 0x3ef   : > { %3676 = vmatprep.mubr.bf16.mxu1 %v15163_v12 }
 0x3f1   : > { %v17414_v14 = vpop.f32.mrb[12].mxu1 }
 0x3f2   : > { %v3464_v15 = vpop.f32.mrb[13].mxu1 }
 0x3f3   : > { %v17417_v17 = vpop.f32.mrb[14].mxu1 }
 0x3f4   : > { %v3467_v19 = vpop.f32.mrb[15].mxu1 }
 0x3f6   : > { %3677 = vmatmul.mubr.bf16.gmra.mrb[120].mxu1 %v15165_v16 }
 0x3f7   : > { %3684 = vmatprep.mubr.bf16.mxu1 %v15166_v18 }
 0x3f9   : > { %v3470_v20 = vpop.f32.mrb[16].mxu1 }
 0x3fa   : > { %v3725_v21 = vmax.f32 %v17396_v60, %v3470_v20  ;;  %v3472_v22 = vpop.f32.mrb[17].mxu1 }
 0x3fb   : > { %v3473_v24 = vpop.f32.mrb[18].mxu1 }
 0x3fc   : > { %v3726_v26 = vmax.f32 %v17399_v63, %v3473_v24  ;;  %v3475_v27 = vpop.f32.mrb[19].mxu1 }
 0x3fe   : > { %3685 = vmatmul.mubr.bf16.gmra.mrb[124].mxu1 %v15168_v23 }
 0x3ff   : > { %3692 = vmatprep.mubr.bf16.mxu1 %v15169_v25 }
 0x401   : > { %v3478_v28 = vpop.f32.mrb[20].mxu1 }
 0x402   : > { %v3727_v29 = vmax.f32 %v17402_v3, %v3478_v28  ;;  %v3480_v30 = vpop.f32.mrb[21].mxu1 }
 0x403   : > { %v3481_v32 = vpop.f32.mrb[22].mxu1 }
 0x404   : > { %v3728_v34 = vmax.f32 %v17405_v6, %v3481_v32  ;;  %v3483_v35 = vpop.f32.mrb[23].mxu1 }
 0x406   : > { %3693 = vmatmul.mubr.bf16.gmra.mrb[128].mxu1 %v15171_v31 }
 0x407   : > { %3700 = vmatprep.mubr.bf16.mxu1 %v15172_v33 }
 0x409   : > { %v3486_v36 = vpop.f32.mrb[24].mxu1 }
 0x40a   : > { %v3729_v37 = vmax.f32 %v17408_v47, %v3486_v36  ;;  %v3488_v38 = vpop.f32.mrb[25].mxu1 }
 0x40b   : > { %v3489_v40 = vpop.f32.mrb[26].mxu1  ;;  %v15181_v38 = vld [vmem:[%s16589_s25] sm:$0xff]  }
 0x40c   : > { %v3730_v42 = vmax.f32 %v17411_v11, %v3489_v40  ;;  %v3491_v43 = vpop.f32.mrb[27].mxu1  ;;  %14249 = vmatprep.subr.bf16.mxu0 %v15181_v38 }
 0x40d   : > { %14250 = vmatpush3.bf16.msra.mxu0 %v15181_v38 }
 0x40e   : > { %3701 = vmatmul.mubr.bf16.gmra.mrb[132].mxu1 %v15174_v39 }
 0x40f   : > { %3708 = vmatprep.mubr.bf16.mxu1 %v15175_v41 }
 0x411   : > { %v3494_v44 = vpop.f32.mrb[28].mxu1 }
 0x412   : > { %v3731_v45 = vmax.f32 %v17414_v14, %v3494_v44  ;;  %v3496_v46 = vpop.f32.mrb[29].mxu1 }
 0x413   : > { %v3497_v49 = vpop.f32.mrb[30].mxu1  ;;  %v15183_v46 = vld [vmem:[%s16589_s25 + $0x10] sm:$0xff]  }
 0x414   : > { %v3732_v51 = vmax.f32 %v17417_v17, %v3497_v49  ;;  %v3499_v52 = vpop.f32.mrb[31].mxu1 }
 0x416   : > { %3709 = vmatmul.mubr.bf16.gmra.mrb[136].mxu1 %v15177_v48 }
 0x417   : > { %3716 = vmatprep.mubr.bf16.mxu1 %v15178_v50 }
 0x419   : > { %v3502_v53 = vpop.f32.mrb[32].mxu1 }
 0x41a   : > { %v3733_v54 = vmax.f32 %v3725_v21, %v3502_v53  ;;  %v3504_v55 = vpop.f32.mrb[33].mxu1 }
 0x41b   : > { %v3505_v57 = vpop.f32.mrb[34].mxu1 }
 0x41c   : > { %v3734_v58 = vmax.f32 %v3726_v26, %v3505_v57  ;;  %v3507_v59 = vpop.f32.mrb[35].mxu1 }
 0x41e   : > { %3717 = vmatmul.mubr.bf16.gmra.mrb[140].mxu1 %v15180_v56 }
 0x421   : > { %v3510_v60 = vpop.f32.mrb[36].mxu1 }
 0x422   : > { %v3735_v61 = vmax.f32 %v3727_v29, %v3510_v60  ;;  %v3512_v62 = vpop.f32.mrb[37].mxu1 }
 0x423   : > { %v3513_v63 = vpop.f32.mrb[38].mxu1 }
 0x424   : > { %v3736_v1 = vmax.f32 %v3728_v34, %v3513_v63  ;;  %v3515_v2 = vpop.f32.mrb[39].mxu1 }
 0x429   : > { %v3518_v3 = vpop.f32.mrb[40].mxu1 }
 0x42a   : > { %v3520_v4 = vpop.f32.mrb[41].mxu1  ;;  %v3737_v5 = vmax.f32 %v3729_v37, %v3518_v3 }
 0x42b   : > { %v3521_v6 = vpop.f32.mrb[42].mxu1 }
 0x42c   : > { %v3523_v7 = vpop.f32.mrb[43].mxu1  ;;  %v3738_v8 = vmax.f32 %v3730_v42, %v3521_v6  ;;  %v15182_v42 = vld [vmem:[%s16589_s25 + $0x8] sm:$0xff]  }
 0x42d   : > { %14251 = vmatprep.subr.bf16.mxu0 %v15182_v42 }
 0x42e   : > { %14252 = vmatpush3.bf16.msra.mxu0 %v15182_v42 }
 0x42f   : > { %14253 = vmatprep.subr.bf16.mxu0 %v15183_v46 }
 0x431   : > { %v3526_v47 = vpop.f32.mrb[44].mxu1 }
 0x432   : > { %v3528_v9 = vpop.f32.mrb[45].mxu1  ;;  %v3739_v10 = vmax.f32 %v3731_v45, %v3526_v47  ;;  %14254 = vmatpush3.bf16.msra.mxu0 %v15183_v46 }
 0x433   : > { %v3529_v11 = vpop.f32.mrb[46].mxu1 }
 0x434   : > { %v3531_v12 = vpop.f32.mrb[47].mxu1  ;;  %v3740_v13 = vmax.f32 %v3732_v51, %v3529_v11  ;;  %v15184_v51 = vld [vmem:[%s16589_s25 + $0x18] sm:$0xff]  }
 0x435   : > { %14255 = vmatprep.subr.bf16.mxu0 %v15184_v51 }
 0x436   : > { %14256 = vmatpush3.bf16.msra.mxu0 %v15184_v51 }
 0x439   : > { %v3534_v14 = vpop.f32.mrb[48].mxu1 }
 0x43a   : > { %v3536_v15 = vpop.f32.mrb[49].mxu1  ;;  %v3741_v16 = vmax.f32 %v3733_v54, %v3534_v14 }
 0x43b   : > { %v3537_v17 = vpop.f32.mrb[50].mxu1 }
 0x43c   : > { %v3539_v18 = vpop.f32.mrb[51].mxu1  ;;  %v3742_v19 = vmax.f32 %v3734_v58, %v3537_v17 }
 0x441   : > { %v3542_v20 = vpop.f32.mrb[52].mxu1 }
 0x442   : > { %v3544_v21 = vpop.f32.mrb[53].mxu1  ;;  %v3743_v22 = vmax.f32 %v3735_v61, %v3542_v20 }
 0x443   : > { %v3545_v23 = vpop.f32.mrb[54].mxu1 }
 0x444   : > { %v3547_v24 = vpop.f32.mrb[55].mxu1  ;;  %v3744_v25 = vmax.f32 %v3736_v1, %v3545_v23 }
 0x449   : > { %v3550_v26 = vpop.f32.mrb[56].mxu1 }
 0x44a   : > { %v3745_v27 = vmax.f32 %v3737_v5, %v3550_v26  ;;  %v3552_v28 = vpop.f32.mrb[57].mxu1 }
 0x44b   : > { %v3553_v29 = vpop.f32.mrb[58].mxu1 }
 0x44c   : > { %v3746_v30 = vmax.f32 %v3738_v8, %v3553_v29  ;;  %v3555_v31 = vpop.f32.mrb[59].mxu1 }
 0x451   : > { %v3558_v32 = vpop.f32.mrb[60].mxu1 }
 0x452   : > { %v3747_v33 = vmax.f32 %v3739_v10, %v3558_v32  ;;  %v3560_v34 = vpop.f32.mrb[61].mxu1 }
 0x453   : > { %v3561_v35 = vpop.f32.mrb[62].mxu1 }
 0x454   : > { %v3748_v36 = vmax.f32 %v3740_v13, %v3561_v35  ;;  %v3563_v37 = vpop.f32.mrb[63].mxu1 }
 0x459   : > { %v3566_v39 = vpop.f32.mrb[64].mxu1 }
 0x45a   : > { %v3749_v40 = vmax.f32 %v3741_v16, %v3566_v39  ;;  %v3568_v41 = vpop.f32.mrb[65].mxu1 }
 0x45b   : > { %v3569_v43 = vpop.f32.mrb[66].mxu1 }
 0x45c   : > { %v3750_v44 = vmax.f32 %v3742_v19, %v3569_v43  ;;  %v3571_v45 = vpop.f32.mrb[67].mxu1 }
 0x461   : > { %v3574_v48 = vpop.f32.mrb[68].mxu1 }
 0x462   : > { %v3751_v49 = vmax.f32 %v3743_v22, %v3574_v48  ;;  %v3576_v50 = vpop.f32.mrb[69].mxu1 }
 0x463   : > { %v3577_v52 = vpop.f32.mrb[70].mxu1 }
 0x464   : > { %v3752_v53 = vmax.f32 %v3744_v25, %v3577_v52  ;;  %v3579_v54 = vpop.f32.mrb[71].mxu1 }
 0x469   : > { %v3582_v55 = vpop.f32.mrb[72].mxu1 }
 0x46a   : > { %v3753_v56 = vmax.f32 %v3745_v27, %v3582_v55  ;;  %v3584_v57 = vpop.f32.mrb[73].mxu1 }
 0x46b   : > { %v3585_v58 = vpop.f32.mrb[74].mxu1 }
 0x46c   : > { %v3754_v59 = vmax.f32 %v3746_v30, %v3585_v58  ;;  %v3587_v60 = vpop.f32.mrb[75].mxu1 }
 0x471   : > { %v3590_v61 = vpop.f32.mrb[76].mxu1 }
 0x472   : > { %v3755_v62 = vmax.f32 %v3747_v33, %v3590_v61  ;;  %v3592_v63 = vpop.f32.mrb[77].mxu1 }
 0x473   : > { %v3593_v1 = vpop.f32.mrb[78].mxu1 }
 0x474   : > { %v3756_v2 = vmax.f32 %v3748_v36, %v3593_v1  ;;  %v3595_v3 = vpop.f32.mrb[79].mxu1 }
 0x479   : > { %v3598_v4 = vpop.f32.mrb[80].mxu1 }
 0x47a   : > { %v3757_v5 = vmax.f32 %v3749_v40, %v3598_v4  ;;  %v3600_v6 = vpop.f32.mrb[81].mxu1 }
 0x47b   : > { %v3601_v7 = vpop.f32.mrb[82].mxu1 }
 0x47c   : > { %v3758_v8 = vmax.f32 %v3750_v44, %v3601_v7  ;;  %v3603_v47 = vpop.f32.mrb[83].mxu1 }
 0x481   : > { %v3606_v9 = vpop.f32.mrb[84].mxu1 }
 0x482   : > { %v3759_v10 = vmax.f32 %v3751_v49, %v3606_v9  ;;  %v3608_v11 = vpop.f32.mrb[85].mxu1 }
 0x483   : > { %v3609_v12 = vpop.f32.mrb[86].mxu1 }
 0x484   : > { %v3760_v13 = vmax.f32 %v3752_v53, %v3609_v12  ;;  %v3611_v14 = vpop.f32.mrb[87].mxu1 }
 0x489   : > { %v3614_v15 = vpop.f32.mrb[88].mxu1 }
 0x48a   : > { %v3761_v16 = vmax.f32 %v3753_v56, %v3614_v15  ;;  %v3616_v17 = vpop.f32.mrb[89].mxu1 }
 0x48b   : > { %v3617_v18 = vpop.f32.mrb[90].mxu1 }
 0x48c   : > { %v3762_v19 = vmax.f32 %v3754_v59, %v3617_v18  ;;  %v3619_v20 = vpop.f32.mrb[91].mxu1 }
 0x491   : > { %v3622_v21 = vpop.f32.mrb[92].mxu1 }
 0x492   : > { %v3763_v22 = vmax.f32 %v3755_v62, %v3622_v21  ;;  %v3624_v23 = vpop.f32.mrb[93].mxu1 }
 0x493   : > { %v3625_v24 = vpop.f32.mrb[94].mxu1 }
 0x494   : > { %v3764_v25 = vmax.f32 %v3756_v2, %v3625_v24  ;;  %v3627_v26 = vpop.f32.mrb[95].mxu1 }
 0x499   : > { %v3630_v27 = vpop.f32.mrb[96].mxu1 }
 0x49a   : > { %v3765_v28 = vmax.f32 %v3757_v5, %v3630_v27  ;;  %v3632_v29 = vpop.f32.mrb[97].mxu1 }
 0x49b   : > { %v3633_v30 = vpop.f32.mrb[98].mxu1 }
 0x49c   : > { %v3766_v31 = vmax.f32 %v3758_v8, %v3633_v30  ;;  %v3635_v32 = vpop.f32.mrb[99].mxu1 }
 0x4a1   : > { %v3638_v33 = vpop.f32.mrb[100].mxu1 }
 0x4a2   : > { %v3767_v34 = vmax.f32 %v3759_v10, %v3638_v33  ;;  %v3640_v35 = vpop.f32.mrb[101].mxu1 }
 0x4a3   : > { %v3641_v36 = vpop.f32.mrb[102].mxu1 }
 0x4a4   : > { %v3768_v37 = vmax.f32 %v3760_v13, %v3641_v36  ;;  %v3643_v38 = vpop.f32.mrb[103].mxu1 }
 0x4a9   : > { %v3646_v39 = vpop.f32.mrb[104].mxu1 }
 0x4aa   : > { %v3769_v40 = vmax.f32 %v3761_v16, %v3646_v39  ;;  %v3648_v41 = vpop.f32.mrb[105].mxu1 }
 0x4ab   : > { %v3649_v42 = vpop.f32.mrb[106].mxu1  ;;  %v13122_v41 = vld [vmem:[%s19281_s1] ss:$0 sm:$0xff]  ;;  %s19307_s1 = sld [smem:[#allocation42_spill]] }
 0x4ac   : > { %v3770_v43 = vmax.f32 %v3762_v19, %v3649_v42  ;;  %v3651_v44 = vpop.f32.mrb[107].mxu1 }
 0x4b1   : > { %v3654_v45 = vpop.f32.mrb[108].mxu1 }
 0x4b2   : > { %v3771_v46 = vmax.f32 %v3763_v22, %v3654_v45  ;;  %v3656_v48 = vpop.f32.mrb[109].mxu1 }
 0x4b3   : > { %v3657_v49 = vpop.f32.mrb[110].mxu1 }
 0x4b4   : > { %v3772_v50 = vmax.f32 %v3764_v25, %v3657_v49  ;;  %v3659_v51 = vpop.f32.mrb[111].mxu1 }
 0x4b9   : > { %v3662_v52 = vpop.f32.mrb[112].mxu1 }
 0x4ba   : > { %v3773_v53 = vmax.f32 %v3765_v28, %v3662_v52  ;;  %v3664_v54 = vpop.f32.mrb[113].mxu1 }
 0x4bb   : > { %v3665_v55 = vpop.f32.mrb[114].mxu1 }
 0x4bc   : > { %v3774_v56 = vmax.f32 %v3766_v31, %v3665_v55  ;;  %v3667_v57 = vpop.f32.mrb[115].mxu1 }
 0x4c1   : > { %v3670_v58 = vpop.f32.mrb[116].mxu1 }
 0x4c2   : > { %v3775_v59 = vmax.f32 %v3767_v34, %v3670_v58  ;;  %v3672_v60 = vpop.f32.mrb[117].mxu1 }
 0x4c3   : > { %v3673_v61 = vpop.f32.mrb[118].mxu1 }
 0x4c4   : > { %v3776_v62 = vmax.f32 %v3768_v37, %v3673_v61  ;;  %v3675_v63 = vpop.f32.mrb[119].mxu1 }
 0x4c9   : > { %v3678_v1 = vpop.f32.mrb[120].mxu1 }
 0x4ca   : > { %v3777_v2 = vmax.f32 %v3769_v40, %v3678_v1  ;;  %v3680_v3 = vpop.f32.mrb[121].mxu1  ;;  %v17458_v40 = vld [vmem:[%s16584_s21] sm:$0xff]  }
 0x4cb   : > { %v3681_v4 = vpop.f32.mrb[122].mxu1 }
 0x4cc   : > { %v3778_v5 = vmax.f32 %v3770_v43, %v3681_v4  ;;  %v3683_v6 = vpop.f32.mrb[123].mxu1 }
 0x4d1   : > { %v3686_v7 = vpop.f32.mrb[124].mxu1 }
 0x4d2   : > { %v3779_v8 = vmax.f32 %v3771_v46, %v3686_v7  ;;  %v3688_v47 = vpop.f32.mrb[125].mxu1 }
 0x4d3   : > { %v3689_v9 = vpop.f32.mrb[126].mxu1  ;;  %v17467_v47 = vld [vmem:[%s16584_s21 + $0x10] sm:$0xff]  }
 0x4d4   : > { %v3780_v10 = vmax.f32 %v3772_v50, %v3689_v9  ;;  %v3691_v11 = vpop.f32.mrb[127].mxu1  ;;  %v17474_v9 = vld [vmem:[%s16584_s21 + $0x18] sm:$0xff]  }
 0x4d5   : > { %v17484_v11 = vld [vmem:[%s16584_s21 + $0x28] sm:$0xff]  }
 0x4d9   : > { %v3694_v12 = vpop.f32.mrb[128].mxu1 }
 0x4da   : > { %v3781_v13 = vmax.f32 %v3773_v53, %v3694_v12  ;;  %v3696_v14 = vpop.f32.mrb[129].mxu1  ;;  %v17487_v12 = vld [vmem:[%s16584_s21 + $0x30] sm:$0xff]  }
 0x4db   : > { %v3697_v15 = vpop.f32.mrb[130].mxu1  ;;  %v17497_v14 = vld [vmem:[%s16584_s21 + $0x40] sm:$0xff]  }
 0x4dc   : > { %v3782_v16 = vmax.f32 %v3774_v56, %v3697_v15  ;;  %v3699_v17 = vpop.f32.mrb[131].mxu1  ;;  %v17504_v15 = vld [vmem:[%s16584_s21 + $0x48] sm:$0xff]  }
 0x4dd   : > { %v17514_v17 = vld [vmem:[%s16584_s21 + $0x58] sm:$0xff]  }
 0x4de   : > { %v17441_v18 = vpack.c.bf16 %v3782_v16, %v3781_v13  ;;  %v17494_v13 = vld [vmem:[%s16584_s21 + $0x38] sm:$0xff]   ;;  %v17507_v16 = vld [vmem:[%s16584_s21 + $0x50] sm:$0xff]  }
 0x4e0   : > { %14257 = vmatprep.mubr.msk.bf16.mxu0 %vm2923_vm3, %v17441_v18 }
 0x4e1   : > { %v3702_v19 = vpop.f32.mrb[132].mxu1 }
 0x4e2   : > { %v3783_v20 = vmax.f32 %v3775_v59, %v3702_v19  ;;  %v3704_v21 = vpop.f32.mrb[133].mxu1  ;;  %v17517_v19 = vld [vmem:[%s16584_s21 + $0x60] sm:$0xff]  }
 0x4e3   : > { %v3705_v22 = vpop.f32.mrb[134].mxu1  ;;  %v17527_v21 = vld [vmem:[%s16584_s21 + $0x70] sm:$0xff]  }
 0x4e4   : > { %v3784_v23 = vmax.f32 %v3776_v62, %v3705_v22  ;;  %v3707_v24 = vpop.f32.mrb[135].mxu1  ;;  %v17534_v22 = vld [vmem:[%s16584_s21 + $0x78] sm:$0xff]  }
 0x4e5   : > { %v17544_v24 = vld [vmem:[%s16584_s21 + $0x88] sm:$0xff]  }
 0x4e6   : > { %v17445_v25 = vpack.c.bf16 %v3784_v23, %v3783_v20  ;;  %v17524_v20 = vld [vmem:[%s16584_s21 + $0x68] sm:$0xff]   ;;  %v17537_v23 = vld [vmem:[%s16584_s21 + $0x80] sm:$0xff]  }
 0x4e8   : > { %14258 = vmatmul.mubr.msk.bf16.vlgmr.msra.gmra.mrb[64].mxu0 %vm2923_vm3, %v17445_v25 }
 0x4e9   : > { %v3710_v26 = vpop.f32.mrb[136].mxu1 }
 0x4ea   : > { %v3785_v27 = vmax.f32 %v3777_v2, %v3710_v26  ;;  %v3712_v28 = vpop.f32.mrb[137].mxu1  ;;  %v17547_v26 = vld [vmem:[%s16584_s21 + $0x90] sm:$0xff]  }
 0x4eb   : > { %v3713_v29 = vpop.f32.mrb[138].mxu1  ;;  %v17557_v28 = vld [vmem:[%s16584_s21 + $0xa0] sm:$0xff]  }
 0x4ec   : > { %v3786_v30 = vmax.f32 %v3778_v5, %v3713_v29  ;;  %v3715_v31 = vpop.f32.mrb[139].mxu1  ;;  %v17564_v29 = vld [vmem:[%s16584_s21 + $0xa8] sm:$0xff]  }
 0x4ed   : > { %v17574_v31 = vld [vmem:[%s16584_s21 + $0xb8] sm:$0xff]  }
 0x4ee   : > { %v17449_v32 = vpack.c.bf16 %v3786_v30, %v3785_v27  ;;  %v17554_v27 = vld [vmem:[%s16584_s21 + $0x98] sm:$0xff]   ;;  %v17567_v30 = vld [vmem:[%s16584_s21 + $0xb0] sm:$0xff]  }
 0x4f0   : > { %14261 = vmatprep.mubr.msk.bf16.mxu0 %vm2923_vm3, %v17449_v32 }
 0x4f1   : > { %v3718_v33 = vpop.f32.mrb[140].mxu1 }
 0x4f2   : > { %v3787_v34 = vmax.f32 %v3779_v8, %v3718_v33  ;;  %v3720_v35 = vpop.f32.mrb[141].mxu1  ;;  %v17464_v8 = vld [vmem:[%s16584_s21 + $0x8] sm:$0xff]   ;;  %v17577_v33 = vld [vmem:[%s16584_s21 + $0xc0] sm:$0xff]  }
 0x4f3   : > { %v3721_v36 = vpop.f32.mrb[142].mxu1  ;;  %v17587_v35 = vld [vmem:[%s16584_s21 + $0xd0] sm:$0xff]  }
 0x4f4   : > { %v3788_v37 = vmax.f32 %v3780_v10, %v3721_v36  ;;  %v3723_v38 = vpop.f32.mrb[143].mxu1  ;;  %v17477_v10 = vld [vmem:[%s16584_s21 + $0x20] sm:$0xff]   ;;  %v17594_v36 = vld [vmem:[%s16584_s21 + $0xd8] sm:$0xff]  }
 0x4f5   : > { %19282 = vst [vmem:[#allocation108_spill] sm:$0xff] %v17594_v36  ;;  %v17604_v38 = vld [vmem:[%s16584_s21 + $0xe8] sm:$0xff]  }
 0x4f6   : > { %v17453_v39 = vpack.c.bf16 %v3788_v37, %v3787_v34  ;;  %v17584_v34 = vld [vmem:[%s16584_s21 + $0xc8] sm:$0xff]   ;;  %v17597_v37 = vld [vmem:[%s16584_s21 + $0xe0] sm:$0xff]   ;;  %19285 = vst [vmem:[#allocation110_spill] sm:$0xff] %v17604_v38 }
 0x4f7   : > { %19283 = vst [vmem:[#allocation109_spill] sm:$0xff] %v17597_v37 }
 0x4f8   : > { %14262 = vmatmul.mubr.msk.bf16.gmra.mrb[68].mxu0 %vm2923_vm3, %v17453_v39 }
 0x4f9   : > { %14273 = vmatprep.mubr.msk.bf16.mxu0 %vm2923_vm3, %v17458_v40 }
 0x5bb   : > { %v14259_v42 = vpop.f32.mrb[64].mxu0 }
 0x5bc   : > { %v3897_v43 = vadd.f32 %v14259_v42, %v13122_v41  ;;  %v3888_v44 = vpop.f32.mrb[65].mxu0  ;;  %v17614_v42 = vld [vmem:[%s16584_s21 + $0xf8] sm:$0xff]  }
 0x5bd   : > { %v3889_v45 = vadd.f32 %v13122_v41, %v3888_v44  ;;  %v14260_v46 = vpop.f32.mrb[66].mxu0  ;;  %19287 = vst [vmem:[#allocation112_spill] sm:$0xff] %v17614_v42  ;;  %v17624_v44 = vld [vmem:[%s16584_s21 + $0x108] sm:$0xff]  }
 0x5be   : > { %v3900_v48 = vadd.f32 %v14260_v46, %v13122_v41  ;;  %v3891_v49 = vpop.f32.mrb[67].mxu0  ;;  %v3921_v51 = vmax.f32 %v3897_v43, 0.0  ;;  %v17617_v43 = vld [vmem:[%s16584_s21 + $0x100] sm:$0xff]   ;;  %19289 = vst [vmem:[#allocation114_spill] sm:$0xff] %v17624_v44  ;;  %v17634_v46 = vld [vmem:[%s16584_s21 + $0x118] sm:$0xff]  }
 0x5bf   : > { %v3892_v50 = vadd.f32 %v13122_v41, %v3891_v49  ;;  %v3919_v53 = vmax.f32 %v3889_v45, 0.0  ;;  %19288 = vst [vmem:[#allocation113_spill] sm:$0xff] %v17617_v43  ;;  %v17627_v45 = vld [vmem:[%s16584_s21 + $0x110] sm:$0xff]   ;;  %19291 = vst [vmem:[#allocation116_spill] sm:$0xff] %v17634_v46 }
 0x5c0   : > { %v3922_v52 = vmax.f32 %v3900_v48, 0.0  ;;  %19290 = vst [vmem:[#allocation115_spill] sm:$0xff] %v17627_v45  ;;  %v15221_v48 = vld [vmem:[%s19284_s20] sm:$0xff]  }
 0x5c1   : > { %v3920_v54 = vmax.f32 %v3892_v50, 0.0 }
 0x5c2   : > { %v4000_v55 = vpack.c.bf16 %v3922_v52, %v3921_v51 }
 0x5c3   : > { %v3999_v56 = vpack.c.bf16 %v3920_v54, %v3919_v53  ;;  %v15222_v53 = vld [vmem:[%s19284_s20 + $0x8] sm:$0xff]  }
 0x5c5   : > { %14265 = vmatprep.subr.bf16.mxu0 %v3999_v56 }
 0x5c6   : > { %14266 = vmatpush3.bf16.msra.mxu0 %v3999_v56 }
 0x5c7   : > { %14267 = vmatprep.subr.bf16.mxu0 %v4000_v55 }
 0x5ca   : > { %14268 = vmatpush3.bf16.msra.mxu0 %v4000_v55 }
 0x5cb   : > { %v14263_v57 = vpop.f32.mrb[68].mxu0 }
 0x5cc   : > { %v3913_v58 = vadd.f32 %v14263_v57, %v13122_v41  ;;  %v3904_v59 = vpop.f32.mrb[69].mxu0 }
 0x5cd   : > { %v3905_v60 = vadd.f32 %v13122_v41, %v3904_v59  ;;  %v14264_v61 = vpop.f32.mrb[70].mxu0  ;;  %v13203_v59 = vld [vmem:[%s19293_s12] ss:$0 sm:$0xff] }
 0x5ce   : > { %v3916_v62 = vadd.f32 %v14264_v61, %v13122_v41  ;;  %v3907_v63 = vpop.f32.mrb[71].mxu0  ;;  %v3925_v2 = vmax.f32 %v3913_v58, 0.0  ;;  %v17641_v58 = vld [vmem:[%s19292_s23] sm:$0xff]  }
 0x5cf   : > { %v3908_v1 = vadd.f32 %v13122_v41, %v3907_v63  ;;  %v3923_v4 = vmax.f32 %v3905_v60, 0.0  ;;  %v17607_v41 = vld [vmem:[%s16584_s21 + $0xf0] sm:$0xff]   ;;  %v13204_v60 = vld [vmem:[%s19293_s12 + $0x1] ss:$0 sm:$0xff] }
 0x5d0   : > { %v3926_v3 = vmax.f32 %v3916_v62, 0.0  ;;  %19286 = vst [vmem:[#allocation111_spill] sm:$0xff] %v17607_v41 }
 0x5d1   : > { %v3924_v5 = vmax.f32 %v3908_v1, 0.0 }
 0x5d2   : > { %v4002_v6 = vpack.c.bf16 %v3926_v3, %v3925_v2 }
 0x5d3   : > { %v4001_v7 = vpack.c.bf16 %v3924_v5, %v3923_v4 }
 0x5d5   : > { %14269 = vmatprep.subr.bf16.mxu0 %v4001_v7 }
 0x5d6   : > { %14270 = vmatpush3.bf16.msra.mxu0 %v4001_v7 }
 0x5d7   : > { %14271 = vmatprep.subr.bf16.mxu0 %v4002_v6 }
 0x5da   : > { %14272 = vmatpush3.bf16.msra.mxu0 %v4002_v6 }
 0x5db   : > { %14345 = vmatprep.subr.bf16.mxu0 %v15221_v48 }
 0x5dd   : > { %14274 = vmatmul.mubr.msk.bf16.vlgmr.msra.gmra.mrb[72].mxu0 %vm2923_vm3, %v17464_v8 }
 0x5de   : > { %14277 = vmatprep.mubr.msk.bf16.mxu0 %vm2923_vm3, %v17467_v47  ;;  %14346 = vmatpush3.bf16.msra.mxu0 %v15221_v48 }
 0x5df   : > { %14347 = vmatprep.subr.bf16.mxu0 %v15222_v53 }
 0x5e2   : > { %14348 = vmatpush3.bf16.msra.mxu0 %v15222_v53 }
 0x5e3   : > { %14357 = vmatprep.subr.bf16.mxu0 %v17641_v58 }
 0x5e5   : > { %14278 = vmatmul.mubr.msk.bf16.gmra.mrb[76].mxu0 %vm2923_vm3, %v17474_v9 }
 0x5e6   : > { %14281 = vmatprep.mubr.msk.bf16.mxu0 %vm2923_vm3, %v17477_v10 }
 0x5ed   : > { %14282 = vmatmul.mubr.msk.bf16.gmra.mrb[80].mxu0 %vm2923_vm3, %v17484_v11 }
 0x5ee   : > { %14285 = vmatprep.mubr.msk.bf16.mxu0 %vm2923_vm3, %v17487_v12 }
 0x5f5   : > { %14286 = vmatmul.mubr.msk.bf16.gmra.mrb[84].mxu0 %vm2923_vm3, %v17494_v13 }
 0x5f6   : > { %14289 = vmatprep.mubr.msk.bf16.mxu0 %vm2923_vm3, %v17497_v14 }
 0x5fd   : > { %14290 = vmatmul.mubr.msk.bf16.gmra.mrb[88].mxu0 %vm2923_vm3, %v17504_v15 }
 0x5fe   : > { %14293 = vmatprep.mubr.msk.bf16.mxu0 %vm2923_vm3, %v17507_v16 }
 0x605   : > { %14294 = vmatmul.mubr.msk.bf16.gmra.mrb[92].mxu0 %vm2923_vm3, %v17514_v17 }
 0x606   : > { %14297 = vmatprep.mubr.msk.bf16.mxu0 %vm2923_vm3, %v17517_v19 }
 0x60d   : > { %14298 = vmatmul.mubr.msk.bf16.gmra.mrb[96].mxu0 %vm2923_vm3, %v17524_v20 }
 0x60e   : > { %14301 = vmatprep.mubr.msk.bf16.mxu0 %vm2923_vm3, %v17527_v21 }
 0x615   : > { %14302 = vmatmul.mubr.msk.bf16.gmra.mrb[100].mxu0 %vm2923_vm3, %v17534_v22 }
 0x616   : > { %14305 = vmatprep.mubr.msk.bf16.mxu0 %vm2923_vm3, %v17537_v23 }
 0x61d   : > { %14306 = vmatmul.mubr.msk.bf16.gmra.mrb[104].mxu0 %vm2923_vm3, %v17544_v24 }
 0x61e   : > { %14309 = vmatprep.mubr.msk.bf16.mxu0 %vm2923_vm3, %v17547_v26 }
 0x625   : > { %14310 = vmatmul.mubr.msk.bf16.gmra.mrb[108].mxu0 %vm2923_vm3, %v17554_v27 }
 0x626   : > { %14313 = vmatprep.mubr.msk.bf16.mxu0 %vm2923_vm3, %v17557_v28 }
 0x62d   : > { %14314 = vmatmul.mubr.msk.bf16.gmra.mrb[112].mxu0 %vm2923_vm3, %v17564_v29 }
 0x62e   : > { %14317 = vmatprep.mubr.msk.bf16.mxu0 %vm2923_vm3, %v17567_v30 }
 0x635   : > { %14318 = vmatmul.mubr.msk.bf16.gmra.mrb[116].mxu0 %vm2923_vm3, %v17574_v31 }
 0x636   : > { %14321 = vmatprep.mubr.msk.bf16.mxu0 %vm2923_vm3, %v17577_v33 }
 0x63d   : > { %14322 = vmatmul.mubr.msk.bf16.gmra.mrb[120].mxu0 %vm2923_vm3, %v17584_v34 }
 0x63e   : > { %14325 = vmatprep.mubr.msk.bf16.mxu0 %vm2923_vm3, %v17587_v35 }
 0x645   : > { %14326 = vmatmul.mubr.msk.bf16.gmra.mrb[124].mxu0 %vm2923_vm3, %v17594_v36 }
 0x646   : > { %14329 = vmatprep.mubr.msk.bf16.mxu0 %vm2923_vm3, %v17597_v37 }
 0x64d   : > { %14330 = vmatmul.mubr.msk.bf16.gmra.mrb[128].mxu0 %vm2923_vm3, %v17604_v38 }
 0x64e   : > { %14333 = vmatprep.mubr.msk.bf16.mxu0 %vm2923_vm3, %v17607_v41 }
 0x655   : > { %14334 = vmatmul.mubr.msk.bf16.gmra.mrb[132].mxu0 %vm2923_vm3, %v17614_v42 }
 0x656   : > { %14337 = vmatprep.mubr.msk.bf16.mxu0 %vm2923_vm3, %v17617_v43 }
 0x65d   : > { %14338 = vmatmul.mubr.msk.bf16.gmra.mrb[136].mxu0 %vm2923_vm3, %v17624_v44 }
 0x65e   : > { %14341 = vmatprep.mubr.msk.bf16.mxu0 %vm2923_vm3, %v17627_v45 }
 0x665   : > { %14342 = vmatmul.mubr.msk.bf16.gmra.mrb[140].mxu0 %vm2923_vm3, %v17634_v46 }
 0x6b0   : > { %v14275_v49 = vpop.f32.mrb[72].mxu0 }
 0x6b1   : > { %v4325_v50 = vpop.f32.mrb[73].mxu0  ;;  %v4620_v62 = vmul.f32 %v14275_v49, %v13203_v59 }
 0x6b2   : > { %v14276_v51 = vpop.f32.mrb[74].mxu0  ;;  %v4618_v2 = vmul.f32 %v13203_v59, %v4325_v50 }
 0x6b3   : > { %v4328_v52 = vpop.f32.mrb[75].mxu0  ;;  %v4621_v6 = vmul.f32 %v14276_v51, %v13203_v59 }
 0x6b4   : > { %v4619_v53 = vmul.f32 %v13203_v59, %v4328_v52 }
 0x6b8   : > { %v14279_v54 = vpop.f32.mrb[76].mxu0 }
 0x6b9   : > { %v4341_v55 = vpop.f32.mrb[77].mxu0  ;;  %v4624_v42 = vmul.f32 %v14279_v54, %v13203_v59 }
 0x6ba   : > { %v14280_v56 = vpop.f32.mrb[78].mxu0  ;;  %v4622_v49 = vmul.f32 %v13203_v59, %v4341_v55 }
 0x6bb   : > { %v4344_v57 = vpop.f32.mrb[79].mxu0  ;;  %v4625_v50 = vmul.f32 %v14280_v56, %v13203_v59 }
 0x6bc   : > { %v4623_v51 = vmul.f32 %v13203_v59, %v4344_v57  ;;  %v15228_v57 = vld [vmem:[%s19294_s2 + $0x8] sm:$0xff]  }
 0x6c0   : > { %v14283_v61 = vpop.f32.mrb[80].mxu0 }
 0x6c1   : > { %v4634_v63 = vmul.f32 %v14283_v61, %v13204_v60  ;;  %v4357_v1 = vpop.f32.mrb[81].mxu0 }
 0x6c2   : > { %v4632_v3 = vmul.f32 %v13204_v60, %v4357_v1  ;;  %v14284_v4 = vpop.f32.mrb[82].mxu0 }
 0x6c3   : > { %v4642_v5 = vadd.f32 %v4634_v63, %v4620_v62  ;;  %v4635_v7 = vmul.f32 %v14284_v4, %v13204_v60  ;;  %v4360_v48 = vpop.f32.mrb[83].mxu0 }
 0x6c4   : > { %v4640_v0 = vadd.f32 %v4632_v3, %v4618_v2  ;;  %v4633_v46 = vmul.f32 %v13204_v60, %v4360_v48 }
 0x6c5   : > { %v4643_v45 = vadd.f32 %v4635_v7, %v4621_v6 }
 0x6c6   : > { %v4641_v44 = vadd.f32 %v4633_v46, %v4619_v53  ;;  %v13205_v46 = vld [vmem:[%s19293_s12 + $0x2] ss:$0 sm:$0xff] }
 0x6c8   : > { %v14287_v43 = vpop.f32.mrb[84].mxu0 }
 0x6c9   : > { %v4638_v41 = vmul.f32 %v14287_v43, %v13204_v60  ;;  %v4373_v38 = vpop.f32.mrb[85].mxu0 }
 0x6ca   : > { %v4636_v61 = vmul.f32 %v13204_v60, %v4373_v38  ;;  %v14288_v37 = vpop.f32.mrb[86].mxu0 }
 0x6cb   : > { %v4646_v1 = vadd.f32 %v4638_v41, %v4624_v42  ;;  %v4639_v36 = vmul.f32 %v14288_v37, %v13204_v60  ;;  %v4376_v62 = vpop.f32.mrb[87].mxu0  ;;  %v15227_v42 = vld [vmem:[%s19294_s2] sm:$0xff]  }
 0x6cc   : > { %v4644_v63 = vadd.f32 %v4636_v61, %v4622_v49  ;;  %v4637_v2 = vmul.f32 %v13204_v60, %v4376_v62  ;;  %14373 = vmatprep.subr.bf16.mxu1 %v15227_v42 }
 0x6cd   : > { %v4647_v52 = vadd.f32 %v4639_v36, %v4625_v50  ;;  %14374 = vmatpush3.bf16.msra.mxu1 %v15227_v42 }
 0x6ce   : > { %v4645_v3 = vadd.f32 %v4637_v2, %v4623_v51  ;;  %14375 = vmatprep.subr.bf16.mxu1 %v15228_v57 }
 0x6d0   : > { %v14291_v4 = vpop.f32.mrb[88].mxu0 }
 0x6d1   : > { %v4656_v6 = vmul.f32 %v14291_v4, %v13205_v46  ;;  %v4389_v54 = vpop.f32.mrb[89].mxu0  ;;  %14376 = vmatpush3.bf16.msra.mxu1 %v15228_v57  ;;  %v13206_v4 = vld [vmem:[%s19293_s12 + $0x3] ss:$0 sm:$0xff] }
 0x6d2   : > { %v4654_v43 = vmul.f32 %v13205_v46, %v4389_v54  ;;  %v14292_v7 = vpop.f32.mrb[90].mxu0 }
 0x6d3   : > { %v4664_v55 = vadd.f32 %v4656_v6, %v4642_v5  ;;  %v4657_v38 = vmul.f32 %v14292_v7, %v13205_v46  ;;  %v4392_v48 = vpop.f32.mrb[91].mxu0 }
 0x6d4   : > { %v4662_v56 = vadd.f32 %v4654_v43, %v4640_v0  ;;  %v4655_v41 = vmul.f32 %v13205_v46, %v4392_v48 }
 0x6d5   : > { %v4665_v37 = vadd.f32 %v4657_v38, %v4643_v45 }
 0x6d6   : > { %v4663_v59 = vadd.f32 %v4655_v41, %v4641_v44 }
 0x6d8   : > { %v14295_v60 = vpop.f32.mrb[92].mxu0 }
 0x6d9   : > { %v4660_v36 = vmul.f32 %v14295_v60, %v13205_v46  ;;  %v4405_v53 = vpop.f32.mrb[93].mxu0 }
 0x6da   : > { %v4658_v49 = vmul.f32 %v13205_v46, %v4405_v53  ;;  %v14296_v61 = vpop.f32.mrb[94].mxu0 }
 0x6db   : > { %v4668_v50 = vadd.f32 %v4660_v36, %v4646_v1  ;;  %v4661_v62 = vmul.f32 %v14296_v61, %v13205_v46  ;;  %v4408_v5 = vpop.f32.mrb[95].mxu0 }
 0x6dc   : > { %v4666_v51 = vadd.f32 %v4658_v49, %v4644_v63  ;;  %v4659_v2 = vmul.f32 %v13205_v46, %v4408_v5 }
 0x6dd   : > { %v4669_v0 = vadd.f32 %v4661_v62, %v4647_v52 }
 0x6de   : > { %v4667_v45 = vadd.f32 %v4659_v2, %v4645_v3 }
 0x6e0   : > { %v14299_v6 = vpop.f32.mrb[96].mxu0 }
 0x6e1   : > { %v4678_v44 = vmul.f32 %v14299_v6, %v13206_v4  ;;  %v4421_v54 = vpop.f32.mrb[97].mxu0 }
 0x6e2   : > { %v4676_v43 = vmul.f32 %v13206_v4, %v4421_v54  ;;  %v14300_v7 = vpop.f32.mrb[98].mxu0 }
 0x6e3   : > { %v4686_v38 = vadd.f32 %v4678_v44, %v4664_v55  ;;  %v4679_v48 = vmul.f32 %v14300_v7, %v13206_v4  ;;  %v4424_v41 = vpop.f32.mrb[99].mxu0  ;;  %v13207_v55 = vld [vmem:[%s19293_s12 + $0x4] ss:$0 sm:$0xff] }
 0x6e4   : > { %v4684_v42 = vadd.f32 %v4676_v43, %v4662_v56  ;;  %v4677_v60 = vmul.f32 %v13206_v4, %v4424_v41 }
 0x6e5   : > { %v4687_v1 = vadd.f32 %v4679_v48, %v4665_v37 }
 0x6e6   : > { %v4685_v36 = vadd.f32 %v4677_v60, %v4663_v59 }
 0x6e8   : > { %v14303_v53 = vpop.f32.mrb[100].mxu0 }
 0x6e9   : > { %v4682_v63 = vmul.f32 %v14303_v53, %v13206_v4  ;;  %v4437_v46 = vpop.f32.mrb[101].mxu0 }
 0x6ea   : > { %v4680_v57 = vmul.f32 %v13206_v4, %v4437_v46  ;;  %v14304_v52 = vpop.f32.mrb[102].mxu0 }
 0x6eb   : > { %v4690_v3 = vadd.f32 %v4682_v63, %v4668_v50  ;;  %v4683_v49 = vmul.f32 %v14304_v52, %v13206_v4  ;;  %v4440_v61 = vpop.f32.mrb[103].mxu0 }
 0x6ec   : > { %v4688_v62 = vadd.f32 %v4680_v57, %v4666_v51  ;;  %v4681_v5 = vmul.f32 %v13206_v4, %v4440_v61 }
 0x6ed   : > { %v4691_v2 = vadd.f32 %v4683_v49, %v4669_v0 }
 0x6ee   : > { %v4689_v6 = vadd.f32 %v4681_v5, %v4667_v45 }
 0x6f0   : > { %v14307_v44 = vpop.f32.mrb[104].mxu0 }
 0x6f1   : > { %v4700_v54 = vmul.f32 %v14307_v44, %v13207_v55  ;;  %v4453_v56 = vpop.f32.mrb[105].mxu0 }
 0x6f2   : > { %v4698_v43 = vmul.f32 %v13207_v55, %v4453_v56  ;;  %v14308_v7 = vpop.f32.mrb[106].mxu0 }
 0x6f3   : > { %v4708_v37 = vadd.f32 %v4700_v54, %v4686_v38  ;;  %v4701_v59 = vmul.f32 %v14308_v7, %v13207_v55  ;;  %v4456_v48 = vpop.f32.mrb[107].mxu0  ;;  %v13208_v38 = vld [vmem:[%s19293_s12 + $0x5] ss:$0 sm:$0xff] }
 0x6f4   : > { %v4706_v41 = vadd.f32 %v4698_v43, %v4684_v42  ;;  %v4699_v60 = vmul.f32 %v13207_v55, %v4456_v48 }
 0x6f5   : > { %v4709_v53 = vadd.f32 %v4701_v59, %v4687_v1 }
 0x6f6   : > { %v4707_v50 = vadd.f32 %v4699_v60, %v4685_v36 }
 0x6f8   : > { %v14311_v63 = vpop.f32.mrb[108].mxu0 }
 0x6f9   : > { %v4704_v46 = vmul.f32 %v14311_v63, %v13207_v55  ;;  %v4469_v51 = vpop.f32.mrb[109].mxu0 }
 0x6fa   : > { %v4702_v4 = vmul.f32 %v13207_v55, %v4469_v51  ;;  %v14312_v0 = vpop.f32.mrb[110].mxu0 }
 0x6fb   : > { %v4712_v45 = vadd.f32 %v4704_v46, %v4690_v3  ;;  %v4705_v57 = vmul.f32 %v14312_v0, %v13207_v55  ;;  %v4472_v52 = vpop.f32.mrb[111].mxu0 }
 0x6fc   : > { %v4710_v49 = vadd.f32 %v4702_v4, %v4688_v62  ;;  %v4703_v61 = vmul.f32 %v13207_v55, %v4472_v52 }
 0x6fd   : > { %v4713_v5 = vadd.f32 %v4705_v57, %v4691_v2 }
 0x6fe   : > { %v4711_v44 = vadd.f32 %v4703_v61, %v4689_v6 }
 0x700   : > { %v14315_v54 = vpop.f32.mrb[112].mxu0 }
 0x701   : > { %v4722_v56 = vmul.f32 %v14315_v54, %v13208_v38  ;;  %v4485_v42 = vpop.f32.mrb[113].mxu0 }
 0x702   : > { %v4720_v43 = vmul.f32 %v13208_v38, %v4485_v42  ;;  %v14316_v7 = vpop.f32.mrb[114].mxu0 }
 0x703   : > { %v4730_v1 = vadd.f32 %v4722_v56, %v4708_v37  ;;  %v4723_v36 = vmul.f32 %v14316_v7, %v13208_v38  ;;  %v4488_v59 = vpop.f32.mrb[115].mxu0  ;;  %v13209_v37 = vld [vmem:[%s19293_s12 + $0x6] ss:$0 sm:$0xff] }
 0x704   : > { %v4728_v48 = vadd.f32 %v4720_v43, %v4706_v41  ;;  %v4721_v60 = vmul.f32 %v13208_v38, %v4488_v59 }
 0x705   : > { %v4731_v63 = vadd.f32 %v4723_v36, %v4709_v53 }
 0x706   : > { %v4729_v3 = vadd.f32 %v4721_v60, %v4707_v50 }
 0x708   : > { %v14319_v46 = vpop.f32.mrb[116].mxu0 }
 0x709   : > { %v4726_v51 = vmul.f32 %v14319_v46, %v13208_v38  ;;  %v4501_v62 = vpop.f32.mrb[117].mxu0 }
 0x70a   : > { %v4724_v55 = vmul.f32 %v13208_v38, %v4501_v62  ;;  %v14320_v2 = vpop.f32.mrb[118].mxu0 }
 0x70b   : > { %v4734_v6 = vadd.f32 %v4726_v51, %v4712_v45  ;;  %v4727_v4 = vmul.f32 %v14320_v2, %v13208_v38  ;;  %v4504_v0 = vpop.f32.mrb[119].mxu0 }
 0x70c   : > { %v4732_v57 = vadd.f32 %v4724_v55, %v4710_v49  ;;  %v4725_v52 = vmul.f32 %v13208_v38, %v4504_v0 }
 0x70d   : > { %v4735_v61 = vadd.f32 %v4727_v4, %v4713_v5 }
 0x70e   : > { %v4733_v54 = vadd.f32 %v4725_v52, %v4711_v44 }
 0x710   : > { %v14323_v56 = vpop.f32.mrb[120].mxu0 }
 0x711   : > { %v4744_v42 = vmul.f32 %v14323_v56, %v13209_v37  ;;  %v4517_v41 = vpop.f32.mrb[121].mxu0 }
 0x712   : > { %v4742_v43 = vmul.f32 %v13209_v37, %v4517_v41  ;;  %v14324_v7 = vpop.f32.mrb[122].mxu0 }
 0x713   : > { %v4752_v53 = vadd.f32 %v4744_v42, %v4730_v1  ;;  %v4745_v50 = vmul.f32 %v14324_v7, %v13209_v37  ;;  %v4520_v36 = vpop.f32.mrb[123].mxu0  ;;  %v13210_v1 = vld [vmem:[%s19293_s12 + $0x7] ss:$0 sm:$0xff] }
 0x714   : > { %v4750_v59 = vadd.f32 %v4742_v43, %v4728_v48  ;;  %v4743_v60 = vmul.f32 %v13209_v37, %v4520_v36 }
 0x715   : > { %v4753_v46 = vadd.f32 %v4745_v50, %v4731_v63 }
 0x716   : > { %v4751_v45 = vadd.f32 %v4743_v60, %v4729_v3 }
 0x718   : > { %v14327_v51 = vpop.f32.mrb[124].mxu0 }
 0x719   : > { %v4748_v62 = vmul.f32 %v14327_v51, %v13209_v37  ;;  %v4533_v49 = vpop.f32.mrb[125].mxu0 }
 0x71a   : > { %v4746_v38 = vmul.f32 %v13209_v37, %v4533_v49  ;;  %v14328_v5 = vpop.f32.mrb[126].mxu0 }
 0x71b   : > { %v4756_v44 = vadd.f32 %v4748_v62, %v4734_v6  ;;  %v4749_v55 = vmul.f32 %v14328_v5, %v13209_v37  ;;  %v4536_v2 = vpop.f32.mrb[127].mxu0 }
 0x71c   : > { %v4754_v4 = vadd.f32 %v4746_v38, %v4732_v57  ;;  %v4747_v0 = vmul.f32 %v13209_v37, %v4536_v2 }
 0x71d   : > { %v4757_v52 = vadd.f32 %v4749_v55, %v4735_v61 }
 0x71e   : > { %v4755_v56 = vadd.f32 %v4747_v0, %v4733_v54 }
 0x720   : > { %v14331_v42 = vpop.f32.mrb[128].mxu0 }
 0x721   : > { %v4766_v41 = vmul.f32 %v14331_v42, %v13210_v1  ;;  %v4549_v48 = vpop.f32.mrb[129].mxu0 }
 0x722   : > { %v4764_v43 = vmul.f32 %v13210_v1, %v4549_v48  ;;  %v14332_v7 = vpop.f32.mrb[130].mxu0 }
 0x723   : > { %v4774_v63 = vadd.f32 %v4766_v41, %v4752_v53  ;;  %v4767_v3 = vmul.f32 %v14332_v7, %v13210_v1  ;;  %v4552_v50 = vpop.f32.mrb[131].mxu0  ;;  %v13211_v53 = vld [vmem:[%s19293_s12 + $0x8] ss:$0 sm:$0xff] }
 0x724   : > { %v4772_v36 = vadd.f32 %v4764_v43, %v4750_v59  ;;  %v4765_v60 = vmul.f32 %v13210_v1, %v4552_v50  ;;  %v13212_v50 = vld [vmem:[#allocation2] ss:$0 sm:$0xff] }
 0x725   : > { %v4775_v51 = vadd.f32 %v4767_v3, %v4753_v46 }
 0x726   : > { %v4773_v6 = vadd.f32 %v4765_v60, %v4751_v45 }
 0x728   : > { %v14335_v62 = vpop.f32.mrb[132].mxu0 }
 0x729   : > { %v4770_v49 = vmul.f32 %v14335_v62, %v13210_v1  ;;  %v4565_v57 = vpop.f32.mrb[133].mxu0 }
 0x72a   : > { %v4768_v37 = vmul.f32 %v13210_v1, %v4565_v57  ;;  %v14336_v61 = vpop.f32.mrb[134].mxu0 }
 0x72b   : > { %v4778_v54 = vadd.f32 %v4770_v49, %v4756_v44  ;;  %v4771_v38 = vmul.f32 %v14336_v61, %v13210_v1  ;;  %v4568_v5 = vpop.f32.mrb[135].mxu0 }
 0x72c   : > { %v4776_v55 = vadd.f32 %v4768_v37, %v4754_v4  ;;  %v4769_v2 = vmul.f32 %v13210_v1, %v4568_v5 }
 0x72d   : > { %v4779_v0 = vadd.f32 %v4771_v38, %v4757_v52 }
 0x72e   : > { %v4777_v42 = vadd.f32 %v4769_v2, %v4755_v56 }
 0x730   : > { %v14339_v41 = vpop.f32.mrb[136].mxu0 }
 0x731   : > { %v4788_v48 = vmul.f32 %v14339_v41, %v13211_v53  ;;  %v4581_v59 = vpop.f32.mrb[137].mxu0 }
 0x732   : > { %v4786_v43 = vmul.f32 %v13211_v53, %v4581_v59  ;;  %v14340_v7 = vpop.f32.mrb[138].mxu0  ;;  %v17656_v59 = vld [vmem:[%s19292_s23 + $0x8] sm:$0xff]  }
 0x733   : > { %v4796_v46 = vadd.f32 %v4788_v48, %v4774_v63  ;;  %v4789_v45 = vmul.f32 %v14340_v7, %v13211_v53  ;;  %v4584_v3 = vpop.f32.mrb[139].mxu0 }
 0x734   : > { %v4794_v60 = vadd.f32 %v4786_v43, %v4772_v36  ;;  %v4787_v62 = vmul.f32 %v13211_v53, %v4584_v3 }
 0x735   : > { %v4797_v57 = vadd.f32 %v4789_v45, %v4775_v51  ;;  %v4810_v49 = vadd.f32 %v13212_v50, %v4796_v46 }
 0x736   : > { %v4795_v44 = vadd.f32 %v4787_v62, %v4773_v6  ;;  %v4808_v1 = vadd.f32 %v13212_v50, %v4794_v60 }
 0x737   : > { %v4811_v4 = vadd.f32 %v13212_v50, %v4797_v57 }
 0x738   : > { %v4809_v52 = vadd.f32 %v13212_v50, %v4795_v44  ;;  %v14343_v56 = vpop.f32.mrb[140].mxu0 }
 0x739   : > { %v4821_v37 = vpack.c.bf16 %v4811_v4, %v4810_v49  ;;  %v4792_v61 = vmul.f32 %v14343_v56, %v13211_v53  ;;  %v4597_v38 = vpop.f32.mrb[141].mxu0 }
 0x73a   : > { %v4820_v5 = vpack.c.bf16 %v4809_v52, %v4808_v1  ;;  %v4790_v2 = vmul.f32 %v13211_v53, %v4597_v38  ;;  %v14344_v63 = vpop.f32.mrb[142].mxu0 }
 0x73b   : > { %v4800_v41 = vadd.f32 %v4792_v61, %v4778_v54  ;;  %v4793_v48 = vmul.f32 %v14344_v63, %v13211_v53  ;;  %v4600_v36 = vpop.f32.mrb[143].mxu0  ;;  %v17663_v54 = vld [vmem:[%s19292_s23 + $0x10] sm:$0xff]  }
 0x73c   : > { %v4798_v51 = vadd.f32 %v4790_v2, %v4776_v55  ;;  %v4791_v6 = vmul.f32 %v13211_v53, %v4600_v36  ;;  %14349 = vmatprep.mubr.msk.bf16.mxu0 %vm4843_vm4, %v4820_v5 }
 0x73d   : > { %v4801_v43 = vadd.f32 %v4793_v48, %v4779_v0  ;;  %14350 = vmatmul.mubr.msk.bf16.vlgmr.msra.gmra.mrb[144].mxu0 %vm4843_vm4, %v4821_v37  ;;  %v4814_v46 = vadd.f32 %v13212_v50, %v4800_v41  ;;  %v17668_v0 = vld [vmem:[%s19292_s23 + $0x18] sm:$0xff]  }
 0x73e   : > { %v4799_v7 = vadd.f32 %v4791_v6, %v4777_v42  ;;  %14358 = vmatpush3.bf16.msra.mxu0 %v17641_v58  ;;  %v4812_v3 = vadd.f32 %v13212_v50, %v4798_v51  ;;  %v15229_v42 = vld [vmem:[%s19294_s2 + $0x10] sm:$0xff]  }
 0x73f   : > { %v4815_v45 = vadd.f32 %v13212_v50, %v4801_v43  ;;  %14359 = vmatprep.subr.bf16.mxu0 %v17656_v59  ;;  %14377 = vmatprep.subr.bf16.mxu1 %v15229_v42 }
 0x740   : > { %v4813_v60 = vadd.f32 %v13212_v50, %v4799_v7  ;;  %14378 = vmatpush3.bf16.msra.mxu1 %v15229_v42 }
 0x741   : > { %v4823_v55 = vpack.c.bf16 %v4815_v45, %v4814_v46 }
 0x742   : > { %v4822_v53 = vpack.c.bf16 %v4813_v60, %v4812_v3  ;;  %14360 = vmatpush3.bf16.msra.mxu0 %v17656_v59 }
 0x743   : > { %14361 = vmatprep.subr.bf16.mxu0 %v17663_v54 }
 0x744   : > { %14353 = vmatprep.mubr.msk.bf16.mxu0 %vm4843_vm4, %v4822_v53 }
 0x745   : > { %14354 = vmatmul.mubr.msk.bf16.gmra.mrb[148].mxu0 %vm4843_vm4, %v4823_v55 }
 0x746   : > { %14362 = vmatpush3.bf16.msra.mxu0 %v17663_v54  ;;  %14365 = vmatprep.mubr.msk.bf16.mxu0 %vm2923_vm3, %v17441_v18  ;;  %v15230_v18 = vld [vmem:[%s19294_s2 + $0x18] sm:$0xff]   ;;  %s19311_s2 = sld [smem:[#allocation50_spill]] }
 0x747   : > { %14363 = vmatprep.subr.bf16.mxu0 %v17668_v0  ;;  %14379 = vmatprep.subr.bf16.mxu1 %v15230_v18 }
 0x748   : > { %14380 = vmatpush3.bf16.msra.mxu1 %v15230_v18 }
 0x74a   : > { %14364 = vmatpush3.bf16.msra.mxu0 %v17668_v0 }
 0x74d   : > { %14366 = vmatmul.mubr.msk.bf16.vlgmr.msra.gmra.mrb[152].mxu0 %vm2923_vm3, %v17445_v25  ;;  %v13213_v25 = vld [vmem:[%s19295_s11] ss:$0 sm:$0xff]  ;;  %s19308_s11 = sld [smem:[#allocation45_spill]] }
 0x74e   : > { %14369 = vmatprep.mubr.msk.bf16.mxu0 %vm2923_vm3, %v17449_v32 }
 0x755   : > { %14370 = vmatmul.mubr.msk.bf16.gmra.mrb[156].mxu0 %vm2923_vm3, %v17453_v39 }
 0x756   : > { %14397 = vmatprep.mubr.msk.bf16.mxu0 %vm2923_vm3, %v17458_v40 }
 0x810   : > { %v14351_v50 = vpop.f32.mrb[144].mxu0 }
 0x811   : > { %v4890_v62 = vpop.f32.mrb[145].mxu0  ;;  %v4899_v1 = vadd.f32 %v14351_v50, %v13213_v25 }
 0x812   : > { %v14352_v57 = vpop.f32.mrb[146].mxu0  ;;  %v4891_v39 = vadd.f32 %v13213_v25, %v4890_v62 }
 0x813   : > { %v4893_v44 = vpop.f32.mrb[147].mxu0  ;;  %v4902_v56 = vadd.f32 %v14352_v57, %v13213_v25  ;;  %v4923_v40 = vmax.f32 %v4899_v1, 0.0 }
 0x814   : > { %v4894_v37 = vadd.f32 %v13213_v25, %v4893_v44  ;;  %v4921_v61 = vmax.f32 %v4891_v39, 0.0 }
 0x815   : > { %v4924_v5 = vmax.f32 %v4902_v56, 0.0  ;;  %v13228_v56 = vld [vmem:[%s19296_s28] ss:$0 sm:$0xff]  ;;  %s12984_s28 = sshll.u32 %s17225_s10, 6 }
 0x816   : > { %v4922_v41 = vmax.f32 %v4894_v37, 0.0 }
 0x818   : > { %v14355_v49 = vpop.f32.mrb[148].mxu0 }
 0x819   : > { %v4906_v4 = vpop.f32.mrb[149].mxu0  ;;  %v4915_v51 = vadd.f32 %v14355_v49, %v13213_v25 }
 0x81a   : > { %v14356_v32 = vpop.f32.mrb[150].mxu0  ;;  %v4907_v7 = vadd.f32 %v13213_v25, %v4906_v4 }
 0x81b   : > { %v4909_v52 = vpop.f32.mrb[151].mxu0  ;;  %v4918_v45 = vadd.f32 %v14356_v32, %v13213_v25  ;;  %v4927_v53 = vmax.f32 %v4915_v51, 0.0 }
 0x81c   : > { %v4910_v60 = vadd.f32 %v13213_v25, %v4909_v52  ;;  %v4925_v42 = vmax.f32 %v4907_v7, 0.0 }
 0x81d   : > { %v4928_v50 = vmax.f32 %v4918_v45, 0.0 }
 0x81e   : > { %v4926_v44 = vmax.f32 %v4910_v60, 0.0 }
 0x820   : > { %v14367_v38 = vpop.f32.mrb[152].mxu0 }
 0x821   : > { %v5004_v2 = vadd.f32 %v14367_v38, %v4923_v40  ;;  %v4995_v63 = vpop.f32.mrb[153].mxu0 }
 0x822   : > { %v4996_v48 = vadd.f32 %v4995_v63, %v4921_v61  ;;  %v14368_v36 = vpop.f32.mrb[154].mxu0 }
 0x823   : > { %v5007_v6 = vadd.f32 %v14368_v36, %v4924_v5  ;;  %v4998_v43 = vpop.f32.mrb[155].mxu0 }
 0x824   : > { %v4999_v46 = vadd.f32 %v4998_v43, %v4922_v41 }
 0x825   : > { %v17688_v3 = vpack.c.bf16 %v5007_v6, %v5004_v2 }
 0x826   : > { %v17690_v55 = vpack.c.bf16 %v4999_v46, %v4996_v48 }
 0x828   : > { %v14371_v18 = vpop.f32.mrb[156].mxu0  ;;  %14381 = vmatprep.mubr.msk.bf16.mxu1 %vm2923_vm3, %v17690_v55 }
 0x829   : > { %v5020_v62 = vadd.f32 %v14371_v18, %v4927_v53  ;;  %v5011_v57 = vpop.f32.mrb[157].mxu0  ;;  %14382 = vmatmul.mubr.msk.bf16.vlgmr.msra.gmra.mrb[144].mxu1 %vm2923_vm3, %v17688_v3 }
 0x82a   : > { %v5012_v49 = vadd.f32 %v5011_v57, %v4925_v42  ;;  %v14372_v4 = vpop.f32.mrb[158].mxu0 }
 0x82b   : > { %v5023_v32 = vadd.f32 %v14372_v4, %v4928_v50  ;;  %v5014_v25 = vpop.f32.mrb[159].mxu0 }
 0x82c   : > { %v5015_v1 = vadd.f32 %v5014_v25, %v4926_v44 }
 0x82d   : > { %v17696_v52 = vpack.c.bf16 %v5023_v32, %v5020_v62 }
 0x82e   : > { %v17698_v39 = vpack.c.bf16 %v5015_v1, %v5012_v49 }
 0x830   : > { %14385 = vmatprep.mubr.msk.bf16.mxu1 %vm2923_vm3, %v17698_v39 }
 0x831   : > { %14386 = vmatmul.mubr.msk.bf16.gmra.mrb[148].mxu1 %vm2923_vm3, %v17696_v52 }
 0x8fc   : > { %v14383_v37 = vpop.f32.mrb[144].mxu1 }
 0x8fd   : > { %v5134_v40 = vadd.f32 %v14383_v37, %v13228_v56  ;;  %v5125_v61 = vpop.f32.mrb[145].mxu1 }
 0x8fe   : > { %v5126_v38 = vadd.f32 %v13228_v56, %v5125_v61  ;;  %v14384_v5 = vpop.f32.mrb[146].mxu1 }
 0x8ff   : > { %v5137_v2 = vadd.f32 %v14384_v5, %v13228_v56  ;;  %v5128_v63 = vpop.f32.mrb[147].mxu1  ;;  %v5158_v48 = vmax.f32 %v5134_v40, 0.0 }
 0x900   : > { %v5129_v41 = vadd.f32 %v13228_v56, %v5128_v63  ;;  %v5156_v51 = vmax.f32 %v5126_v38, 0.0 }
 0x901   : > { %v5159_v36 = vmax.f32 %v5137_v2, 0.0 }
 0x902   : > { %v5157_v6 = vmax.f32 %v5129_v41, 0.0 }
 0x903   : > { %v5165_v43 = vpack.c.bf16 %v5159_v36, %v5158_v48 }
 0x904   : > { %v5164_v7 = vpack.c.bf16 %v5157_v6, %v5156_v51  ;;  %v14387_v46 = vpop.f32.mrb[148].mxu1 }
 0x905   : > { %v5150_v45 = vadd.f32 %v14387_v46, %v13228_v56  ;;  %v5141_v60 = vpop.f32.mrb[149].mxu1 }
 0x906   : > { %v5142_v53 = vadd.f32 %v13228_v56, %v5141_v60  ;;  %v14388_v42 = vpop.f32.mrb[150].mxu1  ;;  %14389 = vmatprep.subr.bf16.mxu0 %v5164_v7 }
 0x907   : > { %v5153_v18 = vadd.f32 %v14388_v42, %v13228_v56  ;;  %v5144_v50 = vpop.f32.mrb[151].mxu1  ;;  %14390 = vmatpush3.bf16.msra.mxu0 %v5164_v7  ;;  %v5162_v57 = vmax.f32 %v5150_v45, 0.0 }
 0x908   : > { %v5145_v62 = vadd.f32 %v13228_v56, %v5144_v50  ;;  %14391 = vmatprep.subr.bf16.mxu0 %v5165_v43  ;;  %v5160_v49 = vmax.f32 %v5142_v53, 0.0 }
 0x909   : > { %v5163_v44 = vmax.f32 %v5153_v18, 0.0 }
 0x90a   : > { %v5161_v4 = vmax.f32 %v5145_v62, 0.0 }
 0x90b   : > { %v5167_v32 = vpack.c.bf16 %v5163_v44, %v5162_v57  ;;  %14392 = vmatpush3.bf16.msra.mxu0 %v5165_v43 }
 0x90c   : > { %v5166_v25 = vpack.c.bf16 %v5161_v4, %v5160_v49  ;;  %v13275_v49 = vld [vmem:[%s19307_s1 + $0x2] ss:$0 sm:$0xff] }
 0x90e   : > { %14393 = vmatprep.subr.bf16.mxu0 %v5166_v25 }
 0x90f   : > { %14394 = vmatpush3.bf16.msra.mxu0 %v5166_v25 }
 0x910   : > { %14395 = vmatprep.subr.bf16.mxu0 %v5167_v32 }
 0x913   : > { %14396 = vmatpush3.bf16.msra.mxu0 %v5167_v32 }
 0x916   : > { %14398 = vmatmul.mubr.msk.bf16.vlgmr.msra.gmra.mrb[160].mxu0 %vm2923_vm3, %v17464_v8  ;;  %v19298_v8 = vld [vmem:[#allocation108_spill] sm:$0xff] }
 0x917   : > { %14401 = vmatprep.mubr.msk.bf16.mxu0 %vm2923_vm3, %v17467_v47  ;;  %v19299_v47 = vld [vmem:[#allocation109_spill] sm:$0xff] }
 0x91e   : > { %14402 = vmatmul.mubr.msk.bf16.gmra.mrb[164].mxu0 %vm2923_vm3, %v17474_v9  ;;  %v19300_v9 = vld [vmem:[#allocation110_spill] sm:$0xff] }
 0x91f   : > { %14405 = vmatprep.mubr.msk.bf16.mxu0 %vm2923_vm3, %v17477_v10  ;;  %v19301_v10 = vld [vmem:[#allocation111_spill] sm:$0xff] }
 0x926   : > { %14406 = vmatmul.mubr.msk.bf16.gmra.mrb[168].mxu0 %vm2923_vm3, %v17484_v11  ;;  %v19302_v11 = vld [vmem:[#allocation112_spill] sm:$0xff] }
 0x927   : > { %14409 = vmatprep.mubr.msk.bf16.mxu0 %vm2923_vm3, %v17487_v12  ;;  %v19303_v12 = vld [vmem:[#allocation113_spill] sm:$0xff] }
 0x92e   : > { %14410 = vmatmul.mubr.msk.bf16.gmra.mrb[172].mxu0 %vm2923_vm3, %v17494_v13  ;;  %v19304_v13 = vld [vmem:[#allocation114_spill] sm:$0xff] }
 0x92f   : > { %14413 = vmatprep.mubr.msk.bf16.mxu0 %vm2923_vm3, %v17497_v14  ;;  %v19305_v14 = vld [vmem:[#allocation115_spill] sm:$0xff] }
 0x936   : > { %14414 = vmatmul.mubr.msk.bf16.gmra.mrb[176].mxu0 %vm2923_vm3, %v17504_v15  ;;  %v19306_v15 = vld [vmem:[#allocation116_spill] sm:$0xff] }
 0x937   : > { %14417 = vmatprep.mubr.msk.bf16.mxu0 %vm2923_vm3, %v17507_v16 }
 0x93e   : > { %14418 = vmatmul.mubr.msk.bf16.gmra.mrb[180].mxu0 %vm2923_vm3, %v17514_v17 }
 0x93f   : > { %14421 = vmatprep.mubr.msk.bf16.mxu0 %vm2923_vm3, %v17517_v19 }
 0x946   : > { %14422 = vmatmul.mubr.msk.bf16.gmra.mrb[184].mxu0 %vm2923_vm3, %v17524_v20 }
 0x947   : > { %14425 = vmatprep.mubr.msk.bf16.mxu0 %vm2923_vm3, %v17527_v21  ;;  %v15231_v21 = vld [vmem:[%s19297_s26] sm:$0xff]  }
 0x948   : > { %14469 = vmatprep.subr.bf16.mxu1 %v15231_v21 }
 0x949   : > { %14470 = vmatpush3.bf16.msra.mxu1 %v15231_v21 }
 0x94e   : > { %14426 = vmatmul.mubr.msk.bf16.gmra.mrb[188].mxu0 %vm2923_vm3, %v17534_v22  ;;  %v15232_v22 = vld [vmem:[%s19297_s26 + $0x8] sm:$0xff]  }
 0x94f   : > { %14429 = vmatprep.mubr.msk.bf16.mxu0 %vm2923_vm3, %v17537_v23  ;;  %14471 = vmatprep.subr.bf16.mxu1 %v15232_v22 }
 0x950   : > { %14472 = vmatpush3.bf16.msra.mxu1 %v15232_v22 }
 0x951   : > { %14481 = vmatprep.subr.bf16.mxu1 %v17641_v58 }
 0x956   : > { %14430 = vmatmul.mubr.msk.bf16.gmra.mrb[192].mxu0 %vm2923_vm3, %v17544_v24 }
 0x957   : > { %14433 = vmatprep.mubr.msk.bf16.mxu0 %vm2923_vm3, %v17547_v26 }
 0x95e   : > { %14434 = vmatmul.mubr.msk.bf16.gmra.mrb[196].mxu0 %vm2923_vm3, %v17554_v27 }
 0x95f   : > { %14437 = vmatprep.mubr.msk.bf16.mxu0 %vm2923_vm3, %v17557_v28  ;;  %v13273_v28 = vld [vmem:[%s19307_s1] ss:$0 sm:$0xff] }
 0x966   : > { %14438 = vmatmul.mubr.msk.bf16.gmra.mrb[200].mxu0 %vm2923_vm3, %v17564_v29  ;;  %v13274_v29 = vld [vmem:[%s19307_s1 + $0x1] ss:$0 sm:$0xff] }
 0x967   : > { %14441 = vmatprep.mubr.msk.bf16.mxu0 %vm2923_vm3, %v17567_v30 }
 0x96e   : > { %14442 = vmatmul.mubr.msk.bf16.gmra.mrb[204].mxu0 %vm2923_vm3, %v17574_v31 }
 0x96f   : > { %14445 = vmatprep.mubr.msk.bf16.mxu0 %vm2923_vm3, %v17577_v33 }
 0x976   : > { %14446 = vmatmul.mubr.msk.bf16.gmra.mrb[208].mxu0 %vm2923_vm3, %v17584_v34 }
 0x977   : > { %14449 = vmatprep.mubr.msk.bf16.mxu0 %vm2923_vm3, %v17587_v35 }
 0x97e   : > { %14450 = vmatmul.mubr.msk.bf16.gmra.mrb[212].mxu0 %vm2923_vm3, %v19298_v8 }
 0x97f   : > { %14453 = vmatprep.mubr.msk.bf16.mxu0 %vm2923_vm3, %v19299_v47 }
 0x986   : > { %14454 = vmatmul.mubr.msk.bf16.gmra.mrb[216].mxu0 %vm2923_vm3, %v19300_v9 }
 0x987   : > { %14457 = vmatprep.mubr.msk.bf16.mxu0 %vm2923_vm3, %v19301_v10 }
 0x98e   : > { %14458 = vmatmul.mubr.msk.bf16.gmra.mrb[220].mxu0 %vm2923_vm3, %v19302_v11 }
 0x98f   : > { %14461 = vmatprep.mubr.msk.bf16.mxu0 %vm2923_vm3, %v19303_v12 }
 0x996   : > { %14462 = vmatmul.mubr.msk.bf16.gmra.mrb[224].mxu0 %vm2923_vm3, %v19304_v13 }
 0x997   : > { %14465 = vmatprep.mubr.msk.bf16.mxu0 %vm2923_vm3, %v19305_v14 }
 0x99e   : > { %14466 = vmatmul.mubr.msk.bf16.gmra.mrb[228].mxu0 %vm2923_vm3, %v19306_v15 }
 0x9e9   : > { %v14399_v16 = vpop.f32.mrb[160].mxu0 }
 0x9ea   : > { %v5202_v17 = vpop.f32.mrb[161].mxu0  ;;  %v5497_v31 = vmul.f32 %v14399_v16, %v13273_v28 }
 0x9eb   : > { %v14400_v19 = vpop.f32.mrb[162].mxu0  ;;  %v5495_v35 = vmul.f32 %v13273_v28, %v5202_v17 }
 0x9ec   : > { %v5205_v20 = vpop.f32.mrb[163].mxu0  ;;  %v5498_v37 = vmul.f32 %v14400_v19, %v13273_v28 }
 0x9ed   : > { %v5496_v5 = vmul.f32 %v13273_v28, %v5205_v20 }
 0x9f1   : > { %v14403_v23 = vpop.f32.mrb[164].mxu0 }
 0x9f2   : > { %v5218_v24 = vpop.f32.mrb[165].mxu0  ;;  %v5501_v58 = vmul.f32 %v14403_v23, %v13273_v28 }
 0x9f3   : > { %v14404_v26 = vpop.f32.mrb[166].mxu0  ;;  %v5499_v43 = vmul.f32 %v13273_v28, %v5218_v24 }
 0x9f4   : > { %v5221_v27 = vpop.f32.mrb[167].mxu0  ;;  %v5502_v45 = vmul.f32 %v14404_v26, %v13273_v28 }
 0x9f5   : > { %v5500_v18 = vmul.f32 %v13273_v28, %v5221_v27 }
 0x9f9   : > { %v14407_v30 = vpop.f32.mrb[168].mxu0 }
 0x9fa   : > { %v5511_v33 = vmul.f32 %v14407_v30, %v13274_v29  ;;  %v5234_v34 = vpop.f32.mrb[169].mxu0  ;;  %v13276_v30 = vld [vmem:[%s19307_s1 + $0x3] ss:$0 sm:$0xff] }
 0x9fb   : > { %v5509_v1 = vmul.f32 %v13274_v29, %v5234_v34  ;;  %v14408_v56 = vpop.f32.mrb[170].mxu0 }
 0x9fc   : > { %v5519_v40 = vadd.f32 %v5511_v33, %v5497_v31  ;;  %v5512_v61 = vmul.f32 %v14408_v56, %v13274_v29  ;;  %v5237_v38 = vpop.f32.mrb[171].mxu0 }
 0x9fd   : > { %v5517_v2 = vadd.f32 %v5509_v1, %v5495_v35  ;;  %v5510_v63 = vmul.f32 %v13274_v29, %v5237_v38 }
 0x9fe   : > { %v5520_v41 = vadd.f32 %v5512_v61, %v5498_v37 }
 0x9ff   : > { %v5518_v48 = vadd.f32 %v5510_v63, %v5496_v5 }
 0xa01   : > { %v14411_v36 = vpop.f32.mrb[172].mxu0 }
 0xa02   : > { %v5515_v51 = vmul.f32 %v14411_v36, %v13274_v29  ;;  %v5250_v6 = vpop.f32.mrb[173].mxu0 }
 0xa03   : > { %v5513_v7 = vmul.f32 %v13274_v29, %v5250_v6  ;;  %v14412_v46 = vpop.f32.mrb[174].mxu0 }
 0xa04   : > { %v5523_v60 = vadd.f32 %v5515_v51, %v5501_v58  ;;  %v5516_v53 = vmul.f32 %v14412_v46, %v13274_v29  ;;  %v5253_v42 = vpop.f32.mrb[175].mxu0 }
 0xa05   : > { %v5521_v50 = vadd.f32 %v5513_v7, %v5499_v43  ;;  %v5514_v62 = vmul.f32 %v13274_v29, %v5253_v42 }
 0xa06   : > { %v5524_v57 = vadd.f32 %v5516_v53, %v5502_v45  ;;  %v13277_v53 = vld [vmem:[%s19307_s1 + $0x4] ss:$0 sm:$0xff] }
 0xa07   : > { %v5522_v44 = vadd.f32 %v5514_v62, %v5500_v18 }
 0xa09   : > { %v14415_v4 = vpop.f32.mrb[176].mxu0 }
 0xa0a   : > { %v5533_v32 = vmul.f32 %v14415_v4, %v13275_v49  ;;  %v5266_v25 = vpop.f32.mrb[177].mxu0 }
 0xa0b   : > { %v5531_v8 = vmul.f32 %v13275_v49, %v5266_v25  ;;  %v14416_v47 = vpop.f32.mrb[178].mxu0 }
 0xa0c   : > { %v5541_v9 = vadd.f32 %v5533_v32, %v5519_v40  ;;  %v5534_v10 = vmul.f32 %v14416_v47, %v13275_v49  ;;  %v5269_v11 = vpop.f32.mrb[179].mxu0 }
 0xa0d   : > { %v5539_v12 = vadd.f32 %v5531_v8, %v5517_v2  ;;  %v5532_v13 = vmul.f32 %v13275_v49, %v5269_v11 }
 0xa0e   : > { %v5542_v14 = vadd.f32 %v5534_v10, %v5520_v41 }
 0xa0f   : > { %v5540_v15 = vadd.f32 %v5532_v13, %v5518_v48 }
 0xa11   : > { %v14419_v16 = vpop.f32.mrb[180].mxu0 }
 0xa12   : > { %v5537_v17 = vmul.f32 %v14419_v16, %v13275_v49  ;;  %v5282_v19 = vpop.f32.mrb[181].mxu0 }
 0xa13   : > { %v5535_v20 = vmul.f32 %v13275_v49, %v5282_v19  ;;  %v14420_v21 = vpop.f32.mrb[182].mxu0 }
 0xa14   : > { %v5545_v22 = vadd.f32 %v5537_v17, %v5523_v60  ;;  %v5538_v23 = vmul.f32 %v14420_v21, %v13275_v49  ;;  %v5285_v24 = vpop.f32.mrb[183].mxu0 }
 0xa15   : > { %v5543_v26 = vadd.f32 %v5535_v20, %v5521_v50  ;;  %v5536_v27 = vmul.f32 %v13275_v49, %v5285_v24 }
 0xa16   : > { %v5546_v28 = vadd.f32 %v5538_v23, %v5524_v57 }
 0xa17   : > { %v5544_v29 = vadd.f32 %v5536_v27, %v5522_v44 }
 0xa19   : > { %v14423_v31 = vpop.f32.mrb[184].mxu0 }
 0xa1a   : > { %v5555_v33 = vmul.f32 %v14423_v31, %v13276_v30  ;;  %v5298_v34 = vpop.f32.mrb[185].mxu0 }
 0xa1b   : > { %v5553_v35 = vmul.f32 %v13276_v30, %v5298_v34  ;;  %v14424_v1 = vpop.f32.mrb[186].mxu0 }
 0xa1c   : > { %v5563_v56 = vadd.f32 %v5555_v33, %v5541_v9  ;;  %v5556_v37 = vmul.f32 %v14424_v1, %v13276_v30  ;;  %v5301_v40 = vpop.f32.mrb[187].mxu0 }
 0xa1d   : > { %v5561_v61 = vadd.f32 %v5553_v35, %v5539_v12  ;;  %v5554_v38 = vmul.f32 %v13276_v30, %v5301_v40 }
 0xa1e   : > { %v5564_v5 = vadd.f32 %v5556_v37, %v5542_v14 }
 0xa1f   : > { %v5562_v2 = vadd.f32 %v5554_v38, %v5540_v15 }
 0xa21   : > { %v14427_v63 = vpop.f32.mrb[188].mxu0 }
 0xa22   : > { %v5559_v41 = vmul.f32 %v14427_v63, %v13276_v30  ;;  %v5314_v48 = vpop.f32.mrb[189].mxu0 }
 0xa23   : > { %v5557_v36 = vmul.f32 %v13276_v30, %v5314_v48  ;;  %v14428_v58 = vpop.f32.mrb[190].mxu0 }
 0xa24   : > { %v5567_v51 = vadd.f32 %v5559_v41, %v5545_v22  ;;  %v5560_v6 = vmul.f32 %v14428_v58, %v13276_v30  ;;  %v5317_v43 = vpop.f32.mrb[191].mxu0  ;;  %v13278_v22 = vld [vmem:[%s19307_s1 + $0x5] ss:$0 sm:$0xff] }
 0xa25   : > { %v5565_v7 = vadd.f32 %v5557_v36, %v5543_v26  ;;  %v5558_v46 = vmul.f32 %v13276_v30, %v5317_v43 }
 0xa26   : > { %v5568_v45 = vadd.f32 %v5560_v6, %v5546_v28 }
 0xa27   : > { %v5566_v60 = vadd.f32 %v5558_v46, %v5544_v29 }
 0xa29   : > { %v14431_v42 = vpop.f32.mrb[192].mxu0 }
 0xa2a   : > { %v5577_v18 = vmul.f32 %v14431_v42, %v13277_v53  ;;  %v5330_v50 = vpop.f32.mrb[193].mxu0 }
 0xa2b   : > { %v5575_v62 = vmul.f32 %v13277_v53, %v5330_v50  ;;  %v14432_v57 = vpop.f32.mrb[194].mxu0 }
 0xa2c   : > { %v5585_v44 = vadd.f32 %v5577_v18, %v5563_v56  ;;  %v5578_v49 = vmul.f32 %v14432_v57, %v13277_v53  ;;  %v5333_v4 = vpop.f32.mrb[195].mxu0 }
 0xa2d   : > { %v5583_v32 = vadd.f32 %v5575_v62, %v5561_v61  ;;  %v5576_v25 = vmul.f32 %v13277_v53, %v5333_v4 }
 0xa2e   : > { %v5586_v8 = vadd.f32 %v5578_v49, %v5564_v5 }
 0xa2f   : > { %v5584_v47 = vadd.f32 %v5576_v25, %v5562_v2 }
 0xa31   : > { %v14435_v9 = vpop.f32.mrb[196].mxu0 }
 0xa32   : > { %v5581_v10 = vmul.f32 %v14435_v9, %v13277_v53  ;;  %v5346_v11 = vpop.f32.mrb[197].mxu0 }
 0xa33   : > { %v5579_v12 = vmul.f32 %v13277_v53, %v5346_v11  ;;  %v14436_v13 = vpop.f32.mrb[198].mxu0 }
 0xa34   : > { %v5589_v14 = vadd.f32 %v5581_v10, %v5567_v51  ;;  %v5582_v15 = vmul.f32 %v14436_v13, %v13277_v53  ;;  %v5349_v16 = vpop.f32.mrb[199].mxu0  ;;  %v13279_v51 = vld [vmem:[%s19307_s1 + $0x6] ss:$0 sm:$0xff] }
 0xa35   : > { %v5587_v17 = vadd.f32 %v5579_v12, %v5565_v7  ;;  %v5580_v19 = vmul.f32 %v13277_v53, %v5349_v16 }
 0xa36   : > { %v5590_v20 = vadd.f32 %v5582_v15, %v5568_v45 }
 0xa37   : > { %v5588_v21 = vadd.f32 %v5580_v19, %v5566_v60 }
 0xa39   : > { %v14439_v23 = vpop.f32.mrb[200].mxu0 }
 0xa3a   : > { %v5599_v24 = vmul.f32 %v14439_v23, %v13278_v22  ;;  %v5362_v26 = vpop.f32.mrb[201].mxu0 }
 0xa3b   : > { %v5597_v27 = vmul.f32 %v13278_v22, %v5362_v26  ;;  %v14440_v28 = vpop.f32.mrb[202].mxu0 }
 0xa3c   : > { %v5607_v29 = vadd.f32 %v5599_v24, %v5585_v44  ;;  %v5600_v30 = vmul.f32 %v14440_v28, %v13278_v22  ;;  %v5365_v31 = vpop.f32.mrb[203].mxu0 }
 0xa3d   : > { %v5605_v33 = vadd.f32 %v5597_v27, %v5583_v32  ;;  %v5598_v34 = vmul.f32 %v13278_v22, %v5365_v31 }
 0xa3e   : > { %v5608_v35 = vadd.f32 %v5600_v30, %v5586_v8 }
 0xa3f   : > { %v5606_v1 = vadd.f32 %v5598_v34, %v5584_v47 }
 0xa41   : > { %v14443_v56 = vpop.f32.mrb[204].mxu0 }
 0xa42   : > { %v5603_v37 = vmul.f32 %v14443_v56, %v13278_v22  ;;  %v5378_v40 = vpop.f32.mrb[205].mxu0 }
 0xa43   : > { %v5601_v61 = vmul.f32 %v13278_v22, %v5378_v40  ;;  %v14444_v38 = vpop.f32.mrb[206].mxu0 }
 0xa44   : > { %v5611_v5 = vadd.f32 %v5603_v37, %v5589_v14  ;;  %v5604_v2 = vmul.f32 %v14444_v38, %v13278_v22  ;;  %v5381_v63 = vpop.f32.mrb[207].mxu0  ;;  %v13280_v14 = vld [vmem:[%s19307_s1 + $0x7] ss:$0 sm:$0xff] }
 0xa45   : > { %v5609_v41 = vadd.f32 %v5601_v61, %v5587_v17  ;;  %v5602_v48 = vmul.f32 %v13278_v22, %v5381_v63 }
 0xa46   : > { %v5612_v36 = vadd.f32 %v5604_v2, %v5590_v20 }
 0xa47   : > { %v5610_v58 = vadd.f32 %v5602_v48, %v5588_v21 }
 0xa49   : > { %v14447_v6 = vpop.f32.mrb[208].mxu0 }
 0xa4a   : > { %v5621_v43 = vmul.f32 %v14447_v6, %v13279_v51  ;;  %v5394_v7 = vpop.f32.mrb[209].mxu0 }
 0xa4b   : > { %v5619_v46 = vmul.f32 %v13279_v51, %v5394_v7  ;;  %v14448_v45 = vpop.f32.mrb[210].mxu0 }
 0xa4c   : > { %v5629_v60 = vadd.f32 %v5621_v43, %v5607_v29  ;;  %v5622_v53 = vmul.f32 %v14448_v45, %v13279_v51  ;;  %v5397_v42 = vpop.f32.mrb[211].mxu0  ;;  %v13282_v43 = vld [vmem:[#allocation5] ss:$0 sm:$0xff] }
 0xa4d   : > { %v5627_v18 = vadd.f32 %v5619_v46, %v5605_v33  ;;  %v5620_v50 = vmul.f32 %v13279_v51, %v5397_v42 }
 0xa4e   : > { %v5630_v62 = vadd.f32 %v5622_v53, %v5608_v35 }
 0xa4f   : > { %v5628_v57 = vadd.f32 %v5620_v50, %v5606_v1 }
 0xa51   : > { %v14451_v44 = vpop.f32.mrb[212].mxu0 }
 0xa52   : > { %v5625_v49 = vmul.f32 %v14451_v44, %v13279_v51  ;;  %v5410_v4 = vpop.f32.mrb[213].mxu0 }
 0xa53   : > { %v5623_v32 = vmul.f32 %v13279_v51, %v5410_v4  ;;  %v14452_v25 = vpop.f32.mrb[214].mxu0 }
 0xa54   : > { %v5633_v8 = vadd.f32 %v5625_v49, %v5611_v5  ;;  %v5626_v47 = vmul.f32 %v14452_v25, %v13279_v51  ;;  %v5413_v9 = vpop.f32.mrb[215].mxu0  ;;  %v13281_v5 = vld [vmem:[%s19307_s1 + $0x8] ss:$0 sm:$0xff]  ;;  %s19310_s1 = sld [smem:[#allocation48_spill]] }
 0xa55   : > { %v5631_v10 = vadd.f32 %v5623_v32, %v5609_v41  ;;  %v5624_v11 = vmul.f32 %v13279_v51, %v5413_v9 }
 0xa56   : > { %v5634_v12 = vadd.f32 %v5626_v47, %v5612_v36 }
 0xa57   : > { %v5632_v13 = vadd.f32 %v5624_v11, %v5610_v58 }
 0xa59   : > { %v14455_v15 = vpop.f32.mrb[216].mxu0 }
 0xa5a   : > { %v5643_v16 = vmul.f32 %v14455_v15, %v13280_v14  ;;  %v5426_v17 = vpop.f32.mrb[217].mxu0 }
 0xa5b   : > { %v5641_v19 = vmul.f32 %v13280_v14, %v5426_v17  ;;  %v14456_v20 = vpop.f32.mrb[218].mxu0 }
 0xa5c   : > { %v5651_v21 = vadd.f32 %v5643_v16, %v5629_v60  ;;  %v5644_v22 = vmul.f32 %v14456_v20, %v13280_v14  ;;  %v5429_v23 = vpop.f32.mrb[219].mxu0 }
 0xa5d   : > { %v5649_v24 = vadd.f32 %v5641_v19, %v5627_v18  ;;  %v5642_v26 = vmul.f32 %v13280_v14, %v5429_v23 }
 0xa5e   : > { %v5652_v27 = vadd.f32 %v5644_v22, %v5630_v62 }
 0xa5f   : > { %v5650_v28 = vadd.f32 %v5642_v26, %v5628_v57 }
 0xa61   : > { %v14459_v29 = vpop.f32.mrb[220].mxu0 }
 0xa62   : > { %v5647_v30 = vmul.f32 %v14459_v29, %v13280_v14  ;;  %v5442_v31 = vpop.f32.mrb[221].mxu0 }
 0xa63   : > { %v5645_v33 = vmul.f32 %v13280_v14, %v5442_v31  ;;  %v14460_v34 = vpop.f32.mrb[222].mxu0 }
 0xa64   : > { %v5655_v35 = vadd.f32 %v5647_v30, %v5633_v8  ;;  %v5648_v1 = vmul.f32 %v14460_v34, %v13280_v14  ;;  %v5445_v56 = vpop.f32.mrb[223].mxu0 }
 0xa65   : > { %v5653_v37 = vadd.f32 %v5645_v33, %v5631_v10  ;;  %v5646_v40 = vmul.f32 %v13280_v14, %v5445_v56  ;;  %v16058_v14 = vld [vmem:[%s19292_s23] sm:$0xff]  }
 0xa66   : > { %v5656_v61 = vadd.f32 %v5648_v1, %v5634_v12 }
 0xa67   : > { %v5654_v38 = vadd.f32 %v5646_v40, %v5632_v13 }
 0xa69   : > { %v14463_v2 = vpop.f32.mrb[224].mxu0 }
 0xa6a   : > { %v5665_v63 = vmul.f32 %v14463_v2, %v13281_v5  ;;  %v5458_v41 = vpop.f32.mrb[225].mxu0 }
 0xa6b   : > { %v5663_v48 = vmul.f32 %v13281_v5, %v5458_v41  ;;  %v14464_v36 = vpop.f32.mrb[226].mxu0 }
 0xa6c   : > { %v5673_v58 = vadd.f32 %v5665_v63, %v5651_v21  ;;  %v5666_v51 = vmul.f32 %v14464_v36, %v13281_v5  ;;  %v5461_v6 = vpop.f32.mrb[227].mxu0 }
 0xa6d   : > { %v5671_v7 = vadd.f32 %v5663_v48, %v5649_v24  ;;  %v5664_v46 = vmul.f32 %v13281_v5, %v5461_v6 }
 0xa6e   : > { %v5674_v45 = vadd.f32 %v5666_v51, %v5652_v27  ;;  %v5687_v53 = vadd.f32 %v13282_v43, %v5673_v58 }
 0xa6f   : > { %v5672_v60 = vadd.f32 %v5664_v46, %v5650_v28  ;;  %v5685_v18 = vadd.f32 %v13282_v43, %v5671_v7 }
 0xa70   : > { %v5688_v42 = vadd.f32 %v13282_v43, %v5674_v45 }
 0xa71   : > { %v5686_v50 = vadd.f32 %v13282_v43, %v5672_v60  ;;  %v14467_v62 = vpop.f32.mrb[228].mxu0 }
 0xa72   : > { %v5698_v57 = vpack.c.bf16 %v5688_v42, %v5687_v53  ;;  %v5669_v44 = vmul.f32 %v14467_v62, %v13281_v5  ;;  %v5474_v49 = vpop.f32.mrb[229].mxu0 }
 0xa73   : > { %v5697_v4 = vpack.c.bf16 %v5686_v50, %v5685_v18  ;;  %v5667_v32 = vmul.f32 %v13281_v5, %v5474_v49  ;;  %v14468_v25 = vpop.f32.mrb[230].mxu0 }
 0xa74   : > { %v5677_v8 = vadd.f32 %v5669_v44, %v5655_v35  ;;  %v5670_v47 = vmul.f32 %v14468_v25, %v13281_v5  ;;  %v5477_v9 = vpop.f32.mrb[231].mxu0 }
 0xa75   : > { %v5675_v10 = vadd.f32 %v5667_v32, %v5653_v37  ;;  %v5668_v11 = vmul.f32 %v13281_v5, %v5477_v9  ;;  %14473 = vmatprep.mubr.msk.bf16.mxu1 %vm4843_vm4, %v5697_v4 }
 0xa76   : > { %v5678_v12 = vadd.f32 %v5670_v47, %v5656_v61  ;;  %14474 = vmatmul.mubr.msk.bf16.vlgmr.msra.gmra.mrb[152].mxu1 %vm4843_vm4, %v5698_v57  ;;  %v5691_v15 = vadd.f32 %v13282_v43, %v5677_v8 }
 0xa77   : > { %v5676_v13 = vadd.f32 %v5668_v11, %v5654_v38  ;;  %14482 = vmatpush3.bf16.msra.mxu1 %v16058_v14  ;;  %v5689_v17 = vadd.f32 %v13282_v43, %v5675_v10  ;;  %v15244_v14 = vld [vmem:[%s19310_s1 + $0x10] sm:$0xff]  }
 0xa78   : > { %v5692_v16 = vadd.f32 %v13282_v43, %v5678_v12  ;;  %14483 = vmatprep.subr.bf16.mxu1 %v17656_v59  ;;  %v15242_v12 = vld [vmem:[%s19310_s1] sm:$0xff]  }
 0xa79   : > { %v5690_v19 = vadd.f32 %v13282_v43, %v5676_v13  ;;  %v15243_v13 = vld [vmem:[%s19310_s1 + $0x8] sm:$0xff]  }
 0xa7a   : > { %v5700_v20 = vpack.c.bf16 %v5692_v16, %v5691_v15  ;;  %v15245_v15 = vld [vmem:[%s19310_s1 + $0x18] sm:$0xff]   ;;  %v17919_v16 = vld [vmem:[%s19311_s2] sm:$0xff]   ;;  %s19313_s1 = sld [smem:[#allocation51_spill]] }
 0xa7b   : > { %v5699_v21 = vpack.c.bf16 %v5690_v19, %v5689_v17  ;;  %14484 = vmatpush3.bf16.msra.mxu1 %v17656_v59  ;;  %v16547_v59 = vmov 0.0  }
 0xa7c   : > { %14485 = vmatprep.subr.bf16.mxu1 %v17663_v54  ;;  %14569 = vmatprep.subr.bf16.mxu0 %v16547_v59 }
 0xa7d   : > { %14477 = vmatprep.mubr.msk.bf16.mxu1 %vm4843_vm4, %v5699_v21  ;;  %14577 = vmatprep.mubr.msk.bf16.mxu0 %vm16548_vm5, %v16547_v59 }
 0xa7e   : > { %14478 = vmatmul.mubr.msk.bf16.gmra.mrb[156].mxu1 %vm4843_vm4, %v5700_v20 }
 0xa7f   : > { %14486 = vmatpush3.bf16.msra.mxu1 %v17663_v54  ;;  %14489 = vmatprep.mubr.msk.bf16.mxu1 %vm2923_vm3, %v17690_v55 }
 0xa80   : > { %14487 = vmatprep.subr.bf16.mxu1 %v17668_v0 }
 0xa83   : > { %14488 = vmatpush3.bf16.msra.mxu1 %v17668_v0 }
 0xa84   : > { %14497 = vmatprep.subr.bf16.mxu1 %v16547_v59 }
 0xa86   : > { %14490 = vmatmul.mubr.msk.bf16.vlgmr.msra.gmra.mrb[160].mxu1 %vm2923_vm3, %v17688_v3 }
 0xa87   : > { %14493 = vmatprep.mubr.msk.bf16.mxu1 %vm2923_vm3, %v17698_v39  ;;  %v13283_v39 = vld [vmem:[%s19308_s11] ss:$0 sm:$0xff]  ;;  %s17814_s11 = scalar_lea.vmem [#allocation17], %s12984_s28  ;;  %s19309_s28 = sld [smem:[#allocation46_spill]] }
 0xa8d   : > { %v17847_v49 = vld [vmem:[%s19309_s28] sm:$0xff]   ;;  %v17856_v4 = vld [vmem:[%s19309_s28 + $0x8] sm:$0xff]   ;;  %v17863_v32 = vld [vmem:[%s19309_s28 + $0x10] sm:$0xff]  }
 0xa8e   : > { %14494 = vmatmul.mubr.msk.bf16.gmra.mrb[164].mxu1 %vm2923_vm3, %v17696_v52  ;;  %v17870_v25 = vld [vmem:[%s19309_s28 + $0x18] sm:$0xff]   ;;  %v17877_v8 = vld [vmem:[%s19309_s28 + $0x20] sm:$0xff]   ;;  %v17884_v47 = vld [vmem:[%s19309_s28 + $0x28] sm:$0xff]  }
 0xa8f   : > { %14505 = vmatprep.mubr.msk.bf16.mxu1 %vm16548_vm5, %v16547_v59  ;;  %v17891_v9 = vld [vmem:[%s19309_s28 + $0x30] sm:$0xff]   ;;  %v17898_v10 = vld [vmem:[%s19309_s28 + $0x38] sm:$0xff]   ;;  %v17905_v11 = vld [vmem:[%s19309_s28 + $0x40] sm:$0xff]  }
 0xb49   : > { %v14475_v54 = vpop.f32.mrb[152].mxu1 }
 0xb4a   : > { %v5766_v0 = vpop.f32.mrb[153].mxu1  ;;  %v5775_v24 = vadd.f32 %v14475_v54, %v13283_v39  ;;  %v13312_v54 = vld [vmem:[%s19312_s3] ss:$0 sm:$0xff] }
 0xb4b   : > { %v14476_v3 = vpop.f32.mrb[154].mxu1  ;;  %v5767_v27 = vadd.f32 %v13283_v39, %v5766_v0  ;;  %v13313_v0 = vld [vmem:[%s19312_s3 + $0x1] ss:$0 sm:$0xff] }
 0xb4c   : > { %v5769_v55 = vpop.f32.mrb[155].mxu1  ;;  %v5778_v28 = vadd.f32 %v14476_v3, %v13283_v39  ;;  %v5799_v30 = vmax.f32 %v5775_v24, 0.0 }
 0xb4d   : > { %v5770_v29 = vadd.f32 %v13283_v39, %v5769_v55  ;;  %v5797_v31 = vmax.f32 %v5767_v27, 0.0 }
 0xb4e   : > { %v5800_v34 = vmax.f32 %v5778_v28, 0.0 }
 0xb4f   : > { %v5798_v56 = vmax.f32 %v5770_v29, 0.0  ;;  %v13314_v29 = vld [vmem:[%s19312_s3 + $0x2] ss:$0 sm:$0xff] }
 0xb51   : > { %v14479_v22 = vpop.f32.mrb[156].mxu1 }
 0xb52   : > { %v5782_v52 = vpop.f32.mrb[157].mxu1  ;;  %v5791_v61 = vadd.f32 %v14479_v22, %v13283_v39 }
 0xb53   : > { %v14480_v23 = vpop.f32.mrb[158].mxu1  ;;  %v5783_v2 = vadd.f32 %v13283_v39, %v5782_v52 }
 0xb54   : > { %v5785_v26 = vpop.f32.mrb[159].mxu1  ;;  %v5794_v41 = vadd.f32 %v14480_v23, %v13283_v39  ;;  %v5803_v51 = vmax.f32 %v5791_v61, 0.0 }
 0xb55   : > { %v5786_v36 = vadd.f32 %v13283_v39, %v5785_v26  ;;  %v5801_v6 = vmax.f32 %v5783_v2, 0.0 }
 0xb56   : > { %v5804_v7 = vmax.f32 %v5794_v41, 0.0 }
 0xb57   : > { %v5802_v60 = vmax.f32 %v5786_v36, 0.0 }
 0xb59   : > { %v14491_v33 = vpop.f32.mrb[160].mxu1 }
 0xb5a   : > { %v5848_v35 = vadd.f32 %v14491_v33, %v5799_v30  ;;  %v5839_v1 = vpop.f32.mrb[161].mxu1 }
 0xb5b   : > { %v5840_v37 = vadd.f32 %v5839_v1, %v5797_v31  ;;  %v14492_v40 = vpop.f32.mrb[162].mxu1 }
 0xb5c   : > { %5872 = vst.msk [vmem:[%s17814_s11 + $0x10] sm:$0xff] %vm2923_vm3, %v5848_v35  ;;  %v5851_v38 = vadd.f32 %v14492_v40, %v5800_v34  ;;  %v5842_v5 = vpop.f32.mrb[163].mxu1  ;;  %v13315_v40 = vld [vmem:[%s19312_s3 + $0x3] ss:$0 sm:$0xff] }
 0xb5d   : > { %5870 = vst.msk [vmem:[%s17814_s11] sm:$0xff] %vm2923_vm3, %v5840_v37  ;;  %v5843_v63 = vadd.f32 %v5842_v5, %v5798_v56 }
 0xb5e   : > { %5873 = vst.msk [vmem:[%s17814_s11 + $0x18] sm:$0xff] %vm2923_vm3, %v5851_v38  ;;  %v17822_v48 = vpack.c.bf16 %v5851_v38, %v5848_v35 }
 0xb5f   : > { %5871 = vst.msk [vmem:[%s17814_s11 + $0x8] sm:$0xff] %vm2923_vm3, %v5843_v63  ;;  %v17826_v58 = vpack.c.bf16 %v5843_v63, %v5840_v37 }
 0xb61   : > { %v14495_v43 = vpop.f32.mrb[164].mxu1  ;;  %14498 = vmatpush3.bf16.msra.mxu1 %v17826_v58 }
 0xb62   : > { %v5864_v46 = vadd.f32 %v14495_v43, %v5803_v51  ;;  %v5855_v45 = vpop.f32.mrb[165].mxu1  ;;  %14499 = vmatprep.subr.bf16.mxu1 %v16547_v59 }
 0xb63   : > { %v5856_v53 = vadd.f32 %v5855_v45, %v5801_v6  ;;  %v14496_v42 = vpop.f32.mrb[166].mxu1  ;;  %v13316_v6 = vld [vmem:[%s19312_s3 + $0x4] ss:$0 sm:$0xff] }
 0xb64   : > { %5876 = vst.msk [vmem:[%s17814_s11 + $0x30] sm:$0xff] %vm2923_vm3, %v5864_v46  ;;  %v5867_v18 = vadd.f32 %v14496_v42, %v5804_v7  ;;  %v5858_v50 = vpop.f32.mrb[167].mxu1 }
 0xb65   : > { %5874 = vst.msk [vmem:[%s17814_s11 + $0x20] sm:$0xff] %vm2923_vm3, %v5856_v53  ;;  %v5859_v62 = vadd.f32 %v5858_v50, %v5802_v60  ;;  %14500 = vmatpush3.bf16.msra.mxu1 %v17822_v48  ;;  %v13317_v50 = vld [vmem:[%s19312_s3 + $0x5] ss:$0 sm:$0xff] }
 0xb66   : > { %5877 = vst.msk [vmem:[%s17814_s11 + $0x38] sm:$0xff] %vm2923_vm3, %v5867_v18  ;;  %v17837_v57 = vpack.c.bf16 %v5867_v18, %v5864_v46  ;;  %14501 = vmatprep.subr.bf16.mxu1 %v16547_v59 }
 0xb67   : > { %5875 = vst.msk [vmem:[%s17814_s11 + $0x28] sm:$0xff] %vm2923_vm3, %v5859_v62  ;;  %v17842_v44 = vpack.c.bf16 %v5859_v62, %v5856_v53 }
 0xb69   : > { %14502 = vmatpush3.bf16.msra.mxu1 %v17842_v44 }
 0xb6a   : > { %14503 = vmatprep.subr.bf16.mxu1 %v16547_v59 }
 0xb6d   : > { %14504 = vmatpush3.bf16.msra.mxu1 %v17837_v57 }
 0xb6e   : > { %14541 = vmatprep.subr.bf16.mxu1 %v16547_v59 }
 0xb70   : > { %14506 = vmatmul.mubr.msk.bf16.vlgmr.msra.gmra.mrb[168].mxu1 %vm2923_vm3, %v17847_v49 }
 0xb71   : > { %14509 = vmatprep.mubr.msk.bf16.mxu1 %vm16548_vm5, %v16547_v59  ;;  %14542 = vmatpush3.bf16.msra.mxu1 %v15242_v12 }
 0xb72   : > { %14543 = vmatprep.subr.bf16.mxu1 %v16547_v59 }
 0xb75   : > { %14544 = vmatpush3.bf16.msra.mxu1 %v15243_v13 }
 0xb76   : > { %14545 = vmatprep.subr.bf16.mxu1 %v16547_v59 }
 0xb78   : > { %14510 = vmatmul.mubr.msk.bf16.gmra.mrb[172].mxu1 %vm2923_vm3, %v17856_v4 }
 0xb79   : > { %14513 = vmatprep.mubr.msk.bf16.mxu1 %vm16548_vm5, %v16547_v59  ;;  %14546 = vmatpush3.bf16.msra.mxu1 %v15244_v14 }
 0xb7a   : > { %14547 = vmatprep.subr.bf16.mxu1 %v16547_v59 }
 0xb7d   : > { %14548 = vmatpush3.bf16.msra.mxu1 %v15245_v15 }
 0xb7e   : > { %14553 = vmatprep.subr.bf16.mxu1 %v17919_v16 }
 0xb80   : > { %14514 = vmatmul.mubr.msk.bf16.gmra.mrb[176].mxu1 %vm2923_vm3, %v17863_v32 }
 0xb81   : > { %14517 = vmatprep.mubr.msk.bf16.mxu1 %vm16548_vm5, %v16547_v59 }
 0xb88   : > { %14518 = vmatmul.mubr.msk.bf16.gmra.mrb[180].mxu1 %vm2923_vm3, %v17870_v25 }
 0xb89   : > { %14521 = vmatprep.mubr.msk.bf16.mxu1 %vm16548_vm5, %v16547_v59 }
 0xb90   : > { %14522 = vmatmul.mubr.msk.bf16.gmra.mrb[184].mxu1 %vm2923_vm3, %v17877_v8 }
 0xb91   : > { %14525 = vmatprep.mubr.msk.bf16.mxu1 %vm16548_vm5, %v16547_v59 }
 0xb98   : > { %14526 = vmatmul.mubr.msk.bf16.gmra.mrb[188].mxu1 %vm2923_vm3, %v17884_v47 }
 0xb99   : > { %14529 = vmatprep.mubr.msk.bf16.mxu1 %vm16548_vm5, %v16547_v59 }
 0xba0   : > { %14530 = vmatmul.mubr.msk.bf16.gmra.mrb[192].mxu1 %vm2923_vm3, %v17891_v9 }
 0xba1   : > { %14533 = vmatprep.mubr.msk.bf16.mxu1 %vm16548_vm5, %v16547_v59 }
 0xba8   : > { %14534 = vmatmul.mubr.msk.bf16.gmra.mrb[196].mxu1 %vm2923_vm3, %v17898_v10 }
 0xba9   : > { %14537 = vmatprep.mubr.msk.bf16.mxu1 %vm16548_vm5, %v16547_v59 }
 0xbb0   : > { %14538 = vmatmul.mubr.msk.bf16.gmra.mrb[200].mxu1 %vm2923_vm3, %v17905_v11 }
 0xbb1   : > { %14549 = vmatprep.mubr.msk.bf16.mxu1 %vm16548_vm5, %v16547_v59 }
 0xc43   : > { %v6016_v17 = vpop.f32.mrb[168].mxu1 }
 0xc44   : > { %v14507_v19 = vpop.f32.mrb[169].mxu1  ;;  %v6093_v55 = vmul.f32 %v13312_v54, %v6016_v17 }
 0xc45   : > { %v6019_v20 = vpop.f32.mrb[170].mxu1 }
 0xc46   : > { %v14508_v21 = vpop.f32.mrb[171].mxu1  ;;  %v6094_v23 = vmul.f32 %v13312_v54, %v6019_v20 }
 0xc47   : > { %v13318_v21 = vld [vmem:[%s19312_s3 + $0x6] ss:$0 sm:$0xff] }
 0xc4b   : > { %v6024_v3 = vpop.f32.mrb[172].mxu1 }
 0xc4c   : > { %v6101_v39 = vmul.f32 %v13313_v0, %v6024_v3  ;;  %v14511_v22 = vpop.f32.mrb[173].mxu1 }
 0xc4d   : > { %v6027_v52 = vpop.f32.mrb[174].mxu1 }
 0xc4e   : > { %v6103_v24 = vadd.f32 %v6101_v39, %v6093_v55  ;;  %v6102_v26 = vmul.f32 %v13313_v0, %v6027_v52  ;;  %v14512_v27 = vpop.f32.mrb[175].mxu1 }
 0xc50   : > { %v6104_v28 = vadd.f32 %v6102_v26, %v6094_v23 }
 0xc53   : > { %v6032_v30 = vpop.f32.mrb[176].mxu1 }
 0xc54   : > { %v6111_v31 = vmul.f32 %v13314_v29, %v6032_v30  ;;  %v14515_v33 = vpop.f32.mrb[177].mxu1 }
 0xc55   : > { %v6035_v34 = vpop.f32.mrb[178].mxu1 }
 0xc56   : > { %v6113_v35 = vadd.f32 %v6111_v31, %v6103_v24  ;;  %v6112_v1 = vmul.f32 %v13314_v29, %v6035_v34  ;;  %v14516_v56 = vpop.f32.mrb[179].mxu1  ;;  %v13319_v24 = vld [vmem:[%s19312_s3 + $0x7] ss:$0 sm:$0xff] }
 0xc58   : > { %v6114_v37 = vadd.f32 %v6112_v1, %v6104_v28 }
 0xc5b   : > { %v6040_v61 = vpop.f32.mrb[180].mxu1 }
 0xc5c   : > { %v6121_v38 = vmul.f32 %v13315_v40, %v6040_v61  ;;  %v14519_v5 = vpop.f32.mrb[181].mxu1 }
 0xc5d   : > { %v6043_v2 = vpop.f32.mrb[182].mxu1 }
 0xc5e   : > { %v6123_v63 = vadd.f32 %v6121_v38, %v6113_v35  ;;  %v6122_v41 = vmul.f32 %v13315_v40, %v6043_v2  ;;  %v14520_v36 = vpop.f32.mrb[183].mxu1  ;;  %v13320_v35 = vld [vmem:[%s19312_s3 + $0x8] ss:$0 sm:$0xff]  ;;  %v13321_v2 = vld [vmem:[#allocation7] ss:$0 sm:$0xff]  ;;  %s19318_s3 = sld [smem:[#allocation55_spill]] }
 0xc60   : > { %v6124_v51 = vadd.f32 %v6122_v41, %v6114_v37 }
 0xc63   : > { %v6048_v43 = vpop.f32.mrb[184].mxu1 }
 0xc64   : > { %v6131_v7 = vmul.f32 %v13316_v6, %v6048_v43  ;;  %v14523_v46 = vpop.f32.mrb[185].mxu1  ;;  %v15248_v43 = vld [vmem:[%s19311_s2 + $0x10] sm:$0xff]  }
 0xc65   : > { %v6051_v45 = vpop.f32.mrb[186].mxu1 }
 0xc66   : > { %v6133_v60 = vadd.f32 %v6131_v7, %v6123_v63  ;;  %v6132_v53 = vmul.f32 %v13316_v6, %v6051_v45  ;;  %v14524_v42 = vpop.f32.mrb[187].mxu1  ;;  %v15247_v6 = vld [vmem:[%s19311_s2 + $0x8] sm:$0xff]   ;;  %v15249_v7 = vld [vmem:[%s19311_s2 + $0x18] sm:$0xff]   ;;  %s19315_s2 = sld [smem:[#allocation52_spill]] }
 0xc68   : > { %v6134_v18 = vadd.f32 %v6132_v53, %v6124_v51 }
 0xc6b   : > { %v6056_v62 = vpop.f32.mrb[188].mxu1 }
 0xc6c   : > { %v6141_v12 = vmul.f32 %v13317_v50, %v6056_v62  ;;  %v14527_v13 = vpop.f32.mrb[189].mxu1 }
 0xc6d   : > { %v6059_v14 = vpop.f32.mrb[190].mxu1 }
 0xc6e   : > { %v6143_v15 = vadd.f32 %v6141_v12, %v6133_v60  ;;  %v6142_v17 = vmul.f32 %v13317_v50, %v6059_v14  ;;  %v14528_v19 = vpop.f32.mrb[191].mxu1  ;;  %v13328_v60 = vld [vmem:[%s19313_s1] ss:$0 sm:$0xff]  ;;  %s19314_s1 = sld [smem:[#allocation54_spill]] }
 0xc70   : > { %v6144_v20 = vadd.f32 %v6142_v17, %v6134_v18 }
 0xc73   : > { %v6064_v54 = vpop.f32.mrb[192].mxu1 }
 0xc74   : > { %v6151_v0 = vmul.f32 %v13318_v21, %v6064_v54  ;;  %v14531_v3 = vpop.f32.mrb[193].mxu1 }
 0xc75   : > { %v6067_v55 = vpop.f32.mrb[194].mxu1 }
 0xc76   : > { %v6153_v39 = vadd.f32 %v6151_v0, %v6143_v15  ;;  %v6152_v22 = vmul.f32 %v13318_v21, %v6067_v55  ;;  %v14532_v52 = vpop.f32.mrb[195].mxu1 }
 0xc78   : > { %v6154_v23 = vadd.f32 %v6152_v22, %v6144_v20 }
 0xc7b   : > { %v6072_v26 = vpop.f32.mrb[196].mxu1 }
 0xc7c   : > { %v6161_v27 = vmul.f32 %v13319_v24, %v6072_v26  ;;  %v14535_v28 = vpop.f32.mrb[197].mxu1 }
 0xc7d   : > { %v6075_v29 = vpop.f32.mrb[198].mxu1 }
 0xc7e   : > { %v6163_v30 = vadd.f32 %v6161_v27, %v6153_v39  ;;  %v6162_v31 = vmul.f32 %v13319_v24, %v6075_v29  ;;  %v14536_v33 = vpop.f32.mrb[199].mxu1  ;;  %v13347_v29 = vld [vmem:[%s19315_s2 + $0x1] ss:$0 sm:$0xff] }
 0xc80   : > { %v6164_v34 = vadd.f32 %v6162_v31, %v6154_v23 }
 0xc83   : > { %v6080_v1 = vpop.f32.mrb[200].mxu1 }
 0xc84   : > { %v6171_v56 = vmul.f32 %v13320_v35, %v6080_v1  ;;  %v14539_v37 = vpop.f32.mrb[201].mxu1 }
 0xc85   : > { %v6083_v40 = vpop.f32.mrb[202].mxu1 }
 0xc86   : > { %v6173_v61 = vadd.f32 %v6171_v56, %v6163_v30  ;;  %v6172_v38 = vmul.f32 %v13320_v35, %v6083_v40  ;;  %v14540_v5 = vpop.f32.mrb[203].mxu1 }
 0xc88   : > { %v6174_v63 = vadd.f32 %v6172_v38, %v6164_v34  ;;  %v6181_v41 = vadd.f32 %v13321_v2, %v6173_v61  ;;  %v13348_v38 = vld [vmem:[%s19315_s2 + $0x2] ss:$0 sm:$0xff] }
 0xc8a   : > { %v6182_v36 = vadd.f32 %v13321_v2, %v6174_v63 }
 0xc8c   : > { %v6191_v51 = vpack.c.bf16 %v6182_v36, %v6181_v41 }
 0xc8e   : > { %14550 = vmatmul.mubr.msk.bf16.vlgmr.msra.gmra.mrb[204].mxu1 %vm2923_vm3, %v6191_v51 }
 0xc8f   : > { %14554 = vmatpush3.bf16.msra.mxu1 %v17919_v16  ;;  %14561 = vmatprep.mubr.msk.bf16.mxu1 %vm2923_vm3, %v17826_v58 }
 0xc90   : > { %14555 = vmatprep.subr.bf16.mxu1 %v15247_v6 }
 0xc93   : > { %14556 = vmatpush3.bf16.msra.mxu1 %v15247_v6 }
 0xc94   : > { %14557 = vmatprep.subr.bf16.mxu1 %v15248_v43 }
 0xc97   : > { %14558 = vmatpush3.bf16.msra.mxu1 %v15248_v43 }
 0xc98   : > { %14559 = vmatprep.subr.bf16.mxu1 %v15249_v7 }
 0xc9b   : > { %14560 = vmatpush3.bf16.msra.mxu1 %v15249_v7  ;;  %v13349_v7 = vld [vmem:[%s19315_s2 + $0x3] ss:$0 sm:$0xff] }
 0xc9c   : > { %14613 = vmatprep.subr.bf16.mxu1 %v16547_v59 }
 0xc9e   : > { %14562 = vmatmul.mubr.msk.bf16.vlgmr.msra.gmra.mrb[208].mxu1 %vm2923_vm3, %v17822_v48 }
 0xc9f   : > { %14565 = vmatprep.mubr.msk.bf16.mxu1 %vm2923_vm3, %v17842_v44 }
 0xca6   : > { %14566 = vmatmul.mubr.msk.bf16.gmra.mrb[212].mxu1 %vm2923_vm3, %v17837_v57 }
 0xca7   : > { %14621 = vmatprep.mubr.msk.bf16.mxu1 %vm16548_vm5, %v16547_v59 }
 0xd61   : > { %v17947_v58 = vpop.f32.mrb[204].mxu1 }
 0xd62   : > { %v14551_v16 = vpop.f32.mrb[205].mxu1 }
 0xd63   : > { %v17949_v46 = vpop.f32.mrb[206].mxu1 }
 0xd64   : > { %v14552_v45 = vpop.f32.mrb[207].mxu1 }
 0xd71   : > { %v14563_v53 = vpop.f32.mrb[208].mxu1 }
 0xd72   : > { %v6363_v42 = vadd.f32 %v14563_v53, %v13328_v60  ;;  %v6354_v18 = vpop.f32.mrb[209].mxu1 }
 0xd73   : > { %v6355_v48 = vadd.f32 %v13328_v60, %v6354_v18  ;;  %v14564_v50 = vpop.f32.mrb[210].mxu1 }
 0xd74   : > { %v6366_v62 = vadd.f32 %v14564_v50, %v13328_v60  ;;  %v6357_v44 = vpop.f32.mrb[211].mxu1  ;;  %v6387_v13 = vmax.f32 %v6363_v42, 0.0 }
 0xd75   : > { %v6358_v12 = vadd.f32 %v13328_v60, %v6357_v44  ;;  %v6385_v14 = vmax.f32 %v6355_v48, 0.0 }
 0xd76   : > { %v6388_v57 = vmax.f32 %v6366_v62, 0.0  ;;  %v13350_v62 = vld [vmem:[%s19315_s2 + $0x4] ss:$0 sm:$0xff] }
 0xd77   : > { %v6386_v15 = vmax.f32 %v6358_v12, 0.0 }
 0xd78   : > { %v6404_v17 = vpack.c.bf16 %v6388_v57, %v6387_v13 }
 0xd79   : > { %v6403_v19 = vpack.c.bf16 %v6386_v15, %v6385_v14  ;;  %v14567_v20 = vpop.f32.mrb[212].mxu1 }
 0xd7a   : > { %v6379_v21 = vadd.f32 %v14567_v20, %v13328_v60  ;;  %v6370_v54 = vpop.f32.mrb[213].mxu1  ;;  %v13351_v20 = vld [vmem:[%s19315_s2 + $0x5] ss:$0 sm:$0xff] }
 0xd7b   : > { %v6371_v0 = vadd.f32 %v13328_v60, %v6370_v54  ;;  %v14568_v3 = vpop.f32.mrb[214].mxu1  ;;  %14570 = vmatpush3.bf16.msra.mxu0 %v6403_v19 }
 0xd7c   : > { %v6382_v55 = vadd.f32 %v14568_v3, %v13328_v60  ;;  %v6373_v39 = vpop.f32.mrb[215].mxu1  ;;  %14571 = vmatprep.subr.bf16.mxu0 %v16547_v59  ;;  %v6391_v52 = vmax.f32 %v6379_v21, 0.0 }
 0xd7d   : > { %v6374_v22 = vadd.f32 %v13328_v60, %v6373_v39  ;;  %v6389_v24 = vmax.f32 %v6371_v0, 0.0 }
 0xd7e   : > { %v6392_v23 = vmax.f32 %v6382_v55, 0.0 }
 0xd7f   : > { %v6390_v26 = vmax.f32 %v6374_v22, 0.0  ;;  %14572 = vmatpush3.bf16.msra.mxu0 %v6404_v17 }
 0xd80   : > { %v6406_v27 = vpack.c.bf16 %v6392_v23, %v6391_v52  ;;  %14573 = vmatprep.subr.bf16.mxu0 %v16547_v59  ;;  %v13352_v23 = vld [vmem:[%s19315_s2 + $0x6] ss:$0 sm:$0xff] }
 0xd81   : > { %v6405_v28 = vpack.c.bf16 %v6390_v26, %v6389_v24 }
 0xd83   : > { %14574 = vmatpush3.bf16.msra.mxu0 %v6405_v28 }
 0xd84   : > { %14575 = vmatprep.subr.bf16.mxu0 %v16547_v59 }
 0xd87   : > { %14576 = vmatpush3.bf16.msra.mxu0 %v6406_v27 }
 0xd88   : > { %14683 = vmatprep.subr.bf16.mxu0 %v16547_v59 }
 0xd8a   : > { %14578 = vmatmul.mubr.msk.bf16.vlgmr.msra.gmra.mrb[232].mxu0 %vm2923_vm3, %v17847_v49  ;;  %v15250_v49 = vld [vmem:[%s19314_s1] sm:$0xff]  }
 0xd8b   : > { %14581 = vmatprep.mubr.msk.bf16.mxu0 %vm16548_vm5, %v16547_v59  ;;  %14614 = vmatpush3.bf16.msra.mxu1 %v15250_v49 }
 0xd8c   : > { %14615 = vmatprep.subr.bf16.mxu1 %v16547_v59 }
 0xd92   : > { %14582 = vmatmul.mubr.msk.bf16.gmra.mrb[236].mxu0 %vm2923_vm3, %v17856_v4  ;;  %v15251_v4 = vld [vmem:[%s19314_s1 + $0x8] sm:$0xff]  }
 0xd93   : > { %14585 = vmatprep.mubr.msk.bf16.mxu0 %vm16548_vm5, %v16547_v59  ;;  %14616 = vmatpush3.bf16.msra.mxu1 %v15251_v4 }
 0xd94   : > { %14617 = vmatprep.subr.bf16.mxu1 %v16547_v59 }
 0xd9a   : > { %14586 = vmatmul.mubr.msk.bf16.gmra.mrb[240].mxu0 %vm2923_vm3, %v17863_v32  ;;  %v15252_v32 = vld [vmem:[%s19314_s1 + $0x10] sm:$0xff]  }
 0xd9b   : > { %14589 = vmatprep.mubr.msk.bf16.mxu0 %vm16548_vm5, %v16547_v59  ;;  %14618 = vmatpush3.bf16.msra.mxu1 %v15252_v32 }
 0xd9c   : > { %14619 = vmatprep.subr.bf16.mxu1 %v16547_v59 }
 0xda2   : > { %14590 = vmatmul.mubr.msk.bf16.gmra.mrb[244].mxu0 %vm2923_vm3, %v17870_v25  ;;  %v15253_v25 = vld [vmem:[%s19314_s1 + $0x18] sm:$0xff]   ;;  %s19316_s1 = sld [smem:[#allocation57_spill]] }
 0xda3   : > { %14593 = vmatprep.mubr.msk.bf16.mxu0 %vm16548_vm5, %v16547_v59  ;;  %14620 = vmatpush3.bf16.msra.mxu1 %v15253_v25 }
 0xda4   : > { %14625 = vmatprep.subr.bf16.mxu1 %v16547_v59 }
 0xdaa   : > { %14594 = vmatmul.mubr.msk.bf16.gmra.mrb[248].mxu0 %vm2923_vm3, %v17877_v8 }
 0xdab   : > { %14597 = vmatprep.mubr.msk.bf16.mxu0 %vm16548_vm5, %v16547_v59 }
 0xdb2   : > { %14598 = vmatmul.mubr.msk.bf16.gmra.mrb[252].mxu0 %vm2923_vm3, %v17884_v47 }
 0xdb3   : > { %14601 = vmatprep.mubr.msk.bf16.mxu0 %vm16548_vm5, %v16547_v59 }
 0xdba   : > { %14602 = vmatmul.mubr.msk.bf16.gmra.mrb[0].mxu0 %vm2923_vm3, %v17891_v9 }
 0xdbb   : > { %14605 = vmatprep.mubr.msk.bf16.mxu0 %vm16548_vm5, %v16547_v59 }
 0xdc2   : > { %14606 = vmatmul.mubr.msk.bf16.gmra.mrb[4].mxu0 %vm2923_vm3, %v17898_v10 }
 0xdc3   : > { %14609 = vmatprep.mubr.msk.bf16.mxu0 %vm16548_vm5, %v16547_v59 }
 0xdca   : > { %14610 = vmatmul.mubr.msk.bf16.gmra.mrb[8].mxu0 %vm2923_vm3, %v17905_v11  ;;  %v13346_v11 = vld [vmem:[%s19315_s2] ss:$0 sm:$0xff] }
 0xdcb   : > { %14691 = vmatprep.mubr.msk.bf16.mxu0 %vm16548_vm5, %v16547_v59 }
 0xe5d   : > { %v6441_v8 = vpop.f32.mrb[232].mxu0 }
 0xe5e   : > { %v14579_v47 = vpop.f32.mrb[233].mxu0  ;;  %v6518_v31 = vmul.f32 %v13346_v11, %v6441_v8  ;;  %v13353_v8 = vld [vmem:[%s19315_s2 + $0x7] ss:$0 sm:$0xff] }
 0xe5f   : > { %v6444_v9 = vpop.f32.mrb[234].mxu0 }
 0xe60   : > { %v14580_v10 = vpop.f32.mrb[235].mxu0  ;;  %v6519_v1 = vmul.f32 %v13346_v11, %v6444_v9 }
 0xe65   : > { %v6449_v30 = vpop.f32.mrb[236].mxu0 }
 0xe66   : > { %v6526_v33 = vmul.f32 %v13347_v29, %v6449_v30  ;;  %v14583_v34 = vpop.f32.mrb[237].mxu0 }
 0xe67   : > { %v6452_v35 = vpop.f32.mrb[238].mxu0  ;;  %v13354_v34 = vld [vmem:[%s19315_s2 + $0x8] ss:$0 sm:$0xff]  ;;  %s19317_s2 = sld [smem:[#allocation49_spill]] }
 0xe68   : > { %v6528_v56 = vadd.f32 %v6526_v33, %v6518_v31  ;;  %v6527_v37 = vmul.f32 %v13347_v29, %v6452_v35  ;;  %v14584_v40 = vpop.f32.mrb[239].mxu0 }
 0xe6a   : > { %v6529_v61 = vadd.f32 %v6527_v37, %v6519_v1 }
 0xe6d   : > { %v6457_v5 = vpop.f32.mrb[240].mxu0 }
 0xe6e   : > { %v6536_v2 = vmul.f32 %v13348_v38, %v6457_v5  ;;  %v14587_v63 = vpop.f32.mrb[241].mxu0  ;;  %v13355_v5 = vld [vmem:[#allocation8] ss:$0 sm:$0xff] }
 0xe6f   : > { %v6460_v41 = vpop.f32.mrb[242].mxu0 }
 0xe70   : > { %v6538_v36 = vadd.f32 %v6536_v2, %v6528_v56  ;;  %v6537_v51 = vmul.f32 %v13348_v38, %v6460_v41  ;;  %v14588_v6 = vpop.f32.mrb[243].mxu0 }
 0xe71   : > { %v15255_v6 = vld [vmem:[%s19316_s1 + $0x8] sm:$0xff]  }
 0xe72   : > { %v6539_v43 = vadd.f32 %v6537_v51, %v6529_v61 }
 0xe75   : > { %v6465_v16 = vpop.f32.mrb[244].mxu0 }
 0xe76   : > { %v6546_v45 = vmul.f32 %v13349_v7, %v6465_v16  ;;  %v14591_v60 = vpop.f32.mrb[245].mxu0  ;;  %v15258_v16 = vld [vmem:[%s19316_s1 + $0x20] sm:$0xff]  }
 0xe77   : > { %v6468_v53 = vpop.f32.mrb[246].mxu0  ;;  %v15260_v60 = vld [vmem:[%s19316_s1 + $0x30] sm:$0xff]  }
 0xe78   : > { %v6548_v42 = vadd.f32 %v6546_v45, %v6538_v36  ;;  %v6547_v18 = vmul.f32 %v13349_v7, %v6468_v53  ;;  %v14592_v48 = vpop.f32.mrb[247].mxu0  ;;  %v15254_v36 = vld [vmem:[%s19316_s1] sm:$0xff]   ;;  %v15257_v7 = vld [vmem:[%s19316_s1 + $0x18] sm:$0xff]   ;;  %v15259_v45 = vld [vmem:[%s19316_s1 + $0x28] sm:$0xff]  }
 0xe79   : > { %v15261_v53 = vld [vmem:[%s19316_s1 + $0x38] sm:$0xff]  }
 0xe7a   : > { %v6549_v50 = vadd.f32 %v6547_v18, %v6539_v43  ;;  %v15256_v43 = vld [vmem:[%s19316_s1 + $0x10] sm:$0xff]   ;;  %v13356_v18 = vld [vmem:[%s19318_s3] ss:$0 sm:$0xff]  ;;  %s19320_s1 = sld [smem:[#allocation56_spill]]  ;;  %s19321_s3 = sld [smem:[#allocation61_spill]] }
 0xe7d   : > { %v6473_v44 = vpop.f32.mrb[248].mxu0 }
 0xe7e   : > { %v6556_v12 = vmul.f32 %v13350_v62, %v6473_v44  ;;  %v14595_v13 = vpop.f32.mrb[249].mxu0 }
 0xe7f   : > { %v6476_v57 = vpop.f32.mrb[250].mxu0 }
 0xe80   : > { %v6558_v14 = vadd.f32 %v6556_v12, %v6548_v42  ;;  %v6557_v15 = vmul.f32 %v13350_v62, %v6476_v57  ;;  %v14596_v17 = vpop.f32.mrb[251].mxu0  ;;  %v13322_v42 = vld [vmem:[%s19317_s2] ss:$0 sm:$0xff]  ;;  %s19324_s2 = sld [smem:[#allocation63_spill]] }
 0xe81   : > { %v6261_v48 = vadd.f32 %v13322_v42, %v17947_v58  ;;  %v6264_v62 = vadd.f32 %v13322_v42, %v17949_v46  ;;  %v13362_v58 = vld [vmem:[%s19319_s4] ss:$0 sm:$0xff]  ;;  %s19323_s4 = sld [smem:[#allocation59_spill]] }
 0xe82   : > { %v6559_v19 = vadd.f32 %v6557_v15, %v6549_v50 }
 0xe83   : > { %v6267_v57 = vmax.f32 %v6261_v48, 0.0 }
 0xe85   : > { %v6481_v21 = vpop.f32.mrb[252].mxu0 }
 0xe86   : > { %v6566_v54 = vmul.f32 %v13351_v20, %v6481_v21  ;;  %v14599_v0 = vpop.f32.mrb[253].mxu0 }
 0xe87   : > { %v6484_v3 = vpop.f32.mrb[254].mxu0 }
 0xe88   : > { %v6568_v55 = vadd.f32 %v6566_v54, %v6558_v14  ;;  %v6567_v39 = vmul.f32 %v13351_v20, %v6484_v3  ;;  %v14600_v22 = vpop.f32.mrb[255].mxu0 }
 0xe8a   : > { %v6569_v52 = vadd.f32 %v6567_v39, %v6559_v19  ;;  %v6268_v19 = vmax.f32 %v6264_v62, 0.0 }
 0xe8d   : > { %v6489_v24 = vpop.f32.mrb[0].mxu0 }
 0xe8e   : > { %v6576_v26 = vmul.f32 %v13352_v23, %v6489_v24  ;;  %v14603_v27 = vpop.f32.mrb[1].mxu0 }
 0xe8f   : > { %v6492_v28 = vpop.f32.mrb[2].mxu0  ;;  %v15262_v27 = vld [vmem:[%s19320_s1] sm:$0xff]  }
 0xe90   : > { %v6578_v49 = vadd.f32 %v6576_v26, %v6568_v55  ;;  %v6577_v4 = vmul.f32 %v13352_v23, %v6492_v28  ;;  %v14604_v32 = vpop.f32.mrb[3].mxu0  ;;  %v15263_v28 = vld [vmem:[%s19320_s1 + $0x8] sm:$0xff]  }
 0xe91   : > { %v15266_v32 = vld [vmem:[%s19320_s1 + $0x20] sm:$0xff]  }
 0xe92   : > { %v6579_v25 = vadd.f32 %v6577_v4, %v6569_v52  ;;  %v15265_v4 = vld [vmem:[%s19320_s1 + $0x18] sm:$0xff]  }
 0xe95   : > { %v6497_v47 = vpop.f32.mrb[4].mxu0 }
 0xe96   : > { %v6586_v9 = vmul.f32 %v13353_v8, %v6497_v47  ;;  %v14607_v10 = vpop.f32.mrb[5].mxu0  ;;  %v15269_v47 = vld [vmem:[%s19320_s1 + $0x38] sm:$0xff]  }
 0xe97   : > { %v6500_v11 = vpop.f32.mrb[6].mxu0  ;;  %v19322_v10 = vmov 0  }
 0xe98   : > { %v6588_v29 = vadd.f32 %v6586_v9, %v6578_v49  ;;  %v6587_v30 = vmul.f32 %v13353_v8, %v6500_v11  ;;  %v14608_v31 = vpop.f32.mrb[7].mxu0  ;;  %v15264_v49 = vld [vmem:[%s19320_s1 + $0x10] sm:$0xff]   ;;  %v15270_v9 = vld [vmem:[%s19320_s1 + $0x40] sm:$0xff]  }
 0xe99   : > { %v15268_v8 = vld [vmem:[%s19320_s1 + $0x30] sm:$0xff]   ;;  %v15271_v11 = vld [vmem:[%s19321_s3] sm:$0xff]   ;;  %v15274_v31 = vld [vmem:[%s19321_s3 + $0x18] sm:$0xff]  }
 0xe9a   : > { %v6589_v33 = vadd.f32 %v6587_v30, %v6579_v25  ;;  %v15267_v25 = vld [vmem:[%s19320_s1 + $0x28] sm:$0xff]   ;;  %14684 = vmatpush3.bf16.msra.mxu0 %v15271_v11  ;;  %v15273_v30 = vld [vmem:[%s19321_s3 + $0x10] sm:$0xff]   ;;  %s19325_s1 = sld [smem:[#allocation62_spill]] }
 0xe9b   : > { %14685 = vmatprep.subr.bf16.mxu0 %v16547_v59 }
 0xe9d   : > { %v6505_v35 = vpop.f32.mrb[8].mxu0 }
 0xe9e   : > { %v6596_v1 = vmul.f32 %v13354_v34, %v6505_v35  ;;  %v14611_v56 = vpop.f32.mrb[9].mxu0 }
 0xe9f   : > { %v6508_v37 = vpop.f32.mrb[10].mxu0  ;;  %v13389_v56 = vld [vmem:[%s19323_s4] ss:$0 sm:$0xff] }
 0xea0   : > { %v6598_v40 = vadd.f32 %v6596_v1, %v6588_v29  ;;  %v6597_v61 = vmul.f32 %v13354_v34, %v6508_v37  ;;  %v14612_v38 = vpop.f32.mrb[11].mxu0  ;;  %v15272_v29 = vld [vmem:[%s19321_s3 + $0x8] sm:$0xff]   ;;  %v13390_v37 = vld [vmem:[%s19323_s4 + $0x1] ss:$0 sm:$0xff]  ;;  %s19326_s3 = sld [smem:[#allocation64_spill]] }
 0xea1   : > { %14686 = vmatpush3.bf16.msra.mxu0 %v15272_v29 }
 0xea2   : > { %v6599_v2 = vadd.f32 %v6597_v61, %v6589_v33  ;;  %v6606_v63 = vadd.f32 %v13355_v5, %v6598_v40  ;;  %14687 = vmatprep.subr.bf16.mxu0 %v16547_v59 }
 0xea4   : > { %v6607_v41 = vadd.f32 %v13355_v5, %v6599_v2 }
 0xea5   : > { %14688 = vmatpush3.bf16.msra.mxu0 %v15273_v30 }
 0xea6   : > { %v6616_v51 = vpack.c.bf16 %v6607_v41, %v6606_v63  ;;  %14689 = vmatprep.subr.bf16.mxu0 %v16547_v59 }
 0xea8   : > { %14622 = vmatmul.mubr.msk.bf16.vlgmr.msra.gmra.mrb[216].mxu1 %vm2923_vm3, %v6616_v51 }
 0xea9   : > { %14626 = vmatpush3.bf16.msra.mxu1 %v15254_v36  ;;  %14641 = vmatprep.mubr.msk.bf16.mxu1 %vm16548_vm5, %v16547_v59 }
 0xeaa   : > { %14627 = vmatprep.subr.bf16.mxu1 %v16547_v59  ;;  %14690 = vmatpush3.bf16.msra.mxu0 %v15274_v31 }
 0xeab   : > { %14695 = vmatprep.subr.bf16.mxu0 %v16547_v59 }
 0xead   : > { %14628 = vmatpush3.bf16.msra.mxu1 %v15255_v6 }
 0xeae   : > { %14629 = vmatprep.subr.bf16.mxu1 %v16547_v59 }
 0xeb1   : > { %14630 = vmatpush3.bf16.msra.mxu1 %v15256_v43  ;;  %v13391_v43 = vld [vmem:[%s19323_s4 + $0x2] ss:$0 sm:$0xff] }
 0xeb2   : > { %14631 = vmatprep.subr.bf16.mxu1 %v16547_v59 }
 0xeb5   : > { %14632 = vmatpush3.bf16.msra.mxu1 %v15257_v7 }
 0xeb6   : > { %14633 = vmatprep.subr.bf16.mxu1 %v16547_v59 }
 0xeb9   : > { %14634 = vmatpush3.bf16.msra.mxu1 %v15258_v16 }
 0xeba   : > { %14635 = vmatprep.subr.bf16.mxu1 %v16547_v59 }
 0xebd   : > { %14636 = vmatpush3.bf16.msra.mxu1 %v15259_v45 }
 0xebe   : > { %14637 = vmatprep.subr.bf16.mxu1 %v16547_v59 }
 0xec1   : > { %14638 = vmatpush3.bf16.msra.mxu1 %v15260_v60 }
 0xec2   : > { %14639 = vmatprep.subr.bf16.mxu1 %v16547_v59 }
 0xec5   : > { %14640 = vmatpush3.bf16.msra.mxu1 %v15261_v53 }
 0xec6   : > { %14645 = vmatprep.subr.bf16.mxu1 %v16547_v59 }
 0xf7b   : > { %v6685_v50 = vpop.f32.mrb[216].mxu1 }
 0xf7c   : > { %v6686_v44 = vadd.f32 %v13356_v18, %v6685_v50  ;;  %v14623_v12 = vpop.f32.mrb[217].mxu1  ;;  %v13392_v50 = vld [vmem:[%s19323_s4 + $0x3] ss:$0 sm:$0xff] }
 0xf7d   : > { %v6688_v13 = vpop.f32.mrb[218].mxu1 }
 0xf7e   : > { %v6692_v14 = vmax.f32 %v6686_v44, 0.0  ;;  %v6689_v15 = vadd.f32 %v13356_v18, %v6688_v13  ;;  %v14624_v17 = vpop.f32.mrb[219].mxu1 }
 0xf80   : > { %v6694_v20 = vadd.f32 %v6692_v14, %v6267_v57  ;;  %v6693_v21 = vmax.f32 %v6689_v15, 0.0 }
 0xf82   : > { %v6695_v54 = vadd.f32 %v6693_v21, %v6268_v19  ;;  %v13393_v19 = vld [vmem:[%s19323_s4 + $0x4] ss:$0 sm:$0xff] }
 0xf84   : > { %v18032_v0 = vpack.c.bf16 %v6695_v54, %v6694_v20 }
 0xf86   : > { %14642 = vmatmul.mubr.bf16.vlgmr.msra.gmra.mrb[220].mxu1 %v18032_v0 }
 0xf87   : > { %14647 = vmatprep.mubr.msk.bf16.mxu1 %vm16548_vm5, %v16547_v59 }
0x1059   : > { %v6812_v46 = vpop.f32.mrb[220].mxu1 }
0x105a   : > { %v6813_v3 = vadd.f32 %v13362_v58, %v6812_v46  ;;  %v14643_v55 = vpop.f32.mrb[221].mxu1 }
0x105b   : > { %v6815_v39 = vpop.f32.mrb[222].mxu1 }
0x105c   : > { %v6816_v22 = vadd.f32 %v13362_v58, %v6815_v39  ;;  %v14644_v52 = vpop.f32.mrb[223].mxu1  ;;  %v6819_v23 = vmax.f32 %v6813_v3, 0.0 }
0x105e   : > { %v6820_v24 = vmax.f32 %v6816_v22, 0.0  ;;  %v13394_v22 = vld [vmem:[%s19323_s4 + $0x5] ss:$0 sm:$0xff] }
0x1060   : > { %v6839_v26 = vpack.c.bf16 %v6820_v24, %v6819_v23 }
0x1062   : > { %14646 = vmatpush3.bf16.msra.mxu1 %v6839_v26 }
0x1065   : > { %14648 = vmatmul.mubr.msk.bf16.vlgmr.msra.gmra.mrb[224].mxu1 %vm6885_vm6, %v15262_v27 }
0x1066   : > { %14651 = vmatprep.mubr.msk.bf16.mxu1 %vm16548_vm5, %v16547_v59 }
0x106d   : > { %14652 = vmatmul.mubr.msk.bf16.gmra.mrb[228].mxu1 %vm6885_vm6, %v15263_v28 }
0x106e   : > { %14655 = vmatprep.mubr.msk.bf16.mxu1 %vm16548_vm5, %v16547_v59 }
0x1075   : > { %14656 = vmatmul.mubr.msk.bf16.gmra.mrb[232].mxu1 %vm6885_vm6, %v15264_v49 }
0x1076   : > { %14659 = vmatprep.mubr.msk.bf16.mxu1 %vm16548_vm5, %v16547_v59 }
0x107d   : > { %14660 = vmatmul.mubr.msk.bf16.gmra.mrb[236].mxu1 %vm6885_vm6, %v15265_v4 }
0x107e   : > { %14663 = vmatprep.mubr.msk.bf16.mxu1 %vm16548_vm5, %v16547_v59 }
0x1085   : > { %14664 = vmatmul.mubr.msk.bf16.gmra.mrb[240].mxu1 %vm6885_vm6, %v15266_v32  ;;  %v13395_v32 = vld [vmem:[%s19323_s4 + $0x6] ss:$0 sm:$0xff] }
0x1086   : > { %14667 = vmatprep.mubr.msk.bf16.mxu1 %vm16548_vm5, %v16547_v59 }
0x108d   : > { %14668 = vmatmul.mubr.msk.bf16.gmra.mrb[244].mxu1 %vm6885_vm6, %v15267_v25 }
0x108e   : > { %14671 = vmatprep.mubr.msk.bf16.mxu1 %vm16548_vm5, %v16547_v59 }
0x1095   : > { %14672 = vmatmul.mubr.msk.bf16.gmra.mrb[248].mxu1 %vm6885_vm6, %v15268_v8 }
0x1096   : > { %14675 = vmatprep.mubr.msk.bf16.mxu1 %vm16548_vm5, %v16547_v59 }
0x109d   : > { %14676 = vmatmul.mubr.msk.bf16.gmra.mrb[252].mxu1 %vm6885_vm6, %v15269_v47 }
0x109e   : > { %14679 = vmatprep.mubr.msk.bf16.mxu1 %vm16548_vm5, %v16547_v59 }
0x10a5   : > { %14680 = vmatmul.mubr.msk.bf16.gmra.mrb[0].mxu1 %vm6885_vm6, %v15270_v9 }
0x10a6   : > { %7632 = vmatprep.mubr.bf16.mxu1 %v19322_v10 }
0x1138   : > { %v6947_v33 = vpop.f32.mrb[224].mxu1 }
0x1139   : > { %v14649_v34 = vpop.f32.mrb[225].mxu1  ;;  %v7024_v61 = vmul.f32 %v13389_v56, %v6947_v33  ;;  %v13396_v33 = vld [vmem:[%s19323_s4 + $0x7] ss:$0 sm:$0xff] }
0x113a   : > { %v6950_v35 = vpop.f32.mrb[226].mxu1 }
0x113b   : > { %v14650_v1 = vpop.f32.mrb[227].mxu1  ;;  %v7025_v63 = vmul.f32 %v13389_v56, %v6950_v35 }
0x1140   : > { %v6955_v40 = vpop.f32.mrb[228].mxu1 }
0x1141   : > { %v7032_v38 = vmul.f32 %v13390_v37, %v6955_v40  ;;  %v14653_v5 = vpop.f32.mrb[229].mxu1 }
0x1142   : > { %v6958_v2 = vpop.f32.mrb[230].mxu1  ;;  %v13397_v5 = vld [vmem:[%s19323_s4 + $0x8] ss:$0 sm:$0xff]  ;;  %s19327_s4 = sld [smem:[#allocation69_spill]] }
0x1143   : > { %v7034_v41 = vadd.f32 %v7032_v38, %v7024_v61  ;;  %v7033_v36 = vmul.f32 %v13390_v37, %v6958_v2  ;;  %v14654_v51 = vpop.f32.mrb[231].mxu1 }
0x1145   : > { %v7035_v6 = vadd.f32 %v7033_v36, %v7025_v63 }
0x1148   : > { %v6963_v7 = vpop.f32.mrb[232].mxu1 }
0x1149   : > { %v7042_v16 = vmul.f32 %v13391_v43, %v6963_v7  ;;  %v14657_v45 = vpop.f32.mrb[233].mxu1  ;;  %v13398_v7 = vld [vmem:[#allocation10] ss:$0 sm:$0xff] }
0x114a   : > { %v6966_v60 = vpop.f32.mrb[234].mxu1 }
0x114b   : > { %v7044_v53 = vadd.f32 %v7042_v16, %v7034_v41  ;;  %v7043_v42 = vmul.f32 %v13391_v43, %v6966_v60  ;;  %v14658_v18 = vpop.f32.mrb[235].mxu1 }
0x114c   : > { %v15276_v18 = vld [vmem:[%s19324_s2 + $0x8] sm:$0xff]  }
0x114d   : > { %v7045_v48 = vadd.f32 %v7043_v42, %v7035_v6 }
0x1150   : > { %v6971_v62 = vpop.f32.mrb[236].mxu1 }
0x1151   : > { %v7052_v44 = vmul.f32 %v13392_v50, %v6971_v62  ;;  %v14661_v12 = vpop.f32.mrb[237].mxu1  ;;  %v15279_v62 = vld [vmem:[%s19324_s2 + $0x20] sm:$0xff]  }
0x1152   : > { %v6974_v13 = vpop.f32.mrb[238].mxu1  ;;  %v15281_v12 = vld [vmem:[%s19324_s2 + $0x30] sm:$0xff]  }
0x1153   : > { %v7054_v57 = vadd.f32 %v7052_v44, %v7044_v53  ;;  %v7053_v14 = vmul.f32 %v13392_v50, %v6974_v13  ;;  %v14662_v15 = vpop.f32.mrb[239].mxu1  ;;  %v15275_v53 = vld [vmem:[%s19324_s2] sm:$0xff]   ;;  %v15278_v50 = vld [vmem:[%s19324_s2 + $0x18] sm:$0xff]   ;;  %v15280_v44 = vld [vmem:[%s19324_s2 + $0x28] sm:$0xff]  }
0x1154   : > { %v15282_v13 = vld [vmem:[%s19324_s2 + $0x38] sm:$0xff]  }
0x1155   : > { %v7055_v17 = vadd.f32 %v7053_v14, %v7045_v48  ;;  %v15277_v48 = vld [vmem:[%s19324_s2 + $0x10] sm:$0xff]   ;;  %s12985_s2 = sshll.u32 %s17225_s10, 4 }
0x1156   : > { %s18114_s5 = scalar_lea.vmem [#allocation19], %s12985_s2  ;;  %s19329_s2 = sld [smem:[#allocation73_spill]] }
0x1158   : > { %v6979_v20 = vpop.f32.mrb[240].mxu1 }
0x1159   : > { %v7062_v21 = vmul.f32 %v13393_v19, %v6979_v20  ;;  %v14665_v54 = vpop.f32.mrb[241].mxu1 }
0x115a   : > { %v6982_v58 = vpop.f32.mrb[242].mxu1 }
0x115b   : > { %v7064_v46 = vadd.f32 %v7062_v21, %v7054_v57  ;;  %v7063_v3 = vmul.f32 %v13393_v19, %v6982_v58  ;;  %v14666_v55 = vpop.f32.mrb[243].mxu1  ;;  %v13399_v19 = vld [vmem:[%s19325_s1] ss:$0 sm:$0xff]  ;;  %s19328_s1 = sld [smem:[#allocation67_spill]] }
0x115d   : > { %v7065_v39 = vadd.f32 %v7063_v3, %v7055_v17 }
0x1160   : > { %v6987_v52 = vpop.f32.mrb[244].mxu1 }
0x1161   : > { %v7072_v23 = vmul.f32 %v13394_v22, %v6987_v52  ;;  %v14669_v24 = vpop.f32.mrb[245].mxu1 }
0x1162   : > { %v6990_v26 = vpop.f32.mrb[246].mxu1  ;;  %v15284_v24 = vld [vmem:[%s19327_s4] sm:$0xff]  }
0x1163   : > { %v7074_v27 = vadd.f32 %v7072_v23, %v7064_v46  ;;  %v7073_v28 = vmul.f32 %v13394_v22, %v6990_v26  ;;  %v14670_v49 = vpop.f32.mrb[247].mxu1  ;;  %v18119_v23 = vld [vmem:[%s19326_s3] sm:$0xff]   ;;  %v15285_v26 = vld [vmem:[%s19327_s4 + $0x8] sm:$0xff]  }
0x1164   : > { %v15287_v49 = vld [vmem:[%s19327_s4 + $0x18] sm:$0xff]  }
0x1165   : > { %v7075_v4 = vadd.f32 %v7073_v28, %v7065_v39  ;;  %v15286_v28 = vld [vmem:[%s19327_s4 + $0x10] sm:$0xff]  }
0x1168   : > { %v6995_v25 = vpop.f32.mrb[248].mxu1 }
0x1169   : > { %v7082_v8 = vmul.f32 %v13395_v32, %v6995_v25  ;;  %v14673_v47 = vpop.f32.mrb[249].mxu1  ;;  %v15290_v25 = vld [vmem:[%s19327_s4 + $0x28] sm:$0xff]  }
0x116a   : > { %v6998_v9 = vpop.f32.mrb[250].mxu1  ;;  %v15293_v47 = vld [vmem:[%s19327_s4 + $0x38] sm:$0xff]  }
0x116b   : > { %v7084_v11 = vadd.f32 %v7082_v8, %v7074_v27  ;;  %v7083_v29 = vmul.f32 %v13395_v32, %v6998_v9  ;;  %v14674_v30 = vpop.f32.mrb[251].mxu1  ;;  %v18130_v27 = vld [vmem:[%s19326_s3 + $0x8] sm:$0xff]   ;;  %v15289_v32 = vld [vmem:[%s19327_s4 + $0x20] sm:$0xff]   ;;  %v15292_v8 = vld [vmem:[%s19327_s4 + $0x30] sm:$0xff]   ;;  %s19335_s4 = sld [smem:[#allocation68_spill]] }
0x116c   : > { %v15296_v9 = vld [vmem:[%s19328_s1 + $0x4] ss:$8 sps:$4 sm:$0xff]   ;;  %v15297_v30 = vld [vmem:[%s19328_s1 + $0x10] ss:$8 sps:$4 sm:$0xff]  }
0x116d   : > { %v7085_v31 = vadd.f32 %v7083_v29, %v7075_v4  ;;  %v18141_v4 = vld [vmem:[%s19326_s3 + $0x10] ss:$0 sps:$4 sm:$0x33]   ;;  %7600 = vmatprep.subr.bf16.mxu1 %v15296_v9  ;;  %v15299_v29 = vld [vmem:[%s19328_s1 + $0x14] ss:$8 sps:$4 sm:$0xff]   ;;  %s19330_s3 = sld [smem:[#allocation65_spill]] }
0x1170   : > { %v7003_v34 = vpop.f32.mrb[252].mxu1 }
0x1171   : > { %v7092_v35 = vmul.f32 %v13396_v33, %v7003_v34  ;;  %v14677_v1 = vpop.f32.mrb[253].mxu1  ;;  %v15305_v34 = vld [vmem:[%s19328_s1 + $0x34] ss:$8 sps:$4 sm:$0xff]  }
0x1172   : > { %v7006_v56 = vpop.f32.mrb[254].mxu1  ;;  %v15308_v1 = vld [vmem:[%s19328_s1 + $0x44] ss:$8 sps:$4 sm:$0xff]  }
0x1173   : > { %v7094_v37 = vadd.f32 %v7092_v35, %v7084_v11  ;;  %v7093_v40 = vmul.f32 %v13396_v33, %v7006_v56  ;;  %v14678_v61 = vpop.f32.mrb[255].mxu1  ;;  %v15294_v11 = vld [vmem:[%s19328_s1] ss:$8 sps:$4 sm:$0xff]   ;;  %v15303_v35 = vld [vmem:[%s19328_s1 + $0x30] ss:$8 sps:$4 sm:$0xff]  }
0x1174   : > { %7601 = vmatpush1.bf16.msra.mxu1 %v15294_v11  ;;  %v15300_v33 = vld [vmem:[%s19328_s1 + $0x20] ss:$8 sps:$4 sm:$0xff]   ;;  %v15314_v61 = vld [vmem:[%s19328_s1 + $0x64] ss:$8 sps:$4 sm:$0xff]  }
0x1175   : > { %v7095_v38 = vadd.f32 %v7093_v40, %v7085_v31  ;;  %7602 = vmatprep.subr.bf16.mxu1 %v15299_v29  ;;  %v15302_v31 = vld [vmem:[%s19328_s1 + $0x24] ss:$8 sps:$4 sm:$0xff]   ;;  %v15306_v56 = vld [vmem:[%s19328_s1 + $0x40] ss:$8 sps:$4 sm:$0xff]   ;;  %v15309_v40 = vld [vmem:[%s19328_s1 + $0x50] ss:$8 sps:$4 sm:$0xff]  }
0x1176   : > { %v15318_v29 = vld [vmem:[%s19329_s2] ss:$8 sps:$4 sm:$0xff]  }
0x1178   : > { %v7011_v2 = vpop.f32.mrb[0].mxu1  ;;  %7603 = vmatpush1.bf16.msra.mxu1 %v15297_v30 }
0x1179   : > { %v7102_v63 = vmul.f32 %v13397_v5, %v7011_v2  ;;  %v14681_v41 = vpop.f32.mrb[1].mxu1  ;;  %7604 = vmatprep.subr.bf16.mxu1 %v15302_v31  ;;  %v15315_v2 = vld [vmem:[%s19328_s1 + $0x70] ss:$8 sps:$4 sm:$0xff]   ;;  %v15323_v31 = vld [vmem:[%s19329_s2 + $0x14] ss:$8 sps:$4 sm:$0xff]  }
0x117a   : > { %v7014_v36 = vpop.f32.mrb[2].mxu1  ;;  %v13419_v41 = vld [vmem:[%s19330_s3] ss:$0 sm:$0xff] }
0x117b   : > { %v7104_v51 = vadd.f32 %v7102_v63, %v7094_v37  ;;  %v7103_v6 = vmul.f32 %v13397_v5, %v7014_v36  ;;  %v14682_v43 = vpop.f32.mrb[3].mxu1  ;;  %v15311_v37 = vld [vmem:[%s19328_s1 + $0x54] ss:$8 sps:$4 sm:$0xff]   ;;  %v15320_v63 = vld [vmem:[%s19329_s2 + $0x4] ss:$8 sps:$4 sm:$0xff]  }
0x117c   : > { %7605 = vmatpush1.bf16.msra.mxu1 %v15300_v33  ;;  %v15317_v5 = vld [vmem:[%s19328_s1 + $0x74] ss:$8 sps:$4 sm:$0xff]   ;;  %v13420_v36 = vld [vmem:[%s19330_s3 + $0x1] ss:$0 sm:$0xff]  ;;  %v15321_v33 = vld [vmem:[%s19329_s2 + $0x10] ss:$8 sps:$4 sm:$0xff]  }
0x117d   : > { %v7105_v16 = vadd.f32 %v7103_v6, %v7095_v38  ;;  %v7112_v45 = vadd.f32 %v13398_v7, %v7104_v51  ;;  %7606 = vmatprep.subr.bf16.mxu1 %v15305_v34  ;;  %v15312_v38 = vld [vmem:[%s19328_s1 + $0x60] ss:$8 sps:$4 sm:$0xff]   ;;  %s19331_s1 = sld [smem:[#allocation70_spill]] }
0x117e   : > { %v13422_v6 = vld [vmem:[%s19330_s3 + $0x3] ss:$0 sm:$0xff] }
0x117f   : > { %v7113_v60 = vadd.f32 %v13398_v7, %v7105_v16 }
0x1180   : > { %7607 = vmatpush1.bf16.msra.mxu1 %v15303_v35 }
0x1181   : > { %v7122_v42 = vpack.c.bf16 %v7113_v60, %v7112_v45  ;;  %7608 = vmatprep.subr.bf16.mxu1 %v15308_v1  ;;  %v13421_v45 = vld [vmem:[%s19330_s3 + $0x2] ss:$0 sm:$0xff] }
0x1183   : > { %14692 = vmatmul.mubr.msk.bf16.vlgmr.msra.gmra.mrb[12].mxu0 %vm2923_vm3, %v7122_v42  ;;  %v13445_v34 = vld [vmem:[%s19331_s1] ss:$0 sm:$0xff]  ;;  %s19332_s1 = sld [smem:[#allocation76_spill]] }
0x1184   : > { %14696 = vmatpush3.bf16.msra.mxu0 %v15275_v53  ;;  %14711 = vmatprep.mubr.msk.bf16.mxu0 %vm16548_vm5, %v16547_v59 }
0x1185   : > { %14697 = vmatprep.subr.bf16.mxu0 %v16547_v59  ;;  %7609 = vmatpush1.bf16.msra.mxu1 %v15306_v56 }
0x1186   : > { %7610 = vmatprep.subr.bf16.mxu1 %v15311_v37 }
0x1188   : > { %14698 = vmatpush3.bf16.msra.mxu0 %v15276_v18 }
0x1189   : > { %14699 = vmatprep.subr.bf16.mxu0 %v16547_v59  ;;  %7611 = vmatpush1.bf16.msra.mxu1 %v15309_v40 }
0x118a   : > { %7612 = vmatprep.subr.bf16.mxu1 %v15314_v61 }
0x118c   : > { %14700 = vmatpush3.bf16.msra.mxu0 %v15277_v48 }
0x118d   : > { %14701 = vmatprep.subr.bf16.mxu0 %v16547_v59  ;;  %7613 = vmatpush1.bf16.msra.mxu1 %v15312_v38 }
0x118e   : > { %7614 = vmatprep.subr.bf16.mxu1 %v15317_v5 }
0x1190   : > { %14702 = vmatpush3.bf16.msra.mxu0 %v15278_v50 }
0x1191   : > { %14703 = vmatprep.subr.bf16.mxu0 %v16547_v59  ;;  %7615 = vmatpush1.bf16.msra.mxu1 %v15315_v2 }
0x1192   : > { %8023 = vmatprep.subr.bf16.mxu1 %v15320_v63  ;;  %v15326_v63 = vld [vmem:[%s19329_s2 + $0x24] ss:$8 sps:$4 sm:$0xff]  }
0x1194   : > { %14704 = vmatpush3.bf16.msra.mxu0 %v15279_v62  ;;  %v13423_v62 = vld [vmem:[%s19330_s3 + $0x4] ss:$0 sm:$0xff] }
0x1195   : > { %14705 = vmatprep.subr.bf16.mxu0 %v16547_v59 }
0x1198   : > { %14706 = vmatpush3.bf16.msra.mxu0 %v15280_v44  ;;  %v13424_v44 = vld [vmem:[%s19330_s3 + $0x5] ss:$0 sm:$0xff] }
0x1199   : > { %14707 = vmatprep.subr.bf16.mxu0 %v16547_v59 }
0x119c   : > { %14708 = vmatpush3.bf16.msra.mxu0 %v15281_v12 }
0x119d   : > { %14709 = vmatprep.subr.bf16.mxu0 %v16547_v59 }
0x11a0   : > { %14710 = vmatpush3.bf16.msra.mxu0 %v15282_v13 }
0x11a1   : > { %14715 = vmatprep.subr.bf16.mxu0 %v16547_v59 }
0x11a3   : > { %14712 = vmatmul.mubr.bf16.vlgmr.msra.gmra.mrb[16].mxu0 %v18032_v0 }
0x11a4   : > { %14717 = vmatprep.mubr.msk.bf16.mxu0 %vm16548_vm5, %v16547_v59 }
0x1256   : > { %v7191_v57 = vpop.f32.mrb[12].mxu0 }
0x1257   : > { %v14693_v14 = vpop.f32.mrb[13].mxu0  ;;  %v7192_v20 = vadd.f32 %v13399_v19, %v7191_v57 }
0x1258   : > { %v7194_v15 = vpop.f32.mrb[14].mxu0  ;;  %v13425_v14 = vld [vmem:[%s19330_s3 + $0x6] ss:$0 sm:$0xff] }
0x1259   : > { %v14694_v17 = vpop.f32.mrb[15].mxu0  ;;  %v7195_v21 = vadd.f32 %v13399_v19, %v7194_v15  ;;  %v7198_v54 = vmax.f32 %v7192_v20, 0.0  ;;  %v13426_v15 = vld [vmem:[%s19330_s3 + $0x7] ss:$0 sm:$0xff] }
0x125b   : > { %v7199_v46 = vmax.f32 %v7195_v21, 0.0 }
0x1276   : > { %v7298_v58 = vpop.f32.mrb[16].mxu0 }
0x1277   : > { %v7299_v3 = vadd.f32 %v7298_v58, %v7198_v54  ;;  %v14713_v55 = vpop.f32.mrb[17].mxu0 }
0x1278   : > { %v7301_v0 = vpop.f32.mrb[18].mxu0 }
0x1279   : > { %7305 = vst [vmem:[%s18114_s5] sm:$0xff] %v7299_v3  ;;  %v7302_v39 = vadd.f32 %v7301_v0, %v7199_v46  ;;  %v14714_v22 = vpop.f32.mrb[19].mxu0 }
0x127b   : > { %7306 = vst [vmem:[%s18114_s5 + $0x8] sm:$0xff] %v7302_v39  ;;  %v7322_v52 = vpack.c.bf16 %v7302_v39, %v7299_v3 }
0x127d   : > { %14716 = vmatpush3.bf16.msra.mxu0 %v7322_v52 }
0x127e   : > { %14729 = vmatprep.subr.bf16.mxu0 %v16547_v59 }
0x1280   : > { %14718 = vmatmul.mubr.msk.bf16.vlgmr.msra.gmra.mrb[20].mxu0 %vm6885_vm6, %v18119_v23 }
0x1281   : > { %14730 = vmatpush3.bf16.msra.mxu0 %v15284_v24  ;;  %14721 = vmatprep.mubr.msk.bf16.mxu0 %vm16548_vm5, %v16547_v59 }
0x1282   : > { %14731 = vmatprep.subr.bf16.mxu0 %v16547_v59 }
0x1285   : > { %14732 = vmatpush3.bf16.msra.mxu0 %v15285_v26 }
0x1286   : > { %14733 = vmatprep.subr.bf16.mxu0 %v16547_v59 }
0x1288   : > { %14722 = vmatmul.mubr.msk.bf16.gmra.mrb[24].mxu0 %vm6885_vm6, %v18130_v27 }
0x1289   : > { %14734 = vmatpush3.bf16.msra.mxu0 %v15286_v28  ;;  %14725 = vmatprep.mubr.msk.bf16.mxu0 %vm16548_vm5, %v16547_v59 }
0x128a   : > { %14735 = vmatprep.subr.bf16.mxu0 %v16547_v59 }
0x128d   : > { %14736 = vmatpush3.bf16.msra.mxu0 %v15287_v49 }
0x128e   : > { %14737 = vmatprep.subr.bf16.mxu0 %v16547_v59 }
0x1290   : > { %14726 = vmatmul.mubr.msk.bf16.gmra.mrb[28].mxu0 %vm6885_vm6, %v18141_v4 }
0x1291   : > { %14738 = vmatpush3.bf16.msra.mxu0 %v15289_v32  ;;  %14745 = vmatprep.mubr.msk.bf16.mxu0 %vm16548_vm5, %v16547_v59 }
0x1292   : > { %14739 = vmatprep.subr.bf16.mxu0 %v16547_v59 }
0x1295   : > { %14740 = vmatpush3.bf16.msra.mxu0 %v15290_v25  ;;  %v13428_v25 = vld [vmem:[#allocation11] ss:$0 sm:$0xff] }
0x1296   : > { %14741 = vmatprep.subr.bf16.mxu0 %v16547_v59 }
0x1299   : > { %14742 = vmatpush3.bf16.msra.mxu0 %v15292_v8 }
0x129a   : > { %14743 = vmatprep.subr.bf16.mxu0 %v16547_v59 }
0x129d   : > { %14744 = vmatpush3.bf16.msra.mxu0 %v15293_v47 }
0x129e   : > { %14749 = vmatprep.subr.bf16.mxu0 %v16547_v59 }
0x12a0   : > { %14746 = vmatmul.mubr.bf16.vlgmr.msra.gmra.mrb[32].mxu0 %v7322_v52  ;;  %v13427_v52 = vld [vmem:[%s19330_s3 + $0x8] ss:$0 sm:$0xff]  ;;  %s19334_s3 = sld [smem:[#allocation82_spill]] }
0x12a1   : > { %14751 = vmatprep.mubr.msk.bf16.mxu0 %vm16548_vm5, %v16547_v59 }
0x1353   : > { %v7379_v51 = vpop.f32.mrb[20].mxu0 }
0x1354   : > { %v7407_v43 = vmul.f32 %v13419_v41, %v7379_v51  ;;  %v7414_v7 = vmul.f32 %v13420_v36, %v7379_v51  ;;  %v14719_v16 = vpop.f32.mrb[21].mxu0  ;;  %v15324_v41 = vld [vmem:[%s19329_s2 + $0x20] ss:$8 sps:$4 sm:$0xff]   ;;  %v15327_v36 = vld [vmem:[%s19329_s2 + $0x30] ss:$8 sps:$4 sm:$0xff]  }
0x1355   : > { %v7382_v60 = vpop.f32.mrb[22].mxu0  ;;  %v15330_v51 = vld [vmem:[%s19329_s2 + $0x40] ss:$8 sps:$4 sm:$0xff]   ;;  %v15341_v16 = vld [vmem:[%s19329_s2 + $0x74] ss:$8 sps:$4 sm:$0xff]  }
0x1356   : > { %v7416_v53 = vrot.slane %v7414_v7, 4  ;;  %v7433_v42 = vmul.f32 %v13422_v6, %v7382_v60  ;;  %v14720_v18 = vpop.f32.mrb[23].mxu0  ;;  %v7425_v50 = vmul.f32 %v13421_v45, %v7382_v60  ;;  %v15333_v6 = vld [vmem:[%s19329_s2 + $0x50] ss:$8 sps:$4 sm:$0xff]   ;;  %v15336_v7 = vld [vmem:[%s19329_s2 + $0x60] ss:$8 sps:$4 sm:$0xff]  }
0x1357   : > { %v15339_v45 = vld [vmem:[%s19329_s2 + $0x70] ss:$8 sps:$4 sm:$0xff]   ;;  %v15342_v60 = vld [vmem:[%s19332_s1 + $0x40] sm:$0xff]   ;;  %v15345_v18 = vld [vmem:[%s19332_s1 + $0x8] sm:$0xff]  }
0x1358   : > { %v7418_v48 = vadd.f32 %v7416_v53, %v7407_v43  ;;  %v7435_v13 = vrot.slane %v7433_v42, 4  ;;  %v15338_v43 = vld [vmem:[%s19329_s2 + $0x64] ss:$8 sps:$4 sm:$0xff]  }
0x1359   : > { %v15343_v53 = vld [vmem:[%s19332_s1] sm:$0xff]   ;;  %v15344_v42 = vld [vmem:[%s19332_s1 + $0x48] sm:$0xff]  }
0x135a   : > { %v7426_v12 = vadd.f32 %v7425_v50, %v7418_v48  ;;  %v15346_v48 = vld [vmem:[%s19332_s1 + $0x50] sm:$0xff]  }
0x135b   : > { %v7387_v57 = vpop.f32.mrb[24].mxu0  ;;  %v15347_v50 = vld [vmem:[%s19332_s1 + $0x10] sm:$0xff]  }
0x135c   : > { %v7437_v17 = vadd.f32 %v7435_v13, %v7426_v12  ;;  %v7444_v19 = vmul.f32 %v13423_v62, %v7387_v57  ;;  %v7452_v20 = vmul.f32 %v13424_v44, %v7387_v57  ;;  %v14723_v21 = vpop.f32.mrb[25].mxu0  ;;  %v15348_v62 = vld [vmem:[%s19332_s1 + $0x58] sm:$0xff]   ;;  %v15350_v12 = vld [vmem:[%s19332_s1 + $0x60] sm:$0xff]   ;;  %v15352_v57 = vld [vmem:[%s19332_s1 + $0x68] sm:$0xff]  }
0x135d   : > { %v7390_v54 = vpop.f32.mrb[26].mxu0  ;;  %v15349_v44 = vld [vmem:[%s19332_s1 + $0x18] sm:$0xff]   ;;  %v15351_v13 = vld [vmem:[%s19332_s1 + $0x20] sm:$0xff]  }
0x135e   : > { %v7445_v58 = vadd.f32 %v7444_v19, %v7437_v17  ;;  %v7454_v46 = vrot.slane %v7452_v20, 4  ;;  %v7463_v3 = vmul.f32 %v13425_v14, %v7390_v54  ;;  %v7471_v55 = vmul.f32 %v13426_v15, %v7390_v54  ;;  %v14724_v0 = vpop.f32.mrb[27].mxu0  ;;  %v15353_v14 = vld [vmem:[%s19332_s1 + $0x28] sm:$0xff]  }
0x1360   : > { %v7456_v39 = vadd.f32 %v7454_v46, %v7445_v58  ;;  %v7473_v22 = vrot.slane %v7471_v55, 4 }
0x1362   : > { %v7464_v24 = vadd.f32 %v7463_v3, %v7456_v39 }
0x1363   : > { %v7395_v26 = vpop.f32.mrb[28].mxu0 }
0x1364   : > { %v7475_v28 = vadd.f32 %v7473_v22, %v7464_v24  ;;  %v7482_v49 = vmul.f32 %v13427_v52, %v7395_v26  ;;  %v14727_v32 = vpop.f32.mrb[29].mxu0 }
0x1365   : > { %v7398_v8 = vpop.f32.mrb[30].mxu0 }
0x1366   : > { %v7483_v47 = vadd.f32 %v7482_v49, %v7475_v28  ;;  %v14728_v9 = vpop.f32.mrb[31].mxu0 }
0x1368   : > { %v7490_v11 = vadd.f32 %v13428_v25, %v7483_v47 }
0x136a   : > { %v7507_v30 = vpack.c.bf16 %v7490_v11, %v7490_v11 }
0x136c   : > { %7633 = vmatmul.mubr.bf16.vlgmr.msra.gmra.mrb[4].mxu1 %v7507_v30 }
0x136d   : > { %8024 = vmatpush1.bf16.msra.mxu1 %v15318_v29  ;;  %8055 = vmatprep.mubr.bf16.mxu1 %v19322_v10 }
0x136e   : > { %8025 = vmatprep.subr.bf16.mxu1 %v15323_v31 }
0x1371   : > { %8026 = vmatpush1.bf16.msra.mxu1 %v15321_v33 }
0x1372   : > { %8027 = vmatprep.subr.bf16.mxu1 %v15326_v63 }
0x1373   : > { %v7748_v35 = vpop.f32.mrb[32].mxu0 }
0x1374   : > { %v7749_v1 = vadd.f32 %v13445_v34, %v7748_v35  ;;  %v14747_v56 = vpop.f32.mrb[33].mxu0 }
0x1375   : > { %v7751_v37 = vpop.f32.mrb[34].mxu0  ;;  %8028 = vmatpush1.bf16.msra.mxu1 %v15324_v41 }
0x1376   : > { %v7752_v40 = vadd.f32 %v13445_v34, %v7751_v37  ;;  %v14748_v61 = vpop.f32.mrb[35].mxu0  ;;  %v7755_v38 = vmax.f32 %v7749_v1, 0.0 }
0x1378   : > { %v7756_v5 = vmax.f32 %v7752_v40, 0.0 }
0x137a   : > { %v7767_v2 = vpack.c.bf16 %v7756_v5, %v7755_v38 }
0x137c   : > { %14750 = vmatpush3.bf16.msra.mxu0 %v7767_v2 }
0x137d   : > { %14223 = vmatprep.subr.bf16.mxu0 %v15342_v60  ;;  %v15355_v60 = vld [vmem:[%s19332_s1 + $0x30] sm:$0xff]  }
0x137f   : > { %14752 = vmatmul.mubr.msk.bf16.vlgmr.msra.gmra.mrb[36].mxu0 %vm6885_vm6, %v18119_v23  ;;  %v15329_v23 = vld [vmem:[%s19329_s2 + $0x34] ss:$8 sps:$4 sm:$0xff]  }
0x1380   : > { %14755 = vmatprep.mubr.msk.bf16.mxu0 %vm16548_vm5, %v16547_v59  ;;  %8029 = vmatprep.subr.bf16.mxu1 %v15329_v23 }
0x1381   : > { %8030 = vmatpush1.bf16.msra.mxu1 %v15327_v36  ;;  %14224 = vmatpush3.bf16.msra.mxu0 %v15343_v53  ;;  %v15356_v53 = vld [vmem:[%s19332_s1 + $0x78] sm:$0xff]  }
0x1382   : > { %14225 = vmatprep.subr.bf16.mxu0 %v15344_v42  ;;  %v15357_v42 = vld [vmem:[%s19332_s1 + $0x38] sm:$0xff]  }
0x1385   : > { %14226 = vmatpush3.bf16.msra.mxu0 %v15345_v18  ;;  %v15360_v18 = vld [vmem:[%s19334_s3 + $0x4] ss:$8 sps:$4 sm:$0xff]  }
0x1386   : > { %14227 = vmatprep.subr.bf16.mxu0 %v15346_v48  ;;  %v7510_v48 = vlaneseq }
0x1387   : > { %14756 = vmatmul.mubr.msk.bf16.gmra.mrb[40].mxu0 %vm6885_vm6, %v18130_v27  ;;  %v15332_v27 = vld [vmem:[%s19329_s2 + $0x44] ss:$8 sps:$4 sm:$0xff]  }
0x1388   : > { %14759 = vmatprep.mubr.msk.bf16.mxu0 %vm16548_vm5, %v16547_v59  ;;  %8031 = vmatprep.subr.bf16.mxu1 %v15332_v27 }
0x1389   : > { %8032 = vmatpush1.bf16.msra.mxu1 %v15330_v51  ;;  %14228 = vmatpush3.bf16.msra.mxu0 %v15347_v50  ;;  %v13466_v51 = vld [vmem:[#allocation13] ss:$0 sm:$0xff]  ;;  %v18245_v50 = vshrl.u32 %v7510_v48, 7 }
0x138a   : > { %14229 = vmatprep.subr.bf16.mxu0 %v15348_v62 }
0x138b   : > { %v18248_v62 = vsub.s32 0, %v18245_v50 }
0x138d   : > { %14230 = vmatpush3.bf16.msra.mxu0 %v15349_v44  ;;  %v7508_v44 = vld [vmem:[%s19335_s4] sm:$0x3]  ;;  %s19337_s4 = sld [smem:[#allocation77_spill]] }
0x138e   : > { %14231 = vmatprep.subr.bf16.mxu0 %v15350_v12  ;;  %v18252_v12 = vsub.s32 1, %v18245_v50 }
0x138f   : > { %14760 = vmatmul.mubr.msk.bf16.gmra.mrb[44].mxu0 %vm6885_vm6, %v18141_v4  ;;  %v15335_v4 = vld [vmem:[%s19329_s2 + $0x54] ss:$8 sps:$4 sm:$0xff]   ;;  %s19333_s2 = sld [smem:[#allocation71_spill]] }
0x1390   : > { %8033 = vmatprep.subr.bf16.mxu1 %v15335_v4 }
0x1391   : > { %8034 = vmatpush1.bf16.msra.mxu1 %v15333_v6  ;;  %14232 = vmatpush3.bf16.msra.mxu0 %v15351_v13 }
0x1392   : > { %8035 = vmatprep.subr.bf16.mxu1 %v15338_v43  ;;  %14233 = vmatprep.subr.bf16.mxu0 %v15352_v57  ;;  %v7513_v57 = vrot.slane %v7508_v44, %v18248_v62 }
0x1395   : > { %8036 = vmatpush1.bf16.msra.mxu1 %v15336_v7  ;;  %14234 = vmatpush3.bf16.msra.mxu0 %v15353_v14  ;;  %v13458_v21 = vld [vmem:[%s19333_s2 + $0x1] ss:$0 sm:$0xff]  ;;  %v13457_v54 = vld [vmem:[%s19333_s2] ss:$0 sm:$0xff]  ;;  %v13460_v46 = vld [vmem:[%s19333_s2 + $0x3] ss:$0 sm:$0xff]  ;;  %v7517_v14 = vrot.slane %v7508_v44, %v18252_v12 }
0x1396   : > { %8037 = vmatprep.subr.bf16.mxu1 %v15341_v16  ;;  %v13459_v0 = vld [vmem:[%s19333_s2 + $0x2] ss:$0 sm:$0xff]  ;;  %v13461_v32 = vld [vmem:[%s19333_s2 + $0x4] ss:$0 sm:$0xff]  ;;  %v13462_v25 = vld [vmem:[%s19333_s2 + $0x5] ss:$0 sm:$0xff] }
0x1397   : > { %v13464_v11 = vld [vmem:[%s19333_s2 + $0x7] ss:$0 sm:$0xff]  ;;  %v13463_v34 = vld [vmem:[%s19333_s2 + $0x6] ss:$0 sm:$0xff]  ;;  %v13465_v5 = vld [vmem:[%s19333_s2 + $0x8] ss:$0 sm:$0xff] }
0x1398   : > { %s19336_s2 = sld [smem:[#allocation74_spill]] }
0x1399   : > { %8038 = vmatpush1.bf16.msra.mxu1 %v15339_v45  ;;  %v15354_v45 = vld [vmem:[%s19332_s1 + $0x70] sm:$0xff]   ;;  %s19339_s1 = sld [smem:[#allocation75_spill]] }
0x139a   : > { %14763 = vmatprep.subr.bf16.mxu1 %v16547_v59  ;;  %14235 = vmatprep.subr.bf16.mxu0 %v15354_v45 }
0x139b   : > { %14236 = vmatpush3.bf16.msra.mxu0 %v15355_v60  ;;  %v13483_v60 = vld [vmem:[%s19337_s4] ss:$0 sm:$0xff]  ;;  %s19340_s4 = sld [smem:[#allocation78_spill]] }
0x139c   : > { %14237 = vmatprep.subr.bf16.mxu0 %v15356_v53 }
0x139e   : > { %v7931_v13 = vld [vmem:[%s19336_s2] sm:$0x3]  ;;  %s19338_s2 = sld [smem:[#allocation80_spill]] }
0x139f   : > { %14238 = vmatpush3.bf16.msra.mxu0 %v15357_v42 }
0x13a0   : > { %8778 = vmatprep.subr.bf16.mxu0 %v15360_v18 }
0x143f   : > { %v18224_v15 = vpop.f32.mrb[4].mxu1 }
0x1440   : > { %v18226_v17 = vpop.f32.mrb[5].mxu1 }
0x1441   : > { %v7638_v19 = vpop.f32.mrb[6].mxu1 }
0x1442   : > { %v7639_v20 = vpop.f32.mrb[7].mxu1  ;;  %v7936_v19 = vrot.slane %v7931_v13, %v18248_v62 }
0x1443   : > { %v7940_v20 = vrot.slane %v7931_v13, %v18252_v12 }
0x1452   : > { %v7802_v58 = vpop.f32.mrb[36].mxu0 }
0x1453   : > { %v7837_v3 = vmul.f32 %v13458_v21, %v7802_v58  ;;  %v14753_v55 = vpop.f32.mrb[37].mxu0  ;;  %v7830_v22 = vmul.f32 %v13457_v54, %v7802_v58  ;;  %v7635_v21 = vadd.f32 %v18224_v15, %v7513_v57  ;;  %v7637_v54 = vadd.f32 %v18226_v17, %v7517_v14  ;;  %v15358_v17 = vld [vmem:[%s19334_s3] ss:$8 sps:$4 sm:$0xff]  }
0x1454   : > { %v7805_v39 = vpop.f32.mrb[38].mxu0 }
0x1455   : > { %v7839_v52 = vrot.slane %v7837_v3, 4  ;;  %v7856_v24 = vmul.f32 %v13460_v46, %v7805_v39  ;;  %v14754_v26 = vpop.f32.mrb[39].mxu0  ;;  %v7848_v49 = vmul.f32 %v13459_v0, %v7805_v39  ;;  %v7641_v39 = vmax.f32 %v7635_v21, 0.0  ;;  %v15406_v21 = vld [vmem:[%s19339_s1] sm:$0xff]  }
0x1457   : > { %v7841_v28 = vadd.f32 %v7839_v52, %v7830_v22  ;;  %v7858_v47 = vrot.slane %v7856_v24, 4  ;;  %v7642_v24 = vmax.f32 %v7637_v54, 0.0  ;;  %v15409_v54 = vld [vmem:[%s19338_s2] ss:$8 sps:$4 sm:$0xff]  }
0x1459   : > { %v7849_v8 = vadd.f32 %v7848_v49, %v7841_v28 }
0x145a   : > { %v7810_v9 = vpop.f32.mrb[40].mxu0 }
0x145b   : > { %v7860_v29 = vadd.f32 %v7858_v47, %v7849_v8  ;;  %v7867_v30 = vmul.f32 %v13461_v32, %v7810_v9  ;;  %v7875_v31 = vmul.f32 %v13462_v25, %v7810_v9  ;;  %v14757_v33 = vpop.f32.mrb[41].mxu0  ;;  %v15363_v25 = vld [vmem:[%s19334_s3 + $0x14] ss:$8 sps:$4 sm:$0xff]   ;;  %v15361_v8 = vld [vmem:[%s19334_s3 + $0x10] ss:$8 sps:$4 sm:$0xff]  }
0x145c   : > { %v7813_v35 = vpop.f32.mrb[42].mxu0  ;;  %v15366_v47 = vld [vmem:[%s19334_s3 + $0x24] ss:$8 sps:$4 sm:$0xff]   ;;  %v15364_v9 = vld [vmem:[%s19334_s3 + $0x20] ss:$8 sps:$4 sm:$0xff]  }
0x145d   : > { %v7868_v1 = vadd.f32 %v7867_v30, %v7860_v29  ;;  %v7877_v56 = vrot.slane %v7875_v31, 4  ;;  %v7894_v37 = vmul.f32 %v13464_v11, %v7813_v35  ;;  %v14758_v40 = vpop.f32.mrb[43].mxu0  ;;  %v7886_v38 = vmul.f32 %v13463_v34, %v7813_v35  ;;  %v15369_v11 = vld [vmem:[%s19334_s3 + $0x34] ss:$8 sps:$4 sm:$0xff]   ;;  %v15367_v29 = vld [vmem:[%s19334_s3 + $0x30] ss:$8 sps:$4 sm:$0xff]  }
0x145e   : > { %v15372_v30 = vld [vmem:[%s19334_s3 + $0x44] ss:$8 sps:$4 sm:$0xff]   ;;  %v15370_v31 = vld [vmem:[%s19334_s3 + $0x40] ss:$8 sps:$4 sm:$0xff]   ;;  %v15375_v33 = vld [vmem:[%s19334_s3 + $0x54] ss:$8 sps:$4 sm:$0xff]  }
0x145f   : > { %v7879_v61 = vadd.f32 %v7877_v56, %v7868_v1  ;;  %v7896_v63 = vrot.slane %v7894_v37, 4  ;;  %v15373_v34 = vld [vmem:[%s19334_s3 + $0x50] ss:$8 sps:$4 sm:$0xff]   ;;  %v15378_v35 = vld [vmem:[%s19334_s3 + $0x64] ss:$8 sps:$4 sm:$0xff]  }
0x1460   : > { %v15376_v1 = vld [vmem:[%s19334_s3 + $0x60] ss:$8 sps:$4 sm:$0xff]   ;;  %v15381_v56 = vld [vmem:[%s19334_s3 + $0x74] ss:$8 sps:$4 sm:$0xff]   ;;  %v15379_v37 = vld [vmem:[%s19334_s3 + $0x70] ss:$8 sps:$4 sm:$0xff]  }
0x1461   : > { %v7887_v2 = vadd.f32 %v7886_v38, %v7879_v61  ;;  %v15384_v40 = vld [vmem:[%s19334_s3 + $0x84] ss:$8 sps:$4 sm:$0xff]   ;;  %v15382_v61 = vld [vmem:[%s19334_s3 + $0x80] ss:$8 sps:$4 sm:$0xff]   ;;  %v15387_v38 = vld [vmem:[%s19334_s3 + $0x94] ss:$8 sps:$4 sm:$0xff]  }
0x1462   : > { %v7818_v41 = vpop.f32.mrb[44].mxu0 }
0x1463   : > { %v7898_v23 = vadd.f32 %v7896_v63, %v7887_v2  ;;  %v7905_v36 = vmul.f32 %v13465_v5, %v7818_v41  ;;  %v14761_v27 = vpop.f32.mrb[45].mxu0  ;;  %v15385_v5 = vld [vmem:[%s19334_s3 + $0x90] ss:$8 sps:$4 sm:$0xff]   ;;  %v15390_v2 = vld [vmem:[%s19334_s3 + $0xa4] ss:$8 sps:$4 sm:$0xff]  }
0x1464   : > { %v7821_v4 = vpop.f32.mrb[46].mxu0  ;;  %v15388_v63 = vld [vmem:[%s19334_s3 + $0xa0] ss:$8 sps:$4 sm:$0xff]   ;;  %v15393_v41 = vld [vmem:[%s19334_s3 + $0xb4] ss:$8 sps:$4 sm:$0xff]  }
0x1465   : > { %v7906_v6 = vadd.f32 %v7905_v36, %v7898_v23  ;;  %v14762_v43 = vpop.f32.mrb[47].mxu0  ;;  %v15391_v23 = vld [vmem:[%s19334_s3 + $0xb0] ss:$8 sps:$4 sm:$0xff]   ;;  %v15396_v36 = vld [vmem:[%s19334_s3 + $0xc4] ss:$8 sps:$4 sm:$0xff]  }
0x1466   : > { %v15394_v27 = vld [vmem:[%s19334_s3 + $0xc0] ss:$8 sps:$4 sm:$0xff]   ;;  %v15397_v4 = vld [vmem:[%s19334_s3 + $0xd0] ss:$8 sps:$4 sm:$0xff]  }
0x1467   : > { %v7913_v7 = vadd.f32 %v13466_v51, %v7906_v6  ;;  %v15399_v51 = vld [vmem:[%s19334_s3 + $0xd4] ss:$8 sps:$4 sm:$0xff]   ;;  %v15402_v6 = vld [vmem:[%s19334_s3 + $0xe4] ss:$8 sps:$4 sm:$0xff]   ;;  %v15400_v43 = vld [vmem:[%s19334_s3 + $0xe0] ss:$8 sps:$4 sm:$0xff]  }
0x1469   : > { %v7930_v16 = vpack.c.bf16 %v7913_v7, %v7913_v7  ;;  %v15405_v7 = vld [vmem:[%s19334_s3 + $0xf4] ss:$8 sps:$4 sm:$0xff]  }
0x146b   : > { %8056 = vmatmul.mubr.bf16.vlgmr.msra.gmra.mrb[8].mxu1 %v7930_v16  ;;  %v15403_v16 = vld [vmem:[%s19334_s3 + $0xf0] ss:$8 sps:$4 sm:$0xff]   ;;  %s19344_s3 = sld [smem:[#allocation83_spill]] }
0x146c   : > { %14765 = vmatprep.mubr.msk.bf16.mxu1 %vm16548_vm5, %v16547_v59 }
0x153e   : > { %v8057_v58 = vpop.f32.mrb[8].mxu1 }
0x153f   : > { %v8058_v46 = vadd.f32 %v8057_v58, %v7936_v19  ;;  %v8059_v3 = vpop.f32.mrb[9].mxu1  ;;  %v15411_v19 = vld [vmem:[%s19338_s2 + $0x4] ss:$8 sps:$4 sm:$0xff]   ;;  %v15414_v58 = vld [vmem:[%s19338_s2 + $0x14] ss:$8 sps:$4 sm:$0xff]  }
0x1540   : > { %v8060_v55 = vadd.f32 %v8059_v3, %v7940_v20  ;;  %v8061_v0 = vpop.f32.mrb[10].mxu1  ;;  %v15407_v3 = vld [vmem:[%s19339_s1 + $0x8] sm:$0xff]  }
0x1541   : > { %v8064_v22 = vmax.f32 %v8058_v46, 0.0  ;;  %v8062_v52 = vpop.f32.mrb[11].mxu1  ;;  %v15412_v46 = vld [vmem:[%s19338_s2 + $0x10] ss:$8 sps:$4 sm:$0xff]  }
0x1542   : > { %v8065_v26 = vmax.f32 %v8060_v55, 0.0  ;;  %v15408_v55 = vld [vmem:[%s19339_s1 + $0x10] ss:$0 sps:$4 sm:$0x33]   ;;  %s19341_s1 = sld [smem:[#allocation81_spill]] }
0x1543   : > { %v8066_v28 = vadd.f32 %v8064_v22, %v7641_v39 }
0x1544   : > { %v8067_v49 = vadd.f32 %v8065_v26, %v7642_v24  ;;  %v15417_v24 = vld [vmem:[%s19338_s2 + $0x24] ss:$8 sps:$4 sm:$0xff]   ;;  %v15415_v26 = vld [vmem:[%s19338_s2 + $0x20] ss:$8 sps:$4 sm:$0xff]  }
0x1545   : > { %v18262_v32 = vpack.c.bf16 %v8066_v28, %v8066_v28  ;;  %v15418_v28 = vld [vmem:[%s19338_s2 + $0x30] ss:$8 sps:$4 sm:$0xff]  }
0x1546   : > { %v8111_v15 = vpack.c.bf16 %v8067_v49, %v8067_v49  ;;  %v15423_v49 = vld [vmem:[%s19338_s2 + $0x44] ss:$8 sps:$4 sm:$0xff]  }
0x1548   : > { %8247 = vmatprep.mubr.bf16.mxu0 %v8111_v15 }
0x1549   : > { %8248 = vmatmul.mubr.bf16.vlgmr.msra.gmra.mrb[48].mxu0 %v18262_v32 }
0x154a   : > { %8779 = vmatpush1.bf16.msra.mxu0 %v15358_v17  ;;  %8810 = vmatprep.mubr.bf16.mxu0 %v8111_v15  ;;  %v15421_v15 = vld [vmem:[%s19338_s2 + $0x40] ss:$8 sps:$4 sm:$0xff]   ;;  %v15426_v17 = vld [vmem:[%s19338_s2 + $0x54] ss:$8 sps:$4 sm:$0xff]  }
0x154b   : > { %8780 = vmatprep.subr.bf16.mxu0 %v15363_v25  ;;  %v15429_v25 = vld [vmem:[%s19338_s2 + $0x64] ss:$8 sps:$4 sm:$0xff]  }
0x154e   : > { %8781 = vmatpush1.bf16.msra.mxu0 %v15361_v8  ;;  %v15427_v8 = vld [vmem:[%s19338_s2 + $0x60] ss:$8 sps:$4 sm:$0xff]  }
0x154f   : > { %8782 = vmatprep.subr.bf16.mxu0 %v15366_v47  ;;  %v15432_v47 = vld [vmem:[%s19338_s2 + $0x74] ss:$8 sps:$4 sm:$0xff]  }
0x1552   : > { %8783 = vmatpush1.bf16.msra.mxu0 %v15364_v9  ;;  %v15430_v9 = vld [vmem:[%s19338_s2 + $0x70] ss:$8 sps:$4 sm:$0xff]  }
0x1553   : > { %8784 = vmatprep.subr.bf16.mxu0 %v15369_v11  ;;  %v13507_v11 = vld [vmem:[%s19340_s4 + $0x1] ss:$0 sm:$0xff] }
0x1556   : > { %8785 = vmatpush1.bf16.msra.mxu0 %v15367_v29  ;;  %v13506_v29 = vld [vmem:[%s19340_s4] ss:$0 sm:$0xff] }
0x1557   : > { %8786 = vmatprep.subr.bf16.mxu0 %v15372_v30 }
0x155a   : > { %8787 = vmatpush1.bf16.msra.mxu0 %v15370_v31  ;;  %v13509_v31 = vld [vmem:[%s19340_s4 + $0x3] ss:$0 sm:$0xff] }
0x155b   : > { %8788 = vmatprep.subr.bf16.mxu0 %v15375_v33 }
0x155e   : > { %8789 = vmatpush1.bf16.msra.mxu0 %v15373_v34 }
0x155f   : > { %8790 = vmatprep.subr.bf16.mxu0 %v15378_v35  ;;  %v13508_v35 = vld [vmem:[%s19340_s4 + $0x2] ss:$0 sm:$0xff] }
0x1562   : > { %8791 = vmatpush1.bf16.msra.mxu0 %v15376_v1 }
0x1563   : > { %8792 = vmatprep.subr.bf16.mxu0 %v15381_v56 }
0x1566   : > { %8793 = vmatpush1.bf16.msra.mxu0 %v15379_v37 }
0x1567   : > { %8794 = vmatprep.subr.bf16.mxu0 %v15384_v40 }
0x156a   : > { %8795 = vmatpush1.bf16.msra.mxu0 %v15382_v61 }
0x156b   : > { %8796 = vmatprep.subr.bf16.mxu0 %v15387_v38 }
0x156e   : > { %8797 = vmatpush1.bf16.msra.mxu0 %v15385_v5 }
0x156f   : > { %8798 = vmatprep.subr.bf16.mxu0 %v15390_v2  ;;  %v13510_v2 = vld [vmem:[%s19340_s4 + $0x4] ss:$0 sm:$0xff] }
0x1572   : > { %8799 = vmatpush1.bf16.msra.mxu0 %v15388_v63  ;;  %v13511_v63 = vld [vmem:[%s19340_s4 + $0x5] ss:$0 sm:$0xff] }
0x1573   : > { %8800 = vmatprep.subr.bf16.mxu0 %v15393_v41 }
0x1576   : > { %8801 = vmatpush1.bf16.msra.mxu0 %v15391_v23 }
0x1577   : > { %8802 = vmatprep.subr.bf16.mxu0 %v15396_v36 }
0x157a   : > { %8803 = vmatpush1.bf16.msra.mxu0 %v15394_v27  ;;  %v13513_v27 = vld [vmem:[%s19340_s4 + $0x7] ss:$0 sm:$0xff] }
0x157b   : > { %8804 = vmatprep.subr.bf16.mxu0 %v15399_v51 }
0x157e   : > { %8805 = vmatpush1.bf16.msra.mxu0 %v15397_v4 }
0x157f   : > { %8806 = vmatprep.subr.bf16.mxu0 %v15402_v6 }
0x1582   : > { %8807 = vmatpush1.bf16.msra.mxu0 %v15400_v43 }
0x1583   : > { %8808 = vmatprep.subr.bf16.mxu0 %v15405_v7  ;;  %v13512_v7 = vld [vmem:[%s19340_s4 + $0x6] ss:$0 sm:$0xff] }
0x1586   : > { %8809 = vmatpush1.bf16.msra.mxu0 %v15403_v16 }
0x1589   : > { %8811 = vmatmul.mubr.bf16.vlgmr.msra.gmra.mrb[52].mxu0 %v18262_v32  ;;  %v15424_v32 = vld [vmem:[%s19338_s2 + $0x50] ss:$8 sps:$4 sm:$0xff]  }
0x161c   : > { %v14239_v45 = vpop.f32.mrb[48].mxu0 }
0x161d   : > { %v14240_v53 = vpop.f32.mrb[49].mxu0 }
0x161e   : > { %v14241_v42 = vadd.f32 %v14240_v53, %v14239_v45  ;;  %v14242_v18 = vpop.f32.mrb[50].mxu0 }
0x161f   : > { %v14243_v44 = vpop.f32.mrb[51].mxu0 }
0x1620   : > { %v8250_v13 = vadd.f32 %v14241_v42, %v13483_v60 }
0x1622   : > { %v8255_v57 = vmax.f32 %v8250_v13, 0.0  ;;  %v13514_v13 = vld [vmem:[%s19340_s4 + $0x8] ss:$0 sm:$0xff]  ;;  %s14000_s4 = sshll.u32 %s17148_s18, 3  ;;  %s19345_s18 = sld [smem:[#allocation88_spill]] }
0x1624   : > { %v8261_v14 = vpack.c.bf16 %v8255_v57, %v8255_v57 }
0x1626   : > { %v8286_v20 = vsel %vm2724_vm2, %v8261_v14, 0 }
0x1627   : > { %14764 = vmatpush3.bf16.msra.mxu1 %v8286_v20 }
0x1628   : > { %8543 = vmatprep.subr.bf16.mxu1 %v15411_v19 }
0x162a   : > { %14766 = vmatmul.mubr.msk.bf16.vlgmr.msra.gmra.mrb[12].mxu1 %vm8275_vm7, %v15406_v21 }
0x162b   : > { %14769 = vmatprep.mubr.msk.bf16.mxu1 %vm16548_vm5, %v16547_v59  ;;  %8544 = vmatpush1.bf16.msra.mxu1 %v15409_v54 }
0x162c   : > { %8545 = vmatprep.subr.bf16.mxu1 %v15414_v58  ;;  %v13515_v58 = vld [vmem:[#allocation14] ss:$0 sm:$0xff] }
0x162f   : > { %8546 = vmatpush1.bf16.msra.mxu1 %v15412_v46 }
0x1630   : > { %8547 = vmatprep.subr.bf16.mxu1 %v15417_v24  ;;  %v8451_v24 = vld [vmem:[%s19341_s1] sm:$0x3]  ;;  %s2413_s1 = scalar_lea.vmem %s19342_s14, %s14000_s4  ;;  %s19347_s4 = sld [smem:[#allocation84_spill]] }
0x1632   : > { %14770 = vmatmul.mubr.msk.bf16.gmra.mrb[16].mxu1 %vm8275_vm7, %v15407_v3 }
0x1633   : > { %14773 = vmatprep.mubr.msk.bf16.mxu1 %vm16548_vm5, %v16547_v59  ;;  %8548 = vmatpush1.bf16.msra.mxu1 %v15415_v26  ;;  %v15420_v59 = vld [vmem:[%s19338_s2 + $0x34] ss:$8 sps:$4 sm:$0xff]   ;;  %v8456_v26 = vrot.slane %v8451_v24, %v18248_v62  ;;  %s19343_s2 = sld [smem:[#allocation86_spill]] }
0x1634   : > { %8549 = vmatprep.subr.bf16.mxu1 %v15420_v59  ;;  %v8460_v59 = vrot.slane %v8451_v24, %v18252_v12 }
0x1637   : > { %8550 = vmatpush1.bf16.msra.mxu1 %v15418_v28 }
0x1638   : > { %8551 = vmatprep.subr.bf16.mxu1 %v15423_v49 }
0x1639   : > { %v15472_v24 = vld [vmem:[%s19343_s2 + $0x184] ss:$16 sps:$4 sm:$0xff]  }
0x163a   : > { %14774 = vmatmul.mubr.msk.bf16.gmra.mrb[20].mxu1 %vm8275_vm7, %v15408_v55 }
0x163b   : > { %8575 = vmatprep.mubr.bf16.mxu1 %v19322_v10  ;;  %8552 = vmatpush1.bf16.msra.mxu1 %v15421_v15 }
0x163c   : > { %8553 = vmatprep.subr.bf16.mxu1 %v15426_v17 }
0x163f   : > { %8554 = vmatpush1.bf16.msra.mxu1 %v15424_v32 }
0x1640   : > { %8555 = vmatprep.subr.bf16.mxu1 %v15429_v25 }
0x1643   : > { %8556 = vmatpush1.bf16.msra.mxu1 %v15427_v8 }
0x1644   : > { %8557 = vmatprep.subr.bf16.mxu1 %v15432_v47 }
0x1647   : > { %8558 = vmatpush1.bf16.msra.mxu1 %v15430_v9 }
0x165c   : > { %v18313_v0 = vpop.f32.mrb[52].mxu0 }
0x165d   : > { %v18315_v39 = vpop.f32.mrb[53].mxu0 }
0x165e   : > { %v8816_v22 = vpop.f32.mrb[54].mxu0 }
0x165f   : > { %v8817_v52 = vpop.f32.mrb[55].mxu0 }
0x16fd   : > { %v8322_v30 = vpop.f32.mrb[12].mxu1 }
0x16fe   : > { %v8357_v33 = vmul.f32 %v13507_v11, %v8322_v30  ;;  %v14767_v34 = vpop.f32.mrb[13].mxu1  ;;  %v8350_v56 = vmul.f32 %v13506_v29, %v8322_v30 }
0x16ff   : > { %v8325_v1 = vpop.f32.mrb[14].mxu1 }
0x1700   : > { %v8359_v37 = vrot.slane %v8357_v33, 4  ;;  %v8376_v40 = vmul.f32 %v13509_v31, %v8325_v1  ;;  %v14768_v61 = vpop.f32.mrb[15].mxu1  ;;  %v8368_v5 = vmul.f32 %v13508_v35, %v8325_v1  ;;  %v15436_v33 = vld [vmem:[%s19343_s2 + $0x4] ss:$16 sps:$4 sm:$0xff]   ;;  %v15437_v1 = vld [vmem:[%s19343_s2 + $0x20] ss:$16 sps:$4 sm:$0xff]  }
0x1701   : > { %v15439_v35 = vld [vmem:[%s19343_s2 + $0x24] ss:$16 sps:$4 sm:$0xff]   ;;  %v15443_v61 = vld [vmem:[%s19343_s2 + $0x60] ss:$16 sps:$4 sm:$0xff]  }
0x1702   : > { %v8361_v38 = vadd.f32 %v8359_v37, %v8350_v56  ;;  %v8378_v23 = vrot.slane %v8376_v40, 4  ;;  %v15442_v56 = vld [vmem:[%s19343_s2 + $0x44] ss:$16 sps:$4 sm:$0xff]   ;;  %v15440_v37 = vld [vmem:[%s19343_s2 + $0x40] ss:$16 sps:$4 sm:$0xff]  }
0x1703   : > { %v15445_v40 = vld [vmem:[%s19343_s2 + $0x64] ss:$16 sps:$4 sm:$0xff]  }
0x1704   : > { %v8369_v41 = vadd.f32 %v8368_v5, %v8361_v38  ;;  %v15448_v38 = vld [vmem:[%s19343_s2 + $0x84] ss:$16 sps:$4 sm:$0xff]   ;;  %v15446_v5 = vld [vmem:[%s19343_s2 + $0x80] ss:$16 sps:$4 sm:$0xff]  }
0x1705   : > { %v8330_v36 = vpop.f32.mrb[16].mxu1 }
0x1706   : > { %v8380_v51 = vadd.f32 %v8378_v23, %v8369_v41  ;;  %v8387_v4 = vmul.f32 %v13510_v2, %v8330_v36  ;;  %v8395_v6 = vmul.f32 %v13511_v63, %v8330_v36  ;;  %v14771_v43 = vpop.f32.mrb[17].mxu1  ;;  %v15451_v2 = vld [vmem:[%s19343_s2 + $0xa4] ss:$16 sps:$4 sm:$0xff]   ;;  %v15449_v63 = vld [vmem:[%s19343_s2 + $0xa0] ss:$16 sps:$4 sm:$0xff]  }
0x1707   : > { %v8333_v16 = vpop.f32.mrb[18].mxu1  ;;  %v15454_v41 = vld [vmem:[%s19343_s2 + $0xc4] ss:$16 sps:$4 sm:$0xff]   ;;  %v15452_v23 = vld [vmem:[%s19343_s2 + $0xc0] ss:$16 sps:$4 sm:$0xff]  }
0x1708   : > { %v8388_v45 = vadd.f32 %v8387_v4, %v8380_v51  ;;  %v8397_v60 = vrot.slane %v8395_v6, 4  ;;  %v8414_v53 = vmul.f32 %v13513_v27, %v8333_v16  ;;  %v14772_v42 = vpop.f32.mrb[19].mxu1  ;;  %v8406_v44 = vmul.f32 %v13512_v7, %v8333_v16  ;;  %v15457_v36 = vld [vmem:[%s19343_s2 + $0xe4] ss:$16 sps:$4 sm:$0xff]   ;;  %v15455_v27 = vld [vmem:[%s19343_s2 + $0xe0] ss:$16 sps:$4 sm:$0xff]  }
0x1709   : > { %v15460_v51 = vld [vmem:[%s19343_s2 + $0x104] ss:$16 sps:$4 sm:$0xff]   ;;  %v15458_v4 = vld [vmem:[%s19343_s2 + $0x100] ss:$16 sps:$4 sm:$0xff]   ;;  %v15514_v7 = vld [vmem:[%s19343_s2 + $0xc] ss:$16 sps:$4 sm:$0xff]  }
0x170a   : > { %v8399_v18 = vadd.f32 %v8397_v60, %v8388_v45  ;;  %v8416_v14 = vrot.slane %v8414_v53, 4  ;;  %v15463_v6 = vld [vmem:[%s19343_s2 + $0x124] ss:$16 sps:$4 sm:$0xff]   ;;  %v15461_v43 = vld [vmem:[%s19343_s2 + $0x120] ss:$16 sps:$4 sm:$0xff]   ;;  %9532 = vmatprep.subr.bf16.mxu0 %v15514_v7 }
0x170b   : > { %v15512_v16 = vld [vmem:[%s19343_s2 + $0x8] ss:$16 sps:$4 sm:$0xff]   ;;  %v15520_v45 = vld [vmem:[%s19343_s2 + $0x2c] ss:$16 sps:$4 sm:$0xff]  }
0x170c   : > { %v8407_v57 = vadd.f32 %v8406_v44, %v8399_v18  ;;  %9533 = vmatpush1.bf16.msra.mxu0 %v15512_v16  ;;  %v15518_v60 = vld [vmem:[%s19343_s2 + $0x28] ss:$16 sps:$4 sm:$0xff]   ;;  %v15526_v53 = vld [vmem:[%s19343_s2 + $0x4c] ss:$16 sps:$4 sm:$0xff]  }
0x170d   : > { %v8338_v19 = vpop.f32.mrb[20].mxu1  ;;  %9534 = vmatprep.subr.bf16.mxu0 %v15520_v45  ;;  %v15524_v42 = vld [vmem:[%s19343_s2 + $0x48] ss:$16 sps:$4 sm:$0xff]   ;;  %v15532_v18 = vld [vmem:[%s19343_s2 + $0x6c] ss:$16 sps:$4 sm:$0xff]  }
0x170e   : > { %v8418_v20 = vadd.f32 %v8416_v14, %v8407_v57  ;;  %v8425_v21 = vmul.f32 %v13514_v13, %v8338_v19  ;;  %v14775_v54 = vpop.f32.mrb[21].mxu1  ;;  %v15530_v44 = vld [vmem:[%s19343_s2 + $0x68] ss:$16 sps:$4 sm:$0xff]   ;;  %v15538_v13 = vld [vmem:[%s19343_s2 + $0x8c] ss:$16 sps:$4 sm:$0xff]  }
0x170f   : > { %v8341_v46 = vpop.f32.mrb[22].mxu1  ;;  %v15536_v57 = vld [vmem:[%s19343_s2 + $0x88] ss:$16 sps:$4 sm:$0xff]   ;;  %v15544_v14 = vld [vmem:[%s19343_s2 + $0xac] ss:$16 sps:$4 sm:$0xff]  }
0x1710   : > { %v8426_v3 = vadd.f32 %v8425_v21, %v8418_v20  ;;  %v14776_v55 = vpop.f32.mrb[23].mxu1  ;;  %9535 = vmatpush1.bf16.msra.mxu0 %v15518_v60  ;;  %v15542_v19 = vld [vmem:[%s19343_s2 + $0xa8] ss:$16 sps:$4 sm:$0xff]   ;;  %v15550_v20 = vld [vmem:[%s19343_s2 + $0xcc] ss:$16 sps:$4 sm:$0xff]  }
0x1711   : > { %9536 = vmatprep.subr.bf16.mxu0 %v15526_v53  ;;  %v15548_v21 = vld [vmem:[%s19343_s2 + $0xc8] ss:$16 sps:$4 sm:$0xff]   ;;  %v15553_v54 = vld [vmem:[%s19343_s2 + $0xec] ss:$16 sps:$4 sm:$0xff]   ;;  %v15466_v55 = vld [vmem:[%s19343_s2 + $0x144] ss:$16 sps:$4 sm:$0xff]  }
0x1712   : > { %v8433_v22 = vadd.f32 %v13515_v58, %v8426_v3  ;;  %v15551_v58 = vld [vmem:[%s19343_s2 + $0xe8] ss:$16 sps:$4 sm:$0xff]   ;;  %v15556_v46 = vld [vmem:[%s19343_s2 + $0x10c] ss:$16 sps:$4 sm:$0xff]   ;;  %v15464_v3 = vld [vmem:[%s19343_s2 + $0x140] ss:$16 sps:$4 sm:$0xff]  }
0x1713   : > { %v8832_v45 = vld [vmem:[%s19347_s4 + $0xc] sm:$0x3] }
0x1714   : > { %v8450_v52 = vpack.c.bf16 %v8433_v22, %v8433_v22  ;;  %9537 = vmatpush1.bf16.msra.mxu0 %v15524_v42  ;;  %v15469_v22 = vld [vmem:[%s19343_s2 + $0x164] ss:$16 sps:$4 sm:$0xff]  }
0x1715   : > { %9538 = vmatprep.subr.bf16.mxu0 %v15532_v18 }
0x1716   : > { %8576 = vmatmul.mubr.bf16.vlgmr.msra.gmra.mrb[24].mxu1 %v8450_v52  ;;  %v15467_v52 = vld [vmem:[%s19343_s2 + $0x160] ss:$16 sps:$4 sm:$0xff]  }
0x1717   : > { %8884 = vmatprep.mubr.bf16.mxu1 %v19322_v10 }
0x1718   : > { %9539 = vmatpush1.bf16.msra.mxu0 %v15530_v44 }
0x1719   : > { %9540 = vmatprep.subr.bf16.mxu0 %v15538_v13 }
0x171c   : > { %9541 = vmatpush1.bf16.msra.mxu0 %v15536_v57 }
0x171d   : > { %9542 = vmatprep.subr.bf16.mxu0 %v15544_v14  ;;  %v8833_v14 = vld [vmem:[%s19347_s4 + $0xe] sm:$0x3] }
0x1720   : > { %9543 = vmatpush1.bf16.msra.mxu0 %v15542_v19 }
0x1721   : > { %9544 = vmatprep.subr.bf16.mxu0 %v15550_v20 }
0x1724   : > { %9545 = vmatpush1.bf16.msra.mxu0 %v15548_v21 }
0x1725   : > { %9546 = vmatprep.subr.bf16.mxu0 %v15553_v54 }
0x1728   : > { %9547 = vmatpush1.bf16.msra.mxu0 %v15551_v58 }
0x1729   : > { %9548 = vmatprep.subr.bf16.mxu0 %v15556_v46 }
0x17e9   : > { %v8577_v28 = vpop.f32.mrb[24].mxu1 }
0x17ea   : > { %v8578_v49 = vadd.f32 %v8577_v28, %v8456_v26  ;;  %v8579_v15 = vpop.f32.mrb[25].mxu1  ;;  %v15554_v26 = vld [vmem:[%s19343_s2 + $0x108] ss:$16 sps:$4 sm:$0xff]  }
0x17eb   : > { %v8580_v17 = vadd.f32 %v8579_v15, %v8460_v59  ;;  %v8581_v32 = vpop.f32.mrb[26].mxu1  ;;  %v15559_v59 = vld [vmem:[%s19343_s2 + $0x12c] ss:$16 sps:$4 sm:$0xff]   ;;  %9549 = vmatpush1.bf16.msra.mxu0 %v15554_v26  ;;  %v15557_v28 = vld [vmem:[%s19343_s2 + $0x128] ss:$16 sps:$4 sm:$0xff]  }
0x17ec   : > { %v8584_v25 = vmax.f32 %v8578_v49, 0.0  ;;  %v8582_v8 = vpop.f32.mrb[27].mxu1  ;;  %v15470_v49 = vld [vmem:[%s19343_s2 + $0x180] ss:$16 sps:$4 sm:$0xff]   ;;  %9550 = vmatprep.subr.bf16.mxu0 %v15559_v59  ;;  %v15562_v15 = vld [vmem:[%s19343_s2 + $0x14c] ss:$16 sps:$4 sm:$0xff]  }
0x17ed   : > { %v8585_v47 = vmax.f32 %v8580_v17, 0.0  ;;  %v15475_v17 = vld [vmem:[%s19343_s2 + $0x1a4] ss:$16 sps:$4 sm:$0xff]   ;;  %v15560_v32 = vld [vmem:[%s19343_s2 + $0x148] ss:$16 sps:$4 sm:$0xff]  }
0x17ee   : > { %v8813_v9 = vadd.f32 %v18313_v0, %v8584_v25  ;;  %v18356_v0 = vld [vmem:[%s19344_s3] sm:$0x1f]   ;;  %v15565_v8 = vld [vmem:[%s19343_s2 + $0x16c] ss:$16 sps:$4 sm:$0xff]   ;;  %s19346_s3 = smov %s19345_s18 }
0x17ef   : > { %v8815_v11 = vadd.f32 %v18315_v39, %v8585_v47  ;;  %v15434_v39 = vld [vmem:[%s19343_s2] ss:$16 sps:$4 sm:$0xff]   ;;  %9551 = vmatpush1.bf16.msra.mxu0 %v15557_v28  ;;  %v15563_v47 = vld [vmem:[%s19343_s2 + $0x168] ss:$16 sps:$4 sm:$0xff]  }
0x17f0   : > { %v18345_v29 = vpack.c.bf16 %v8813_v9, %v8813_v9  ;;  %v15473_v25 = vld [vmem:[%s19343_s2 + $0x1a0] ss:$16 sps:$4 sm:$0xff]   ;;  %9552 = vmatprep.subr.bf16.mxu0 %v15562_v15 }
0x17f1   : > { %v8821_v30 = vcombine.low %v8813_v9, %v8815_v11  ;;  %v18348_v31 = vpack.c.bf16 %v8815_v11, %v8815_v11  ;;  %v15568_v9 = vld [vmem:[%s19343_s2 + $0x18c] ss:$16 sps:$4 sm:$0xff]   ;;  %v15566_v11 = vld [vmem:[%s19343_s2 + $0x188] ss:$16 sps:$4 sm:$0xff]  }
0x17f2   : > { %v8847_v34 = vsel %vm2724_vm2, %v18345_v29, 0 }
0x17f3   : > { %8823 = vst [vmem:[%s2413_s1] sm:$0xff] %v8821_v30  ;;  %13565 = vmatprep.subr.msk.bf16.mxu1 %vm2724_vm2, %v18348_v31  ;;  %9553 = vmatpush1.bf16.msra.mxu0 %v15560_v32  ;;  %v15571_v30 = vld [vmem:[%s19343_s2 + $0x1ac] ss:$16 sps:$4 sm:$0xff]   ;;  %s19348_s1 = sld [smem:[#allocation85_spill]] }
0x17f4   : > { %8853 = vmatpush1.bf16.msra.mxu1 %v8847_v34  ;;  %9554 = vmatprep.subr.bf16.mxu0 %v15565_v8  ;;  %v15476_v34 = vld [vmem:[%s19343_s2 + $0x1c0] ss:$16 sps:$4 sm:$0xff]  }
0x17f5   : > { %9491 = vmatprep.subr.bf16.mxu1 %v15436_v33  ;;  %v15478_v33 = vld [vmem:[%s19343_s2 + $0x1c4] ss:$16 sps:$4 sm:$0xff]  }
0x17f7   : > { %13566 = vmatmul.mubr.msk.bf16.vlgmr.msra.gmra.mrb[28].mxu1 %vm8275_vm7, %v18356_v0  ;;  %9555 = vmatpush1.bf16.msra.mxu0 %v15563_v47 }
0x17f8   : > { %9492 = vmatpush1.bf16.msra.mxu1 %v15434_v39  ;;  %9556 = vmatprep.subr.bf16.mxu0 %v15568_v9  ;;  %v15481_v39 = vld [vmem:[%s19343_s2 + $0x1e4] ss:$16 sps:$4 sm:$0xff]  }
0x17f9   : > { %9493 = vmatprep.subr.bf16.mxu1 %v15439_v35  ;;  %v15569_v35 = vld [vmem:[%s19343_s2 + $0x1a8] ss:$16 sps:$4 sm:$0xff]  }
0x17fb   : > { %9557 = vmatpush1.bf16.msra.mxu0 %v15566_v11  ;;  %v9021_v11 = vrot.slane %v8832_v45, %v18252_v12 }
0x17fc   : > { %9494 = vmatpush1.bf16.msra.mxu1 %v15437_v1  ;;  %v15479_v1 = vld [vmem:[%s19343_s2 + $0x1e0] ss:$16 sps:$4 sm:$0xff]   ;;  %9558 = vmatprep.subr.bf16.mxu0 %v15571_v30 }
0x17fd   : > { %9495 = vmatprep.subr.bf16.mxu1 %v15442_v56  ;;  %v15574_v56 = vld [vmem:[%s19343_s2 + $0x1cc] ss:$16 sps:$4 sm:$0xff]   ;;  %v8834_v30 = vld [vmem:[%s19347_s4 + $0x10] sm:$0x3] }
0x17ff   : > { %9559 = vmatpush1.bf16.msra.mxu0 %v15569_v35 }
0x1800   : > { %9496 = vmatpush1.bf16.msra.mxu1 %v15440_v37  ;;  %v15572_v37 = vld [vmem:[%s19343_s2 + $0x1c8] ss:$16 sps:$4 sm:$0xff]   ;;  %9560 = vmatprep.subr.bf16.mxu0 %v15574_v56 }
0x1801   : > { %9497 = vmatprep.subr.bf16.mxu1 %v15445_v40  ;;  %v15577_v40 = vld [vmem:[%s19343_s2 + $0x1ec] ss:$16 sps:$4 sm:$0xff]  }
0x1803   : > { %9561 = vmatpush1.bf16.msra.mxu0 %v15572_v37  ;;  %v9042_v37 = vrot.slane %v8833_v14, %v18252_v12 }
0x1804   : > { %9498 = vmatpush1.bf16.msra.mxu1 %v15443_v61  ;;  %v15484_v61 = vld [vmem:[%s19345_s18 + $0x4] ss:$8 sps:$4 sm:$0xff]   ;;  %9562 = vmatprep.subr.bf16.mxu0 %v15577_v40  ;;  %s19349_s18 = sld [smem:[#allocation92_spill]] }
0x1805   : > { %9499 = vmatprep.subr.bf16.mxu1 %v15448_v38  ;;  %v15575_v38 = vld [vmem:[%s19343_s2 + $0x1e8] ss:$16 sps:$4 sm:$0xff]  }
0x1807   : > { %9563 = vmatpush1.bf16.msra.mxu0 %v15575_v38 }
0x1808   : > { %9500 = vmatpush1.bf16.msra.mxu1 %v15446_v5  ;;  %v8827_v5 = vld [vmem:[%s19347_s4 + $0x2] sm:$0x3] }
0x1809   : > { %9501 = vmatprep.subr.bf16.mxu1 %v15451_v2  ;;  %v8828_v2 = vld [vmem:[%s19347_s4 + $0x4] sm:$0x3]  ;;  %v8916_v42 = vrot.slane %v8827_v5, %v18252_v12 }
0x180a   : > { %v8937_v18 = vrot.slane %v8828_v2, %v18252_v12 }
0x180c   : > { %9502 = vmatpush1.bf16.msra.mxu1 %v15449_v63  ;;  %v8829_v63 = vld [vmem:[%s19347_s4 + $0x6] sm:$0x3] }
0x180d   : > { %9503 = vmatprep.subr.bf16.mxu1 %v15454_v41  ;;  %v8826_v41 = vld [vmem:[%s19347_s4] sm:$0x3]  ;;  %v8958_v58 = vrot.slane %v8829_v63, %v18252_v12 }
0x180e   : > { %v8903_v54 = vrot.slane %v8826_v41, %v18252_v12 }
0x1810   : > { %9504 = vmatpush1.bf16.msra.mxu1 %v15452_v23  ;;  %v8830_v23 = vld [vmem:[%s19347_s4 + $0x8] sm:$0x3] }
0x1811   : > { %9505 = vmatprep.subr.bf16.mxu1 %v15457_v36  ;;  %v8912_v36 = vrot.slane %v8827_v5, %v18248_v62  ;;  %v8975_v7 = vrot.slane %v8830_v23, %v18248_v62 }
0x1814   : > { %9506 = vmatpush1.bf16.msra.mxu1 %v15455_v27  ;;  %v8933_v27 = vrot.slane %v8828_v2, %v18248_v62 }
0x1815   : > { %9507 = vmatprep.subr.bf16.mxu1 %v15460_v51  ;;  %v8954_v51 = vrot.slane %v8829_v63, %v18248_v62  ;;  %v9059_v63 = vrot.slane %v8834_v30, %v18248_v62 }
0x1818   : > { %9508 = vmatpush1.bf16.msra.mxu1 %v15458_v4  ;;  %v8831_v4 = vld [vmem:[%s19347_s4 + $0xa] sm:$0x3]  ;;  %s19363_s4 = sld [smem:[#allocation97_spill]] }
0x1819   : > { %9509 = vmatprep.subr.bf16.mxu1 %v15463_v6  ;;  %v8899_v6 = vrot.slane %v8826_v41, %v18248_v62  ;;  %v8996_v57 = vrot.slane %v8831_v4, %v18248_v62  ;;  %v9000_v15 = vrot.slane %v8831_v4, %v18252_v12 }
0x181c   : > { %9510 = vmatpush1.bf16.msra.mxu1 %v15461_v43 }
0x181d   : > { %9511 = vmatprep.subr.bf16.mxu1 %v15466_v55  ;;  %v8979_v55 = vrot.slane %v8830_v23, %v18252_v12 }
0x1820   : > { %9512 = vmatpush1.bf16.msra.mxu1 %v15464_v3  ;;  %v9017_v3 = vrot.slane %v8832_v45, %v18248_v62 }
0x1821   : > { %9513 = vmatprep.subr.bf16.mxu1 %v15469_v22 }
0x1824   : > { %9514 = vmatpush1.bf16.msra.mxu1 %v15467_v52 }
0x1825   : > { %9515 = vmatprep.subr.bf16.mxu1 %v15472_v24 }
0x1828   : > { %9516 = vmatpush1.bf16.msra.mxu1 %v15470_v49  ;;  %v9038_v49 = vrot.slane %v8833_v14, %v18248_v62 }
0x1829   : > { %9517 = vmatprep.subr.bf16.mxu1 %v15475_v17 }
0x182c   : > { %9518 = vmatpush1.bf16.msra.mxu1 %v15473_v25 }
0x182d   : > { %9519 = vmatprep.subr.bf16.mxu1 %v15478_v33 }
0x1830   : > { %9520 = vmatpush1.bf16.msra.mxu1 %v15476_v34 }
0x1831   : > { %9521 = vmatprep.subr.bf16.mxu1 %v15481_v39 }
0x1834   : > { %9522 = vmatpush1.bf16.msra.mxu1 %v15479_v1 }
0x1835   : > { %9781 = vmatprep.subr.bf16.mxu1 %v15484_v61 }
0x18ca   : > { %v8886_v43 = vpop.f32.mrb[28].mxu1 }
0x18cb   : > { %v8888_v16 = vpop.f32.mrb[29].mxu1  ;;  %v8919_v60 = vmul.f32 %v8912_v36, %v8886_v43  ;;  %v8940_v53 = vmul.f32 %v8933_v27, %v8886_v43  ;;  %v8961_v13 = vmul.f32 %v8954_v51, %v8886_v43  ;;  %v8906_v19 = vmul.f32 %v8899_v6, %v8886_v43 }
0x18cc   : > { %v8890_v44 = vpop.f32.mrb[30].mxu1  ;;  %v8982_v46 = vmul.f32 %v8975_v7, %v8886_v43  ;;  %v8920_v24 = vmul.f32 %v8916_v42, %v8888_v16  ;;  %v8941_v26 = vmul.f32 %v8937_v18, %v8888_v16  ;;  %v9003_v28 = vmul.f32 %v8996_v57, %v8886_v43 }
0x18cd   : > { %v8923_v20 = vrot.slane %v8919_v60, 1  ;;  %v8892_v21 = vpop.f32.mrb[31].mxu1  ;;  %v8944_v52 = vrot.slane %v8940_v53, 2  ;;  %v8965_v59 = vrot.slane %v8961_v13, 3  ;;  %v8907_v32 = vmul.f32 %v8903_v54, %v8888_v16  ;;  %v8835_v60 = vld [vmem:[%s19348_s1] sm:$0x3]  ;;  %s19350_s1 = smov %s19349_s18 }
0x18ce   : > { %v8924_v25 = vrot.slane %v8920_v24, 1  ;;  %v8962_v8 = vmul.f32 %v8958_v58, %v8888_v16  ;;  %v8986_v47 = vrot.slane %v8982_v46, 4  ;;  %v9024_v9 = vmul.f32 %v9017_v3, %v8886_v43  ;;  %v15487_v24 = vld [vmem:[%s19346_s3 + $0x14] ss:$8 sps:$4 sm:$0xff]  }
0x18cf   : > { %v8927_v22 = vadd.f32 %v8923_v20, %v8906_v19  ;;  %v8945_v39 = vrot.slane %v8941_v26, 2  ;;  %v8983_v35 = vmul.f32 %v8979_v55, %v8888_v16  ;;  %v9007_v1 = vrot.slane %v9003_v28, 5  ;;  %v15490_v26 = vld [vmem:[%s19346_s3 + $0x24] ss:$8 sps:$4 sm:$0xff]   ;;  %v15493_v28 = vld [vmem:[%s19346_s3 + $0x34] ss:$8 sps:$4 sm:$0xff]  }
0x18d0   : > { %v8928_v34 = vadd.f32 %v8924_v25, %v8907_v32  ;;  %v9045_v56 = vmul.f32 %v9038_v49, %v8886_v43  ;;  %v8966_v38 = vrot.slane %v8962_v8, 3  ;;  %v9004_v5 = vmul.f32 %v9000_v15, %v8888_v16  ;;  %v15491_v49 = vld [vmem:[%s19346_s3 + $0x30] ss:$8 sps:$4 sm:$0xff]   ;;  %v15496_v15 = vld [vmem:[%s19346_s3 + $0x44] ss:$8 sps:$4 sm:$0xff]  }
0x18d1   : > { %v8948_v17 = vadd.f32 %v8944_v52, %v8927_v22  ;;  %v9028_v2 = vrot.slane %v9024_v9, 6  ;;  %v8987_v36 = vrot.slane %v8983_v35, 4  ;;  %v9025_v27 = vmul.f32 %v9021_v11, %v8888_v16  ;;  %v15502_v32 = vld [vmem:[%s19346_s3 + $0x64] ss:$8 sps:$4 sm:$0xff]   ;;  %v15500_v25 = vld [vmem:[%s19346_s3 + $0x60] ss:$8 sps:$4 sm:$0xff]  }
0x18d2   : > { %v8949_v61 = vadd.f32 %v8945_v39, %v8928_v34  ;;  %v9049_v51 = vrot.slane %v9045_v56, 7  ;;  %v9008_v7 = vrot.slane %v9004_v5, 5  ;;  %v9046_v45 = vmul.f32 %v9042_v37, %v8888_v16  ;;  %v15505_v8 = vld [vmem:[%s19346_s3 + $0x74] ss:$8 sps:$4 sm:$0xff]   ;;  %v15508_v9 = vld [vmem:[%s19346_s3 + $0x84] ss:$8 sps:$4 sm:$0xff]  }
0x18d3   : > { %v8969_v33 = vadd.f32 %v8965_v59, %v8948_v17  ;;  %v9063_v43 = vrot.slane %v8834_v30, %v18252_v12  ;;  %v9066_v42 = vmul.f32 %v9059_v63, %v8890_v44  ;;  %v9029_v13 = vrot.slane %v9025_v27, 6  ;;  %v15482_v44 = vld [vmem:[%s19346_s3] ss:$8 sps:$4 sm:$0xff]   ;;  %v15499_v17 = vld [vmem:[%s19346_s3 + $0x54] ss:$8 sps:$4 sm:$0xff]  }
0x18d4   : > { %v8970_v23 = vadd.f32 %v8966_v38, %v8949_v61  ;;  %v9050_v19 = vrot.slane %v9046_v45, 7  ;;  %v9074_v20 = vrot.slane %v8835_v60, %v18248_v62  ;;  %v9078_v46 = vrot.slane %v8835_v60, %v18252_v12  ;;  %v15488_v59 = vld [vmem:[%s19346_s3 + $0x20] ss:$8 sps:$4 sm:$0xff]   ;;  %v15511_v30 = vld [vmem:[%s19346_s3 + $0x94] ss:$8 sps:$4 sm:$0xff]  }
0x18d5   : > { %v8990_v40 = vadd.f32 %v8986_v47, %v8969_v33  ;;  %v9067_v58 = vmul.f32 %v9063_v43, %v8892_v21  ;;  %v15485_v21 = vld [vmem:[%s19346_s3 + $0x10] ss:$8 sps:$4 sm:$0xff]   ;;  %v15506_v11 = vld [vmem:[%s19346_s3 + $0x80] ss:$8 sps:$4 sm:$0xff]   ;;  %v15517_v34 = vld [vmem:[%s19346_s3 + $0xa4] ss:$8 sps:$4 sm:$0xff]  }
0x18d6   : > { %v8991_v6 = vadd.f32 %v8987_v36, %v8970_v23  ;;  %v15503_v47 = vld [vmem:[%s19346_s3 + $0x70] ss:$8 sps:$4 sm:$0xff]   ;;  %v15515_v39 = vld [vmem:[%s19346_s3 + $0xa0] ss:$8 sps:$4 sm:$0xff]   ;;  %v15523_v35 = vld [vmem:[%s19346_s3 + $0xb4] ss:$8 sps:$4 sm:$0xff]  }
0x18d7   : > { %v9011_v41 = vadd.f32 %v9007_v1, %v8990_v40  ;;  %v15509_v33 = vld [vmem:[%s19346_s3 + $0x90] ss:$8 sps:$4 sm:$0xff]   ;;  %v15529_v56 = vld [vmem:[%s19346_s3 + $0xc4] ss:$8 sps:$4 sm:$0xff]   ;;  %v15527_v37 = vld [vmem:[%s19346_s3 + $0xc0] ss:$8 sps:$4 sm:$0xff]  }
0x18d8   : > { %v9012_v18 = vadd.f32 %v9008_v7, %v8991_v6  ;;  %v15521_v1 = vld [vmem:[%s19346_s3 + $0xb0] ss:$8 sps:$4 sm:$0xff]   ;;  %v15535_v40 = vld [vmem:[%s19346_s3 + $0xd4] ss:$8 sps:$4 sm:$0xff]   ;;  %v15541_v38 = vld [vmem:[%s19346_s3 + $0xe4] ss:$8 sps:$4 sm:$0xff]  }
0x18d9   : > { %v9032_v4 = vadd.f32 %v9028_v2, %v9011_v41  ;;  %v15533_v61 = vld [vmem:[%s19346_s3 + $0xd0] ss:$8 sps:$4 sm:$0xff]   ;;  %v15539_v5 = vld [vmem:[%s19346_s3 + $0xe0] ss:$8 sps:$4 sm:$0xff]   ;;  %v15547_v2 = vld [vmem:[%s19346_s3 + $0xf4] ss:$8 sps:$4 sm:$0xff]  }
0x18da   : > { %v9033_v14 = vadd.f32 %v9029_v13, %v9012_v18  ;;  %v15545_v63 = vld [vmem:[%s19346_s3 + $0xf0] ss:$8 sps:$4 sm:$0xff]   ;;  %v15583_v23 = vld [vmem:[%s19350_s1 + $0xc] ss:$16 sps:$4 sm:$0xff]  }
0x18db   : > { %v9053_v53 = vadd.f32 %v9049_v51, %v9032_v4  ;;  %v15581_v41 = vld [vmem:[%s19349_s18 + $0x8] ss:$16 sps:$4 sm:$0xff]   ;;  %v15589_v36 = vld [vmem:[%s19350_s1 + $0x2c] ss:$16 sps:$4 sm:$0xff]   ;;  %s19351_s18 = sld [smem:[#allocation89_spill]] }
0x18dc   : > { %v9054_v54 = vadd.f32 %v9050_v19, %v9033_v14  ;;  %v15587_v27 = vld [vmem:[%s19350_s1 + $0x28] ss:$16 sps:$4 sm:$0xff]   ;;  %v15595_v51 = vld [vmem:[%s19350_s1 + $0x4c] ss:$16 sps:$4 sm:$0xff]  }
0x18dd   : > { %v9068_v57 = vadd.f32 %v9066_v42, %v9053_v53  ;;  %v15593_v4 = vld [vmem:[%s19350_s1 + $0x48] ss:$16 sps:$4 sm:$0xff]   ;;  %v15601_v6 = vld [vmem:[%s19350_s1 + $0x6c] ss:$16 sps:$4 sm:$0xff]  }
0x18de   : > { %v9069_v16 = vadd.f32 %v9067_v58, %v9054_v54  ;;  %v15607_v7 = vld [vmem:[%s19350_s1 + $0x8c] ss:$16 sps:$4 sm:$0xff]   ;;  %v15605_v45 = vld [vmem:[%s19350_s1 + $0x88] ss:$16 sps:$4 sm:$0xff]  }
0x18df   : > { %v9081_v3 = vadd.f32 %v9074_v20, %v9068_v57  ;;  %v15613_v43 = vld [vmem:[%s19350_s1 + $0xac] ss:$16 sps:$4 sm:$0xff]   ;;  %v15611_v60 = vld [vmem:[%s19350_s1 + $0xa8] ss:$16 sps:$4 sm:$0xff]  }
0x18e0   : > { %v9082_v55 = vadd.f32 %v9078_v46, %v9069_v16  ;;  %v15619_v53 = vld [vmem:[%s19350_s1 + $0xcc] ss:$16 sps:$4 sm:$0xff]   ;;  %v15617_v42 = vld [vmem:[%s19350_s1 + $0xc8] ss:$16 sps:$4 sm:$0xff]  }
0x18e1   : > { %v9147_v52 = vpack.c.bf16 %v9081_v3, %v9081_v3  ;;  %v15625_v18 = vld [vmem:[%s19350_s1 + $0xec] ss:$16 sps:$4 sm:$0xff]   ;;  %v15623_v13 = vld [vmem:[%s19350_s1 + $0xe8] ss:$16 sps:$4 sm:$0xff]  }
0x18e2   : > { %v9148_v22 = vpack.c.bf16 %v9082_v55, %v9082_v55  ;;  %v15631_v57 = vld [vmem:[%s19350_s1 + $0x10c] ss:$16 sps:$4 sm:$0xff]   ;;  %v15629_v14 = vld [vmem:[%s19350_s1 + $0x108] ss:$16 sps:$4 sm:$0xff]  }
0x18e3   : > { %v15637_v19 = vld [vmem:[%s19350_s1 + $0x12c] ss:$16 sps:$4 sm:$0xff]   ;;  %v15635_v20 = vld [vmem:[%s19350_s1 + $0x128] ss:$16 sps:$4 sm:$0xff]  }
0x18e4   : > { %9523 = vmatprep.mubr.bf16.mxu1 %v9148_v22  ;;  %9564 = vmatprep.mubr.bf16.mxu0 %v9148_v22 }
0x18e5   : > { %9524 = vmatmul.mubr.bf16.vlgmr.msra.gmra.mrb[32].mxu1 %v9147_v52  ;;  %9565 = vmatmul.mubr.bf16.vlgmr.msra.gmra.mrb[56].mxu0 %v9147_v52  ;;  %v9609_v52 = vld [vmem:[%s19351_s18] sm:$0x3]  ;;  %s19352_s18 = sld [smem:[#allocation94_spill]] }
0x18e6   : > { %9782 = vmatpush1.bf16.msra.mxu1 %v15482_v44  ;;  %9813 = vmatprep.mubr.bf16.mxu1 %v18348_v31  ;;  %v15494_v31 = vld [vmem:[%s19346_s3 + $0x40] ss:$8 sps:$4 sm:$0xff]  }
0x18e7   : > { %9783 = vmatprep.subr.bf16.mxu1 %v15487_v24  ;;  %9874 = vmatprep.mubr.bf16.mxu0 %v19322_v10  ;;  %v15497_v10 = vld [vmem:[%s19346_s3 + $0x50] ss:$8 sps:$4 sm:$0xff]   ;;  %v9614_v24 = vrot.slane %v9609_v52, %v18248_v62  ;;  %s19354_s3 = sld [smem:[#allocation90_spill]] }
0x18ea   : > { %9784 = vmatpush1.bf16.msra.mxu1 %v15485_v21  ;;  %v9618_v21 = vrot.slane %v9609_v52, %v18252_v12  ;;  %v15668_v52 = vld [vmem:[%s19350_s1 + $0x1e0] ss:$16 sps:$4 sm:$0xff]  }
0x18eb   : > { %9785 = vmatprep.subr.bf16.mxu1 %v15490_v26  ;;  %s19353_s2 = smov %s19352_s18 }
0x18ee   : > { %9786 = vmatpush1.bf16.msra.mxu1 %v15488_v59 }
0x18ef   : > { %9787 = vmatprep.subr.bf16.mxu1 %v15493_v28 }
0x18f2   : > { %9788 = vmatpush1.bf16.msra.mxu1 %v15491_v49 }
0x18f3   : > { %9789 = vmatprep.subr.bf16.mxu1 %v15496_v15 }
0x18f6   : > { %9790 = vmatpush1.bf16.msra.mxu1 %v15494_v31 }
0x18f7   : > { %9791 = vmatprep.subr.bf16.mxu1 %v15499_v17 }
0x18fa   : > { %9792 = vmatpush1.bf16.msra.mxu1 %v15497_v10 }
0x18fb   : > { %9793 = vmatprep.subr.bf16.mxu1 %v15502_v32 }
0x18fe   : > { %9794 = vmatpush1.bf16.msra.mxu1 %v15500_v25 }
0x18ff   : > { %9795 = vmatprep.subr.bf16.mxu1 %v15505_v8  ;;  %v15580_v8 = vld [vmem:[%s19350_s1 + $0x4] ss:$16 sps:$4 sm:$0xff]  }
0x1902   : > { %9796 = vmatpush1.bf16.msra.mxu1 %v15503_v47 }
0x1903   : > { %9797 = vmatprep.subr.bf16.mxu1 %v15508_v9  ;;  %v15578_v9 = vld [vmem:[%s19350_s1] ss:$16 sps:$4 sm:$0xff]  }
0x1906   : > { %9798 = vmatpush1.bf16.msra.mxu1 %v15506_v11  ;;  %v15586_v11 = vld [vmem:[%s19350_s1 + $0x24] ss:$16 sps:$4 sm:$0xff]  }
0x1907   : > { %9799 = vmatprep.subr.bf16.mxu1 %v15511_v30  ;;  %v15584_v30 = vld [vmem:[%s19350_s1 + $0x20] ss:$16 sps:$4 sm:$0xff]  }
0x190a   : > { %9800 = vmatpush1.bf16.msra.mxu1 %v15509_v33  ;;  %v15592_v33 = vld [vmem:[%s19350_s1 + $0x44] ss:$16 sps:$4 sm:$0xff]  }
0x190b   : > { %9801 = vmatprep.subr.bf16.mxu1 %v15517_v34  ;;  %v15590_v34 = vld [vmem:[%s19350_s1 + $0x40] ss:$16 sps:$4 sm:$0xff]  }
0x190e   : > { %9802 = vmatpush1.bf16.msra.mxu1 %v15515_v39  ;;  %v15598_v39 = vld [vmem:[%s19350_s1 + $0x64] ss:$16 sps:$4 sm:$0xff]  }
0x190f   : > { %9803 = vmatprep.subr.bf16.mxu1 %v15523_v35  ;;  %v15596_v35 = vld [vmem:[%s19350_s1 + $0x60] ss:$16 sps:$4 sm:$0xff]  }
0x1912   : > { %9804 = vmatpush1.bf16.msra.mxu1 %v15521_v1  ;;  %v15604_v1 = vld [vmem:[%s19350_s1 + $0x84] ss:$16 sps:$4 sm:$0xff]  }
0x1913   : > { %9805 = vmatprep.subr.bf16.mxu1 %v15529_v56  ;;  %v15610_v56 = vld [vmem:[%s19350_s1 + $0xa4] ss:$16 sps:$4 sm:$0xff]  }
0x1916   : > { %9806 = vmatpush1.bf16.msra.mxu1 %v15527_v37  ;;  %v15608_v37 = vld [vmem:[%s19350_s1 + $0xa0] ss:$16 sps:$4 sm:$0xff]  }
0x1917   : > { %9807 = vmatprep.subr.bf16.mxu1 %v15535_v40  ;;  %v15616_v40 = vld [vmem:[%s19350_s1 + $0xc4] ss:$16 sps:$4 sm:$0xff]  }
0x191a   : > { %9808 = vmatpush1.bf16.msra.mxu1 %v15533_v61  ;;  %v15614_v61 = vld [vmem:[%s19350_s1 + $0xc0] ss:$16 sps:$4 sm:$0xff]  }
0x191b   : > { %9809 = vmatprep.subr.bf16.mxu1 %v15541_v38  ;;  %v15622_v38 = vld [vmem:[%s19350_s1 + $0xe4] ss:$16 sps:$4 sm:$0xff]  }
0x191e   : > { %9810 = vmatpush1.bf16.msra.mxu1 %v15539_v5  ;;  %v15620_v5 = vld [vmem:[%s19350_s1 + $0xe0] ss:$16 sps:$4 sm:$0xff]  }
0x191f   : > { %9811 = vmatprep.subr.bf16.mxu1 %v15547_v2  ;;  %v15628_v2 = vld [vmem:[%s19350_s1 + $0x104] ss:$16 sps:$4 sm:$0xff]  }
0x1922   : > { %9812 = vmatpush1.bf16.msra.mxu1 %v15545_v63  ;;  %v15626_v63 = vld [vmem:[%s19350_s1 + $0x100] ss:$16 sps:$4 sm:$0xff]  }
0x1923   : > { %10522 = vmatprep.subr.bf16.mxu1 %v15583_v23  ;;  %v15632_v23 = vld [vmem:[%s19350_s1 + $0x120] ss:$16 sps:$4 sm:$0xff]  }
0x1925   : > { %9814 = vmatmul.mubr.bf16.vlgmr.msra.gmra.mrb[36].mxu1 %v18345_v29  ;;  %v15599_v29 = vld [vmem:[%s19350_s1 + $0x68] ss:$16 sps:$4 sm:$0xff]  }
0x1926   : > { %10523 = vmatpush1.bf16.msra.mxu1 %v15581_v41  ;;  %v15634_v41 = vld [vmem:[%s19350_s1 + $0x124] ss:$16 sps:$4 sm:$0xff]  }
0x1927   : > { %10524 = vmatprep.subr.bf16.mxu1 %v15589_v36  ;;  %v15638_v36 = vld [vmem:[%s19350_s1 + $0x140] ss:$16 sps:$4 sm:$0xff]  }
0x192a   : > { %10525 = vmatpush1.bf16.msra.mxu1 %v15587_v27  ;;  %v15640_v27 = vld [vmem:[%s19350_s1 + $0x144] ss:$16 sps:$4 sm:$0xff]  }
0x192b   : > { %10526 = vmatprep.subr.bf16.mxu1 %v15595_v51  ;;  %v15641_v51 = vld [vmem:[%s19350_s1 + $0x148] ss:$16 sps:$4 sm:$0xff]  }
0x192e   : > { %10527 = vmatpush1.bf16.msra.mxu1 %v15593_v4  ;;  %v15643_v4 = vld [vmem:[%s19350_s1 + $0x14c] ss:$16 sps:$4 sm:$0xff]  }
0x192f   : > { %10528 = vmatprep.subr.bf16.mxu1 %v15601_v6  ;;  %v15646_v6 = vld [vmem:[%s19350_s1 + $0x164] ss:$16 sps:$4 sm:$0xff]  }
0x1932   : > { %10529 = vmatpush1.bf16.msra.mxu1 %v15599_v29  ;;  %v15649_v29 = vld [vmem:[%s19350_s1 + $0x16c] ss:$16 sps:$4 sm:$0xff]  }
0x1933   : > { %10530 = vmatprep.subr.bf16.mxu1 %v15607_v7  ;;  %v15644_v7 = vld [vmem:[%s19350_s1 + $0x160] ss:$16 sps:$4 sm:$0xff]  }
0x1936   : > { %10531 = vmatpush1.bf16.msra.mxu1 %v15605_v45  ;;  %v15647_v45 = vld [vmem:[%s19350_s1 + $0x168] ss:$16 sps:$4 sm:$0xff]  }
0x1937   : > { %10532 = vmatprep.subr.bf16.mxu1 %v15613_v43  ;;  %v15652_v43 = vld [vmem:[%s19350_s1 + $0x184] ss:$16 sps:$4 sm:$0xff]  }
0x193a   : > { %10533 = vmatpush1.bf16.msra.mxu1 %v15611_v60  ;;  %v15655_v60 = vld [vmem:[%s19350_s1 + $0x18c] ss:$16 sps:$4 sm:$0xff]  }
0x193b   : > { %10534 = vmatprep.subr.bf16.mxu1 %v15619_v53  ;;  %v15650_v53 = vld [vmem:[%s19350_s1 + $0x180] ss:$16 sps:$4 sm:$0xff]  }
0x193e   : > { %10535 = vmatpush1.bf16.msra.mxu1 %v15617_v42  ;;  %v15653_v42 = vld [vmem:[%s19350_s1 + $0x188] ss:$16 sps:$4 sm:$0xff]  }
0x193f   : > { %10536 = vmatprep.subr.bf16.mxu1 %v15625_v18  ;;  %v15658_v18 = vld [vmem:[%s19350_s1 + $0x1a4] ss:$16 sps:$4 sm:$0xff]  }
0x1942   : > { %10537 = vmatpush1.bf16.msra.mxu1 %v15623_v13  ;;  %v15661_v13 = vld [vmem:[%s19350_s1 + $0x1ac] ss:$16 sps:$4 sm:$0xff]  }
0x1943   : > { %10538 = vmatprep.subr.bf16.mxu1 %v15631_v57  ;;  %v15656_v57 = vld [vmem:[%s19350_s1 + $0x1a0] ss:$16 sps:$4 sm:$0xff]  }
0x1946   : > { %10539 = vmatpush1.bf16.msra.mxu1 %v15629_v14  ;;  %v15659_v14 = vld [vmem:[%s19350_s1 + $0x1a8] ss:$16 sps:$4 sm:$0xff]  }
0x1947   : > { %10540 = vmatprep.subr.bf16.mxu1 %v15637_v19  ;;  %v15664_v19 = vld [vmem:[%s19350_s1 + $0x1c4] ss:$16 sps:$4 sm:$0xff]  }
0x194a   : > { %10541 = vmatpush1.bf16.msra.mxu1 %v15635_v20  ;;  %v15667_v20 = vld [vmem:[%s19350_s1 + $0x1cc] ss:$16 sps:$4 sm:$0xff]  }
0x194b   : > { %10542 = vmatprep.subr.bf16.mxu1 %v15643_v4 }
0x194e   : > { %10543 = vmatpush1.bf16.msra.mxu1 %v15641_v51 }
0x194f   : > { %10544 = vmatprep.subr.bf16.mxu1 %v15649_v29 }
0x1952   : > { %10545 = vmatpush1.bf16.msra.mxu1 %v15647_v45 }
0x1953   : > { %10546 = vmatprep.subr.bf16.mxu1 %v15655_v60 }
0x1956   : > { %10547 = vmatpush1.bf16.msra.mxu1 %v15653_v42 }
0x1957   : > { %10548 = vmatprep.subr.bf16.mxu1 %v15661_v13 }
0x195a   : > { %10549 = vmatpush1.bf16.msra.mxu1 %v15659_v14 }
0x195b   : > { %10550 = vmatprep.subr.bf16.mxu1 %v15667_v20 }
0x19b8   : > { %v18508_v54 = vpop.f32.mrb[32].mxu1  ;;  %v18510_v58 = vpop.f32.mrb[56].mxu0 }
0x19b9   : > { %v18512_v46 = vpop.f32.mrb[33].mxu1  ;;  %v18514_v16 = vpop.f32.mrb[57].mxu0 }
0x19ba   : > { %v9529_v3 = vpop.f32.mrb[34].mxu1  ;;  %v9570_v55 = vpop.f32.mrb[58].mxu0 }
0x19bb   : > { %v9530_v22 = vpop.f32.mrb[35].mxu1  ;;  %v9571_v44 = vpop.f32.mrb[59].mxu0  ;;  %v15662_v3 = vld [vmem:[%s19350_s1 + $0x1c0] ss:$16 sps:$4 sm:$0xff]   ;;  %v15665_v55 = vld [vmem:[%s19350_s1 + $0x1c8] ss:$16 sps:$4 sm:$0xff]  }
0x19bc   : > { %v15670_v22 = vld [vmem:[%s19350_s1 + $0x1e4] ss:$16 sps:$4 sm:$0xff]   ;;  %v15673_v44 = vld [vmem:[%s19350_s1 + $0x1ec] ss:$16 sps:$4 sm:$0xff]   ;;  %10551 = vmatpush1.bf16.msra.mxu1 %v15665_v55 }
0x19bd   : > { %10552 = vmatprep.subr.bf16.mxu1 %v15673_v44 }
0x19f8   : > { %v9815_v26 = vpop.f32.mrb[36].mxu1 }
0x19f9   : > { %v9816_v59 = vadd.f32 %v9815_v26, %v9614_v24  ;;  %v9817_v28 = vpop.f32.mrb[37].mxu1  ;;  %v15671_v24 = vld [vmem:[%s19350_s1 + $0x1e8] ss:$16 sps:$4 sm:$0xff]   ;;  %v9825_v26 = vld [vmem:[%s19354_s3 + $0x2] sm:$0x3] }
0x19fa   : > { %v9818_v49 = vadd.f32 %v9817_v28, %v9618_v21  ;;  %v9819_v15 = vpop.f32.mrb[38].mxu1  ;;  %10553 = vmatpush1.bf16.msra.mxu1 %v15671_v24  ;;  %v15676_v21 = vld [vmem:[%s19352_s18 + $0x4] ss:$8 sps:$4 sm:$0xff]   ;;  %s19355_s18 = sld [smem:[#allocation91_spill]] }
0x19fb   : > { %v9822_v31 = vmax.f32 %v9816_v59, 0.0  ;;  %v9820_v17 = vpop.f32.mrb[39].mxu1  ;;  %v9826_v59 = vld [vmem:[%s19354_s3 + $0x4] sm:$0x3]  ;;  %v9827_v28 = vld [vmem:[%s19354_s3 + $0x6] sm:$0x3] }
0x19fc   : > { %v9823_v10 = vmax.f32 %v9818_v49, 0.0  ;;  %v9824_v49 = vld [vmem:[%s19354_s3] sm:$0x3]  ;;  %v9828_v15 = vld [vmem:[%s19354_s3 + $0x8] sm:$0x3]  ;;  %v9923_v17 = vrot.slane %v9826_v59, %v18248_v62 }
0x19fd   : > { %v9834_v32 = vpack.c.bf16 %v9822_v31, %v9822_v31  ;;  %v9902_v31 = vrot.slane %v9825_v26, %v18248_v62 }
0x19fe   : > { %v9835_v25 = vpack.c.bf16 %v9823_v10, %v9823_v10  ;;  %v9944_v10 = vrot.slane %v9827_v28, %v18248_v62 }
0x19ff   : > { %v9837_v47 = vsel %vm2724_vm2, %v9834_v32, 0  ;;  %v9829_v32 = vld [vmem:[%s19354_s3 + $0xa] sm:$0x3] }
0x1a00   : > { %13663 = vmatprep.subr.msk.bf16.mxu0 %vm2724_vm2, %v9835_v25  ;;  %v9889_v25 = vrot.slane %v9824_v49, %v18248_v62 }
0x1a01   : > { %9843 = vmatpush1.bf16.msra.mxu0 %v9837_v47  ;;  %v9965_v47 = vrot.slane %v9828_v15, %v18248_v62 }
0x1a02   : > { %10481 = vmatprep.subr.bf16.mxu0 %v15580_v8 }
0x1a04   : > { %13664 = vmatmul.mubr.msk.bf16.vlgmr.msra.gmra.mrb[60].mxu0 %vm8275_vm7, %v18356_v0  ;;  %v15602_v0 = vld [vmem:[%s19350_s1 + $0x80] ss:$16 sps:$4 sm:$0xff]   ;;  %s19357_s1 = sld [smem:[#allocation93_spill]] }
0x1a05   : > { %10482 = vmatpush1.bf16.msra.mxu0 %v15578_v9 }
0x1a06   : > { %10483 = vmatprep.subr.bf16.mxu0 %v15586_v11  ;;  %v9830_v11 = vld [vmem:[%s19354_s3 + $0xc] sm:$0x3] }
0x1a07   : > { %v10011_v13 = vrot.slane %v9830_v11, %v18252_v12 }
0x1a09   : > { %10484 = vmatpush1.bf16.msra.mxu0 %v15584_v30 }
0x1a0a   : > { %10485 = vmatprep.subr.bf16.mxu0 %v15592_v33 }
0x1a0d   : > { %10486 = vmatpush1.bf16.msra.mxu0 %v15590_v34  ;;  %v9906_v34 = vrot.slane %v9825_v26, %v18252_v12 }
0x1a0e   : > { %10487 = vmatprep.subr.bf16.mxu0 %v15598_v39  ;;  %v9927_v39 = vrot.slane %v9826_v59, %v18252_v12 }
0x1a11   : > { %10488 = vmatpush1.bf16.msra.mxu0 %v15596_v35 }
0x1a12   : > { %10489 = vmatprep.subr.bf16.mxu0 %v15604_v1 }
0x1a15   : > { %10490 = vmatpush1.bf16.msra.mxu0 %v15602_v0  ;;  %v9986_v0 = vrot.slane %v9829_v32, %v18248_v62 }
0x1a16   : > { %10491 = vmatprep.subr.bf16.mxu0 %v15610_v56  ;;  %v9831_v56 = vld [vmem:[%s19354_s3 + $0xe] sm:$0x3] }
0x1a17   : > { %v10028_v29 = vrot.slane %v9831_v56, %v18248_v62  ;;  %v10032_v44 = vrot.slane %v9831_v56, %v18252_v12 }
0x1a19   : > { %10492 = vmatpush1.bf16.msra.mxu0 %v15608_v37 }
0x1a1a   : > { %10493 = vmatprep.subr.bf16.mxu0 %v15616_v40 }
0x1a1d   : > { %10494 = vmatpush1.bf16.msra.mxu0 %v15614_v61 }
0x1a1e   : > { %10495 = vmatprep.subr.bf16.mxu0 %v15622_v38  ;;  %v9893_v38 = vrot.slane %v9824_v49, %v18252_v12 }
0x1a21   : > { %10496 = vmatpush1.bf16.msra.mxu0 %v15620_v5  ;;  %v9948_v5 = vrot.slane %v9827_v28, %v18252_v12 }
0x1a22   : > { %10497 = vmatprep.subr.bf16.mxu0 %v15628_v2 }
0x1a25   : > { %10498 = vmatpush1.bf16.msra.mxu0 %v15626_v63  ;;  %v10007_v63 = vrot.slane %v9830_v11, %v18248_v62 }
0x1a26   : > { %10499 = vmatprep.subr.bf16.mxu0 %v15634_v41  ;;  %v9969_v41 = vrot.slane %v9828_v15, %v18252_v12 }
0x1a29   : > { %10500 = vmatpush1.bf16.msra.mxu0 %v15632_v23 }
0x1a2a   : > { %10501 = vmatprep.subr.bf16.mxu0 %v15640_v27 }
0x1a2d   : > { %10502 = vmatpush1.bf16.msra.mxu0 %v15638_v36 }
0x1a2e   : > { %10503 = vmatprep.subr.bf16.mxu0 %v15646_v6 }
0x1a31   : > { %10504 = vmatpush1.bf16.msra.mxu0 %v15644_v7  ;;  %v9990_v7 = vrot.slane %v9829_v32, %v18252_v12 }
0x1a32   : > { %10505 = vmatprep.subr.bf16.mxu0 %v15652_v43 }
0x1a35   : > { %10506 = vmatpush1.bf16.msra.mxu0 %v15650_v53 }
0x1a36   : > { %10507 = vmatprep.subr.bf16.mxu0 %v15658_v18 }
0x1a39   : > { %10508 = vmatpush1.bf16.msra.mxu0 %v15656_v57  ;;  %v9832_v57 = vld [vmem:[%s19354_s3 + $0x10] sm:$0x3] }
0x1a3a   : > { %10509 = vmatprep.subr.bf16.mxu0 %v15664_v19  ;;  %v10049_v28 = vrot.slane %v9832_v57, %v18248_v62 }
0x1a3d   : > { %10510 = vmatpush1.bf16.msra.mxu0 %v15662_v3 }
0x1a3e   : > { %10511 = vmatprep.subr.bf16.mxu0 %v15670_v22 }
0x1a41   : > { %10512 = vmatpush1.bf16.msra.mxu0 %v15668_v52 }
0x1a42   : > { %10973 = vmatprep.subr.bf16.mxu0 %v15676_v21 }
0x1ad7   : > { %v9876_v8 = vpop.f32.mrb[60].mxu0 }
0x1ad8   : > { %v9878_v9 = vpop.f32.mrb[61].mxu0  ;;  %v9909_v30 = vmul.f32 %v9902_v31, %v9876_v8  ;;  %v9930_v33 = vmul.f32 %v9923_v17, %v9876_v8  ;;  %v9951_v1 = vmul.f32 %v9944_v10, %v9876_v8  ;;  %v9896_v37 = vmul.f32 %v9889_v25, %v9876_v8 }
0x1ad9   : > { %v9880_v35 = vpop.f32.mrb[62].mxu0  ;;  %v9972_v2 = vmul.f32 %v9965_v47, %v9876_v8  ;;  %v9910_v27 = vmul.f32 %v9906_v34, %v9878_v9  ;;  %v9931_v51 = vmul.f32 %v9927_v39, %v9878_v9  ;;  %v9993_v6 = vmul.f32 %v9986_v0, %v9876_v8 }
0x1ada   : > { %v9913_v40 = vrot.slane %v9909_v30, 1  ;;  %v9882_v61 = vpop.f32.mrb[63].mxu0  ;;  %v9934_v36 = vrot.slane %v9930_v33, 2  ;;  %v9955_v4 = vrot.slane %v9951_v1, 3  ;;  %v9897_v43 = vmul.f32 %v9893_v38, %v9878_v9  ;;  %v9833_v30 = vld [vmem:[%s19355_s18] sm:$0x3] }
0x1adb   : > { %v9914_v60 = vrot.slane %v9910_v27, 1  ;;  %v9952_v53 = vmul.f32 %v9948_v5, %v9878_v9  ;;  %v9976_v42 = vrot.slane %v9972_v2, 4  ;;  %v10014_v18 = vmul.f32 %v10007_v63, %v9876_v8  ;;  %v15679_v27 = vld [vmem:[%s19353_s2 + $0x14] ss:$8 sps:$4 sm:$0xff]   ;;  %s19356_s18 = sld [smem:[#allocation87_spill]] }
0x1adc   : > { %v9917_v23 = vadd.f32 %v9913_v40, %v9896_v37  ;;  %v9935_v20 = vrot.slane %v9931_v51, 2  ;;  %v9973_v3 = vmul.f32 %v9969_v41, %v9878_v9  ;;  %v9997_v55 = vrot.slane %v9993_v6, 5  ;;  %v15682_v51 = vld [vmem:[%s19353_s2 + $0x24] ss:$8 sps:$4 sm:$0xff]   ;;  %v15685_v6 = vld [vmem:[%s19353_s2 + $0x34] ss:$8 sps:$4 sm:$0xff]  }
0x1add   : > { %v9918_v19 = vadd.f32 %v9914_v60, %v9897_v43  ;;  %v10035_v22 = vmul.f32 %v10028_v29, %v9876_v8  ;;  %v9956_v21 = vrot.slane %v9952_v53, 3  ;;  %v9994_v26 = vmul.f32 %v9990_v7, %v9878_v9  ;;  %v15683_v29 = vld [vmem:[%s19353_s2 + $0x30] ss:$8 sps:$4 sm:$0xff]   ;;  %v15688_v7 = vld [vmem:[%s19353_s2 + $0x44] ss:$8 sps:$4 sm:$0xff]  }
0x1ade   : > { %v9938_v45 = vadd.f32 %v9934_v36, %v9917_v23  ;;  %v10018_v59 = vrot.slane %v10014_v18, 6  ;;  %v9977_v31 = vrot.slane %v9973_v3, 4  ;;  %v10015_v17 = vmul.f32 %v10011_v13, %v9878_v9  ;;  %v15674_v23 = vld [vmem:[%s19353_s2] ss:$8 sps:$4 sm:$0xff]   ;;  %v15691_v43 = vld [vmem:[%s19353_s2 + $0x54] ss:$8 sps:$4 sm:$0xff]  }
0x1adf   : > { %v9939_v24 = vadd.f32 %v9935_v20, %v9918_v19  ;;  %v10039_v10 = vrot.slane %v10035_v22, 7  ;;  %v9998_v47 = vrot.slane %v9994_v26, 5  ;;  %v10036_v11 = vmul.f32 %v10032_v44, %v9878_v9  ;;  %v15689_v60 = vld [vmem:[%s19353_s2 + $0x50] ss:$8 sps:$4 sm:$0xff]   ;;  %v15694_v53 = vld [vmem:[%s19353_s2 + $0x64] ss:$8 sps:$4 sm:$0xff]  }
0x1ae0   : > { %v9959_v14 = vadd.f32 %v9955_v4, %v9938_v45  ;;  %v10053_v8 = vrot.slane %v9832_v57, %v18252_v12  ;;  %v10056_v34 = vmul.f32 %v10049_v28, %v9880_v35  ;;  %v10019_v1 = vrot.slane %v10015_v17, 6  ;;  %v15680_v4 = vld [vmem:[%s19353_s2 + $0x20] ss:$8 sps:$4 sm:$0xff]   ;;  %v15697_v18 = vld [vmem:[%s19353_s2 + $0x74] ss:$8 sps:$4 sm:$0xff]  }
0x1ae1   : > { %v9960_v15 = vadd.f32 %v9956_v21, %v9939_v24  ;;  %v10040_v37 = vrot.slane %v10036_v11, 7  ;;  %v10064_v40 = vrot.slane %v9833_v30, %v18248_v62  ;;  %v10068_v9 = vrot.slane %v9833_v30, %v18252_v12  ;;  %v15686_v45 = vld [vmem:[%s19353_s2 + $0x40] ss:$8 sps:$4 sm:$0xff]   ;;  %v15695_v13 = vld [vmem:[%s19353_s2 + $0x70] ss:$8 sps:$4 sm:$0xff]  }
0x1ae2   : > { %v9980_v52 = vadd.f32 %v9976_v42, %v9959_v14  ;;  %v10057_v5 = vmul.f32 %v10053_v8, %v9882_v61  ;;  %v15677_v61 = vld [vmem:[%s19353_s2 + $0x10] ss:$8 sps:$4 sm:$0xff]   ;;  %v15692_v42 = vld [vmem:[%s19353_s2 + $0x60] ss:$8 sps:$4 sm:$0xff]   ;;  %v15700_v57 = vld [vmem:[%s19353_s2 + $0x84] ss:$8 sps:$4 sm:$0xff]  }
0x1ae3   : > { %v9981_v25 = vadd.f32 %v9977_v31, %v9960_v15  ;;  %v15698_v14 = vld [vmem:[%s19353_s2 + $0x80] ss:$8 sps:$4 sm:$0xff]   ;;  %v15703_v19 = vld [vmem:[%s19353_s2 + $0x94] ss:$8 sps:$4 sm:$0xff]   ;;  %v15701_v20 = vld [vmem:[%s19353_s2 + $0x90] ss:$8 sps:$4 sm:$0xff]  }
0x1ae4   : > { %v10001_v49 = vadd.f32 %v9997_v55, %v9980_v52  ;;  %v15706_v3 = vld [vmem:[%s19353_s2 + $0xa4] ss:$8 sps:$4 sm:$0xff]   ;;  %v15704_v55 = vld [vmem:[%s19353_s2 + $0xa0] ss:$8 sps:$4 sm:$0xff]   ;;  %v15709_v22 = vld [vmem:[%s19353_s2 + $0xb4] ss:$8 sps:$4 sm:$0xff]  }
0x1ae5   : > { %v10002_v39 = vadd.f32 %v9998_v47, %v9981_v25  ;;  %v15707_v44 = vld [vmem:[%s19353_s2 + $0xb0] ss:$8 sps:$4 sm:$0xff]   ;;  %v15712_v52 = vld [vmem:[%s19353_s2 + $0xc4] ss:$8 sps:$4 sm:$0xff]   ;;  %v15710_v24 = vld [vmem:[%s19353_s2 + $0xc0] ss:$8 sps:$4 sm:$0xff]  }
0x1ae6   : > { %v10022_v32 = vadd.f32 %v10018_v59, %v10001_v49  ;;  %v15715_v21 = vld [vmem:[%s19353_s2 + $0xd4] ss:$8 sps:$4 sm:$0xff]   ;;  %v15713_v26 = vld [vmem:[%s19353_s2 + $0xd0] ss:$8 sps:$4 sm:$0xff]   ;;  %v15718_v59 = vld [vmem:[%s19353_s2 + $0xe4] ss:$8 sps:$4 sm:$0xff]  }
0x1ae7   : > { %v10023_v56 = vadd.f32 %v10019_v1, %v10002_v39  ;;  %v15716_v28 = vld [vmem:[%s19353_s2 + $0xe0] ss:$8 sps:$4 sm:$0xff]   ;;  %v15721_v49 = vld [vmem:[%s19353_s2 + $0xf4] ss:$8 sps:$4 sm:$0xff]   ;;  %v15719_v15 = vld [vmem:[%s19353_s2 + $0xf0] ss:$8 sps:$4 sm:$0xff]  }
0x1ae8   : > { %v10043_v33 = vadd.f32 %v10039_v10, %v10022_v32  ;;  %v15724_v31 = vld [vmem:[%s19353_s2 + $0x104] ss:$8 sps:$4 sm:$0xff]   ;;  %v18631_v17 = vsub.s32 2, %v18245_v50  ;;  %v9149_v10 = vld [vmem:[%s19356_s18] sm:$0xf]  ;;  %v18635_v32 = vsub.s32 3, %v18245_v50 }
0x1ae9   : > { %v10044_v38 = vadd.f32 %v10040_v37, %v10023_v56  ;;  %v10139_v25 = vld [vmem:[%s19357_s1] sm:$0xf]  ;;  %v9474_v47 = vrot.slane %v9149_v10, %v18248_v62  ;;  %v9478_v8 = vrot.slane %v9149_v10, %v18252_v12  ;;  %s19358_s1 = sld [smem:[#allocation100_spill]]  ;;  %s19359_s18 = sld [smem:[#allocation98_spill]] }
0x1aea   : > { %v10058_v0 = vadd.f32 %v10056_v34, %v10043_v33  ;;  %v9482_v11 = vrot.slane %v9149_v10, %v18631_v17  ;;  %v9486_v30 = vrot.slane %v9149_v10, %v18635_v32  ;;  %v10464_v33 = vrot.slane %v10139_v25, %v18248_v62  ;;  %v15751_v10 = vld [vmem:[%s19353_s2 + $0x194] ss:$8 sps:$4 sm:$0xff]  }
0x1aeb   : > { %v10059_v2 = vadd.f32 %v10057_v5, %v10044_v38  ;;  %v10472_v34 = vrot.slane %v10139_v25, %v18631_v17  ;;  %v10468_v39 = vrot.slane %v10139_v25, %v18252_v12  ;;  %v10476_v1 = vrot.slane %v10139_v25, %v18635_v32  ;;  %v15749_v25 = vld [vmem:[%s19353_s2 + $0x190] ss:$8 sps:$4 sm:$0xff]  }
0x1aec   : > { %v10071_v63 = vadd.f32 %v10064_v40, %v10058_v0  ;;  %v9526_v0 = vadd.f32 %v18508_v54, %v9474_v47  ;;  %v9567_v56 = vadd.f32 %v18510_v58, %v9482_v11  ;;  %v9528_v37 = vadd.f32 %v18512_v46, %v9478_v8  ;;  %v15754_v47 = vld [vmem:[%s19353_s2 + $0x1a4] ss:$8 sps:$4 sm:$0xff]   ;;  %v15752_v11 = vld [vmem:[%s19353_s2 + $0x1a0] ss:$8 sps:$4 sm:$0xff]   ;;  %v15757_v8 = vld [vmem:[%s19353_s2 + $0x1b4] ss:$8 sps:$4 sm:$0xff]  }
0x1aed   : > { %v10072_v41 = vadd.f32 %v10068_v9, %v10059_v2  ;;  %v9569_v40 = vadd.f32 %v18514_v16, %v9486_v30  ;;  %v15755_v30 = vld [vmem:[%s19353_s2 + $0x1b0] ss:$8 sps:$4 sm:$0xff]  }
0x1aee   : > { %v10137_v36 = vpack.c.bf16 %v10071_v63, %v10071_v63 }
0x1aef   : > { %v10138_v35 = vpack.c.bf16 %v10072_v41, %v10072_v41  ;;  %v9576_v16 = vmax.f32 %v9569_v40, 0.0  ;;  %s19360_s3 = smov %s19359_s18  ;;  %v15767_v40 = vld [vmem:[%s19353_s2 + $0x1f0] ss:$8 sps:$4 sm:$0xff]  }
0x1af1   : > { %10513 = vmatprep.mubr.bf16.mxu0 %v10138_v35  ;;  %10554 = vmatprep.mubr.bf16.mxu1 %v10138_v35 }
0x1af2   : > { %10514 = vmatmul.mubr.bf16.vlgmr.msra.gmra.mrb[64].mxu0 %v10137_v36  ;;  %10555 = vmatmul.mubr.bf16.vlgmr.msra.gmra.mrb[40].mxu1 %v10137_v36 }
0x1af3   : > { %10974 = vmatpush1.bf16.msra.mxu0 %v15674_v23 }
0x1af4   : > { %10975 = vmatprep.subr.bf16.mxu0 %v15679_v27 }
0x1af7   : > { %10976 = vmatpush1.bf16.msra.mxu0 %v15677_v61  ;;  %v9573_v61 = vmax.f32 %v9526_v0, 0.0  ;;  %v15766_v0 = vld [vmem:[%s19353_s2 + $0x1e4] ss:$8 sps:$4 sm:$0xff]  }
0x1af8   : > { %10977 = vmatprep.subr.bf16.mxu0 %v15682_v51  ;;  %v9575_v51 = vmax.f32 %v9567_v56, 0.0  ;;  %v15764_v56 = vld [vmem:[%s19353_s2 + $0x1e0] ss:$8 sps:$4 sm:$0xff]  }
0x1afb   : > { %10978 = vmatpush1.bf16.msra.mxu0 %v15680_v4 }
0x1afc   : > { %10979 = vmatprep.subr.bf16.mxu0 %v15685_v6  ;;  %v9574_v6 = vmax.f32 %v9528_v37, 0.0  ;;  %v15769_v37 = vld [vmem:[%s19353_s2 + $0x1f4] ss:$8 sps:$4 sm:$0xff]  }
0x1aff   : > { %10980 = vmatpush1.bf16.msra.mxu0 %v15683_v29 }
0x1b00   : > { %10981 = vmatprep.subr.bf16.mxu0 %v15688_v7 }
0x1b03   : > { %10982 = vmatpush1.bf16.msra.mxu0 %v15686_v45 }
0x1b04   : > { %10983 = vmatprep.subr.bf16.mxu0 %v15691_v43 }
0x1b07   : > { %10984 = vmatpush1.bf16.msra.mxu0 %v15689_v60 }
0x1b08   : > { %10985 = vmatprep.subr.bf16.mxu0 %v15694_v53 }
0x1b0b   : > { %10986 = vmatpush1.bf16.msra.mxu0 %v15692_v42 }
0x1b0c   : > { %10987 = vmatprep.subr.bf16.mxu0 %v15697_v18  ;;  %v15722_v18 = vld [vmem:[%s19353_s2 + $0x100] ss:$8 sps:$4 sm:$0xff]  }
0x1b0f   : > { %10988 = vmatpush1.bf16.msra.mxu0 %v15695_v13 }
0x1b10   : > { %10989 = vmatprep.subr.bf16.mxu0 %v15700_v57  ;;  %v15727_v57 = vld [vmem:[%s19353_s2 + $0x114] ss:$8 sps:$4 sm:$0xff]  }
0x1b13   : > { %10990 = vmatpush1.bf16.msra.mxu0 %v15698_v14 }
0x1b14   : > { %10991 = vmatprep.subr.bf16.mxu0 %v15703_v19  ;;  %v15725_v19 = vld [vmem:[%s19353_s2 + $0x110] ss:$8 sps:$4 sm:$0xff]  }
0x1b17   : > { %10992 = vmatpush1.bf16.msra.mxu0 %v15701_v20  ;;  %v15730_v20 = vld [vmem:[%s19353_s2 + $0x124] ss:$8 sps:$4 sm:$0xff]  }
0x1b18   : > { %10993 = vmatprep.subr.bf16.mxu0 %v15706_v3  ;;  %v15728_v3 = vld [vmem:[%s19353_s2 + $0x120] ss:$8 sps:$4 sm:$0xff]  }
0x1b1b   : > { %10994 = vmatpush1.bf16.msra.mxu0 %v15704_v55  ;;  %v15733_v55 = vld [vmem:[%s19353_s2 + $0x134] ss:$8 sps:$4 sm:$0xff]  }
0x1b1c   : > { %10995 = vmatprep.subr.bf16.mxu0 %v15709_v22  ;;  %v15731_v22 = vld [vmem:[%s19353_s2 + $0x130] ss:$8 sps:$4 sm:$0xff]  }
0x1b1f   : > { %10996 = vmatpush1.bf16.msra.mxu0 %v15707_v44  ;;  %v15736_v44 = vld [vmem:[%s19353_s2 + $0x144] ss:$8 sps:$4 sm:$0xff]  }
0x1b20   : > { %10997 = vmatprep.subr.bf16.mxu0 %v15712_v52  ;;  %v15734_v52 = vld [vmem:[%s19353_s2 + $0x140] ss:$8 sps:$4 sm:$0xff]  }
0x1b23   : > { %10998 = vmatpush1.bf16.msra.mxu0 %v15710_v24  ;;  %v15739_v24 = vld [vmem:[%s19353_s2 + $0x154] ss:$8 sps:$4 sm:$0xff]  }
0x1b24   : > { %10999 = vmatprep.subr.bf16.mxu0 %v15715_v21  ;;  %v15737_v21 = vld [vmem:[%s19353_s2 + $0x150] ss:$8 sps:$4 sm:$0xff]  }
0x1b27   : > { %11000 = vmatpush1.bf16.msra.mxu0 %v15713_v26  ;;  %v15742_v26 = vld [vmem:[%s19353_s2 + $0x164] ss:$8 sps:$4 sm:$0xff]  }
0x1b28   : > { %11001 = vmatprep.subr.bf16.mxu0 %v15718_v59  ;;  %v15740_v59 = vld [vmem:[%s19353_s2 + $0x160] ss:$8 sps:$4 sm:$0xff]  }
0x1b2b   : > { %11002 = vmatpush1.bf16.msra.mxu0 %v15716_v28  ;;  %v15745_v28 = vld [vmem:[%s19353_s2 + $0x174] ss:$8 sps:$4 sm:$0xff]  }
0x1b2c   : > { %11003 = vmatprep.subr.bf16.mxu0 %v15721_v49  ;;  %v15743_v49 = vld [vmem:[%s19353_s2 + $0x170] ss:$8 sps:$4 sm:$0xff]  }
0x1b2f   : > { %11004 = vmatpush1.bf16.msra.mxu0 %v15719_v15  ;;  %v15748_v15 = vld [vmem:[%s19353_s2 + $0x184] ss:$8 sps:$4 sm:$0xff]  }
0x1b30   : > { %11014 = vmatprep.subr.bf16.mxu0 %v15724_v31  ;;  %v15746_v31 = vld [vmem:[%s19353_s2 + $0x180] ss:$8 sps:$4 sm:$0xff]  }
0x1bc5   : > { %v10515_v38 = vpop.f32.mrb[64].mxu0  ;;  %v10556_v5 = vpop.f32.mrb[40].mxu1 }
0x1bc6   : > { %v10516_v9 = vadd.f32 %v10515_v38, %v10464_v33  ;;  %v10557_v2 = vadd.f32 %v10556_v5, %v10472_v34  ;;  %v10517_v63 = vpop.f32.mrb[65].mxu0  ;;  %v10558_v41 = vpop.f32.mrb[41].mxu1  ;;  %v15760_v33 = vld [vmem:[%s19353_s2 + $0x1c4] ss:$8 sps:$4 sm:$0xff]   ;;  %v15758_v34 = vld [vmem:[%s19353_s2 + $0x1c0] ss:$8 sps:$4 sm:$0xff]  }
0x1bc7   : > { %v10518_v35 = vadd.f32 %v10517_v63, %v10468_v39  ;;  %v10559_v23 = vadd.f32 %v10558_v41, %v10476_v1  ;;  %v10519_v36 = vpop.f32.mrb[66].mxu0  ;;  %v10560_v27 = vpop.f32.mrb[42].mxu1  ;;  %v15763_v39 = vld [vmem:[%s19353_s2 + $0x1d4] ss:$8 sps:$4 sm:$0xff]   ;;  %v15761_v1 = vld [vmem:[%s19353_s2 + $0x1d0] ss:$8 sps:$4 sm:$0xff]  }
0x1bc8   : > { %v10563_v54 = vmax.f32 %v10516_v9, 0.0  ;;  %v10565_v58 = vmax.f32 %v10557_v2, 0.0  ;;  %v10520_v4 = vpop.f32.mrb[67].mxu0  ;;  %v10561_v46 = vpop.f32.mrb[43].mxu1  ;;  %v15772_v38 = vld [vmem:[%s19358_s1 + $0x4] ss:$16 sps:$4 sm:$0xff]  }
0x1bc9   : > { %v10564_v29 = vmax.f32 %v10518_v35, 0.0  ;;  %v10566_v7 = vmax.f32 %v10559_v23, 0.0  ;;  %v15770_v5 = vld [vmem:[%s19358_s1] ss:$16 sps:$4 sm:$0xff]   ;;  %v15775_v2 = vld [vmem:[%s19358_s1 + $0x24] ss:$16 sps:$4 sm:$0xff]  }
0x1bca   : > { %v10567_v45 = vadd.f32 %v10563_v54, %v9573_v61  ;;  %v18650_v43 = vadd.f32 %v10565_v58, %v9575_v51  ;;  %v15866_v63 = vld [vmem:[%s19359_s18] ss:$16 sps:$4 sm:$0xff]   ;;  %v15868_v41 = vld [vmem:[%s19360_s3 + $0x4] ss:$16 sps:$4 sm:$0xff]   ;;  %s19361_s18 = sld [smem:[#allocation95_spill]]  ;;  %s19362_s2 = sld [smem:[#allocation96_spill]] }
0x1bcb   : > { %v10568_v60 = vadd.f32 %v10564_v29, %v9574_v6  ;;  %v10570_v53 = vadd.f32 %v10566_v7, %v9576_v16  ;;  %v15773_v35 = vld [vmem:[%s19358_s1 + $0x20] ss:$16 sps:$4 sm:$0xff]   ;;  %v15871_v23 = vld [vmem:[%s19360_s3 + $0x24] ss:$16 sps:$4 sm:$0xff]   ;;  %11491 = vmatprep.subr.bf16.mxu1 %v15868_v41 }
0x1bcc   : > { %v18655_v13 = vpack.c.bf16 %v10567_v45, %v10567_v45  ;;  %v18696_v9 = vpack.c.bf16 %v18650_v43, %v18650_v43  ;;  %v15778_v36 = vld [vmem:[%s19358_s1 + $0x44] ss:$16 sps:$4 sm:$0xff]   ;;  %11492 = vmatpush1.bf16.msra.mxu1 %v15866_v63  ;;  %v15869_v27 = vld [vmem:[%s19360_s3 + $0x20] ss:$16 sps:$4 sm:$0xff]  }
0x1bcd   : > { %v18652_v42 = vpack.c.bf16 %v10568_v60, %v10568_v60  ;;  %v18658_v14 = vpack.c.bf16 %v10570_v53, %v10570_v53  ;;  %11493 = vmatprep.subr.bf16.mxu1 %v15871_v23  ;;  %v15874_v61 = vld [vmem:[%s19360_s3 + $0x44] ss:$16 sps:$4 sm:$0xff]   ;;  %v15776_v51 = vld [vmem:[%s19358_s1 + $0x40] ss:$16 sps:$4 sm:$0xff]  }
0x1bce   : > { %v15781_v54 = vld [vmem:[%s19358_s1 + $0x64] ss:$16 sps:$4 sm:$0xff]   ;;  %v15872_v58 = vld [vmem:[%s19360_s3 + $0x40] ss:$16 sps:$4 sm:$0xff]  }
0x1bcf   : > { %11005 = vmatprep.mubr.bf16.mxu0 %v18652_v42  ;;  %v15877_v4 = vld [vmem:[%s19360_s3 + $0x64] ss:$16 sps:$4 sm:$0xff]   ;;  %v15779_v46 = vld [vmem:[%s19358_s1 + $0x60] ss:$16 sps:$4 sm:$0xff]  }
0x1bd0   : > { %11006 = vmatmul.mubr.bf16.vlgmr.msra.gmra.mrb[68].mxu0 %v18655_v13  ;;  %11494 = vmatpush1.bf16.msra.mxu1 %v15869_v27  ;;  %v15784_v6 = vld [vmem:[%s19358_s1 + $0x84] ss:$16 sps:$4 sm:$0xff]   ;;  %v15875_v16 = vld [vmem:[%s19360_s3 + $0x60] ss:$16 sps:$4 sm:$0xff]  }
0x1bd1   : > { %11015 = vmatpush1.bf16.msra.mxu0 %v15722_v18  ;;  %11046 = vmatprep.mubr.bf16.mxu0 %v18658_v14  ;;  %v15880_v29 = vld [vmem:[%s19360_s3 + $0x84] ss:$16 sps:$4 sm:$0xff]   ;;  %v15782_v7 = vld [vmem:[%s19358_s1 + $0x80] ss:$16 sps:$4 sm:$0xff]  }
0x1bd2   : > { %11016 = vmatprep.subr.bf16.mxu0 %v15727_v57  ;;  %11495 = vmatprep.subr.bf16.mxu1 %v15874_v61  ;;  %v15787_v45 = vld [vmem:[%s19358_s1 + $0xa4] ss:$16 sps:$4 sm:$0xff]   ;;  %v15878_v43 = vld [vmem:[%s19360_s3 + $0x80] ss:$16 sps:$4 sm:$0xff]  }
0x1bd3   : > { %v15883_v60 = vld [vmem:[%s19360_s3 + $0xa4] ss:$16 sps:$4 sm:$0xff]   ;;  %v15785_v53 = vld [vmem:[%s19358_s1 + $0xa0] ss:$16 sps:$4 sm:$0xff]  }
0x1bd4   : > { %11496 = vmatpush1.bf16.msra.mxu1 %v15872_v58  ;;  %v15790_v18 = vld [vmem:[%s19358_s1 + $0xc4] ss:$16 sps:$4 sm:$0xff]   ;;  %v15881_v57 = vld [vmem:[%s19360_s3 + $0xa0] ss:$16 sps:$4 sm:$0xff]  }
0x1bd5   : > { %11017 = vmatpush1.bf16.msra.mxu0 %v15725_v19  ;;  %11497 = vmatprep.subr.bf16.mxu1 %v15877_v4  ;;  %v15886_v19 = vld [vmem:[%s19360_s3 + $0xc4] ss:$16 sps:$4 sm:$0xff]   ;;  %v15815_v63 = vld [vmem:[%s19358_s1 + $0x1e0] ss:$16 sps:$4 sm:$0xff]  }
0x1bd6   : > { %11018 = vmatprep.subr.bf16.mxu0 %v15730_v20  ;;  %v15788_v20 = vld [vmem:[%s19358_s1 + $0xc0] ss:$16 sps:$4 sm:$0xff]   ;;  %v15820_v41 = vld [vmem:[%s19358_s1 + $0x204] ss:$16 sps:$4 sm:$0xff]  }
0x1bd7   : > { %v15823_v23 = vld [vmem:[%s19358_s1 + $0x224] ss:$16 sps:$4 sm:$0xff]   ;;  %v15824_v61 = vld [vmem:[%s19358_s1 + $0x240] ss:$16 sps:$4 sm:$0xff]  }
0x1bd8   : > { %11498 = vmatpush1.bf16.msra.mxu1 %v15875_v16  ;;  %v15826_v27 = vld [vmem:[%s19358_s1 + $0x244] ss:$16 sps:$4 sm:$0xff]   ;;  %v15830_v4 = vld [vmem:[%s19358_s1 + $0x280] ss:$16 sps:$4 sm:$0xff]  }
0x1bd9   : > { %11019 = vmatpush1.bf16.msra.mxu0 %v15728_v3  ;;  %11499 = vmatprep.subr.bf16.mxu1 %v15880_v29  ;;  %v15793_v3 = vld [vmem:[%s19358_s1 + $0xe4] ss:$16 sps:$4 sm:$0xff]  }
0x1bda   : > { %11020 = vmatprep.subr.bf16.mxu0 %v15733_v55  ;;  %v15884_v55 = vld [vmem:[%s19360_s3 + $0xc0] ss:$16 sps:$4 sm:$0xff]   ;;  %v15832_v58 = vld [vmem:[%s19358_s1 + $0x284] ss:$16 sps:$4 sm:$0xff]  }
0x1bdb   : > { %v15838_v16 = vld [vmem:[%s19358_s1 + $0x2c4] ss:$16 sps:$4 sm:$0xff]  }
0x1bdc   : > { %11500 = vmatpush1.bf16.msra.mxu1 %v15878_v43  ;;  %v15907_v29 = vld [vmem:[%s19360_s3 + $0x1a4] ss:$16 sps:$4 sm:$0xff]  }
0x1bdd   : > { %11021 = vmatpush1.bf16.msra.mxu0 %v15731_v22  ;;  %11501 = vmatprep.subr.bf16.mxu1 %v15883_v60  ;;  %v15889_v22 = vld [vmem:[%s19360_s3 + $0xe4] ss:$16 sps:$4 sm:$0xff]  }
0x1bde   : > { %11022 = vmatprep.subr.bf16.mxu0 %v15736_v44  ;;  %v15791_v44 = vld [vmem:[%s19358_s1 + $0xe0] ss:$16 sps:$4 sm:$0xff]   ;;  %v15841_v43 = vld [vmem:[%s19358_s1 + $0x2e4] ss:$16 sps:$4 sm:$0xff]  }
0x1bdf   : > { %v15910_v60 = vld [vmem:[%s19360_s3 + $0x1c4] ss:$16 sps:$4 sm:$0xff]  }
0x1be0   : > { %11502 = vmatpush1.bf16.msra.mxu1 %v15881_v57  ;;  %v15844_v57 = vld [vmem:[%s19358_s1 + $0x304] ss:$16 sps:$4 sm:$0xff]  }
0x1be1   : > { %11023 = vmatpush1.bf16.msra.mxu0 %v15734_v52  ;;  %11503 = vmatprep.subr.bf16.mxu1 %v15886_v19  ;;  %v15796_v52 = vld [vmem:[%s19358_s1 + $0x104] ss:$16 sps:$4 sm:$0xff]  }
0x1be2   : > { %11024 = vmatprep.subr.bf16.mxu0 %v15739_v24  ;;  %v15887_v24 = vld [vmem:[%s19360_s3 + $0xe0] ss:$16 sps:$4 sm:$0xff]   ;;  %v15913_v19 = vld [vmem:[%s19360_s3 + $0x1e4] ss:$16 sps:$4 sm:$0xff]  }
0x1be4   : > { %11504 = vmatpush1.bf16.msra.mxu1 %v15884_v55  ;;  %v15847_v55 = vld [vmem:[%s19358_s1 + $0x324] ss:$16 sps:$4 sm:$0xff]  }
0x1be5   : > { %11025 = vmatpush1.bf16.msra.mxu0 %v15737_v21  ;;  %11505 = vmatprep.subr.bf16.mxu1 %v15889_v22  ;;  %v15892_v21 = vld [vmem:[%s19360_s3 + $0x104] ss:$16 sps:$4 sm:$0xff]   ;;  %v15916_v22 = vld [vmem:[%s19360_s3 + $0xc] ss:$16 sps:$4 sm:$0xff]  }
0x1be6   : > { %11026 = vmatprep.subr.bf16.mxu0 %v15742_v26  ;;  %v15794_v26 = vld [vmem:[%s19358_s1 + $0x100] ss:$16 sps:$4 sm:$0xff]  }
0x1be8   : > { %11506 = vmatpush1.bf16.msra.mxu1 %v15887_v24  ;;  %v15848_v24 = vld [vmem:[%s19358_s1 + $0x340] ss:$16 sps:$4 sm:$0xff]  }
0x1be9   : > { %11027 = vmatpush1.bf16.msra.mxu0 %v15740_v59  ;;  %v15799_v59 = vld [vmem:[%s19358_s1 + $0x124] ss:$16 sps:$4 sm:$0xff]   ;;  %11507 = vmatprep.subr.bf16.mxu1 %v15892_v21 }
0x1bea   : > { %11028 = vmatprep.subr.bf16.mxu0 %v15745_v28  ;;  %v15890_v28 = vld [vmem:[%s19360_s3 + $0x100] ss:$16 sps:$4 sm:$0xff]   ;;  %v15853_v21 = vld [vmem:[%s19358_s1 + $0x364] ss:$16 sps:$4 sm:$0xff]  }
0x1bec   : > { %11508 = vmatpush1.bf16.msra.mxu1 %v15890_v28  ;;  %v15854_v28 = vld [vmem:[%s19358_s1 + $0x380] ss:$16 sps:$4 sm:$0xff]  }
0x1bed   : > { %11029 = vmatpush1.bf16.msra.mxu0 %v15743_v49  ;;  %v15895_v49 = vld [vmem:[%s19360_s3 + $0x124] ss:$16 sps:$4 sm:$0xff]  }
0x1bee   : > { %11030 = vmatprep.subr.bf16.mxu0 %v15748_v15  ;;  %v15797_v15 = vld [vmem:[%s19358_s1 + $0x120] ss:$16 sps:$4 sm:$0xff]   ;;  %11509 = vmatprep.subr.bf16.mxu1 %v15895_v49  ;;  %v15859_v49 = vld [vmem:[%s19358_s1 + $0x3a4] ss:$16 sps:$4 sm:$0xff]  }
0x1bf1   : > { %11031 = vmatpush1.bf16.msra.mxu0 %v15746_v31  ;;  %v15802_v31 = vld [vmem:[%s19358_s1 + $0x144] ss:$16 sps:$4 sm:$0xff]  }
0x1bf2   : > { %11032 = vmatprep.subr.bf16.mxu0 %v15751_v10  ;;  %v15893_v10 = vld [vmem:[%s19360_s3 + $0x120] ss:$16 sps:$4 sm:$0xff]  }
0x1bf3   : > { %11510 = vmatpush1.bf16.msra.mxu1 %v15893_v10  ;;  %v15860_v10 = vld [vmem:[%s19358_s1 + $0x3c0] ss:$16 sps:$4 sm:$0xff]  }
0x1bf5   : > { %11033 = vmatpush1.bf16.msra.mxu0 %v15749_v25  ;;  %v15898_v25 = vld [vmem:[%s19360_s3 + $0x144] ss:$16 sps:$4 sm:$0xff]  }
0x1bf6   : > { %11034 = vmatprep.subr.bf16.mxu0 %v15754_v47  ;;  %v15800_v47 = vld [vmem:[%s19358_s1 + $0x140] ss:$16 sps:$4 sm:$0xff]   ;;  %11511 = vmatprep.subr.bf16.mxu1 %v15898_v25  ;;  %v15865_v25 = vld [vmem:[%s19358_s1 + $0x3e4] ss:$16 sps:$4 sm:$0xff]  }
0x1bf9   : > { %11035 = vmatpush1.bf16.msra.mxu0 %v15752_v11  ;;  %v15805_v11 = vld [vmem:[%s19358_s1 + $0x164] ss:$16 sps:$4 sm:$0xff]  }
0x1bfa   : > { %11036 = vmatprep.subr.bf16.mxu0 %v15757_v8  ;;  %v15896_v8 = vld [vmem:[%s19360_s3 + $0x140] ss:$16 sps:$4 sm:$0xff]  }
0x1bfb   : > { %11512 = vmatpush1.bf16.msra.mxu1 %v15896_v8 }
0x1bfd   : > { %11037 = vmatpush1.bf16.msra.mxu0 %v15755_v30  ;;  %v15901_v30 = vld [vmem:[%s19360_s3 + $0x164] ss:$16 sps:$4 sm:$0xff]  }
0x1bfe   : > { %11038 = vmatprep.subr.bf16.mxu0 %v15760_v33  ;;  %v15803_v33 = vld [vmem:[%s19358_s1 + $0x160] ss:$16 sps:$4 sm:$0xff]   ;;  %11513 = vmatprep.subr.bf16.mxu1 %v15901_v30  ;;  %v10571_v30 = vld [vmem:[%s19362_s2 + $0x8] sm:$0x3]  ;;  %s19364_s2 = sld [smem:[#allocation99_spill]] }
0x1c01   : > { %11039 = vmatpush1.bf16.msra.mxu0 %v15758_v34  ;;  %v15808_v34 = vld [vmem:[%s19358_s1 + $0x184] ss:$16 sps:$4 sm:$0xff]  }
0x1c02   : > { %11040 = vmatprep.subr.bf16.mxu0 %v15763_v39  ;;  %v15899_v39 = vld [vmem:[%s19360_s3 + $0x160] ss:$16 sps:$4 sm:$0xff]  }
0x1c03   : > { %11514 = vmatpush1.bf16.msra.mxu1 %v15899_v39 }
0x1c05   : > { %11041 = vmatpush1.bf16.msra.mxu0 %v15761_v1  ;;  %v15904_v1 = vld [vmem:[%s19360_s3 + $0x184] ss:$16 sps:$4 sm:$0xff]  }
0x1c06   : > { %11042 = vmatprep.subr.bf16.mxu0 %v15766_v0  ;;  %v15806_v0 = vld [vmem:[%s19358_s1 + $0x180] ss:$16 sps:$4 sm:$0xff]   ;;  %11515 = vmatprep.subr.bf16.mxu1 %v15904_v1 }
0x1c09   : > { %11043 = vmatpush1.bf16.msra.mxu0 %v15764_v56  ;;  %v15811_v56 = vld [vmem:[%s19358_s1 + $0x1a4] ss:$16 sps:$4 sm:$0xff]  }
0x1c0a   : > { %11044 = vmatprep.subr.bf16.mxu0 %v15769_v37  ;;  %v15902_v37 = vld [vmem:[%s19360_s3 + $0x180] ss:$16 sps:$4 sm:$0xff]  }
0x1c0b   : > { %11516 = vmatpush1.bf16.msra.mxu1 %v15902_v37 }
0x1c0c   : > { %11517 = vmatprep.subr.bf16.mxu1 %v15907_v29  ;;  %v15925_v29 = vld [vmem:[%s19360_s3 + $0x6c] ss:$16 sps:$4 sm:$0xff]  }
0x1c0d   : > { %11045 = vmatpush1.bf16.msra.mxu0 %v15767_v40  ;;  %v15809_v40 = vld [vmem:[%s19358_s1 + $0x1a0] ss:$16 sps:$4 sm:$0xff]  }
0x1c0e   : > { %12345 = vmatprep.subr.bf16.mxu0 %v15772_v38  ;;  %v15814_v38 = vld [vmem:[%s19358_s1 + $0x1c4] ss:$16 sps:$4 sm:$0xff]  }
0x1c10   : > { %11047 = vmatmul.mubr.bf16.vlgmr.msra.gmra.mrb[68].mxu0 %v18696_v9 }
0x1c11   : > { %12346 = vmatpush1.bf16.msra.mxu0 %v15770_v5  ;;  %12377 = vmatprep.mubr.bf16.mxu0 %v18652_v42  ;;  %v15812_v5 = vld [vmem:[%s19358_s1 + $0x1c0] ss:$16 sps:$4 sm:$0xff]  }
0x1c12   : > { %12347 = vmatprep.subr.bf16.mxu0 %v15775_v2  ;;  %v15817_v2 = vld [vmem:[%s19358_s1 + $0x1e4] ss:$16 sps:$4 sm:$0xff]  }
0x1c15   : > { %12348 = vmatpush1.bf16.msra.mxu0 %v15773_v35  ;;  %v15818_v35 = vld [vmem:[%s19358_s1 + $0x200] ss:$16 sps:$4 sm:$0xff]  }
0x1c16   : > { %12349 = vmatprep.subr.bf16.mxu0 %v15778_v36  ;;  %v15821_v36 = vld [vmem:[%s19358_s1 + $0x220] ss:$16 sps:$4 sm:$0xff]  }
0x1c19   : > { %12350 = vmatpush1.bf16.msra.mxu0 %v15776_v51  ;;  %v15829_v51 = vld [vmem:[%s19358_s1 + $0x264] ss:$16 sps:$4 sm:$0xff]  }
0x1c1a   : > { %12351 = vmatprep.subr.bf16.mxu0 %v15781_v54  ;;  %v15827_v54 = vld [vmem:[%s19358_s1 + $0x260] ss:$16 sps:$4 sm:$0xff]  }
0x1c1d   : > { %12352 = vmatpush1.bf16.msra.mxu0 %v15779_v46  ;;  %v15835_v46 = vld [vmem:[%s19358_s1 + $0x2a4] ss:$16 sps:$4 sm:$0xff]  }
0x1c1e   : > { %12353 = vmatprep.subr.bf16.mxu0 %v15784_v6  ;;  %v15833_v6 = vld [vmem:[%s19358_s1 + $0x2a0] ss:$16 sps:$4 sm:$0xff]  }
0x1c21   : > { %12354 = vmatpush1.bf16.msra.mxu0 %v15782_v7  ;;  %v15905_v7 = vld [vmem:[%s19360_s3 + $0x1a0] ss:$16 sps:$4 sm:$0xff]  }
0x1c22   : > { %12355 = vmatprep.subr.bf16.mxu0 %v15787_v45  ;;  %v15836_v45 = vld [vmem:[%s19358_s1 + $0x2c0] ss:$16 sps:$4 sm:$0xff]   ;;  %11518 = vmatpush1.bf16.msra.mxu1 %v15905_v7  ;;  %v15923_v7 = vld [vmem:[%s19360_s3 + $0x68] ss:$16 sps:$4 sm:$0xff]  }
0x1c23   : > { %11519 = vmatprep.subr.bf16.mxu1 %v15910_v60  ;;  %v15931_v60 = vld [vmem:[%s19360_s3 + $0xac] ss:$16 sps:$4 sm:$0xff]  }
0x1c25   : > { %12356 = vmatpush1.bf16.msra.mxu0 %v15785_v53  ;;  %v15908_v53 = vld [vmem:[%s19360_s3 + $0x1c0] ss:$16 sps:$4 sm:$0xff]  }
0x1c26   : > { %12357 = vmatprep.subr.bf16.mxu0 %v15790_v18  ;;  %v15839_v18 = vld [vmem:[%s19358_s1 + $0x2e0] ss:$16 sps:$4 sm:$0xff]   ;;  %11520 = vmatpush1.bf16.msra.mxu1 %v15908_v53  ;;  %v15929_v53 = vld [vmem:[%s19360_s3 + $0xa8] ss:$16 sps:$4 sm:$0xff]  }
0x1c27   : > { %11521 = vmatprep.subr.bf16.mxu1 %v15913_v19  ;;  %v15937_v19 = vld [vmem:[%s19360_s3 + $0xec] ss:$16 sps:$4 sm:$0xff]  }
0x1c29   : > { %12358 = vmatpush1.bf16.msra.mxu0 %v15788_v20  ;;  %v15911_v20 = vld [vmem:[%s19360_s3 + $0x1e0] ss:$16 sps:$4 sm:$0xff]  }
0x1c2a   : > { %12359 = vmatprep.subr.bf16.mxu0 %v15793_v3  ;;  %v15842_v3 = vld [vmem:[%s19358_s1 + $0x300] ss:$16 sps:$4 sm:$0xff]   ;;  %11522 = vmatpush1.bf16.msra.mxu1 %v15911_v20  ;;  %v15935_v20 = vld [vmem:[%s19360_s3 + $0xe8] ss:$16 sps:$4 sm:$0xff]  }
0x1c2b   : > { %11532 = vmatprep.subr.bf16.mxu1 %v15916_v22  ;;  %v15943_v22 = vld [vmem:[%s19360_s3 + $0x12c] ss:$16 sps:$4 sm:$0xff]  }
0x1c2d   : > { %12360 = vmatpush1.bf16.msra.mxu0 %v15791_v44  ;;  %v15845_v44 = vld [vmem:[%s19358_s1 + $0x320] ss:$16 sps:$4 sm:$0xff]  }
0x1c2e   : > { %12361 = vmatprep.subr.bf16.mxu0 %v15796_v52  ;;  %v15850_v52 = vld [vmem:[%s19358_s1 + $0x344] ss:$16 sps:$4 sm:$0xff]  }
0x1c31   : > { %12362 = vmatpush1.bf16.msra.mxu0 %v15794_v26  ;;  %v15851_v26 = vld [vmem:[%s19358_s1 + $0x360] ss:$16 sps:$4 sm:$0xff]  }
0x1c32   : > { %12363 = vmatprep.subr.bf16.mxu0 %v15799_v59  ;;  %v15856_v59 = vld [vmem:[%s19358_s1 + $0x384] ss:$16 sps:$4 sm:$0xff]  }
0x1c35   : > { %12364 = vmatpush1.bf16.msra.mxu0 %v15797_v15  ;;  %v15857_v15 = vld [vmem:[%s19358_s1 + $0x3a0] ss:$16 sps:$4 sm:$0xff]  }
0x1c36   : > { %12365 = vmatprep.subr.bf16.mxu0 %v15802_v31  ;;  %v15862_v31 = vld [vmem:[%s19358_s1 + $0x3c4] ss:$16 sps:$4 sm:$0xff]  }
0x1c39   : > { %12366 = vmatpush1.bf16.msra.mxu0 %v15800_v47  ;;  %v15863_v47 = vld [vmem:[%s19358_s1 + $0x3e0] ss:$16 sps:$4 sm:$0xff]  }
0x1c3a   : > { %12367 = vmatprep.subr.bf16.mxu0 %v15805_v11  ;;  %v10641_v11 = vld [vmem:[%s19361_s18] sm:$0x3]  ;;  %s12548_s18 = sand.u32 1, %s16977_s0  }
0x1c3b   : > { %v10966_v8 = vrot.slane %v10641_v11, %v18248_v62  ;;  %s18944_s6 = scalar_lea.sflag [#allocation18], %s12548_s18 }
0x1c3d   : > { %12368 = vmatpush1.bf16.msra.mxu0 %v15803_v33  ;;  %v10970_v33 = vrot.slane %v10641_v11, %v18252_v12  ;;  %v15964_v11 = vld [vmem:[%s19358_s1 + $0xc] ss:$16 sps:$4 sm:$0xff]  }
0x1c3e   : > { %12369 = vmatprep.subr.bf16.mxu0 %v15808_v34  ;;  %v10572_v34 = vld [vmem:[%s19363_s4] sm:$0x3]  ;;  %s12609_s4 = sshll.u32 %s18114_s5, 4  ;;  %s16549_s5 = smov [#allocation17]   ;;  %s18934_s4 = int_to_ptr.vmem [resolvable:$true] %s12609_s4 }
0x1c3f   : > { %s16287_s9 = sshll.u32 %s16549_s5, 4  ;;  %s16288_s9 = int_to_ptr.vmem [resolvable:$false] %s16287_s9 }
0x1c40   : > { %s16289_s12 = scalar_lea.vmem %s16288_s9, 2048 }
0x1c41   : > { %12370 = vmatpush1.bf16.msra.mxu0 %v15806_v0  ;;  %v11061_v0 = vrot.slane %v10571_v30, %v18248_v62 }
0x1c42   : > { %12371 = vmatprep.subr.bf16.mxu0 %v15811_v56 }
0x1c45   : > { %12372 = vmatpush1.bf16.msra.mxu0 %v15809_v40  ;;  %v11065_v40 = vrot.slane %v10571_v30, %v18252_v12  ;;  %v15967_v30 = vld [vmem:[%s19358_s1 + $0x2c] ss:$16 sps:$4 sm:$0xff]  }
0x1c46   : > { %12373 = vmatprep.subr.bf16.mxu0 %v15814_v38 }
0x1c49   : > { %12374 = vmatpush1.bf16.msra.mxu0 %v15812_v5 }
0x1c4a   : > { %12375 = vmatprep.subr.bf16.mxu0 %v15817_v2  ;;  %v11074_v2 = vrot.slane %v10572_v34, %v18248_v62 }
0x1c4d   : > { %12376 = vmatpush1.bf16.msra.mxu0 %v15815_v63 }
0x1c4e   : > { %12386 = vmatprep.subr.bf16.mxu0 %v15820_v41 }
0x1c50   : > { %12378 = vmatmul.mubr.bf16.vlgmr.msra.gmra.mrb[72].mxu0 %v18655_v13 }
0x1c51   : > { %12387 = vmatpush1.bf16.msra.mxu0 %v15818_v35  ;;  %12418 = vmatprep.mubr.bf16.mxu0 %v18658_v14  ;;  %v11078_v35 = vrot.slane %v10572_v34, %v18252_v12  ;;  %v15970_v34 = vld [vmem:[%s19358_s1 + $0x4c] ss:$16 sps:$4 sm:$0xff]  }
0x1c52   : > { %12388 = vmatprep.subr.bf16.mxu0 %v15823_v23 }
0x1c55   : > { %12389 = vmatpush1.bf16.msra.mxu0 %v15821_v36 }
0x1c56   : > { %12390 = vmatprep.subr.bf16.mxu0 %v15826_v27 }
0x1c59   : > { %12391 = vmatpush1.bf16.msra.mxu0 %v15824_v61 }
0x1c5a   : > { %12392 = vmatprep.subr.bf16.mxu0 %v15829_v51 }
0x1c5d   : > { %12393 = vmatpush1.bf16.msra.mxu0 %v15827_v54  ;;  %v15914_v54 = vld [vmem:[%s19360_s3 + $0x8] ss:$16 sps:$4 sm:$0xff]  }
0x1c5e   : > { %12394 = vmatprep.subr.bf16.mxu0 %v15832_v58 }
0x1c61   : > { %12395 = vmatpush1.bf16.msra.mxu0 %v15830_v4  ;;  %v15919_v4 = vld [vmem:[%s19360_s3 + $0x2c] ss:$16 sps:$4 sm:$0xff]  }
0x1c62   : > { %12396 = vmatprep.subr.bf16.mxu0 %v15835_v46  ;;  %v15917_v46 = vld [vmem:[%s19360_s3 + $0x28] ss:$16 sps:$4 sm:$0xff]  }
0x1c65   : > { %12397 = vmatpush1.bf16.msra.mxu0 %v15833_v6  ;;  %v15922_v6 = vld [vmem:[%s19360_s3 + $0x4c] ss:$16 sps:$4 sm:$0xff]  }
0x1c66   : > { %12398 = vmatprep.subr.bf16.mxu0 %v15838_v16  ;;  %v15920_v16 = vld [vmem:[%s19360_s3 + $0x48] ss:$16 sps:$4 sm:$0xff]  }
0x1c69   : > { %12399 = vmatpush1.bf16.msra.mxu0 %v15836_v45  ;;  %v15928_v45 = vld [vmem:[%s19360_s3 + $0x8c] ss:$16 sps:$4 sm:$0xff]  }
0x1c6a   : > { %12400 = vmatprep.subr.bf16.mxu0 %v15841_v43  ;;  %v15926_v43 = vld [vmem:[%s19360_s3 + $0x88] ss:$16 sps:$4 sm:$0xff]  }
0x1c6d   : > { %12401 = vmatpush1.bf16.msra.mxu0 %v15839_v18  ;;  %v15934_v18 = vld [vmem:[%s19360_s3 + $0xcc] ss:$16 sps:$4 sm:$0xff]  }
0x1c6e   : > { %12402 = vmatprep.subr.bf16.mxu0 %v15844_v57  ;;  %v15932_v57 = vld [vmem:[%s19360_s3 + $0xc8] ss:$16 sps:$4 sm:$0xff]  }
0x1c71   : > { %12403 = vmatpush1.bf16.msra.mxu0 %v15842_v3  ;;  %v15940_v3 = vld [vmem:[%s19360_s3 + $0x10c] ss:$16 sps:$4 sm:$0xff]  }
0x1c72   : > { %12404 = vmatprep.subr.bf16.mxu0 %v15847_v55  ;;  %v15938_v55 = vld [vmem:[%s19360_s3 + $0x108] ss:$16 sps:$4 sm:$0xff]  }
0x1c75   : > { %12405 = vmatpush1.bf16.msra.mxu0 %v15845_v44  ;;  %v15941_v44 = vld [vmem:[%s19360_s3 + $0x128] ss:$16 sps:$4 sm:$0xff]  }
0x1c76   : > { %12406 = vmatprep.subr.bf16.mxu0 %v15850_v52  ;;  %v15946_v52 = vld [vmem:[%s19360_s3 + $0x14c] ss:$16 sps:$4 sm:$0xff]  }
0x1c79   : > { %12407 = vmatpush1.bf16.msra.mxu0 %v15848_v24  ;;  %v15944_v24 = vld [vmem:[%s19360_s3 + $0x148] ss:$16 sps:$4 sm:$0xff]  }
0x1c7a   : > { %12408 = vmatprep.subr.bf16.mxu0 %v15853_v21  ;;  %v15949_v21 = vld [vmem:[%s19360_s3 + $0x16c] ss:$16 sps:$4 sm:$0xff]  }
0x1c7d   : > { %12409 = vmatpush1.bf16.msra.mxu0 %v15851_v26  ;;  %v15947_v26 = vld [vmem:[%s19360_s3 + $0x168] ss:$16 sps:$4 sm:$0xff]  }
0x1c7e   : > { %12410 = vmatprep.subr.bf16.mxu0 %v15856_v59  ;;  %v15952_v59 = vld [vmem:[%s19360_s3 + $0x18c] ss:$16 sps:$4 sm:$0xff]  }
0x1c81   : > { %12411 = vmatpush1.bf16.msra.mxu0 %v15854_v28  ;;  %v15950_v28 = vld [vmem:[%s19360_s3 + $0x188] ss:$16 sps:$4 sm:$0xff]  }
0x1c82   : > { %12412 = vmatprep.subr.bf16.mxu0 %v15859_v49  ;;  %v15955_v49 = vld [vmem:[%s19360_s3 + $0x1ac] ss:$16 sps:$4 sm:$0xff]  }
0x1c85   : > { %12413 = vmatpush1.bf16.msra.mxu0 %v15857_v15  ;;  %v15953_v15 = vld [vmem:[%s19360_s3 + $0x1a8] ss:$16 sps:$4 sm:$0xff]  }
0x1c86   : > { %12414 = vmatprep.subr.bf16.mxu0 %v15862_v31  ;;  %v15958_v31 = vld [vmem:[%s19360_s3 + $0x1cc] ss:$16 sps:$4 sm:$0xff]  }
0x1c89   : > { %12415 = vmatpush1.bf16.msra.mxu0 %v15860_v10  ;;  %v15956_v10 = vld [vmem:[%s19360_s3 + $0x1c8] ss:$16 sps:$4 sm:$0xff]  }
0x1c8a   : > { %12416 = vmatprep.subr.bf16.mxu0 %v15865_v25  ;;  %v15961_v25 = vld [vmem:[%s19360_s3 + $0x1ec] ss:$16 sps:$4 sm:$0xff]  }
0x1c8d   : > { %12417 = vmatpush1.bf16.msra.mxu0 %v15863_v47  ;;  %v15959_v47 = vld [vmem:[%s19360_s3 + $0x1e8] ss:$16 sps:$4 sm:$0xff]  }
0x1c90   : > { %12419 = vmatmul.mubr.bf16.vlgmr.msra.gmra.mrb[72].mxu0 %v18696_v9 }
0x1ce3   : > { %v11048_v39 = vpop.f32.mrb[68].mxu0 }
0x1ce4   : > { %v14777_v1 = vadd.f32 %v11048_v39, %v10966_v8  ;;  %v11050_v56 = vpop.f32.mrb[69].mxu0  ;;  %v15962_v8 = vld [vmem:[%s19358_s1 + $0x8] ss:$16 sps:$4 sm:$0xff]  }
0x1ce5   : > { %v14778_v37 = vadd.f32 %v11050_v56, %v10970_v33  ;;  %v11052_v38 = vpop.f32.mrb[70].mxu0  ;;  %v15965_v33 = vld [vmem:[%s19358_s1 + $0x28] ss:$16 sps:$4 sm:$0xff]   ;;  %v15976_v56 = vld [vmem:[%s19358_s1 + $0x8c] ss:$16 sps:$4 sm:$0xff]  }
0x1ce6   : > { %v11055_v5 = vmax.f32 %v14777_v1, 0.0  ;;  %v11053_v63 = vpop.f32.mrb[71].mxu0  ;;  %v15968_v39 = vld [vmem:[%s19358_s1 + $0x48] ss:$16 sps:$4 sm:$0xff]   ;;  %v15973_v1 = vld [vmem:[%s19358_s1 + $0x6c] ss:$16 sps:$4 sm:$0xff]  }
0x1ce7   : > { %v11056_v41 = vmax.f32 %v14778_v37, 0.0  ;;  %v15974_v37 = vld [vmem:[%s19358_s1 + $0x88] ss:$16 sps:$4 sm:$0xff]   ;;  %v15982_v38 = vld [vmem:[%s19358_s1 + $0xcc] ss:$16 sps:$4 sm:$0xff]  }
0x1ce8   : > { %v11068_v23 = vmul.f32 %v11061_v0, %v11055_v5  ;;  %v15971_v0 = vld [vmem:[%s19358_s1 + $0x68] ss:$16 sps:$4 sm:$0xff]  }
0x1ce9   : > { %v11069_v36 = vmul.f32 %v11065_v40, %v11056_v41  ;;  %v15977_v40 = vld [vmem:[%s19358_s1 + $0xa8] ss:$16 sps:$4 sm:$0xff]   ;;  %v15988_v41 = vld [vmem:[%s19358_s1 + $0x10c] ss:$16 sps:$4 sm:$0xff]  }
0x1cea   : > { %v11081_v27 = vadd.f32 %v11074_v2, %v11068_v23  ;;  %v15980_v5 = vld [vmem:[%s19358_s1 + $0xc8] ss:$16 sps:$4 sm:$0xff]   ;;  %v15985_v2 = vld [vmem:[%s19358_s1 + $0xec] ss:$16 sps:$4 sm:$0xff]  }
0x1ceb   : > { %v11082_v61 = vadd.f32 %v11078_v35, %v11069_v36  ;;  %v15983_v63 = vld [vmem:[%s19358_s1 + $0xe8] ss:$16 sps:$4 sm:$0xff]   ;;  %v15991_v23 = vld [vmem:[%s19358_s1 + $0x12c] ss:$16 sps:$4 sm:$0xff]  }
0x1cec   : > { %v18808_v58 = vpack.c.bf16 %v11081_v27, %v11081_v27  ;;  %v15986_v35 = vld [vmem:[%s19358_s1 + $0x108] ss:$16 sps:$4 sm:$0xff]   ;;  %v15994_v27 = vld [vmem:[%s19358_s1 + $0x14c] ss:$16 sps:$4 sm:$0xff]  }
0x1ced   : > { %v11148_v51 = vpack.c.bf16 %v11082_v61, %v11082_v61  ;;  %v15989_v36 = vld [vmem:[%s19358_s1 + $0x128] ss:$16 sps:$4 sm:$0xff]  }
0x1cee   : > { %v15992_v61 = vld [vmem:[%s19358_s1 + $0x148] ss:$16 sps:$4 sm:$0xff]  }
0x1cef   : > { %11523 = vmatprep.mubr.bf16.mxu1 %v11148_v51 }
0x1cf0   : > { %11524 = vmatmul.mubr.bf16.vlgmr.msra.gmra.mrb[44].mxu1 %v18808_v58 }
0x1cf1   : > { %11533 = vmatpush1.bf16.msra.mxu1 %v15914_v54  ;;  %11564 = vmatprep.mubr.bf16.mxu1 %v11148_v51  ;;  %v15997_v51 = vld [vmem:[%s19358_s1 + $0x16c] ss:$16 sps:$4 sm:$0xff]   ;;  %v15995_v54 = vld [vmem:[%s19358_s1 + $0x168] ss:$16 sps:$4 sm:$0xff]  }
0x1cf2   : > { %11534 = vmatprep.subr.bf16.mxu1 %v15919_v4  ;;  %v15998_v4 = vld [vmem:[%s19358_s1 + $0x188] ss:$16 sps:$4 sm:$0xff]  }
0x1cf5   : > { %11535 = vmatpush1.bf16.msra.mxu1 %v15917_v46  ;;  %v16003_v46 = vld [vmem:[%s19358_s1 + $0x1ac] ss:$16 sps:$4 sm:$0xff]  }
0x1cf6   : > { %11536 = vmatprep.subr.bf16.mxu1 %v15922_v6  ;;  %v16001_v6 = vld [vmem:[%s19358_s1 + $0x1a8] ss:$16 sps:$4 sm:$0xff]  }
0x1cf9   : > { %11537 = vmatpush1.bf16.msra.mxu1 %v15920_v16  ;;  %v16006_v16 = vld [vmem:[%s19358_s1 + $0x1cc] ss:$16 sps:$4 sm:$0xff]  }
0x1cfa   : > { %11538 = vmatprep.subr.bf16.mxu1 %v15925_v29 }
0x1cfd   : > { %11539 = vmatpush1.bf16.msra.mxu1 %v15923_v7 }
0x1cfe   : > { %11540 = vmatprep.subr.bf16.mxu1 %v15928_v45 }
0x1d01   : > { %11541 = vmatpush1.bf16.msra.mxu1 %v15926_v43  ;;  %v16004_v43 = vld [vmem:[%s19358_s1 + $0x1c8] ss:$16 sps:$4 sm:$0xff]  }
0x1d02   : > { %11542 = vmatprep.subr.bf16.mxu1 %v15931_v60 }
0x1d05   : > { %11543 = vmatpush1.bf16.msra.mxu1 %v15929_v53  ;;  %v16009_v53 = vld [vmem:[%s19358_s1 + $0x1ec] ss:$16 sps:$4 sm:$0xff]  }
0x1d06   : > { %11544 = vmatprep.subr.bf16.mxu1 %v15934_v18  ;;  %v16007_v18 = vld [vmem:[%s19358_s1 + $0x1e8] ss:$16 sps:$4 sm:$0xff]  }
0x1d09   : > { %11545 = vmatpush1.bf16.msra.mxu1 %v15932_v57  ;;  %v16012_v57 = vld [vmem:[%s19358_s1 + $0x20c] ss:$16 sps:$4 sm:$0xff]  }
0x1d0a   : > { %11546 = vmatprep.subr.bf16.mxu1 %v15937_v19  ;;  %v16010_v19 = vld [vmem:[%s19358_s1 + $0x208] ss:$16 sps:$4 sm:$0xff]  }
0x1d0d   : > { %11547 = vmatpush1.bf16.msra.mxu1 %v15935_v20  ;;  %v16015_v20 = vld [vmem:[%s19358_s1 + $0x22c] ss:$16 sps:$4 sm:$0xff]  }
0x1d0e   : > { %11548 = vmatprep.subr.bf16.mxu1 %v15940_v3  ;;  %v16013_v3 = vld [vmem:[%s19358_s1 + $0x228] ss:$16 sps:$4 sm:$0xff]  }
0x1d11   : > { %11549 = vmatpush1.bf16.msra.mxu1 %v15938_v55  ;;  %v16018_v55 = vld [vmem:[%s19358_s1 + $0x24c] ss:$16 sps:$4 sm:$0xff]  }
0x1d12   : > { %11550 = vmatprep.subr.bf16.mxu1 %v15943_v22  ;;  %v16016_v22 = vld [vmem:[%s19358_s1 + $0x248] ss:$16 sps:$4 sm:$0xff]  }
0x1d15   : > { %11551 = vmatpush1.bf16.msra.mxu1 %v15941_v44  ;;  %v16021_v44 = vld [vmem:[%s19358_s1 + $0x26c] ss:$16 sps:$4 sm:$0xff]  }
0x1d16   : > { %11552 = vmatprep.subr.bf16.mxu1 %v15946_v52  ;;  %v16019_v52 = vld [vmem:[%s19358_s1 + $0x268] ss:$16 sps:$4 sm:$0xff]  }
0x1d19   : > { %11553 = vmatpush1.bf16.msra.mxu1 %v15944_v24  ;;  %v16022_v24 = vld [vmem:[%s19358_s1 + $0x288] ss:$16 sps:$4 sm:$0xff]  }
0x1d1a   : > { %11554 = vmatprep.subr.bf16.mxu1 %v15949_v21  ;;  %v16025_v21 = vld [vmem:[%s19358_s1 + $0x2a8] ss:$16 sps:$4 sm:$0xff]  }
0x1d1d   : > { %11555 = vmatpush1.bf16.msra.mxu1 %v15947_v26  ;;  %v16030_v26 = vld [vmem:[%s19358_s1 + $0x2cc] ss:$16 sps:$4 sm:$0xff]  }
0x1d1e   : > { %11556 = vmatprep.subr.bf16.mxu1 %v15952_v59  ;;  %v16028_v59 = vld [vmem:[%s19358_s1 + $0x2c8] ss:$16 sps:$4 sm:$0xff]  }
0x1d21   : > { %11557 = vmatpush1.bf16.msra.mxu1 %v15950_v28  ;;  %v16033_v28 = vld [vmem:[%s19358_s1 + $0x2ec] ss:$16 sps:$4 sm:$0xff]  }
0x1d22   : > { %11558 = vmatprep.subr.bf16.mxu1 %v15955_v49  ;;  %v16031_v49 = vld [vmem:[%s19358_s1 + $0x2e8] ss:$16 sps:$4 sm:$0xff]  }
0x1d25   : > { %11559 = vmatpush1.bf16.msra.mxu1 %v15953_v15  ;;  %v16036_v15 = vld [vmem:[%s19358_s1 + $0x30c] ss:$16 sps:$4 sm:$0xff]  }
0x1d26   : > { %11560 = vmatprep.subr.bf16.mxu1 %v15958_v31  ;;  %v16034_v31 = vld [vmem:[%s19358_s1 + $0x308] ss:$16 sps:$4 sm:$0xff]  }
0x1d29   : > { %11561 = vmatpush1.bf16.msra.mxu1 %v15956_v10  ;;  %v16039_v10 = vld [vmem:[%s19358_s1 + $0x32c] ss:$16 sps:$4 sm:$0xff]  }
0x1d2a   : > { %11562 = vmatprep.subr.bf16.mxu1 %v15961_v25  ;;  %v16037_v25 = vld [vmem:[%s19358_s1 + $0x328] ss:$16 sps:$4 sm:$0xff]  }
0x1d2d   : > { %11563 = vmatpush1.bf16.msra.mxu1 %v15959_v47  ;;  %v16042_v47 = vld [vmem:[%s19358_s1 + $0x34c] ss:$16 sps:$4 sm:$0xff]  }
0x1d2e   : > { %12427 = vmatprep.subr.bf16.mxu1 %v15964_v11  ;;  %v16040_v11 = vld [vmem:[%s19358_s1 + $0x348] ss:$16 sps:$4 sm:$0xff]  }
0x1d30   : > { %11565 = vmatmul.mubr.bf16.vlgmr.msra.gmra.mrb[48].mxu1 %v18808_v58  ;;  %v16000_v58 = vld [vmem:[%s19358_s1 + $0x18c] ss:$16 sps:$4 sm:$0xff]  }
0x1d31   : > { %12428 = vmatpush1.bf16.msra.mxu1 %v15962_v8  ;;  %12459 = vmatprep.mubr.bf16.mxu1 %v18652_v42  ;;  %v15979_v42 = vld [vmem:[%s19358_s1 + $0xac] ss:$16 sps:$4 sm:$0xff]  }
0x1d32   : > { %12429 = vmatprep.subr.bf16.mxu1 %v15967_v30  ;;  %v16045_v8 = vld [vmem:[%s19358_s1 + $0x36c] ss:$16 sps:$4 sm:$0xff]   ;;  %v16043_v30 = vld [vmem:[%s19358_s1 + $0x368] ss:$16 sps:$4 sm:$0xff]  }
0x1d35   : > { %12430 = vmatpush1.bf16.msra.mxu1 %v15965_v33  ;;  %v16048_v33 = vld [vmem:[%s19358_s1 + $0x38c] ss:$16 sps:$4 sm:$0xff]  }
0x1d36   : > { %12431 = vmatprep.subr.bf16.mxu1 %v15970_v34  ;;  %v16046_v34 = vld [vmem:[%s19358_s1 + $0x388] ss:$16 sps:$4 sm:$0xff]  }
0x1d39   : > { %12432 = vmatpush1.bf16.msra.mxu1 %v15968_v39  ;;  %v16051_v39 = vld [vmem:[%s19358_s1 + $0x3ac] ss:$16 sps:$4 sm:$0xff]  }
0x1d3a   : > { %12433 = vmatprep.subr.bf16.mxu1 %v15973_v1  ;;  %v16049_v1 = vld [vmem:[%s19358_s1 + $0x3a8] ss:$16 sps:$4 sm:$0xff]  }
0x1d3d   : > { %12434 = vmatpush1.bf16.msra.mxu1 %v15971_v0  ;;  %v16054_v0 = vld [vmem:[%s19358_s1 + $0x3cc] ss:$16 sps:$4 sm:$0xff]  }
0x1d3e   : > { %12435 = vmatprep.subr.bf16.mxu1 %v15976_v56  ;;  %v16052_v56 = vld [vmem:[%s19358_s1 + $0x3c8] ss:$16 sps:$4 sm:$0xff]  }
0x1d41   : > { %12436 = vmatpush1.bf16.msra.mxu1 %v15974_v37  ;;  %v16057_v37 = vld [vmem:[%s19358_s1 + $0x3ec] ss:$16 sps:$4 sm:$0xff]  }
0x1d42   : > { %12437 = vmatprep.subr.bf16.mxu1 %v15979_v42  ;;  %v16055_v42 = vld [vmem:[%s19358_s1 + $0x3e8] ss:$16 sps:$4 sm:$0xff]  }
0x1d45   : > { %12438 = vmatpush1.bf16.msra.mxu1 %v15977_v40  ;;  %v18915_v40 = vld [vmem:[%s19364_s2] sm:$0xf]  ;;  %s14002_s2 = sshll.u32 %s16977_s0, 10 }
0x1d46   : > { %12439 = vmatprep.subr.bf16.mxu1 %v15982_v38  ;;  %v11474_v38 = vrot.slane %v18915_v40, %v18248_v62  ;;  %s18940_s3 = scalar_lea.hbm %s16939_s24, %s14002_s2 }
0x1d49   : > { %12440 = vmatpush1.bf16.msra.mxu1 %v15980_v5  ;;  %v11478_v5 = vrot.slane %v18915_v40, %v18252_v12 }
0x1d4a   : > { %12441 = vmatprep.subr.bf16.mxu1 %v15985_v2 }
0x1d4d   : > { %12442 = vmatpush1.bf16.msra.mxu1 %v15983_v63 }
0x1d4e   : > { %12443 = vmatprep.subr.bf16.mxu1 %v15988_v41 }
0x1d51   : > { %12444 = vmatpush1.bf16.msra.mxu1 %v15986_v35 }
0x1d52   : > { %12445 = vmatprep.subr.bf16.mxu1 %v15991_v23 }
0x1d55   : > { %12446 = vmatpush1.bf16.msra.mxu1 %v15989_v36 }
0x1d56   : > { %12447 = vmatprep.subr.bf16.mxu1 %v15994_v27 }
0x1d59   : > { %12448 = vmatpush1.bf16.msra.mxu1 %v15992_v61 }
0x1d5a   : > { %12449 = vmatprep.subr.bf16.mxu1 %v15997_v51 }
0x1d5d   : > { %12450 = vmatpush1.bf16.msra.mxu1 %v15995_v54 }
0x1d5e   : > { %12451 = vmatprep.subr.bf16.mxu1 %v16000_v58 }
0x1d61   : > { %12452 = vmatpush1.bf16.msra.mxu1 %v15998_v4 }
0x1d62   : > { %12453 = vmatprep.subr.bf16.mxu1 %v16003_v46 }
0x1d63   : > { %v18872_v29 = vpop.f32.mrb[72].mxu0 }
0x1d64   : > { %v18874_v7 = vpop.f32.mrb[73].mxu0 }
0x1d65   : > { %12454 = vmatpush1.bf16.msra.mxu1 %v16001_v6  ;;  %v12424_v45 = vpop.f32.mrb[74].mxu0 }
0x1d66   : > { %v12425_v60 = vpop.f32.mrb[75].mxu0  ;;  %12455 = vmatprep.subr.bf16.mxu1 %v16006_v16 }
0x1d69   : > { %12456 = vmatpush1.bf16.msra.mxu1 %v16004_v43 }
0x1d6a   : > { %12457 = vmatprep.subr.bf16.mxu1 %v16009_v53 }
0x1d6d   : > { %12458 = vmatpush1.bf16.msra.mxu1 %v16007_v18 }
0x1d6e   : > { %12468 = vmatprep.subr.bf16.mxu1 %v16012_v57 }
0x1d70   : > { %12460 = vmatmul.mubr.bf16.vlgmr.msra.gmra.mrb[52].mxu1 %v18655_v13  ;;  %v16024_v13 = vld [vmem:[%s19358_s1 + $0x28c] ss:$16 sps:$4 sm:$0xff]  }
0x1d71   : > { %12469 = vmatpush1.bf16.msra.mxu1 %v16010_v19  ;;  %12500 = vmatprep.mubr.bf16.mxu1 %v18658_v14  ;;  %v16027_v14 = vld [vmem:[%s19358_s1 + $0x2ac] ss:$16 sps:$4 sm:$0xff]   ;;  %s12593_s1 = sshll.u32 %s17814_s11, 4  ;;  %s18942_s1 = int_to_ptr.vmem [resolvable:$true] %s12593_s1 }
0x1d72   : > { %12470 = vmatprep.subr.bf16.mxu1 %v16015_v20  ;;  %s16283_s8 = scalar_lea.vmem %s18942_s1, 1024  ;;  %p16290_p2 = scmp.lt.s32.totalorder %s18942_s1, %s16288_s9 }
0x1d73   : > { %p16284_p8 = scmp.ne.s32.totalorder %s18942_s1, %s16283_s8  ;;  %p16291_p0 = scmp.lt.s32.totalorder %s16289_s12, %s16283_s8 }
0x1d75   : > { %12471 = vmatpush1.bf16.msra.mxu1 %v16013_v3  ;;  %p16285_p13 = pnand %p16284_p8, %p19365_p11  ;;  %p16292_p3 = por %p16291_p0, %p16290_p2 }
0x1d76   : > { %12472 = vmatprep.subr.bf16.mxu1 %v16018_v55 }
0x1d77   : > { %p16286_p1 = pneg %p16285_p13 }
0x1d79   : > { %12473 = vmatpush1.bf16.msra.mxu1 %v16016_v22  ;;  %p16293_p4 = pnand %p16292_p3, %p16286_p1 }
0x1d7a   : > { %12474 = vmatprep.subr.bf16.mxu1 %v16021_v44 }
0x1d7d   : > { %12475 = vmatpush1.bf16.msra.mxu1 %v16019_v52 }
0x1d7e   : > { %12476 = vmatprep.subr.bf16.mxu1 %v16024_v13 }
0x1d81   : > { %12477 = vmatpush1.bf16.msra.mxu1 %v16022_v24 }
0x1d82   : > { %12478 = vmatprep.subr.bf16.mxu1 %v16027_v14 }
0x1d85   : > { %12479 = vmatpush1.bf16.msra.mxu1 %v16025_v21 }
0x1d86   : > { %12480 = vmatprep.subr.bf16.mxu1 %v16030_v26 }
0x1d89   : > { %12481 = vmatpush1.bf16.msra.mxu1 %v16028_v59 }
0x1d8a   : > { %12482 = vmatprep.subr.bf16.mxu1 %v16033_v28 }
0x1d8d   : > { %12483 = vmatpush1.bf16.msra.mxu1 %v16031_v49 }
0x1d8e   : > { %12484 = vmatprep.subr.bf16.mxu1 %v16036_v15 }
0x1d91   : > { %12485 = vmatpush1.bf16.msra.mxu1 %v16034_v31 }
0x1d92   : > { %12486 = vmatprep.subr.bf16.mxu1 %v16039_v10 }
0x1d95   : > { %12487 = vmatpush1.bf16.msra.mxu1 %v16037_v25 }
0x1d96   : > { %12488 = vmatprep.subr.bf16.mxu1 %v16042_v47 }
0x1d99   : > { %12489 = vmatpush1.bf16.msra.mxu1 %v16040_v11 }
0x1d9a   : > { %12490 = vmatprep.subr.bf16.mxu1 %v16045_v8 }
0x1d9d   : > { %12491 = vmatpush1.bf16.msra.mxu1 %v16043_v30 }
0x1d9e   : > { %12492 = vmatprep.subr.bf16.mxu1 %v16048_v33 }
0x1da1   : > { %12493 = vmatpush1.bf16.msra.mxu1 %v16046_v34 }
0x1da2   : > { %12494 = vmatprep.subr.bf16.mxu1 %v16051_v39 }
0x1da5   : > { %12495 = vmatpush1.bf16.msra.mxu1 %v16049_v1 }
0x1da6   : > { %12496 = vmatprep.subr.bf16.mxu1 %v16054_v0 }
0x1da9   : > { %12497 = vmatpush1.bf16.msra.mxu1 %v16052_v56 }
0x1daa   : > { %12498 = vmatprep.subr.bf16.mxu1 %v16057_v37 }
0x1dad   : > { %12499 = vmatpush1.bf16.msra.mxu1 %v16055_v42 }
0x1db0   : > { %12501 = vmatmul.mubr.bf16.vlgmr.msra.gmra.mrb[52].mxu1 %v18696_v9 }
0x1dc3   : > { %v11525_v2 = vpop.f32.mrb[44].mxu1 }
0x1dc4   : > { %v11526_v63 = vadd.f32 %v11525_v2, %v11474_v38  ;;  %v11527_v41 = vpop.f32.mrb[45].mxu1 }
0x1dc5   : > { %v11528_v35 = vadd.f32 %v11527_v41, %v11478_v5  ;;  %v11529_v23 = vpop.f32.mrb[46].mxu1 }
0x1dc6   : > { %v11573_v36 = vmax.f32 %v11526_v63, 0.0  ;;  %v11530_v9 = vpop.f32.mrb[47].mxu1 }
0x1dc7   : > { %v11574_v27 = vmax.f32 %v11528_v35, 0.0 }
0x1dc8   : > { %v18922_v61 = vadd.f32 %v18872_v29, %v11573_v36 }
0x1dc9   : > { %v18925_v62 = vadd.f32 %v18874_v7, %v11574_v27 }
0x1dcb   : > { %v12513_v12 = vcombine.low %v18922_v61, %v18925_v62 }
0x1e03   : > { %v18929_v51 = vpop.f32.mrb[48].mxu1 }
0x1e04   : > { %v18931_v54 = vpop.f32.mrb[49].mxu1 }
0x1e05   : > { %v11570_v58 = vpop.f32.mrb[50].mxu1 }
0x1e06   : > { %v11571_v4 = vpop.f32.mrb[51].mxu1 }
0x1e07   : > { %16296 = shalt.err (!%p16293_p4)
}
0x1e08   : > { %s16297_s11 = scalar_lea.hbm %s18940_s3, 1024  ;;  %s16301_s18 = scalar_lea.hbm %s16939_s24, 2048 }
0x1e09   : > { %p16298_p12 = scmp.ne.s32.totalorder %s18940_s3, %s16297_s11  ;;  %p16302_p9 = scmp.lt.u32.totalorder %s18940_s3, %s16939_s24 }
0x1e0a   : > { %p16303_p10 = scmp.lt.u32.totalorder %s16301_s18, %s16297_s11  ;;  %p16305_p8 = scmp.lt.u32.totalorder %s16297_s11, %s18940_s3 }
0x1e0b   : > { %p16299_p5 = pnand %p16298_p12, %p19365_p11 }
0x1e0c   : > { %p16304_p7 = por %p16303_p10, %p16302_p9 }
0x1e0d   : > { %p16300_p6 = pneg %p16299_p5 }
0x1e0e   : > { %p16306_p13 = por %p16305_p8, %p16304_p7 }
0x1e10   : > { %p16307_p1 = pnand %p16306_p13, %p16300_p6 }
0x1e12   : > { %16310 = shalt.err (!%p16307_p1)
}
0x1e13   : > { %s16550_s9 = smov 128   ;;  %s19366_s8 = sld [smem:[#allocation101_spill]] }
0x1e14   : > { %s16551_s12 = smov 8   ;;  %s14001_s2 = sshll.u32 %s16977_s0, 12 }
0x1e15   : > { %14828 = dma.vmem_to_hbm [thread:$0]  (%p19365_p11), %s18942_s1, 1024, %s18940_s3, %s18944_s6, %s16550_s9, %s16550_s9, %s16551_s12  }
0x1e16   : > { %s12577_s5 = sshll.u32 %s17231_s15, 4  ;;  %s12544_s18 = scalar_lea.sflag [#allocation4], %s17225_s10  ;;  %s18972_s5 = int_to_ptr.vmem [resolvable:$true] %s12577_s5 }
0x1e17   : > { %s16311_s13 = scalar_lea.vmem %s18972_s5, 4096  ;;  %s16552_s14 = smov [#allocation16]  }
0x1e18   : > { %p16312_p2 = scmp.ne.s32.totalorder %s18972_s5, %s16311_s13  ;;  %s16315_s17 = sshll.u32 %s16552_s14, 4  ;;  %s16316_s17 = int_to_ptr.vmem [resolvable:$false] %s16315_s17 }
0x1e19   : > { %s18970_s11 = scalar_lea.hbm %s19366_s8, %s14001_s2  ;;  %s16317_s19 = scalar_lea.vmem %s16316_s17, 8192 }
0x1e1a   : > { %p16313_p0 = pnand %p16312_p2, %p19365_p11  ;;  %p16318_p4 = scmp.lt.s32.totalorder %s18972_s5, %s16316_s17 }
0x1e1b   : > { %p16319_p12 = scmp.lt.s32.totalorder %s16317_s19, %s16311_s13 }
0x1e1c   : > { %p16314_p3 = pneg %p16313_p0 }
0x1e1d   : > { %p16320_p5 = por %p16319_p12, %p16318_p4 }
0x1e1f   : > { %p16321_p6 = pnand %p16320_p5, %p16314_p3 }
0x1e21   : > { %16324 = shalt.err (!%p16321_p6)
}
0x1e22   : > { %s16325_s15 = scalar_lea.hbm %s18970_s11, 4096  ;;  %s16329_s14 = scalar_lea.hbm %s19366_s8, 8192 }
0x1e23   : > { %p16326_p9 = scmp.ne.s32.totalorder %s18970_s11, %s16325_s15  ;;  %p16330_p8 = scmp.lt.u32.totalorder %s18970_s11, %s19366_s8 }
0x1e24   : > { %p16331_p13 = scmp.lt.u32.totalorder %s16329_s14, %s16325_s15  ;;  %p16333_p2 = scmp.lt.u32.totalorder %s16325_s15, %s18970_s11 }
0x1e25   : > { %p16327_p10 = pnand %p16326_p9, %p19365_p11 }
0x1e26   : > { %p16332_p1 = por %p16331_p13, %p16330_p8 }
0x1e27   : > { %p16328_p7 = pneg %p16327_p10 }
0x1e28   : > { %p16334_p0 = por %p16333_p2, %p16332_p1 }
0x1e2a   : > { %p16335_p3 = pnand %p16334_p0, %p16328_p7 }
0x1e2c   : > { %16338 = shalt.err (!%p16335_p3)
}
0x1e2d   : > { %14827 = dma.vmem_to_hbm [thread:$0]  (%p19365_p11), %s18972_s5, 4096, %s18970_s11, %s12544_s18, %s16550_s9, %s16550_s9, %s16551_s12  }
0x1e2e   : > { %s14003_s13 = sshll.u32 %s16977_s0, 8  ;;  %s16339_s19 = scalar_lea.vmem %s18934_s4, 256 }
0x1e2f   : > { %s18999_s17 = scalar_lea.hbm %s16944_s29, %s14003_s13  ;;  %p16340_p4 = scmp.ne.s32.totalorder %s18934_s4, %s16339_s19 }
0x1e30   : > { %s16553_s3 = smov [#allocation19]  }
0x1e31   : > { %p16341_p12 = pnand %p16340_p4, %p19365_p11  ;;  %s16343_s1 = sshll.u32 %s16553_s3, 4  ;;  %s16344_s1 = int_to_ptr.vmem [resolvable:$false] %s16343_s1 }
0x1e32   : > { %s16345_s2 = scalar_lea.vmem %s16344_s1, 512  ;;  %p16346_p6 = scmp.lt.s32.totalorder %s18934_s4, %s16344_s1 }
0x1e33   : > { %p16342_p5 = pneg %p16341_p12  ;;  %p16347_p9 = scmp.lt.s32.totalorder %s16345_s2, %s16339_s19 }
0x1e35   : > { %p16348_p10 = por %p16347_p9, %p16346_p6 }
0x1e37   : > { %p16349_p7 = pnand %p16348_p10, %p16342_p5 }
0x1e39   : > { %16352 = shalt.err (!%p16349_p7)
}
0x1e3a   : > { %s16353_s5 = scalar_lea.hbm %s18999_s17, 256  ;;  %s16357_s11 = scalar_lea.hbm %s16944_s29, 512 }
0x1e3b   : > { %p16354_p8 = scmp.ne.s32.totalorder %s18999_s17, %s16353_s5  ;;  %p16358_p2 = scmp.lt.u32.totalorder %s18999_s17, %s16944_s29 }
0x1e3c   : > { %p16359_p0 = scmp.lt.u32.totalorder %s16357_s11, %s16353_s5  ;;  %p16361_p4 = scmp.lt.u32.totalorder %s16353_s5, %s18999_s17 }
0x1e3d   : > { %p16355_p13 = pnand %p16354_p8, %p19365_p11 }
0x1e3e   : > { %p16360_p3 = por %p16359_p0, %p16358_p2 }
0x1e3f   : > { %p16356_p1 = pneg %p16355_p13 }
0x1e40   : > { %p16362_p12 = por %p16361_p4, %p16360_p3 }
0x1e42   : > { %p16363_p5 = pnand %p16362_p12, %p16356_p1 }
0x1e44   : > { %16366 = shalt.err (!%p16363_p5)
}
0x1e45   : > { %14829 = dma.vmem_to_hbm [thread:$0]  (%p19365_p11), %s18934_s4, 256, %s18999_s17, %s18944_s6, %s16550_s9, %s16550_s9, %s16551_s12   ;;  %v11482_v46 = vrot.slane %v18915_v40, %v18631_v17  ;;  %v11486_v6 = vrot.slane %v18915_v40, %v18635_v32  ;;  %v16554_v16 = vmov 1966171168   ;;  %vm12540_vm8 = vcmp.lt.s32.totalorder %v7510_v48, 512 }
0x1e46   : > { %v12516_v29 = vunpack.c.l.s4 %v16554_v16  ;;  %s12986_s6 = sshll.u32 %s17225_s10, 2  ;;  %s14004_s4 = sshll.u32 %s16977_s0, 6 }
0x1e47   : > { %v11567_v7 = vadd.f32 %v18929_v51, %v11482_v46  ;;  %v11569_v45 = vadd.f32 %v18931_v54, %v11486_v6  ;;  %s2403_s9 = scalar_lea.vmem [#allocation20], %s12986_s6  ;;  %s19036_s18 = scalar_lea.hbm %s16954_s30, %s14004_s4 }
0x1e48   : > { %v12517_v43 = vunpack.c.0.s8 %v12516_v29  ;;  %s12629_s12 = sshll.u32 %s2403_s9, 4  ;;  %s12564_s15 = scalar_lea.sflag [#allocation21], %s17225_s10  ;;  %s19038_s12 = int_to_ptr.vmem [resolvable:$true] %s12629_s12 }
0x1e49   : > { %v11575_v60 = vmax.f32 %v11567_v7, 0.0  ;;  %v11576_v53 = vmax.f32 %v11569_v45, 0.0  ;;  %s16367_s14 = scalar_lea.vmem %s19038_s12, 64  ;;  %s16555_s0 = smov [#allocation20]  }
0x1e4a   : > { %v12520_v17 = vsub.s32 %v12517_v43, %v18245_v50  ;;  %p16368_p6 = scmp.ne.s32.totalorder %s19038_s12, %s16367_s14  ;;  %s16371_s13 = sshll.u32 %s16555_s0, 4  ;;  %s16372_s13 = int_to_ptr.vmem [resolvable:$false] %s16371_s13 }
0x1e4b   : > { %s16373_s17 = scalar_lea.vmem %s16372_s13, 128  ;;  %p16374_p7 = scmp.lt.s32.totalorder %s19038_s12, %s16372_s13 }
0x1e4c   : > { %v12521_v22 = vrot.slane %v12513_v12, %v12520_v17  ;;  %p16369_p9 = pnand %p16368_p6, %p19365_p11  ;;  %p16375_p8 = scmp.lt.s32.totalorder %s16373_s17, %s16367_s14 }
0x1e4e   : > { %p16370_p10 = pneg %p16369_p9  ;;  %p16376_p13 = por %p16375_p8, %p16374_p7 }
0x1e50   : > { %p16377_p1 = pnand %p16376_p13, %p16370_p10 }
0x1e83   : > { %v12502_v18 = vpop.f32.mrb[52].mxu1 }
0x1e84   : > { %v14781_v57 = vadd.f32 %v12502_v18, %v11575_v60  ;;  %v12504_v19 = vpop.f32.mrb[53].mxu1 }
0x1e85   : > { %v14782_v20 = vadd.f32 %v12504_v19, %v11576_v53  ;;  %v12506_v32 = vpop.f32.mrb[54].mxu1 }
0x1e86   : > { %v12507_v3 = vpop.f32.mrb[55].mxu1 }
0x1e87   : > { %v12514_v55 = vcombine.low %v14781_v57, %v14782_v20 }
0x1e89   : > { %v12528_v44 = vrot.slane %v12514_v55, %v12520_v17 }
0x1e8b   : > { %v12529_v52 = vcombine.low %v12521_v22, %v12528_v44 }
0x1e8d   : > { %v12536_v13 = vrot.slane %v12529_v52, %v12520_v17 }
0x1e8f   : > { %12542 = vst.msk [vmem:[%s2403_s9] sm:$0xf] %vm12540_vm8, %v12536_v13 }
0x1e90   : > { %16380 = shalt.err (!%p16377_p1)
}
0x1e91   : > { %s16381_s10 = scalar_lea.hbm %s19036_s18, 64  ;;  %s16385_s19 = scalar_lea.hbm %s16954_s30, 128 }
0x1e92   : > { %p16382_p2 = scmp.ne.s32.totalorder %s19036_s18, %s16381_s10  ;;  %p16386_p4 = scmp.lt.u32.totalorder %s19036_s18, %s16954_s30 }
0x1e93   : > { %p16387_p12 = scmp.lt.u32.totalorder %s16385_s19, %s16381_s10  ;;  %p16389_p6 = scmp.lt.u32.totalorder %s16381_s10, %s19036_s18 }
0x1e94   : > { %p16383_p0 = pnand %p16382_p2, %p19365_p11 }
0x1e95   : > { %p16388_p5 = por %p16387_p12, %p16386_p4 }
0x1e96   : > { %p16384_p3 = pneg %p16383_p0 }
0x1e97   : > { %p16390_p9 = por %p16389_p6, %p16388_p5 }
0x1e99   : > { %p16391_p10 = pnand %p16390_p9, %p16384_p3 }
0x1e9b   : > { %16394 = shalt.err (!%p16391_p10)
}
0x1e9c   : > { %14830 = dma.vmem_to_hbm [thread:$0]  (%p19365_p11), %s19038_s12, 64, %s19036_s18, %s12564_s15  }
0x1e9d PF: > { %s19367_s3 = sld [smem:[#allocation103_spill]]  ;;  %s19368_s1 = sld [smem:[#allocation107_spill]] }
0x1e9e   : > { %p14889_p7 = scmp.ge.s32.totalorder %s16457_s22, 2 }
0x1ea3   : > { %s12641_s2 = sand.u32 1, %s19367_s3   ;;  %p19369_p8 = scmp.ne.s32.totalorder %s19368_s1, 0 }
0x1ea4   : > { %s12642_s5 = scalar_lea.sflag [#allocation4], %s12641_s2 }
0x1ea5   : > { %p14861_p13 = pnand %p14889_p7, %p19369_p8 }
0x1ea7   : > { %16432 = dma.done.wait (!%p14861_p13), %s12642_s5, 4096  }
0x1ea8   : > { %16434 = vsyncadd (!%p14861_p13), %s12642_s5, 4294963200  ;;  %s19370_s11 = sadd.s32 4294967294, %s16457_s22  }
0x1ea9   : > { %s12650_s6 = sand.u32 1, %s19370_s11  }
0x1eaa   : > { %s12651_s4 = scalar_lea.sflag [#allocation18], %s12650_s6 }
0x1eab   : > { %16436 = dma.done.wait (!%p14861_p13), %s12651_s4, 1280  }
0x1eac   : > { %16438 = vsyncadd (!%p14861_p13), %s12651_s4, 4294966016  ;;  %s12677_s7 = scalar_lea.sflag [#allocation21], %s12641_s2 }
0x1ead   : > { %16440 = dma.done.wait (!%p14861_p13), %s12677_s7, 64  }
0x1eae   : > { %16442 = vsyncadd (!%p14861_p13), %s12677_s7, 4294967232  ;;  %s19371_s22 = sld [smem:[#allocation105_spill]]  ;;  %s19372_s9 = sld [smem:[#allocation104_spill]] }
0x1eaf   : > { %s19373_s18 = sld [smem:[#allocation106_spill]]  ;;  %s19374_s15 = smov %s16449_s16 }
0x1eb4   : > { %p179_p11 = scmp.ge.s32.totalorder %s19371_s22, 4   ;;  %s19375_s16 = smov %s19372_s9 }
0x1eb6   :  { %181 = sbr.rel (!%p179_p11) target bundleno = 170 (0xaa), region = 523 }
0x1ebd   :  { %12682 = vsyncpa [#allocation3], 1 }
0x1ebe   :  { %12684 = vsyncpa [#allocation3 + $0x1], 1 }
0x1ebf   :  { %12685 = vsyncpa [#allocation6], 1 }
0x1ec0   :  { %12686 = vsyncpa [#allocation9], 1 }
0x1ec1   :  { %12687 = vsyncpa [#allocation12], 1 }
0x1ec2   :  { %12688 = vsyncpa [#allocation15], 1 }
0x1ec3   :  { %12689 = vsyncpa [#allocation4], 1 }
0x1ec4   :  { %12691 = vsyncpa [#allocation4 + $0x1], 1 }
0x1ec5   :  { %12692 = vsyncpa [#allocation18], 1 }
0x1ec6   :  { %12694 = vsyncpa [#allocation18 + $0x1], 1 }
0x1ec7   :  { %12695 = vsyncpa [#allocation21], 1 }
0x1ec8   :  { %12697 = vsyncpa [#allocation21 + $0x1], 1 }

</bundles_post_ra>
